<compile_context>
chip_gen: v7x
topology: tpu7x:2x2x1
jax: 0.10.0
libtpu: 0.0.40
codegen_flags: <defaults>
</compile_context>

<pallas_src>
import jax
import jax.numpy as jnp
from jax import lax
from jax.experimental import pallas as pl
from jax.experimental.pallas import tpu as pltpu

LANE = 128   # lane width: channels padded to a multiple of this
LPAD = 8     # sublane-aligned interior column offset of the padded scratches


def _round_up(x, m):
    return ((x + m - 1) // m) * m


def _pick_block_rows(rows, width, target_m=512):
    """Largest divisor R of `rows` with R*width <= target_m (>=1)."""
    cap = max(1, target_m // max(width, 1))
    best = 1
    for d in range(1, rows + 1):
        if rows % d == 0 and d <= cap:
            best = d
    return best


def _vmem_limit_bytes():
    """Generation-aware VMEM budget with ~25% headroom for compiler scratch."""
    try:
        cap = int(pltpu.get_tpu_info().vmem_capacity_bytes)
    except Exception:
        cap = 128 * 1024 * 1024
    return int(min(cap * 3 // 4, 100 * 1024 * 1024))


# ----------------------------------------------------------------------------
# Kernel
# ----------------------------------------------------------------------------
def _make_preact_kernel(H, W, Cin_p, Cout_p, Ho, Wo, s, R, CB, has_shortcut,
                        Hp1, Wp1, Hp2, Wp2):
    """Fused PreActBlock kernel for one batch element (grid over B)."""
    nb = Ho // R       # conv row blocks
    nb0 = H // CB      # bn1 row chunks
    bf16 = jnp.bfloat16

    def kernel(*refs):
        if has_shortcut:
            (x_ref, s1_ref, b1_ref, w1_ref, s2_ref, b2_ref, w2_ref, ws_ref,
             out_ref, pad1, pad2) = refs
        else:
            (x_ref, s1_ref, b1_ref, w1_ref, s2_ref, b2_ref, w2_ref,
             out_ref, pad1, pad2) = refs
            ws_ref = None

        # ---- zero ONLY the halo cells the 3x3 taps actually read ------------
        pad1[0, :, :] = jnp.zeros((Wp1, Cin_p), bf16)                         # top
        pad1[H + 1:Hp1, :, :] = jnp.zeros((Hp1 - H - 1, Wp1, Cin_p), bf16)    # bottom
        pad1[:, LPAD - 1:LPAD, :] = jnp.zeros((Hp1, 1, Cin_p), bf16)          # left
        pad1[:, LPAD + W:Wp1, :] = jnp.zeros((Hp1, Wp1 - LPAD - W, Cin_p), bf16)

        pad2[0, :, :] = jnp.zeros((Wp2, Cout_p), bf16)
        pad2[Ho + 1:Hp2, :, :] = jnp.zeros((Hp2 - Ho - 1, Wp2, Cout_p), bf16)
        pad2[:, LPAD - 1:LPAD, :] = jnp.zeros((Hp2, 1, Cout_p), bf16)
        pad2[:, LPAD + Wo:Wp2, :] = jnp.zeros((Hp2, Wp2 - LPAD - Wo, Cout_p), bf16)

        # BN params read once (hoisted out of the loops)
        s1 = s1_ref[0]                                   # (Cin_p,)  f32
        b1 = b1_ref[0]
        s2 = s2_ref[0]                                   # (Cout_p,) f32
        b2 = b2_ref[0]

        # ---- bn1 (folded affine) + relu, in bounded row chunks --------------
        def body0(c, carry):
            r = c * CB
            if CB % 8 == 0:
                r = pl.multiple_of(r, 8)
            xr = x_ref[0, pl.ds(r, CB), :, :]            # (CB, W, Cin_p) f32
            pre = jnp.maximum(xr * s1 + b1, 0.0).astype(bf16)
            pad1[pl.ds(1 + c * CB, CB), LPAD:LPAD + W, :] = pre
            return carry

        lax.fori_loop(0, nb0, body0, 0, unroll=min(nb0, 4))

        # ---- pass 1: conv1 (3x3, stride s) + bn2 + relu ----------------------
        # per-kh accumulation: 3 dots with K=3*Cin_p, <=3 tap temporaries live
        def body1(i, carry):
            base = i * (R * s)
            if (R * s) % 8 == 0:
                base = pl.multiple_of(base, 8)
            chunk = pad1[pl.ds(base, R * s + 2), :, :]   # (R*s+2, Wp1, Cin_p)
            acc = None
            for kh in range(3):
                rk = chunk[kh:kh + R * s]                # (R*s, Wp1, C)
                if s > 1:                                # row decimation, once per kh
                    rk = rk.reshape(R, s, Wp1, Cin_p)[:, 0]
                taps = []
                for kw in range(3):
                    c0 = LPAD - 1 + kw
                    if s == 1:
                        taps.append(rk[:, c0:c0 + Wo, :])
                    else:                                # column decimation via reshape
                        ck = rk[:, c0:c0 + Wo * s, :]
                        taps.append(ck.reshape(R, Wo, s, Cin_p)[:, :, 0, :])
                patch = jnp.concatenate(taps, axis=-1).reshape(R * Wo, 3 * Cin_p)
                d = jnp.dot(patch, w1_ref[kh], preferred_element_type=jnp.float32)
                acc = d if acc is None else acc + d
            act = jnp.maximum(acc * s2 + b2, 0.0).astype(bf16)
            pad2[pl.ds(1 + i * R, R), LPAD:LPAD + Wo, :] = act.reshape(R, Wo, Cout_p)
            return carry

        lax.fori_loop(0, nb, body1, 0, unroll=min(nb, 4))

        # ---- pass 2: conv2 (3x3, stride 1) + fused shortcut + residual add ---
        def body2(i, carry):
            r0 = i * R
            if R % 8 == 0:
                r0 = pl.multiple_of(r0, 8)
            chunk = pad2[pl.ds(r0, R + 2), :, :]         # (R+2, Wp2, Cout_p)
            acc = None
            for kh in range(3):
                rk = chunk[kh:kh + R]
                taps = [rk[:, LPAD - 1 + kw:LPAD - 1 + kw + Wo, :]
                        for kw in range(3)]
                patch = jnp.concatenate(taps, axis=-1).reshape(R * Wo, 3 * Cout_p)
                d = jnp.dot(patch, w2_ref[kh], preferred_element_type=jnp.float32)
                acc = d if acc is None else acc + d
            if has_shortcut:
                # 1x1 conv shortcut on relu(bn1(x)), fused per row block
                rows = pad1[pl.ds(1 + i * R * s, R * s), :, :]
                if s > 1:
                    rows = rows.reshape(R, s, Wp1, Cin_p)[:, 0]
                cols = rows[:, LPAD:LPAD + Wo * s, :]
                if s > 1:
                    cols = cols.reshape(R, Wo, s, Cin_p)[:, :, 0, :]
                acc = acc + jnp.dot(cols.reshape(R * Wo, Cin_p), ws_ref[...],
                                    preferred_element_type=jnp.float32)
            else:
                # identity shortcut: original x, kept in f32 (parity with torch)
                xr = x_ref[0, pl.ds(i * R, R), :, :]     # (R, Wo, Cout_p) f32
                acc = acc + xr.reshape(R * Wo, Cout_p)
            out_ref[0, pl.ds(i * R, R), :, :] = (
                acc.reshape(R, Wo, Cout_p).astype(out_ref.dtype))
            return carry

        lax.fori_loop(0, nb, body2, 0, unroll=min(nb, 4))

    return kernel


# ----------------------------------------------------------------------------
# Wrapper (accepts / returns PyTorch-convention NCHW)
# ----------------------------------------------------------------------------
def preact_block_forward(x_nchw, params, stride):
    B, Cin, H, W = x_nchw.shape
    Cout = params["w1"].shape[-1]
    has_shortcut = (stride != 1) or (Cin != Cout)
    s = stride
    Ho = (H - 1) // s + 1
    Wo = (W - 1) // s + 1
    Cin_p = _round_up(Cin, LANE)
    Cout_p = _round_up(Cout, LANE)
    R = _pick_block_rows(Ho, Wo, target_m=512)   # M~512 feeds 256-wide MXUs
    CB = _pick_block_rows(H, W, target_m=512)    # bn1 row-chunk size

    # padded-scratch geometry (interior starts at row 1, column LPAD)
    Hp1 = max(H, Ho * s) + 2
    Wp1 = LPAD + max(W, Wo * s) + 2
    Hp2 = Ho + 2
    Wp2 = LPAD + Wo + 2

    # ---- host-side layout prep: NCHW -> NHWC, lane-pad channels -------------
    # x stays f32 so bn1 + identity shortcut match PyTorch f32 math; the convs
    # run bf16 (weights + relu'd activations) with f32 accumulation.
    x = jnp.transpose(x_nchw, (0, 2, 3, 1)).astype(jnp.float32)
    x = jnp.pad(x, ((0, 0), (0, 0), (0, 0), (0, Cin_p - Cin)))

    def pad_vec(v, n):
        return jnp.pad(v.astype(jnp.float32), (0, n - v.shape[0])).reshape(1, n)

    s1 = pad_vec(params["bn1_scale"], Cin_p)
    b1 = pad_vec(params["bn1_shift"], Cin_p)
    s2 = pad_vec(params["bn2_scale"], Cout_p)
    b2 = pad_vec(params["bn2_shift"], Cout_p)

    # per-kh weight slabs: (kh, kw*cin, cout) -> one (3*C, Cout) dot per kh
    w1 = jnp.pad(params["w1"], ((0, 0), (0, 0), (0, Cin_p - Cin), (0, Cout_p - Cout)))
    w1 = w1.reshape(3, 3 * Cin_p, Cout_p).astype(jnp.bfloat16)
    w2 = jnp.pad(params["w2"], ((0, 0), (0, 0), (0, Cout_p - Cout), (0, Cout_p - Cout)))
    w2 = w2.reshape(3, 3 * Cout_p, Cout_p).astype(jnp.bfloat16)

    kernel = _make_preact_kernel(H, W, Cin_p, Cout_p, Ho, Wo, s, R, CB,
                                 has_shortcut, Hp1, Wp1, Hp2, Wp2)

    in_specs = [
        pl.BlockSpec((1, H, W, Cin_p), lambda b: (b, 0, 0, 0)),      # x (per batch)
        pl.BlockSpec((1, Cin_p), lambda b: (0, 0)),                  # bn1 scale
        pl.BlockSpec((1, Cin_p), lambda b: (0, 0)),                  # bn1 shift
        pl.BlockSpec((3, 3 * Cin_p, Cout_p), lambda b: (0, 0, 0)),   # conv1 weight
        pl.BlockSpec((1, Cout_p), lambda b: (0, 0)),                 # bn2 scale
        pl.BlockSpec((1, Cout_p), lambda b: (0, 0)),                 # bn2 shift
        pl.BlockSpec((3, 3 * Cout_p, Cout_p), lambda b: (0, 0, 0)),  # conv2 weight
    ]
    inputs = [x, s1, b1, w1, s2, b2, w2]
    if has_shortcut:
        ws = jnp.pad(params["ws"], ((0, Cin_p - Cin), (0, Cout_p - Cout)))
        in_specs.append(pl.BlockSpec((Cin_p, Cout_p), lambda b: (0, 0)))
        inputs.append(ws.astype(jnp.bfloat16))

    scratch = [
        pltpu.VMEM((Hp1, Wp1, Cin_p), jnp.bfloat16),   # padded relu(bn1(x))
        pltpu.VMEM((Hp2, Wp2, Cout_p), jnp.bfloat16),  # padded relu(bn2(conv1))
    ]

    # advisory cost estimate so XLA schedules the surrounding transposes/pads
    flops = 2 * B * Ho * Wo * (9 * Cin_p * Cout_p + 9 * Cout_p * Cout_p
                               + (Cin_p * Cout_p if has_shortcut else 0))
    bytes_acc = (int(x.size) * 4 + int(w1.size) * 2 + int(w2.size) * 2
                 + (Cin_p * Cout_p * 2 if has_shortcut else 0)
                 + B * Ho * Wo * Cout_p * 4)
    cost = pl.CostEstimate(flops=int(flops), transcendentals=0,
                           bytes_accessed=int(bytes_acc))

    out_nhwc = pl.pallas_call(
        kernel,
        out_shape=jax.ShapeDtypeStruct((B, Ho, Wo, Cout_p), jnp.float32),
        grid_spec=pltpu.PrefetchScalarGridSpec(
            num_scalar_prefetch=0,
            grid=(B,),
            in_specs=in_specs,
            out_specs=pl.BlockSpec((1, Ho, Wo, Cout_p), lambda b: (b, 0, 0, 0)),
            scratch_shapes=scratch,
        ),
        compiler_params=pltpu.CompilerParams(
            dimension_semantics=("parallel",),         # batch sharding (v7x 2 TCs)
            vmem_limit_bytes=_vmem_limit_bytes(),      # generation-aware budget
        ),
        cost_estimate=cost,
    )(*inputs)

    # drop channel padding, NHWC -> NCHW (PyTorch interface)
    return jnp.transpose(out_nhwc[..., :Cout], (0, 3, 1, 2))


# ----------------------------------------------------------------------------
# Pure-JAX reference (for correctness check)
# ----------------------------------------------------------------------------
def preact_block_reference(x_nchw, params, stride):
    Cin = x_nchw.shape[1]
    Cout = params["w1"].shape[-1]
    has_shortcut = (stride != 1) or (Cin != Cout)
    x = jnp.transpose(x_nchw, (0, 2, 3, 1)).astype(jnp.float32)
    dn = ("NHWC", "HWIO", "NHWC")
    hi = lax.Precision.HIGHEST
    pre1 = jnp.maximum(x * params["bn1_scale"] + params["bn1_shift"], 0.0)
    if has_shortcut:
        sc = lax.conv_general_dilated(pre1, params["ws"][None, None],
                                      (stride, stride), "VALID",
                                      dimension_numbers=dn, precision=hi)
    else:
        sc = x
    h = lax.conv_general_dilated(pre1, params["w1"], (stride, stride),
                                 ((1, 1), (1, 1)), dimension_numbers=dn, precision=hi)
    h = jnp.maximum(h * params["bn2_scale"] + params["bn2_shift"], 0.0)
    h = lax.conv_general_dilated(h, params["w2"], (1, 1),
                                 ((1, 1), (1, 1)), dimension_numbers=dn, precision=hi)
    out = h + sc
    return jnp.transpose(out, (0, 3, 1, 2))


# ----------------------------------------------------------------------------
# Deterministic parameter init (shapes from PreActBlock.__init__)
# ----------------------------------------------------------------------------
def init_params(key, in_planes, planes, eps=1e-5):
    ks = jax.random.split(key, 11)
    g1 = jax.random.uniform(ks[0], (in_planes,), jnp.float32, 0.5, 1.5)
    beta1 = 0.1 * jax.random.normal(ks[1], (in_planes,), jnp.float32)
    m1 = 0.1 * jax.random.normal(ks[2], (in_planes,), jnp.float32)
    v1 = jax.random.uniform(ks[3], (in_planes,), jnp.float32, 0.5, 1.5)
    g2 = jax.random.uniform(ks[4], (planes,), jnp.float32, 0.5, 1.5)
    beta2 = 0.1 * jax.random.normal(ks[5], (planes,), jnp.float32)
    m2 = 0.1 * jax.random.normal(ks[6], (planes,), jnp.float32)
    v2 = jax.random.uniform(ks[7], (planes,), jnp.float32, 0.5, 1.5)
    w1 = 0.1 * jax.random.normal(ks[8], (3, 3, in_planes, planes), jnp.float32)   # HWIO
    w2 = 0.1 * jax.random.normal(ks[9], (3, 3, planes, planes), jnp.float32)      # HWIO
    ws = 0.1 * jax.random.normal(ks[10], (in_planes, planes), jnp.float32)        # 1x1
    s1 = g1 / jnp.sqrt(v1 + eps)
    s2 = g2 / jnp.sqrt(v2 + eps)
    return dict(bn1_scale=s1, bn1_shift=beta1 - m1 * s1,
                bn2_scale=s2, bn2_shift=beta2 - m2 * s2,
                w1=w1, w2=w2, ws=ws)


# ----------------------------------------------------------------------------
if __name__ == "__main__":
    key = jax.random.PRNGKey(0)
    kx, kp1, kp2 = jax.random.split(key, 3)

    # Config A: downsampling block (stride=2, in_planes != planes) -> conv shortcut
    B, Cin, H, W = 2, 4, 16, 16
    planes = 8
    x = jax.random.normal(kx, (B, Cin, H, W), jnp.float32)
    params = init_params(kp1, Cin, planes)
    out = preact_block_forward(x, params, stride=2)
    out = jax.block_until_ready(out)
    ref = preact_block_reference(x, params, stride=2)
    assert out.shape == ref.shape == (B, planes, H // 2, W // 2)
    err = float(jnp.max(jnp.abs(out - ref)))
    # bf16 conv activations/weights with f32 accumulation vs f32 reference
    assert bool(jnp.allclose(out, ref, atol=5e-2, rtol=5e-2)), f"max abs err {err}"

    # Config B: identity shortcut (stride=1, in_planes == planes)
    Cin2 = planes2 = 8
    x2 = jax.random.normal(kx, (B, Cin2, H, W), jnp.float32)
    params2 = init_params(kp2, Cin2, planes2)
    out2 = preact_block_forward(x2, params2, stride=1)
    out2 = jax.block_until_ready(out2)
    ref2 = preact_block_reference(x2, params2, stride=1)
    assert out2.shape == ref2.shape == (B, planes2, H, W)
    err2 = float(jnp.max(jnp.abs(out2 - ref2)))
    assert bool(jnp.allclose(out2, ref2, atol=5e-2, rtol=5e-2)), f"max abs err {err2}"

    print("KERNEL_OK")
</pallas_src>

<mosaic_0001>
module attributes {stable_mosaic.version = 11 : i64} {
  func.func @kernel(%arg0: i32, %arg1: memref<1x16x16x128xf32, #tpu.memory_space<vmem>>, %arg2: memref<1x128xf32, #tpu.memory_space<vmem>>, %arg3: memref<1x128xf32, #tpu.memory_space<vmem>>, %arg4: memref<3x384x128xbf16, #tpu.memory_space<vmem>>, %arg5: memref<1x128xf32, #tpu.memory_space<vmem>>, %arg6: memref<1x128xf32, #tpu.memory_space<vmem>>, %arg7: memref<3x384x128xbf16, #tpu.memory_space<vmem>>, %arg8: memref<128x128xbf16, #tpu.memory_space<vmem>>, %arg9: memref<1x8x8x128xf32, #tpu.memory_space<vmem>>, %arg10: memref<18x26x128xbf16, #tpu.memory_space<vmem>>, %arg11: memref<10x18x128xbf16, #tpu.memory_space<vmem>>) attributes {dimension_semantics = [#tpu.dimension_semantics<parallel>], iteration_bounds = array<i64: 2>, scalar_prefetch = 0 : i64, scratch_operands = 2 : i64, tpu.core_type = #tpu.core_type<tc>, window_params = [{transform_indices = @transform_0, window_bounds = array<i64: 1, 16, 16, 128>}, {pipeline_mode = #tpu.pipeline_mode<synchronous>, transform_indices = @transform_1, window_bounds = array<i64: 1, 128>}, {pipeline_mode = #tpu.pipeline_mode<synchronous>, transform_indices = @transform_2, window_bounds = array<i64: 1, 128>}, {pipeline_mode = #tpu.pipeline_mode<synchronous>, transform_indices = @transform_3, window_bounds = array<i64: 3, 384, 128>}, {pipeline_mode = #tpu.pipeline_mode<synchronous>, transform_indices = @transform_4, window_bounds = array<i64: 1, 128>}, {pipeline_mode = #tpu.pipeline_mode<synchronous>, transform_indices = @transform_5, window_bounds = array<i64: 1, 128>}, {pipeline_mode = #tpu.pipeline_mode<synchronous>, transform_indices = @transform_6, window_bounds = array<i64: 3, 384, 128>}, {pipeline_mode = #tpu.pipeline_mode<synchronous>, transform_indices = @transform_7, window_bounds = array<i64: 128, 128>}, {transform_indices = @transform_8, window_bounds = array<i64: 1, 8, 8, 128>}]} {
    %cst = arith.constant 0.000000e+00 : bf16
    %0 = vector.broadcast %cst : bf16 to vector<26x128xbf16>
    %c0 = arith.constant 0 : index
    %c0_0 = arith.constant 0 : index
    %c0_1 = arith.constant 0 : index
    %1 = vector.load %arg10[%c0, %c0_0, %c0_1] : memref<18x26x128xbf16, #tpu.memory_space<vmem>>, vector<1x26x128xbf16>
    %2 = vector.shape_cast %1 : vector<1x26x128xbf16> to vector<26x128xbf16>
    %3 = vector.shape_cast %0 : vector<26x128xbf16> to vector<1x26x128xbf16>
    tpu.vector_store %arg10[%c0, %c0_0, %c0_1], %3 {strides = array<i32>} : memref<18x26x128xbf16, #tpu.memory_space<vmem>>, vector<1x26x128xbf16>,
    %cst_2 = arith.constant 0.000000e+00 : bf16
    %4 = vector.broadcast %cst_2 : bf16 to vector<1x26x128xbf16>
    %c17 = arith.constant 17 : index
    %c0_3 = arith.constant 0 : index
    %c0_4 = arith.constant 0 : index
    %5 = vector.load %arg10[%c17, %c0_3, %c0_4] : memref<18x26x128xbf16, #tpu.memory_space<vmem>>, vector<1x26x128xbf16>
    tpu.vector_store %arg10[%c17, %c0_3, %c0_4], %4 {strides = array<i32>} : memref<18x26x128xbf16, #tpu.memory_space<vmem>>, vector<1x26x128xbf16>,
    %cst_5 = arith.constant 0.000000e+00 : bf16
    %6 = vector.broadcast %cst_5 : bf16 to vector<18x1x128xbf16>
    %c0_6 = arith.constant 0 : index
    %c7 = arith.constant 7 : index
    %c0_7 = arith.constant 0 : index
    %7 = vector.load %arg10[%c0_6, %c7, %c0_7] : memref<18x26x128xbf16, #tpu.memory_space<vmem>>, vector<18x1x128xbf16>
    tpu.vector_store %arg10[%c0_6, %c7, %c0_7], %6 {strides = array<i32>} : memref<18x26x128xbf16, #tpu.memory_space<vmem>>, vector<18x1x128xbf16>,
    %cst_8 = arith.constant 0.000000e+00 : bf16
    %8 = vector.broadcast %cst_8 : bf16 to vector<18x2x128xbf16>
    %c0_9 = arith.constant 0 : index
    %c24 = arith.constant 24 : index
    %c0_10 = arith.constant 0 : index
    %9 = vector.load %arg10[%c0_9, %c24, %c0_10] : memref<18x26x128xbf16, #tpu.memory_space<vmem>>, vector<18x2x128xbf16>
    tpu.vector_store %arg10[%c0_9, %c24, %c0_10], %8 {strides = array<i32>} : memref<18x26x128xbf16, #tpu.memory_space<vmem>>, vector<18x2x128xbf16>,
    %cst_11 = arith.constant 0.000000e+00 : bf16
    %10 = vector.broadcast %cst_11 : bf16 to vector<18x128xbf16>
    %c0_12 = arith.constant 0 : index
    %c0_13 = arith.constant 0 : index
    %c0_14 = arith.constant 0 : index
    %11 = vector.load %arg11[%c0_12, %c0_13, %c0_14] : memref<10x18x128xbf16, #tpu.memory_space<vmem>>, vector<1x18x128xbf16>
    %12 = vector.shape_cast %11 : vector<1x18x128xbf16> to vector<18x128xbf16>
    %13 = vector.shape_cast %10 : vector<18x128xbf16> to vector<1x18x128xbf16>
    tpu.vector_store %arg11[%c0_12, %c0_13, %c0_14], %13 {strides = array<i32>} : memref<10x18x128xbf16, #tpu.memory_space<vmem>>, vector<1x18x128xbf16>,
    %cst_15 = arith.constant 0.000000e+00 : bf16
    %14 = vector.broadcast %cst_15 : bf16 to vector<1x18x128xbf16>
    %c9 = arith.constant 9 : index
    %c0_16 = arith.constant 0 : index
    %c0_17 = arith.constant 0 : index
    %15 = vector.load %arg11[%c9, %c0_16, %c0_17] : memref<10x18x128xbf16, #tpu.memory_space<vmem>>, vector<1x18x128xbf16>
    tpu.vector_store %arg11[%c9, %c0_16, %c0_17], %14 {strides = array<i32>} : memref<10x18x128xbf16, #tpu.memory_space<vmem>>, vector<1x18x128xbf16>,
    %cst_18 = arith.constant 0.000000e+00 : bf16
    %16 = vector.broadcast %cst_18 : bf16 to vector<10x1x128xbf16>
    %c0_19 = arith.constant 0 : index
    %c7_20 = arith.constant 7 : index
    %c0_21 = arith.constant 0 : index
    %17 = vector.load %arg11[%c0_19, %c7_20, %c0_21] : memref<10x18x128xbf16, #tpu.memory_space<vmem>>, vector<10x1x128xbf16>
    tpu.vector_store %arg11[%c0_19, %c7_20, %c0_21], %16 {strides = array<i32>} : memref<10x18x128xbf16, #tpu.memory_space<vmem>>, vector<10x1x128xbf16>,
    %cst_22 = arith.constant 0.000000e+00 : bf16
    %18 = vector.broadcast %cst_22 : bf16 to vector<10x2x128xbf16>
    %c0_23 = arith.constant 0 : index
    %c16 = arith.constant 16 : index
    %c0_24 = arith.constant 0 : index
    %19 = vector.load %arg11[%c0_23, %c16, %c0_24] : memref<10x18x128xbf16, #tpu.memory_space<vmem>>, vector<10x2x128xbf16>
    tpu.vector_store %arg11[%c0_23, %c16, %c0_24], %18 {strides = array<i32>} : memref<10x18x128xbf16, #tpu.memory_space<vmem>>, vector<10x2x128xbf16>,
    %c0_25 = arith.constant 0 : index
    %c0_26 = arith.constant 0 : index
    %20 = vector.load %arg2[%c0_25, %c0_26] : memref<1x128xf32, #tpu.memory_space<vmem>>, vector<1x128xf32>
    %21 = vector.shape_cast %20 : vector<1x128xf32> to vector<128xf32>
    %c0_27 = arith.constant 0 : index
    %c0_28 = arith.constant 0 : index
    %22 = vector.load %arg3[%c0_27, %c0_28] : memref<1x128xf32, #tpu.memory_space<vmem>>, vector<1x128xf32>
    %23 = vector.shape_cast %22 : vector<1x128xf32> to vector<128xf32>
    %c0_29 = arith.constant 0 : index
    %c0_30 = arith.constant 0 : index
    %24 = vector.load %arg5[%c0_29, %c0_30] : memref<1x128xf32, #tpu.memory_space<vmem>>, vector<1x128xf32>
    %25 = vector.shape_cast %24 : vector<1x128xf32> to vector<128xf32>
    %c0_31 = arith.constant 0 : index
    %c0_32 = arith.constant 0 : index
    %26 = vector.load %arg6[%c0_31, %c0_32] : memref<1x128xf32, #tpu.memory_space<vmem>>, vector<1x128xf32>
    %27 = vector.shape_cast %26 : vector<1x128xf32> to vector<128xf32>
    %c0_i32 = arith.constant 0 : i32
    %c16_i32 = arith.constant 16 : i32
    %28 = arith.muli %c0_i32, %c16_i32 : i32
    %29 = tpu.assume_multiple %28, 8 : i32
    %c0_33 = arith.constant 0 : index
    %30 = arith.index_cast %29 : i32 to index
    %c0_34 = arith.constant 0 : index
    %c0_35 = arith.constant 0 : index
    %31 = vector.load %arg1[%c0_33, %30, %c0_34, %c0_35] : memref<1x16x16x128xf32, #tpu.memory_space<vmem>>, vector<1x16x16x128xf32>
    %32 = vector.shape_cast %31 : vector<1x16x16x128xf32> to vector<16x16x128xf32>
    %33 = vector.shape_cast %21 : vector<128xf32> to vector<1x1x128xf32>
    %34 = vector.broadcast %33 : vector<1x1x128xf32> to vector<16x16x128xf32>
    %35 = arith.mulf %32, %34 : vector<16x16x128xf32>
    %36 = vector.shape_cast %23 : vector<128xf32> to vector<1x1x128xf32>
    %37 = vector.broadcast %36 : vector<1x1x128xf32> to vector<16x16x128xf32>
    %38 = arith.addf %35, %37 : vector<16x16x128xf32>
    %cst_36 = arith.constant 0.000000e+00 : f32
    %39 = vector.broadcast %cst_36 : f32 to vector<16x16x128xf32>
    %40 = arith.maximumf %38, %39 : vector<16x16x128xf32>
    %41 = arith.truncf %40 : vector<16x16x128xf32> to vector<16x16x128xbf16>
    %c16_i32_37 = arith.constant 16 : i32
    %42 = arith.muli %c0_i32, %c16_i32_37 : i32
    %c1_i32 = arith.constant 1 : i32
    %43 = arith.addi %c1_i32, %42 : i32
    %44 = arith.index_cast %43 : i32 to index
    %c8 = arith.constant 8 : index
    %c0_38 = arith.constant 0 : index
    %45 = vector.load %arg10[%44, %c8, %c0_38] : memref<18x26x128xbf16, #tpu.memory_space<vmem>>, vector<16x16x128xbf16>
    tpu.vector_store %arg10[%44, %c8, %c0_38], %41 {strides = array<i32>} : memref<18x26x128xbf16, #tpu.memory_space<vmem>>, vector<16x16x128xbf16>,
    %c1_i32_39 = arith.constant 1 : i32
    %c0_i32_40 = arith.constant 0 : i32
    %c16_i32_41 = arith.constant 16 : i32
    %46 = arith.muli %c0_i32_40, %c16_i32_41 : i32
    %47 = tpu.assume_multiple %46, 8 : i32
    %48 = arith.index_cast %47 : i32 to index
    %c0_42 = arith.constant 0 : index
    %c0_43 = arith.constant 0 : index
    %49 = vector.load %arg10[%48, %c0_42, %c0_43] : memref<18x26x128xbf16, #tpu.memory_space<vmem>>, vector<18x26x128xbf16>
    %50 = vector.extract_strided_slice %49 {offsets = [0, 0, 0], sizes = [16, 26, 128], strides = [1, 1, 1]} : vector<18x26x128xbf16> to vector<16x26x128xbf16>
    %51 = vector.shape_cast %50 : vector<16x26x128xbf16> to vector<8x2x26x128xbf16>
    %52 = vector.extract_strided_slice %51 {offsets = [0, 0, 0, 0], sizes = [8, 1, 26, 128], strides = [1, 1, 1, 1]} : vector<8x2x26x128xbf16> to vector<8x1x26x128xbf16>
    %53 = vector.shape_cast %52 : vector<8x1x26x128xbf16> to vector<8x26x128xbf16>
    %54 = vector.extract_strided_slice %53 {offsets = [0, 7, 0], sizes = [8, 16, 128], strides = [1, 1, 1]} : vector<8x26x128xbf16> to vector<8x16x128xbf16>
    %55 = vector.shape_cast %54 : vector<8x16x128xbf16> to vector<8x8x2x128xbf16>
    %56 = vector.extract_strided_slice %55 {offsets = [0, 0, 0, 0], sizes = [8, 8, 1, 128], strides = [1, 1, 1, 1]} : vector<8x8x2x128xbf16> to vector<8x8x1x128xbf16>
    %57 = vector.shape_cast %56 : vector<8x8x1x128xbf16> to vector<8x8x128xbf16>
    %58 = vector.extract_strided_slice %53 {offsets = [0, 8, 0], sizes = [8, 16, 128], strides = [1, 1, 1]} : vector<8x26x128xbf16> to vector<8x16x128xbf16>
    %59 = vector.shape_cast %58 : vector<8x16x128xbf16> to vector<8x8x2x128xbf16>
    %60 = vector.extract_strided_slice %59 {offsets = [0, 0, 0, 0], sizes = [8, 8, 1, 128], strides = [1, 1, 1, 1]} : vector<8x8x2x128xbf16> to vector<8x8x1x128xbf16>
    %61 = vector.shape_cast %60 : vector<8x8x1x128xbf16> to vector<8x8x128xbf16>
    %62 = vector.extract_strided_slice %53 {offsets = [0, 9, 0], sizes = [8, 16, 128], strides = [1, 1, 1]} : vector<8x26x128xbf16> to vector<8x16x128xbf16>
    %63 = vector.shape_cast %62 : vector<8x16x128xbf16> to vector<8x8x2x128xbf16>
    %64 = vector.extract_strided_slice %63 {offsets = [0, 0, 0, 0], sizes = [8, 8, 1, 128], strides = [1, 1, 1, 1]} : vector<8x8x2x128xbf16> to vector<8x8x1x128xbf16>
    %65 = vector.shape_cast %64 : vector<8x8x1x128xbf16> to vector<8x8x128xbf16>
    %66 = tpu.concatenate %57, %61, %65 in 2 : vector<8x8x128xbf16>, vector<8x8x128xbf16>, vector<8x8x128xbf16> -> vector<8x8x384xbf16>
    %67 = vector.shape_cast %66 : vector<8x8x384xbf16> to vector<64x384xbf16>
    %c0_44 = arith.constant 0 : index
    %c0_45 = arith.constant 0 : index
    %c0_46 = arith.constant 0 : index
    %68 = vector.load %arg4[%c0_44, %c0_45, %c0_46] : memref<3x384x128xbf16, #tpu.memory_space<vmem>>, vector<1x384x128xbf16>
    %69 = vector.shape_cast %68 : vector<1x384x128xbf16> to vector<384x128xbf16>
    %cst_47 = arith.constant dense<0.000000e+00> : vector<64x128xf32>
    %70 = tpu.matmul %67, %69, %cst_47 {dimension_numbers = #tpu.dot_dimension_numbers<[1], [0], [0], [1], [0, 0, 1, 1], [], []>} : vector<64x384xbf16>, vector<384x128xbf16>, vector<64x128xf32> -> vector<64x128xf32>
    %71 = vector.extract_strided_slice %49 {offsets = [1, 0, 0], sizes = [16, 26, 128], strides = [1, 1, 1]} : vector<18x26x128xbf16> to vector<16x26x128xbf16>
    %72 = vector.shape_cast %71 : vector<16x26x128xbf16> to vector<8x2x26x128xbf16>
    %73 = vector.extract_strided_slice %72 {offsets = [0, 0, 0, 0], sizes = [8, 1, 26, 128], strides = [1, 1, 1, 1]} : vector<8x2x26x128xbf16> to vector<8x1x26x128xbf16>
    %74 = vector.shape_cast %73 : vector<8x1x26x128xbf16> to vector<8x26x128xbf16>
    %75 = vector.extract_strided_slice %74 {offsets = [0, 7, 0], sizes = [8, 16, 128], strides = [1, 1, 1]} : vector<8x26x128xbf16> to vector<8x16x128xbf16>
    %76 = vector.shape_cast %75 : vector<8x16x128xbf16> to vector<8x8x2x128xbf16>
    %77 = vector.extract_strided_slice %76 {offsets = [0, 0, 0, 0], sizes = [8, 8, 1, 128], strides = [1, 1, 1, 1]} : vector<8x8x2x128xbf16> to vector<8x8x1x128xbf16>
    %78 = vector.shape_cast %77 : vector<8x8x1x128xbf16> to vector<8x8x128xbf16>
    %79 = vector.extract_strided_slice %74 {offsets = [0, 8, 0], sizes = [8, 16, 128], strides = [1, 1, 1]} : vector<8x26x128xbf16> to vector<8x16x128xbf16>
    %80 = vector.shape_cast %79 : vector<8x16x128xbf16> to vector<8x8x2x128xbf16>
    %81 = vector.extract_strided_slice %80 {offsets = [0, 0, 0, 0], sizes = [8, 8, 1, 128], strides = [1, 1, 1, 1]} : vector<8x8x2x128xbf16> to vector<8x8x1x128xbf16>
    %82 = vector.shape_cast %81 : vector<8x8x1x128xbf16> to vector<8x8x128xbf16>
    %83 = vector.extract_strided_slice %74 {offsets = [0, 9, 0], sizes = [8, 16, 128], strides = [1, 1, 1]} : vector<8x26x128xbf16> to vector<8x16x128xbf16>
    %84 = vector.shape_cast %83 : vector<8x16x128xbf16> to vector<8x8x2x128xbf16>
    %85 = vector.extract_strided_slice %84 {offsets = [0, 0, 0, 0], sizes = [8, 8, 1, 128], strides = [1, 1, 1, 1]} : vector<8x8x2x128xbf16> to vector<8x8x1x128xbf16>
    %86 = vector.shape_cast %85 : vector<8x8x1x128xbf16> to vector<8x8x128xbf16>
    %87 = tpu.concatenate %78, %82, %86 in 2 : vector<8x8x128xbf16>, vector<8x8x128xbf16>, vector<8x8x128xbf16> -> vector<8x8x384xbf16>
    %88 = vector.shape_cast %87 : vector<8x8x384xbf16> to vector<64x384xbf16>
    %c1 = arith.constant 1 : index
    %c0_48 = arith.constant 0 : index
    %c0_49 = arith.constant 0 : index
    %89 = vector.load %arg4[%c1, %c0_48, %c0_49] : memref<3x384x128xbf16, #tpu.memory_space<vmem>>, vector<1x384x128xbf16>
    %90 = vector.shape_cast %89 : vector<1x384x128xbf16> to vector<384x128xbf16>
    %cst_50 = arith.constant dense<0.000000e+00> : vector<64x128xf32>
    %91 = tpu.matmul %88, %90, %cst_50 {dimension_numbers = #tpu.dot_dimension_numbers<[1], [0], [0], [1], [0, 0, 1, 1], [], []>} : vector<64x384xbf16>, vector<384x128xbf16>, vector<64x128xf32> -> vector<64x128xf32>
    %92 = arith.addf %70, %91 : vector<64x128xf32>
    %93 = vector.extract_strided_slice %49 {offsets = [2, 0, 0], sizes = [16, 26, 128], strides = [1, 1, 1]} : vector<18x26x128xbf16> to vector<16x26x128xbf16>
    %94 = vector.shape_cast %93 : vector<16x26x128xbf16> to vector<8x2x26x128xbf16>
    %95 = vector.extract_strided_slice %94 {offsets = [0, 0, 0, 0], sizes = [8, 1, 26, 128], strides = [1, 1, 1, 1]} : vector<8x2x26x128xbf16> to vector<8x1x26x128xbf16>
    %96 = vector.shape_cast %95 : vector<8x1x26x128xbf16> to vector<8x26x128xbf16>
    %97 = vector.extract_strided_slice %96 {offsets = [0, 7, 0], sizes = [8, 16, 128], strides = [1, 1, 1]} : vector<8x26x128xbf16> to vector<8x16x128xbf16>
    %98 = vector.shape_cast %97 : vector<8x16x128xbf16> to vector<8x8x2x128xbf16>
    %99 = vector.extract_strided_slice %98 {offsets = [0, 0, 0, 0], sizes = [8, 8, 1, 128], strides = [1, 1, 1, 1]} : vector<8x8x2x128xbf16> to vector<8x8x1x128xbf16>
    %100 = vector.shape_cast %99 : vector<8x8x1x128xbf16> to vector<8x8x128xbf16>
    %101 = vector.extract_strided_slice %96 {offsets = [0, 8, 0], sizes = [8, 16, 128], strides = [1, 1, 1]} : vector<8x26x128xbf16> to vector<8x16x128xbf16>
    %102 = vector.shape_cast %101 : vector<8x16x128xbf16> to vector<8x8x2x128xbf16>
    %103 = vector.extract_strided_slice %102 {offsets = [0, 0, 0, 0], sizes = [8, 8, 1, 128], strides = [1, 1, 1, 1]} : vector<8x8x2x128xbf16> to vector<8x8x1x128xbf16>
    %104 = vector.shape_cast %103 : vector<8x8x1x128xbf16> to vector<8x8x128xbf16>
    %105 = vector.extract_strided_slice %96 {offsets = [0, 9, 0], sizes = [8, 16, 128], strides = [1, 1, 1]} : vector<8x26x128xbf16> to vector<8x16x128xbf16>
    %106 = vector.shape_cast %105 : vector<8x16x128xbf16> to vector<8x8x2x128xbf16>
    %107 = vector.extract_strided_slice %106 {offsets = [0, 0, 0, 0], sizes = [8, 8, 1, 128], strides = [1, 1, 1, 1]} : vector<8x8x2x128xbf16> to vector<8x8x1x128xbf16>
    %108 = vector.shape_cast %107 : vector<8x8x1x128xbf16> to vector<8x8x128xbf16>
    %109 = tpu.concatenate %100, %104, %108 in 2 : vector<8x8x128xbf16>, vector<8x8x128xbf16>, vector<8x8x128xbf16> -> vector<8x8x384xbf16>
    %110 = vector.shape_cast %109 : vector<8x8x384xbf16> to vector<64x384xbf16>
    %c2 = arith.constant 2 : index
    %c0_51 = arith.constant 0 : index
    %c0_52 = arith.constant 0 : index
    %111 = vector.load %arg4[%c2, %c0_51, %c0_52] : memref<3x384x128xbf16, #tpu.memory_space<vmem>>, vector<1x384x128xbf16>
    %112 = vector.shape_cast %111 : vector<1x384x128xbf16> to vector<384x128xbf16>
    %cst_53 = arith.constant dense<0.000000e+00> : vector<64x128xf32>
    %113 = tpu.matmul %110, %112, %cst_53 {dimension_numbers = #tpu.dot_dimension_numbers<[1], [0], [0], [1], [0, 0, 1, 1], [], []>} : vector<64x384xbf16>, vector<384x128xbf16>, vector<64x128xf32> -> vector<64x128xf32>
    %114 = arith.addf %92, %113 : vector<64x128xf32>
    %115 = vector.shape_cast %25 : vector<128xf32> to vector<1x128xf32>
    %116 = vector.broadcast %115 : vector<1x128xf32> to vector<64x128xf32>
    %117 = arith.mulf %114, %116 : vector<64x128xf32>
    %118 = vector.shape_cast %27 : vector<128xf32> to vector<1x128xf32>
    %119 = vector.broadcast %118 : vector<1x128xf32> to vector<64x128xf32>
    %120 = arith.addf %117, %119 : vector<64x128xf32>
    %cst_54 = arith.constant 0.000000e+00 : f32
    %121 = vector.broadcast %cst_54 : f32 to vector<64x128xf32>
    %122 = arith.maximumf %120, %121 : vector<64x128xf32>
    %123 = arith.truncf %122 : vector<64x128xf32> to vector<64x128xbf16>
    %124 = vector.shape_cast %123 : vector<64x128xbf16> to vector<8x8x128xbf16>
    %c8_i32 = arith.constant 8 : i32
    %125 = arith.muli %c0_i32_40, %c8_i32 : i32
    %c1_i32_55 = arith.constant 1 : i32
    %126 = arith.addi %c1_i32_55, %125 : i32
    %127 = arith.index_cast %126 : i32 to index
    %c8_56 = arith.constant 8 : index
    %c0_57 = arith.constant 0 : index
    %128 = vector.load %arg11[%127, %c8_56, %c0_57] : memref<10x18x128xbf16, #tpu.memory_space<vmem>>, vector<8x8x128xbf16>
    tpu.vector_store %arg11[%127, %c8_56, %c0_57], %124 {strides = array<i32>} : memref<10x18x128xbf16, #tpu.memory_space<vmem>>, vector<8x8x128xbf16>,
    %c1_i32_58 = arith.constant 1 : i32
    %c0_i32_59 = arith.constant 0 : i32
    %c8_i32_60 = arith.constant 8 : i32
    %129 = arith.muli %c0_i32_59, %c8_i32_60 : i32
    %130 = tpu.assume_multiple %129, 8 : i32
    %131 = arith.index_cast %130 : i32 to index
    %c0_61 = arith.constant 0 : index
    %c0_62 = arith.constant 0 : index
    %132 = vector.load %arg11[%131, %c0_61, %c0_62] : memref<10x18x128xbf16, #tpu.memory_space<vmem>>, vector<10x18x128xbf16>
    %133 = vector.extract_strided_slice %132 {offsets = [0, 0, 0], sizes = [8, 18, 128], strides = [1, 1, 1]} : vector<10x18x128xbf16> to vector<8x18x128xbf16>
    %134 = vector.extract_strided_slice %133 {offsets = [0, 7, 0], sizes = [8, 8, 128], strides = [1, 1, 1]} : vector<8x18x128xbf16> to vector<8x8x128xbf16>
    %135 = vector.extract_strided_slice %133 {offsets = [0, 8, 0], sizes = [8, 8, 128], strides = [1, 1, 1]} : vector<8x18x128xbf16> to vector<8x8x128xbf16>
    %136 = vector.extract_strided_slice %133 {offsets = [0, 9, 0], sizes = [8, 8, 128], strides = [1, 1, 1]} : vector<8x18x128xbf16> to vector<8x8x128xbf16>
    %137 = tpu.concatenate %134, %135, %136 in 2 : vector<8x8x128xbf16>, vector<8x8x128xbf16>, vector<8x8x128xbf16> -> vector<8x8x384xbf16>
    %138 = vector.shape_cast %137 : vector<8x8x384xbf16> to vector<64x384xbf16>
    %c0_63 = arith.constant 0 : index
    %c0_64 = arith.constant 0 : index
    %c0_65 = arith.constant 0 : index
    %139 = vector.load %arg7[%c0_63, %c0_64, %c0_65] : memref<3x384x128xbf16, #tpu.memory_space<vmem>>, vector<1x384x128xbf16>
    %140 = vector.shape_cast %139 : vector<1x384x128xbf16> to vector<384x128xbf16>
    %cst_66 = arith.constant dense<0.000000e+00> : vector<64x128xf32>
    %141 = tpu.matmul %138, %140, %cst_66 {dimension_numbers = #tpu.dot_dimension_numbers<[1], [0], [0], [1], [0, 0, 1, 1], [], []>} : vector<64x384xbf16>, vector<384x128xbf16>, vector<64x128xf32> -> vector<64x128xf32>
    %142 = vector.extract_strided_slice %132 {offsets = [1, 0, 0], sizes = [8, 18, 128], strides = [1, 1, 1]} : vector<10x18x128xbf16> to vector<8x18x128xbf16>
    %143 = vector.extract_strided_slice %142 {offsets = [0, 7, 0], sizes = [8, 8, 128], strides = [1, 1, 1]} : vector<8x18x128xbf16> to vector<8x8x128xbf16>
    %144 = vector.extract_strided_slice %142 {offsets = [0, 8, 0], sizes = [8, 8, 128], strides = [1, 1, 1]} : vector<8x18x128xbf16> to vector<8x8x128xbf16>
    %145 = vector.extract_strided_slice %142 {offsets = [0, 9, 0], sizes = [8, 8, 128], strides = [1, 1, 1]} : vector<8x18x128xbf16> to vector<8x8x128xbf16>
    %146 = tpu.concatenate %143, %144, %145 in 2 : vector<8x8x128xbf16>, vector<8x8x128xbf16>, vector<8x8x128xbf16> -> vector<8x8x384xbf16>
    %147 = vector.shape_cast %146 : vector<8x8x384xbf16> to vector<64x384xbf16>
    %c1_67 = arith.constant 1 : index
    %c0_68 = arith.constant 0 : index
    %c0_69 = arith.constant 0 : index
    %148 = vector.load %arg7[%c1_67, %c0_68, %c0_69] : memref<3x384x128xbf16, #tpu.memory_space<vmem>>, vector<1x384x128xbf16>
    %149 = vector.shape_cast %148 : vector<1x384x128xbf16> to vector<384x128xbf16>
    %cst_70 = arith.constant dense<0.000000e+00> : vector<64x128xf32>
    %150 = tpu.matmul %147, %149, %cst_70 {dimension_numbers = #tpu.dot_dimension_numbers<[1], [0], [0], [1], [0, 0, 1, 1], [], []>} : vector<64x384xbf16>, vector<384x128xbf16>, vector<64x128xf32> -> vector<64x128xf32>
    %151 = arith.addf %141, %150 : vector<64x128xf32>
    %152 = vector.extract_strided_slice %132 {offsets = [2, 0, 0], sizes = [8, 18, 128], strides = [1, 1, 1]} : vector<10x18x128xbf16> to vector<8x18x128xbf16>
    %153 = vector.extract_strided_slice %152 {offsets = [0, 7, 0], sizes = [8, 8, 128], strides = [1, 1, 1]} : vector<8x18x128xbf16> to vector<8x8x128xbf16>
    %154 = vector.extract_strided_slice %152 {offsets = [0, 8, 0], sizes = [8, 8, 128], strides = [1, 1, 1]} : vector<8x18x128xbf16> to vector<8x8x128xbf16>
    %155 = vector.extract_strided_slice %152 {offsets = [0, 9, 0], sizes = [8, 8, 128], strides = [1, 1, 1]} : vector<8x18x128xbf16> to vector<8x8x128xbf16>
    %156 = tpu.concatenate %153, %154, %155 in 2 : vector<8x8x128xbf16>, vector<8x8x128xbf16>, vector<8x8x128xbf16> -> vector<8x8x384xbf16>
    %157 = vector.shape_cast %156 : vector<8x8x384xbf16> to vector<64x384xbf16>
    %c2_71 = arith.constant 2 : index
    %c0_72 = arith.constant 0 : index
    %c0_73 = arith.constant 0 : index
    %158 = vector.load %arg7[%c2_71, %c0_72, %c0_73] : memref<3x384x128xbf16, #tpu.memory_space<vmem>>, vector<1x384x128xbf16>
    %159 = vector.shape_cast %158 : vector<1x384x128xbf16> to vector<384x128xbf16>
    %cst_74 = arith.constant dense<0.000000e+00> : vector<64x128xf32>
    %160 = tpu.matmul %157, %159, %cst_74 {dimension_numbers = #tpu.dot_dimension_numbers<[1], [0], [0], [1], [0, 0, 1, 1], [], []>} : vector<64x384xbf16>, vector<384x128xbf16>, vector<64x128xf32> -> vector<64x128xf32>
    %161 = arith.addf %151, %160 : vector<64x128xf32>
    %c8_i32_75 = arith.constant 8 : i32
    %162 = arith.muli %c0_i32_59, %c8_i32_75 : i32
    %c2_i32 = arith.constant 2 : i32
    %163 = arith.muli %162, %c2_i32 : i32
    %c1_i32_76 = arith.constant 1 : i32
    %164 = arith.addi %c1_i32_76, %163 : i32
    %165 = arith.index_cast %164 : i32 to index
    %c0_77 = arith.constant 0 : index
    %c0_78 = arith.constant 0 : index
    %166 = vector.load %arg10[%165, %c0_77, %c0_78] : memref<18x26x128xbf16, #tpu.memory_space<vmem>>, vector<16x26x128xbf16>
    %167 = vector.shape_cast %166 : vector<16x26x128xbf16> to vector<8x2x26x128xbf16>
    %168 = vector.extract_strided_slice %167 {offsets = [0, 0, 0, 0], sizes = [8, 1, 26, 128], strides = [1, 1, 1, 1]} : vector<8x2x26x128xbf16> to vector<8x1x26x128xbf16>
    %169 = vector.shape_cast %168 : vector<8x1x26x128xbf16> to vector<8x26x128xbf16>
    %170 = vector.extract_strided_slice %169 {offsets = [0, 8, 0], sizes = [8, 16, 128], strides = [1, 1, 1]} : vector<8x26x128xbf16> to vector<8x16x128xbf16>
    %171 = vector.shape_cast %170 : vector<8x16x128xbf16> to vector<8x8x2x128xbf16>
    %172 = vector.extract_strided_slice %171 {offsets = [0, 0, 0, 0], sizes = [8, 8, 1, 128], strides = [1, 1, 1, 1]} : vector<8x8x2x128xbf16> to vector<8x8x1x128xbf16>
    %173 = vector.shape_cast %172 : vector<8x8x1x128xbf16> to vector<8x8x128xbf16>
    %174 = vector.shape_cast %173 : vector<8x8x128xbf16> to vector<64x128xbf16>
    %c0_79 = arith.constant 0 : index
    %c0_80 = arith.constant 0 : index
    %175 = vector.load %arg8[%c0_79, %c0_80] : memref<128x128xbf16, #tpu.memory_space<vmem>>, vector<128x128xbf16>
    %cst_81 = arith.constant dense<0.000000e+00> : vector<64x128xf32>
    %176 = tpu.matmul %174, %175, %cst_81 {dimension_numbers = #tpu.dot_dimension_numbers<[1], [0], [0], [1], [0, 0, 1, 1], [], []>} : vector<64x128xbf16>, vector<128x128xbf16>, vector<64x128xf32> -> vector<64x128xf32>
    %177 = arith.addf %161, %176 : vector<64x128xf32>
    %178 = vector.shape_cast %177 : vector<64x128xf32> to vector<8x8x128xf32>
    %c8_i32_82 = arith.constant 8 : i32
    %179 = arith.muli %c0_i32_59, %c8_i32_82 : i32
    %c0_83 = arith.constant 0 : index
    %180 = arith.index_cast %179 : i32 to index
    %c0_84 = arith.constant 0 : index
    %c0_85 = arith.constant 0 : index
    %181 = vector.load %arg9[%c0_83, %180, %c0_84, %c0_85] : memref<1x8x8x128xf32, #tpu.memory_space<vmem>>, vector<1x8x8x128xf32>
    %182 = vector.shape_cast %181 : vector<1x8x8x128xf32> to vector<8x8x128xf32>
    %183 = vector.shape_cast %178 : vector<8x8x128xf32> to vector<1x8x8x128xf32>
    tpu.vector_store %arg9[%c0_83, %180, %c0_84, %c0_85], %183 {strides = array<i32>} : memref<1x8x8x128xf32, #tpu.memory_space<vmem>>, vector<1x8x8x128xf32>,
    %c1_i32_86 = arith.constant 1 : i32
    return
  }
  func.func @transform_0(%arg0: i32) -> (i32, i32, i32, i32) {
    %c0_i32 = arith.constant 0 : i32
    %c0_i32_0 = arith.constant 0 : i32
    %c0_i32_1 = arith.constant 0 : i32
    %c0_i32_2 = arith.constant 0 : i32
    return %arg0, %c0_i32, %c0_i32_0, %c0_i32_1 : i32, i32, i32, i32
  }
  func.func @transform_1(%arg0: i32) -> (i32, i32) {
    %c0_i32 = arith.constant 0 : i32
    %c0_i32_0 = arith.constant 0 : i32
    %c0_i32_1 = arith.constant 0 : i32
    return %c0_i32, %c0_i32_0 : i32, i32
  }
  func.func @transform_2(%arg0: i32) -> (i32, i32) {
    %c0_i32 = arith.constant 0 : i32
    %c0_i32_0 = arith.constant 0 : i32
    %c0_i32_1 = arith.constant 0 : i32
    return %c0_i32, %c0_i32_0 : i32, i32
  }
  func.func @transform_3(%arg0: i32) -> (i32, i32, i32) {
    %c0_i32 = arith.constant 0 : i32
    %c0_i32_0 = arith.constant 0 : i32
    %c0_i32_1 = arith.constant 0 : i32
    %c0_i32_2 = arith.constant 0 : i32
    return %c0_i32, %c0_i32_0, %c0_i32_1 : i32, i32, i32
  }
  func.func @transform_4(%arg0: i32) -> (i32, i32) {
    %c0_i32 = arith.constant 0 : i32
    %c0_i32_0 = arith.constant 0 : i32
    %c0_i32_1 = arith.constant 0 : i32
    return %c0_i32, %c0_i32_0 : i32, i32
  }
  func.func @transform_5(%arg0: i32) -> (i32, i32) {
    %c0_i32 = arith.constant 0 : i32
    %c0_i32_0 = arith.constant 0 : i32
    %c0_i32_1 = arith.constant 0 : i32
    return %c0_i32, %c0_i32_0 : i32, i32
  }
  func.func @transform_6(%arg0: i32) -> (i32, i32, i32) {
    %c0_i32 = arith.constant 0 : i32
    %c0_i32_0 = arith.constant 0 : i32
    %c0_i32_1 = arith.constant 0 : i32
    %c0_i32_2 = arith.constant 0 : i32
    return %c0_i32, %c0_i32_0, %c0_i32_1 : i32, i32, i32
  }
  func.func @transform_7(%arg0: i32) -> (i32, i32) {
    %c0_i32 = arith.constant 0 : i32
    %c0_i32_0 = arith.constant 0 : i32
    %c0_i32_1 = arith.constant 0 : i32
    return %c0_i32, %c0_i32_0 : i32, i32
  }
  func.func @transform_8(%arg0: i32) -> (i32, i32, i32, i32) {
    %c0_i32 = arith.constant 0 : i32
    %c0_i32_0 = arith.constant 0 : i32
    %c0_i32_1 = arith.constant 0 : i32
    %c0_i32_2 = arith.constant 0 : i32
    return %arg0, %c0_i32, %c0_i32_0, %c0_i32_1 : i32, i32, i32, i32
  }
}

</mosaic_0001>

<bundles_post_ra>
// kernel: tpu_custom_call.1
= control target key start
LH: loop header
LB: loop body
LE: loop exit
PB: predicated region body
PF: predicated region fallthrough
CT: control target
= control target key end

     0   :  { %13 = vsyncpa [#allocation5], 0  ;;  %s19469_s0 = inlined_call_operand.hbm [shape: f32[2,16,16,128], index: 0, kind: input, shape index: {}]   ;;  %s19470_s1 = inlined_call_operand.hbm [shape: f32[1,128], index: 1, kind: input, shape index: {}]   ;;  %s19471_s2 = inlined_call_operand.hbm [shape: f32[1,128], index: 2, kind: input, shape index: {}]   ;;  %s19472_s3 = inlined_call_operand.hbm [shape: bf16[3,384,128], index: 3, kind: input, shape index: {}]   ;;  %s19473_s4 = inlined_call_operand.hbm [shape: f32[1,128], index: 4, kind: input, shape index: {}]   ;;  %s19474_s5 = inlined_call_operand.hbm [shape: f32[1,128], index: 5, kind: input, shape index: {}]   ;;  %s19475_s6 = inlined_call_operand.hbm [shape: bf16[3,384,128], index: 6, kind: input, shape index: {}]   ;;  %s19476_s7 = inlined_call_operand.hbm [shape: bf16[128,128], index: 7, kind: input, shape index: {}]   ;;  %s19477_s8 = inlined_call_operand.hbm [shape: f32[2,8,8,128], index: 8, kind: output, shape index: {}]  }
   0x1   :  { %15 = vsyncpa [#allocation5 + $0x1], 0 }
   0x2   :  { %16 = vsyncpa [#allocation8], 0 }
   0x3   :  { %17 = vsyncpa [#allocation11], 0 }
   0x4   :  { %18 = vsyncpa [#allocation14], 0 }
   0x5   :  { %19 = vsyncpa [#allocation17], 0 }
   0x6   :  { %20 = vsyncpa [#allocation6], 0 }
   0x7   :  { %22 = vsyncpa [#allocation6 + $0x1], 0  ;;  %s15049_s27 = smov 0   ;;  %s15051_s28 = smov 0  }
   0x8   :  { %s15053_s29 = smov 0   ;;  %s15055_s30 = smov 0  }
   0x9 LB: > { %s14987_s9 = smov [#allocation7]   ;;  %s15070_s11 = sadd.s32 4294967295, %s14985_s30   ;;  %s14985_s30 = sphi %s15055_s30, %s19747_s30   ;;  %s14981_s29 = sphi %s15053_s29, %s19746_s29   ;;  %s14977_s28 = sphi %s15051_s28, %s19745_s28   ;;  %s14973_s27 = sphi %s15049_s27, %s19744_s27  }
   0xa   : > { %s245_s10 = sshll.u32 %s14987_s9, 4  ;;  %p13159_p0 = scmp.ge.s32.totalorder %s14985_s30, 1  ;;  %s15075_s10 = int_to_ptr.vmem [resolvable:$true] %s245_s10 }
   0xb   : > { %p19480_p1 = scmp.eq.s32.totalorder %s15070_s11, 0  ;;  %p232_p2 = scmp.lt.s32.totalorder %s14985_s30, 3 }
   0xc   : > { %s14988_s13 = smov [#allocation10]   ;;  %s14989_s16 = smov [#allocation13]  }
   0xd   : > { %p15077_p3 = pnand %p13159_p0, %p232_p2  ;;  %s266_s14 = sshll.u32 %s14988_s13, 4  ;;  %s15084_s14 = int_to_ptr.vmem [resolvable:$true] %s266_s14 }
   0xe   : > { %s291_s17 = sshll.u32 %s14989_s16, 4  ;;  %s14677_s20 = scalar_lea.hbm %s19470_s1, 16  ;;  %s15092_s17 = int_to_ptr.vmem [resolvable:$true] %s291_s17 }
   0xf   : > { %s19566_s12 = scalar_select %p15077_p3, 1, 0 }
  0x10   : > { %p14406_p5 = pneg %p15077_p3  ;;  %p14678_p7 = scmp.ne.s32.totalorder %s19470_s1, %s14677_s20 }
  0x11   : > { %p14684_p11 = scmp.lt.u32.totalorder %s14677_s20, %s19470_s1 }
  0x12   : > { %p15088_p6 = pnand %p14406_p5, %p19480_p1 }
  0x14   : > { %p15102_p8 = pneg %p15088_p6 }
  0x16   : > { %p14680_p9 = pnand %p15102_p8, %p14678_p7 }
  0x18   : > { %p14681_p10 = pneg %p14680_p9 }
  0x1a   : > { %p14686_p12 = pnand %p14684_p11, %p14681_p10 }
  0x1c   : > { %14689 = shalt.err (!%p14686_p12)
}
  0x1d   : > { %s14690_s26 = scalar_lea.vmem %s15075_s10, 16  ;;  %s14697_s9 = scalar_lea.vmem %s15075_s10, 32 }
  0x1e   : > { %p14691_p13 = scmp.ne.s32.totalorder %s15075_s10, %s14690_s26  ;;  %p14698_p5 = scmp.lt.s32.totalorder %s15075_s10, %s15075_s10 }
  0x1f   : > { %p14699_p7 = scmp.lt.s32.totalorder %s14697_s9, %s14690_s26 }
  0x20   : > { %p14693_p0 = pnand %p14691_p13, %p15102_p8 }
  0x21   : > { %p14700_p9 = por %p14699_p7, %p14698_p5 }
  0x22   : > { %p14694_p2 = pneg %p14693_p0 }
  0x24   : > { %p14701_p4 = pnand %p14700_p9, %p14694_p2 }
  0x26   : > { %14704 = shalt.err (!%p14701_p4)
}
  0x27   : > { %14409 = dma.hbm_to_vmem [thread:$0]  (!%p15088_p6), %s19470_s1, 16, %s15075_s10, [#allocation8]  }
  0x28   : > { %s14705_s20 = scalar_lea.hbm %s19472_s3, 9216 }
  0x29   : > { %p14706_p10 = scmp.ne.s32.totalorder %s19472_s3, %s14705_s20  ;;  %p14712_p4 = scmp.lt.u32.totalorder %s14705_s20, %s19472_s3 }
  0x2b   : > { %p14708_p11 = pnand %p14706_p10, %p15102_p8 }
  0x2d   : > { %p14709_p12 = pneg %p14708_p11 }
  0x2f   : > { %p14714_p13 = pnand %p14712_p4, %p14709_p12 }
  0x31   : > { %14717 = shalt.err (!%p14714_p13)
}
  0x32   : > { %s14718_s10 = scalar_lea.vmem %s15084_s14, 9216  ;;  %p14726_p7 = scmp.lt.s32.totalorder %s15084_s14, %s15084_s14 }
  0x33   : > { %p14719_p0 = scmp.ne.s32.totalorder %s15084_s14, %s14718_s10  ;;  %p14727_p9 = scmp.lt.s32.totalorder %s14718_s10, %s14718_s10 }
  0x35   : > { %p14721_p2 = pnand %p14719_p0, %p15102_p8  ;;  %p14728_p10 = por %p14727_p9, %p14726_p7 }
  0x37   : > { %p14722_p5 = pneg %p14721_p2 }
  0x39   : > { %p14729_p11 = pnand %p14728_p10, %p14722_p5 }
  0x3b   : > { %14732 = shalt.err (!%p14729_p11)
}
  0x3c   : > { %s19478_s26 = smov 64   ;;  %s14991_s9 = smov 4  }
  0x3d   : > { %14415 = dma.hbm_to_vmem [thread:$0]  (!%p15088_p6), %s19472_s3, 9216, %s15084_s14, [#allocation11], %s19478_s26, %s19478_s26, %s14991_s9  }
  0x3e   : > { %s14733_s20 = scalar_lea.hbm %s19474_s5, 16 }
  0x3f   : > { %p14734_p12 = scmp.ne.s32.totalorder %s19474_s5, %s14733_s20  ;;  %p14740_p0 = scmp.lt.u32.totalorder %s14733_s20, %s19474_s5 }
  0x41   : > { %p14736_p4 = pnand %p14734_p12, %p15102_p8 }
  0x43   : > { %p14737_p13 = pneg %p14736_p4 }
  0x45   : > { %p14742_p2 = pnand %p14740_p0, %p14737_p13 }
  0x47   : > { %14745 = shalt.err (!%p14742_p2)
}
  0x48   : > { %s14746_s14 = scalar_lea.vmem %s15092_s17, 16  ;;  %s14753_s10 = scalar_lea.vmem %s15092_s17, 32 }
  0x49   : > { %p14747_p5 = scmp.ne.s32.totalorder %s15092_s17, %s14746_s14  ;;  %p14754_p10 = scmp.lt.s32.totalorder %s15092_s17, %s15092_s17 }
  0x4a   : > { %p14755_p11 = scmp.lt.s32.totalorder %s14753_s10, %s14746_s14 }
  0x4b   : > { %p14749_p7 = pnand %p14747_p5, %p15102_p8 }
  0x4c   : > { %p14756_p12 = por %p14755_p11, %p14754_p10 }
  0x4d   : > { %p14750_p9 = pneg %p14749_p7 }
  0x4f   : > { %p14757_p4 = pnand %p14756_p12, %p14750_p9 }
  0x51   : > { %14760 = shalt.err (!%p14757_p4)
}
  0x52   : > { %14421 = dma.hbm_to_vmem [thread:$0]  (!%p15088_p6), %s19474_s5, 16, %s15092_s17, [#allocation14]  }
  0x53   : > { %s14992_s18 = smov [#allocation9]   ;;  %s14993_s20 = smov [#allocation12]  }
  0x54   : > { %s256_s19 = sshll.u32 %s14992_s18, 4  ;;  %s280_s21 = sshll.u32 %s14993_s20, 4  ;;  %s257_s19 = int_to_ptr.vmem [resolvable:$true] %s256_s19  ;;  %s281_s21 = int_to_ptr.vmem [resolvable:$true] %s280_s21 }
  0x55   : > { %s14761_s25 = scalar_lea.hbm %s19471_s2, 16 }
  0x56   : > { %p14762_p13 = scmp.ne.s32.totalorder %s19471_s2, %s14761_s25  ;;  %p14768_p5 = scmp.lt.u32.totalorder %s14761_s25, %s19471_s2 }
  0x58   : > { %p14764_p0 = pnand %p14762_p13, %p15102_p8 }
  0x5a   : > { %p14765_p2 = pneg %p14764_p0 }
  0x5c   : > { %p14770_p7 = pnand %p14768_p5, %p14765_p2 }
  0x5e   : > { %14773 = shalt.err (!%p14770_p7)
}
  0x5f   : > { %s14774_s17 = scalar_lea.vmem %s257_s19, 16  ;;  %s14781_s16 = scalar_lea.vmem %s257_s19, 32 }
  0x60   : > { %p14775_p9 = scmp.ne.s32.totalorder %s257_s19, %s14774_s17  ;;  %p14782_p12 = scmp.lt.s32.totalorder %s257_s19, %s257_s19 }
  0x61   : > { %p14783_p4 = scmp.lt.s32.totalorder %s14781_s16, %s14774_s17 }
  0x62   : > { %p14777_p10 = pnand %p14775_p9, %p15102_p8 }
  0x63   : > { %p14784_p1 = por %p14783_p4, %p14782_p12 }
  0x64   : > { %p14778_p11 = pneg %p14777_p10 }
  0x66   : > { %p14785_p3 = pnand %p14784_p1, %p14778_p11 }
  0x68   : > { %14788 = shalt.err (!%p14785_p3)
}
  0x69   : > { %14412 = dma.hbm_to_vmem [thread:$0]  (!%p15088_p6), %s19471_s2, 16, %s257_s19, [#allocation8]  }
  0x6a   : > { %s14789_s24 = scalar_lea.hbm %s19473_s4, 16 }
  0x6b   : > { %p14790_p13 = scmp.ne.s32.totalorder %s19473_s4, %s14789_s24  ;;  %p14796_p3 = scmp.lt.u32.totalorder %s14789_s24, %s19473_s4 }
  0x6d   : > { %p14792_p0 = pnand %p14790_p13, %p15102_p8 }
  0x6f   : > { %p14793_p1 = pneg %p14792_p0 }
  0x71   : > { %p14798_p2 = pnand %p14796_p3, %p14793_p1 }
  0x73   : > { %14801 = shalt.err (!%p14798_p2)
}
  0x74   : > { %s14802_s17 = scalar_lea.vmem %s281_s21, 16  ;;  %s14809_s19 = scalar_lea.vmem %s281_s21, 32 }
  0x75   : > { %p14803_p5 = scmp.ne.s32.totalorder %s281_s21, %s14802_s17  ;;  %p14810_p10 = scmp.lt.s32.totalorder %s281_s21, %s281_s21 }
  0x76   : > { %p14811_p11 = scmp.lt.s32.totalorder %s14809_s19, %s14802_s17 }
  0x77   : > { %p14805_p7 = pnand %p14803_p5, %p15102_p8 }
  0x78   : > { %p14812_p12 = por %p14811_p11, %p14810_p10 }
  0x79   : > { %p14806_p9 = pneg %p14805_p7 }
  0x7b   : > { %p14813_p4 = pnand %p14812_p12, %p14806_p9 }
  0x7d   : > { %14816 = shalt.err (!%p14813_p4)
}
  0x7e   : > { %14418 = dma.hbm_to_vmem [thread:$0]  (!%p15088_p6), %s19473_s4, 16, %s281_s21, [#allocation11]  }
  0x7f   : > { %s14994_s20 = smov [#allocation15]   ;;  %s14995_s22 = smov [#allocation16]  }
  0x80   : > { %s301_s26 = sshll.u32 %s14994_s20, 4  ;;  %s314_s24 = sshll.u32 %s14995_s22, 4  ;;  %s302_s26 = int_to_ptr.vmem [resolvable:$true] %s301_s26  ;;  %s315_s24 = int_to_ptr.vmem [resolvable:$true] %s314_s24 }
  0x81   : > { %s14817_s10 = scalar_lea.hbm %s19475_s6, 9216 }
  0x82   : > { %p14818_p13 = scmp.ne.s32.totalorder %s19475_s6, %s14817_s10  ;;  %p14824_p3 = scmp.lt.u32.totalorder %s14817_s10, %s19475_s6 }
  0x84   : > { %p14820_p0 = pnand %p14818_p13, %p15102_p8 }
  0x86   : > { %p14821_p1 = pneg %p14820_p0 }
  0x88   : > { %p14826_p2 = pnand %p14824_p3, %p14821_p1 }
  0x8a   : > { %14829 = shalt.err (!%p14826_p2)
}
  0x8b   : > { %s14830_s21 = scalar_lea.vmem %s302_s26, 9216  ;;  %p14838_p10 = scmp.lt.s32.totalorder %s302_s26, %s302_s26 }
  0x8c   : > { %p14831_p5 = scmp.ne.s32.totalorder %s302_s26, %s14830_s21  ;;  %p14839_p11 = scmp.lt.s32.totalorder %s14830_s21, %s14830_s21 }
  0x8e   : > { %p14833_p7 = pnand %p14831_p5, %p15102_p8  ;;  %p14840_p12 = por %p14839_p11, %p14838_p10 }
  0x90   : > { %p14834_p9 = pneg %p14833_p7 }
  0x92   : > { %p14841_p4 = pnand %p14840_p12, %p14834_p9 }
  0x94   : > { %14844 = shalt.err (!%p14841_p4)
}
  0x95   : > { %s19569_s18 = smov 64   ;;  %s14845_s10 = scalar_lea.hbm %s19476_s7, 1024 }
  0x96   : > { %14424 = dma.hbm_to_vmem [thread:$0]  (!%p15088_p6), %s19475_s6, 9216, %s302_s26, [#allocation14], %s19569_s18, %s19569_s18, %s14991_s9  }
  0x97   : > { %p14846_p13 = scmp.ne.s32.totalorder %s19476_s7, %s14845_s10  ;;  %p14852_p3 = scmp.lt.u32.totalorder %s14845_s10, %s19476_s7 }
  0x99   : > { %p14848_p0 = pnand %p14846_p13, %p15102_p8 }
  0x9b   : > { %p14849_p1 = pneg %p14848_p0 }
  0x9d   : > { %p14854_p2 = pnand %p14852_p3, %p14849_p1 }
  0x9f   : > { %14857 = shalt.err (!%p14854_p2)
}
  0xa0   : > { %s14858_s21 = scalar_lea.vmem %s315_s24, 1024  ;;  %p14866_p10 = scmp.lt.s32.totalorder %s315_s24, %s315_s24 }
  0xa1   : > { %p14859_p5 = scmp.ne.s32.totalorder %s315_s24, %s14858_s21  ;;  %p14867_p11 = scmp.lt.s32.totalorder %s14858_s21, %s14858_s21 }
  0xa3   : > { %p14861_p7 = pnand %p14859_p5, %p15102_p8  ;;  %p14868_p12 = por %p14867_p11, %p14866_p10 }
  0xa5   : > { %p14862_p9 = pneg %p14861_p7 }
  0xa7   : > { %p14869_p4 = pnand %p14868_p12, %p14862_p9 }
  0xa9   : > { %14872 = shalt.err (!%p14869_p4)
}
  0xaa   : > { %14427 = dma.hbm_to_vmem [thread:$0]  (!%p15088_p6), %s19476_s7, 1024, %s315_s24, [#allocation17], %s19569_s18, %s19569_s18, %s14991_s9  }
  0xab   : > { %s13158_s15 = sadd.s32 4294967294, %s14985_s30   ;;  %s15254_s23 = sadd.s32 1, %s14985_s30  }
  0xac   : > { %s35_s22 = sadd.s32 1, %s14981_s29  ;;  %s32_s25 = ssub.s32 %s14985_s30, %s15254_s23 }
  0xad   : > { %p42_p8 = scmp.ne.s32.totalorder %s14981_s29, %s14977_s28  ;;  %p33_p13 = scmp.eq.s32.totalorder %s32_s25, 0 }
  0xae   : > { %p43_p0 = scmp.eq.s32.totalorder %s14985_s30, 0  ;;  %p48_p1 = scmp.ne.s32.totalorder %s14977_s28, %s14973_s27 }
  0xaf   : > { %p219_p3 = scmp.eq.s32.totalorder %s15070_s11, 1  ;;  %p19570_p5 = scmp.eq.s32.totalorder %s15070_s11, 0 }
  0xb0   : > { %s15266_s14 = scalar_select %p33_p13, %s14981_s29, %s35_s22  }
  0xb1   : > { %p44_p2 = por %p43_p0, %p42_p8  ;;  %p15270_p7 = por %p19570_p5, %p48_p1 }
  0xb2   : > { %p15274_p6 = por %p219_p3, %p42_p8  ;;  %p225_p9 = scmp.eq.s32.totalorder %s13158_s15, 1 }
  0xb3   : > { %p14443_p10 = scmp.lt.s32.totalorder %s14985_s30, 2  ;;  %s328_s24 = sand.u32 1, %s14981_s29  }
  0xb4   : > { %s19572_s9 = scalar_select %p15274_p6, 1, 0 }
  0xb5   : > { %p15280_p11 = por %p225_p9, %p48_p1  ;;  %s13168_s13 = sshll.u32 %s328_s24, 8 }
  0xb6   : > { %s13736_s17 = sshll.u32 %s14985_s30, 12  ;;  %s332_s26 = scalar_lea.vmem [#allocation4], %s13168_s13 }
  0xb7   : > { %s19573_s18 = scalar_select %p15280_p11, 1, 0 }
  0xb8   : > { %s15288_s21 = scalar_lea.hbm %s19469_s0, %s13736_s17  ;;  %s339_s20 = sshll.u32 %s332_s26, 4  ;;  %s15294_s20 = int_to_ptr.vmem [resolvable:$true] %s339_s20 }
  0xb9   : > { %p15290_p12 = pnand %p14443_p10, %p44_p2  ;;  %s15296_s22 = scalar_lea.sflag [#allocation5], %s328_s24 }
  0xba   : > { %s14873_s25 = scalar_lea.hbm %s15288_s21, 4096  ;;  %s14878_s19 = scalar_lea.hbm %s19469_s0, 8192 }
  0xbb   : > { %p14874_p4 = scmp.ne.s32.totalorder %s15288_s21, %s14873_s25  ;;  %p14875_p8 = pneg %p15290_p12 }
  0xbc   : > { %p14879_p1 = scmp.lt.u32.totalorder %s15288_s21, %s19469_s0  ;;  %p14880_p3 = scmp.lt.u32.totalorder %s14878_s19, %s14873_s25 }
  0xbd   : > { %p14876_p13 = pnand %p14875_p8, %p14874_p4  ;;  %p14882_p5 = scmp.lt.u32.totalorder %s14873_s25, %s15288_s21 }
  0xbe   : > { %p14881_p2 = por %p14880_p3, %p14879_p1 }
  0xbf   : > { %p14877_p0 = pneg %p14876_p13 }
  0xc0   : > { %p14883_p9 = por %p14882_p5, %p14881_p2 }
  0xc2   : > { %p14884_p10 = pnand %p14883_p9, %p14877_p0 }
  0xc4   : > { %14887 = shalt.err (!%p14884_p10)
}
  0xc5   : > { %s14888_s24 = scalar_lea.vmem %s15294_s20, 4096  ;;  %s14996_s13 = smov [#allocation4]  }
  0xc6   : > { %p14889_p4 = scmp.ne.s32.totalorder %s15294_s20, %s14888_s24  ;;  %s14893_s17 = sshll.u32 %s14996_s13, 4  ;;  %s14894_s17 = int_to_ptr.vmem [resolvable:$false] %s14893_s17 }
  0xc7   : > { %s14895_s16 = scalar_lea.vmem %s14894_s17, 8192  ;;  %p14896_p6 = scmp.lt.s32.totalorder %s15294_s20, %s14894_s17 }
  0xc8   : > { %p14891_p13 = pnand %p14889_p4, %p14875_p8  ;;  %p14897_p1 = scmp.lt.s32.totalorder %s14895_s16, %s14888_s24 }
  0xca   : > { %p14892_p11 = pneg %p14891_p13  ;;  %p14898_p3 = por %p14897_p1, %p14896_p6 }
  0xcc   : > { %p14899_p2 = pnand %p14898_p3, %p14892_p11 }
  0xce   : > { %14902 = shalt.err (!%p14899_p2)
}
  0xcf   : > { %s14997_s25 = smov 128   ;;  %s14998_s19 = smov 8  }
  0xd0   : > { %14431 = dma.hbm_to_vmem [thread:$0]  (!%p15290_p12), %s15288_s21, 4096, %s15294_s20, %s15296_s22, %s14997_s25, %s14997_s25, %s14998_s19  }
  0xd1   : > { %p19575_p8 = scmp.ne.s32.totalorder %s19566_s12, 0 }
  0xd3   : > { %351 = sbr.rel (%p19575_p8) target bundleno = 1498 (0x5da), region = 52 }
  0xda   : > { %s15327_s26 = sand.u32 1, %s14977_s28  }
  0xdb   : > { %s13172_s24 = sshll.u32 %s15327_s26, 8  ;;  %s354_s13 = scalar_lea.sflag [#allocation5], %s15327_s26 }
  0xdc   : > { %s15331_s17 = scalar_lea.vmem [#allocation4], %s13172_s24 }
  0xdd   : > { %14948 = dma.done.wait (%p15270_p7), %s354_s13, 4096  }
  0xde   : > { %14950 = vsyncadd (%p15270_p7), %s354_s13, 4294963200  ;;  %p19576_p6 = scmp.eq.s32.totalorder %s15070_s11, 0 }
  0xe0   : > { %14952 = dma.done.wait (%p19576_p6), [#allocation8], 32   ;;  %p19577_p11 = pmov %p19576_p6 }
  0xe1   : > { %p19578_p12 = pmov %p19576_p6 }
  0xe2   : > { %14954 = vsyncadd (%p19577_p11), [#allocation8], 4294967264 }
  0xe3   : > { %14956 = dma.done.wait (%p19578_p12), [#allocation11], 9232   ;;  %p19579_p0 = pmov %p19576_p6 }
  0xe5   : > { %14958 = vsyncadd (%p19579_p0), [#allocation11], 4294958064  ;;  %p19580_p5 = pmov %p19579_p0 }
  0xe6   : > { %p19581_p9 = pmov %p19579_p0 }
  0xe7   : > { %14960 = dma.done.wait (%p19580_p5), [#allocation14], 9232  }
  0xe8   : > { %14962 = vsyncadd (%p19581_p9), [#allocation14], 4294958064  ;;  %p19582_p7 = pmov %p19579_p0 }
  0xe9   : > { %p19583_p10 = pmov %p19579_p0 }
  0xea   : > { %14964 = dma.done.wait (%p19582_p7), [#allocation17], 1024  }
  0xeb   : > { %14966 = vsyncadd (%p19583_p10), [#allocation17], 4294966272  ;;  %v14999_v0 = vmov 0   ;;  %v14499_v1 = vld [vmem:[#allocation10 + $0x100] sm:$0xff]   ;;  %v14502_v4 = vld [vmem:[#allocation10 + $0x108] sm:$0xff]   ;;  %vm428_vm1 = vcmask 1043459   ;;  %v963_v22 = vlaneseq }
  0xec   : > { %419 = vst [vmem:[#allocation2] sm:$0xf] %v14999_v0  ;;  %420 = vst [vmem:[#allocation2 + $0x4] sm:$0xf] %v14999_v0  ;;  %v14500_v2 = vld [vmem:[#allocation10 + $0xc0] sm:$0xff]   ;;  %13778 = vmatprep.subr.bf16.mxu0 %v14499_v1  ;;  %v14503_v5 = vld [vmem:[#allocation10 + $0xc8] sm:$0xff]  }
  0xed   : > { %421 = vst [vmem:[#allocation2 + $0x8] sm:$0xf] %v14999_v0  ;;  %422 = vst [vmem:[#allocation2 + $0xc] sm:$0x1] %v14999_v0  ;;  %v14501_v3 = vld [vmem:[#allocation10 + $0x140] sm:$0xff]   ;;  %13779 = vmatpush3.bf16.msra.mxu0 %v14500_v2  ;;  %v14504_v6 = vld [vmem:[#allocation10 + $0x148] sm:$0xff]  }
  0xee   : > { %424 = vst [vmem:[#allocation2 + $0x110] sm:$0xf] %v14999_v0  ;;  %486 = vst [vmem:[#allocation2 + $0x1c] sm:$0x1] %v14999_v0  ;;  %14102 = vmatprep.subr.bf16.mxu1 %v14501_v3  ;;  %13780 = vmatprep.subr.bf16.mxu0 %v14502_v4  ;;  %v14505_v7 = vld [vmem:[#allocation10 + $0x110] sm:$0xff]   ;;  %v14508_v10 = vld [vmem:[#allocation10 + $0x118] sm:$0xff]  }
  0xef   : > { %487 = vst [vmem:[#allocation2 + $0x2c] sm:$0x1] %v14999_v0  ;;  %488 = vst [vmem:[#allocation2 + $0x3c] sm:$0x1] %v14999_v0  ;;  %14103 = vmatpush3.bf16.msra.mxu1 %v14501_v3  ;;  %v14506_v8 = vld [vmem:[#allocation10 + $0xd0] sm:$0xff]   ;;  %v14509_v11 = vld [vmem:[#allocation10 + $0xd8] sm:$0xff]  }
  0xf0   : > { %489 = vst [vmem:[#allocation2 + $0x4c] sm:$0x1] %v14999_v0  ;;  %490 = vst [vmem:[#allocation2 + $0x5c] sm:$0x1] %v14999_v0  ;;  %14104 = vmatprep.subr.bf16.mxu1 %v14504_v6  ;;  %v14507_v9 = vld [vmem:[#allocation10 + $0x150] sm:$0xff]   ;;  %v14510_v12 = vld [vmem:[#allocation10 + $0x158] sm:$0xff]  }
  0xf1   : > { %491 = vst [vmem:[#allocation2 + $0x6c] sm:$0x1] %v14999_v0  ;;  %492 = vst [vmem:[#allocation2 + $0x7c] sm:$0x1] %v14999_v0  ;;  %13781 = vmatpush3.bf16.msra.mxu0 %v14503_v5  ;;  %v14511_v13 = vld [vmem:[#allocation10 + $0x120] sm:$0xff]   ;;  %v14514_v16 = vld [vmem:[#allocation10 + $0x128] sm:$0xff]  }
  0xf2   : > { %493 = vst [vmem:[#allocation2 + $0x8c] sm:$0x1] %v14999_v0  ;;  %494 = vst [vmem:[#allocation2 + $0x9c] sm:$0x1] %v14999_v0  ;;  %13782 = vmatprep.subr.bf16.mxu0 %v14505_v7  ;;  %vm429_vm0 = vsmask.f32 7950 }
  0xf3   : > { %495 = vst [vmem:[#allocation2 + $0xac] sm:$0x1] %v14999_v0  ;;  %496 = vst [vmem:[#allocation2 + $0xbc] sm:$0x1] %v14999_v0  ;;  %14105 = vmatpush3.bf16.msra.mxu1 %v14504_v6  ;;  %v14513_v14 = vld [vmem:[#allocation10 + $0x160] sm:$0xff]   ;;  %v19584_v17 = vmov 0 }
  0xf4   : > { %497 = vst [vmem:[#allocation2 + $0xcc] sm:$0x1] %v14999_v0  ;;  %498 = vst [vmem:[#allocation2 + $0xdc] sm:$0x1] %v14999_v0  ;;  %14106 = vmatprep.subr.bf16.mxu1 %v14507_v9  ;;  %v14512_v15 = vld [vmem:[#allocation10 + $0xe0] sm:$0xff]   ;;  %v14516_v18 = vld [vmem:[#allocation10 + $0x168] sm:$0xff]  }
  0xf5   : > { %499 = vst [vmem:[#allocation2 + $0xec] sm:$0x1] %v14999_v0  ;;  %500 = vst [vmem:[#allocation2 + $0xfc] sm:$0x1] %v14999_v0  ;;  %13783 = vmatpush3.bf16.msra.mxu0 %v14506_v8  ;;  %v14515_v19 = vld [vmem:[#allocation10 + $0xe8] sm:$0xff]   ;;  %v14517_v20 = vld [vmem:[#allocation10 + $0x130] sm:$0xff]  }
  0xf6   : > { %501 = vst [vmem:[#allocation2 + $0x10c] sm:$0x1] %v14999_v0  ;;  %503 = vst [vmem:[#allocation3] sm:$0xf] %v14999_v0  ;;  %13784 = vmatprep.subr.bf16.mxu0 %v14508_v10  ;;  %v14518_v21 = vld [vmem:[#allocation10 + $0xf0] sm:$0xff]   ;;  %v14520_v26 = vld [vmem:[#allocation10 + $0x138] sm:$0xff]  }
  0xf7   : > { %504 = vst [vmem:[#allocation3 + $0x4] sm:$0xf] %v14999_v0  ;;  %505 = vst [vmem:[#allocation3 + $0x8] sm:$0x1] %v14999_v0  ;;  %14107 = vmatpush3.bf16.msra.mxu1 %v14507_v9  ;;  %v14519_v23 = vld [vmem:[#allocation10 + $0x170] sm:$0xff]   ;;  %v556_v29 = vld [vmem:[%s15331_s17] sm:$0xff] }
  0xf8   : > { %507 = vst [vmem:[#allocation3 + $0x6c] sm:$0xf] %v14999_v0  ;;  %508 = vst [vmem:[#allocation3 + $0x70] sm:$0xf] %v14999_v0  ;;  %14108 = vmatprep.subr.bf16.mxu1 %v14510_v12  ;;  %v15000_v24 = vmov 1966171168  }
  0xf9   : > { %509 = vst [vmem:[#allocation3 + $0x74] sm:$0x1] %v14999_v0  ;;  %541 = vst [vmem:[#allocation3 + $0x14] sm:$0x1] %v14999_v0  ;;  %13785 = vmatpush3.bf16.msra.mxu0 %v14509_v11  ;;  %v961_v25 = vunpack.c.l.s4 %v15000_v24  ;;  %v15358_v27 = vld [vmem:[#allocation7] ss:$0 sm:$0xff] }
  0xfa   : > { %542 = vst [vmem:[#allocation3 + $0x20] sm:$0x1] %v14999_v0  ;;  %543 = vst [vmem:[#allocation3 + $0x2c] sm:$0x1] %v14999_v0  ;;  %13786 = vmatprep.subr.bf16.mxu0 %v14511_v13  ;;  %v15360_v28 = vld [vmem:[#allocation9] ss:$0 sm:$0xff]  ;;  %v594_v34 = vmul.f32 %v15358_v27, %v556_v29 }
  0xfb   : > { %544 = vst [vmem:[#allocation3 + $0x38] sm:$0x1] %v14999_v0  ;;  %545 = vst [vmem:[#allocation3 + $0x44] sm:$0x1] %v14999_v0  ;;  %14109 = vmatpush3.bf16.msra.mxu1 %v14510_v12  ;;  %v14521_v30 = vld [vmem:[#allocation10 + $0xf8] sm:$0xff]   ;;  %v557_v31 = vld [vmem:[%s15331_s17 + $0x8] sm:$0xff]  ;;  %v962_v40 = vunpack.c.0.s8 %v961_v25 }
  0xfc   : > { %546 = vst [vmem:[#allocation3 + $0x50] sm:$0x1] %v14999_v0  ;;  %547 = vst [vmem:[#allocation3 + $0x5c] sm:$0x1] %v14999_v0  ;;  %14110 = vmatprep.subr.bf16.mxu1 %v14513_v14  ;;  %v560_v32 = vld [vmem:[%s15331_s17 + $0x20] sm:$0xff]  ;;  %v561_v33 = vld [vmem:[%s15331_s17 + $0x28] sm:$0xff]  ;;  %v595_v37 = vmul.f32 %v15358_v27, %v557_v31  ;;  %v632_v41 = vadd.f32 %v15360_v28, %v594_v34 }
  0xfd   : > { %548 = vst [vmem:[#allocation3 + $0x68] sm:$0x1] %v14999_v0  ;;  %485 = vst [vmem:[#allocation2 + $0xc] sm:$0x1] %v14999_v0  ;;  %13787 = vmatpush3.bf16.msra.mxu0 %v14512_v15  ;;  %v964_v35 = vshrl.u32 %v963_v22, 7  ;;  %v14522_v36 = vld [vmem:[#allocation10 + $0x178] sm:$0xff]   ;;  %v598_v38 = vmul.f32 %v15358_v27, %v560_v32  ;;  %v599_v39 = vmul.f32 %v15358_v27, %v561_v33 }
  0xfe   : > { %540 = vst [vmem:[#allocation3 + $0x8] sm:$0x1] %v14999_v0  ;;  %549 = vst [vmem:[#allocation3 + $0x74] sm:$0x1] %v14999_v0  ;;  %13788 = vmatprep.subr.bf16.mxu0 %v14514_v16  ;;  %v434_v42 = vld [vmem:[#allocation2 + $0x10] sm:$0x8]  ;;  %v633_v45 = vadd.f32 %v15360_v28, %v595_v37 }
  0xff   : > { %vm15354_vm2 = vmand %vm428_vm1, %vm429_vm0  ;;  %14111 = vmatpush3.bf16.msra.mxu1 %v14513_v14  ;;  %v440_v43 = vld [vmem:[#allocation2 + $0x30] sm:$0x8]  ;;  %v636_v46 = vadd.f32 %v15360_v28, %v598_v38  ;;  %v637_v47 = vadd.f32 %v15360_v28, %v599_v39  ;;  %v14523_v48 = vld [vmem:[#allocation10 + $0x40] sm:$0xff]   ;;  %v664_v50 = vmax.f32 %v632_v41, 0.0  ;;  %v15380_v56 = vsub.s32 %v962_v40, %v964_v35  ;;  %s13180_s12 = sshll.u32 %s15327_s26, 6  ;;  %s13777_s20 = sshll.u32 %s15070_s11, 10 }
 0x100   : > { %v19585_v17 = vsel %vm15354_vm2, 4294967295, %v19584_v17  ;;  %14112 = vmatprep.subr.bf16.mxu1 %v14516_v18  ;;  %v482_v44 = vld [vmem:[#allocation2 + $0x110] sm:$0x8]  ;;  %v435_v49 = vsel %vm15354_vm2, 0, %v434_v42  ;;  %v441_v51 = vsel %vm15354_vm2, 0, %v440_v43  ;;  %v665_v53 = vmax.f32 %v633_v45, 0.0  ;;  %s19425_s16 = scalar_lea.hbm %s19477_s8, %s13777_s20 }
 0x101   : > { %19586 = vst [vmem:[#allocation25_spill] sm:$0xff] %v19585_v17  ;;  %13789 = vmatpush3.bf16.msra.mxu0 %v14515_v19  ;;  %436 = vst [vmem:[#allocation2 + $0x10] sm:$0x8] %v435_v49  ;;  %v483_v52 = vsel %vm15354_vm2, 0, %v482_v44  ;;  %v668_v54 = vmax.f32 %v636_v46, 0.0  ;;  %v669_v55 = vmax.f32 %v637_v47, 0.0  ;;  %v13737_v58 = vpack.c.bf16 %v664_v50, %v664_v50 }
 0x102   : > { %13790 = vmatprep.subr.bf16.mxu0 %v14517_v20  ;;  %442 = vst [vmem:[#allocation2 + $0x30] sm:$0x8] %v441_v51  ;;  %484 = vst [vmem:[#allocation2 + $0x110] sm:$0x8] %v483_v52  ;;  %v14525_v57 = vld [vmem:[#allocation10 + $0x80] sm:$0xff]   ;;  %v13738_v61 = vpack.c.bf16 %v665_v53, %v665_v53  ;;  %vm3144_vm13 = vcmask 1041409  }
 0x103   : > { %14113 = vmatpush3.bf16.msra.mxu1 %v14516_v18  ;;  %vm1464_vm3 = vsmask.f32 256  ;;  %vm1465_vm4 = vsmask.f32 1284  ;;  %v564_v60 = vld [vmem:[%s15331_s17 + $0x40] sm:$0xff]  ;;  %v13741_v62 = vpack.c.bf16 %v668_v54, %v668_v54  ;;  %v13742_v63 = vpack.c.bf16 %v669_v55, %v669_v55  ;;  %v565_v2 = vld [vmem:[%s15331_s17 + $0x48] sm:$0xff] }
 0x104   : > { %14114 = vmatprep.subr.bf16.mxu1 %v14519_v23  ;;  %v13407_v59 = vld.sshfl [vmem:[#allocation2 + $0x1c] sm:$0x1 pattern:$0x75316420]  ;;  %825 = vst [vmem:[#allocation2 + $0x14] sm:$0xf] %v13737_v58  ;;  %v602_v6 = vmul.f32 %v15358_v27, %v564_v60  ;;  %v603_v7 = vmul.f32 %v15358_v27, %v565_v2  ;;  %vm15420_vm8 = vmor %vm1464_vm3, %vm1465_vm4 }
 0x105   : > { %13791 = vmatpush3.bf16.msra.mxu0 %v14518_v21  ;;  %v13408_v0 = vld.sshfl [vmem:[#allocation2 + $0x3c] sm:$0x1 pattern:$0x75316420]  ;;  %v5691_v1 = vrot.slane %v13407_v59, %v15380_v56  ;;  %v569_v5 = vld [vmem:[%s15331_s17 + $0x68] sm:$0xff]  ;;  %vm3147_vm15 = vcmask 1042434  }
 0x106   : > { %13792 = vmatprep.subr.bf16.mxu0 %v14520_v26  ;;  %v5705_v3 = vrot.slane %v13408_v0, %v15380_v56  ;;  %v568_v4 = vld [vmem:[%s15331_s17 + $0x60] sm:$0xff]  ;;  %826 = vst [vmem:[#allocation2 + $0x18] sm:$0xf] %v13738_v61  ;;  %829 = vst [vmem:[#allocation2 + $0x34] sm:$0xf] %v13741_v62  ;;  %v607_v10 = vmul.f32 %v15358_v27, %v569_v5  ;;  %v640_v14 = vadd.f32 %v15360_v28, %v602_v6  ;;  %vm3153_vm0 = vcmask 1044484  }
 0x107   : > { %14115 = vmatpush3.bf16.msra.mxu1 %v14519_v23  ;;  %v13409_v8 = vld.sshfl [vmem:[#allocation2 + $0x5c] sm:$0x1 pattern:$0x75316420]  ;;  %830 = vst [vmem:[#allocation2 + $0x38] sm:$0xf] %v13742_v63  ;;  %v606_v9 = vmul.f32 %v15358_v27, %v568_v4  ;;  %v641_v15 = vadd.f32 %v15360_v28, %v603_v7 }
 0x108   : > { %14116 = vmatprep.subr.bf16.mxu1 %v14522_v36  ;;  %vm1467_vm5 = vsmask.f32 2312  ;;  %v13410_v11 = vld.sshfl [vmem:[#allocation2 + $0x7c] sm:$0x1 pattern:$0x75316420]  ;;  %v5719_v12 = vrot.slane %v13409_v8, %v15380_v56  ;;  %v645_v21 = vadd.f32 %v15360_v28, %v607_v10 }
 0x109   : > { %13793 = vmatpush3.bf16.msra.mxu0 %v14521_v30  ;;  %v15393_v13 = vshll.u32 %v5691_v1, 16  ;;  %v5733_v16 = vrot.slane %v13410_v11, %v15380_v56  ;;  %v13319_v18 = vld.sshfl [vmem:[#allocation2 + $0x10] sm:$0x33 pattern:$0x75316420]  ;;  %v15398_v19 = vshll.u32 %v5705_v3, 16  ;;  %v644_v20 = vadd.f32 %v15360_v28, %v606_v9  ;;  %vm1468_vm10 = vmor %vm15420_vm8, %vm1467_vm5 }
 0x10a   : > { %13830 = vmatprep.subr.bf16.mxu0 %v14523_v48  ;;  %v15402_v22 = vshll.u32 %v5719_v12, 16  ;;  %v13322_v23 = vld.sshfl [vmem:[#allocation2 + $0x30] sm:$0x33 pattern:$0x75316420]  ;;  %v4645_v24 = vcombine.high %v13319_v18, %v13319_v18  ;;  %v672_v25 = vmax.f32 %v640_v14, 0.0 }
 0x10b   : > { %14117 = vmatpush3.bf16.msra.mxu1 %v14522_v36  ;;  %vm1469_vm6 = vsmask.f32 3340  ;;  %v673_v26 = vmax.f32 %v641_v15, 0.0  ;;  %v4709_v27 = vcombine.high %v13322_v23, %v13322_v23  ;;  %v676_v29 = vmax.f32 %v644_v20, 0.0  ;;  %s417_s10 = scalar_lea.vmem [#allocation18], %s13180_s12  ;;  %s13005_s11 = scalar_lea.sflag [#allocation6], %s15327_s26 }
 0x10c   : > { %14126 = vmatprep.subr.bf16.mxu1 %v14525_v57  ;;  %v677_v30 = vmax.f32 %v645_v21, 0.0  ;;  %v15404_v31 = vshll.u32 %v5733_v16, 16  ;;  %v15407_v32 = vrot.slane %v4645_v24, %v15380_v56  ;;  %v13745_v33 = vpack.c.bf16 %v672_v25, %v672_v25  ;;  %v13320_v35 = vld.sshfl [vmem:[#allocation2 + $0x14] sm:$0x33 pattern:$0x75316420]  ;;  %vm1470_vm11 = vmor %vm1468_vm10, %vm1469_vm6 }
 0x10d   : > { %v13746_v34 = vpack.c.bf16 %v673_v26, %v673_v26  ;;  %vm1471_vm7 = vsmask.f32 4368  ;;  %v15410_v28 = vrot.slane %v4709_v27, %v15380_v56  ;;  %v13749_v36 = vpack.c.bf16 %v676_v29, %v676_v29  ;;  %v13321_v38 = vld.sshfl [vmem:[#allocation2 + $0x18] sm:$0x33 pattern:$0x75316420] }
 0x10e   : > { %v13750_v37 = vpack.c.bf16 %v677_v30, %v677_v30  ;;  %v4661_v39 = vcombine.high %v13320_v35, %v13320_v35  ;;  %v15413_v40 = vrot.slane %v13320_v35, %v15380_v56  ;;  %833 = vst [vmem:[#allocation2 + $0x54] sm:$0xf] %v13745_v33  ;;  %v13323_v41 = vld.sshfl [vmem:[#allocation2 + $0x34] sm:$0x33 pattern:$0x75316420]  ;;  %v4685_v42 = vcombine.high %v13321_v38, %v13321_v38  ;;  %vm15513_vm12 = vmor %vm1470_vm11, %vm1471_vm7 }
 0x10f   : > { %834 = vst [vmem:[#allocation2 + $0x58] sm:$0xf] %v13746_v34  ;;  %v15416_v43 = vrot.slane %v13321_v38, %v15380_v56  ;;  %v4653_v45 = vcombine.high %v15407_v32, %v15407_v32  ;;  %837 = vst [vmem:[#allocation2 + $0x74] sm:$0xf] %v13749_v36  ;;  %v4725_v50 = vcombine.high %v13323_v41, %v13323_v41  ;;  %vm1473_vm9 = vsmask.f32 5396 }
 0x110   : > { %838 = vst [vmem:[#allocation2 + $0x78] sm:$0xf] %v13750_v37  ;;  %v13324_v47 = vld.sshfl [vmem:[#allocation2 + $0x38] sm:$0x33 pattern:$0x75316420]  ;;  %v15429_v48 = vrot.slane %v4661_v39, %v15380_v56  ;;  %v15433_v49 = vcombine.high %v15413_v40, %v15413_v40  ;;  %v15436_v51 = vrot.slane %v13323_v41, %v15380_v56  ;;  %v15439_v52 = vrot.slane %v4685_v42, %v15380_v56  ;;  %vm15544_vm4 = vmor %vm15513_vm12, %vm1473_vm9 }
 0x111   : > { %v15443_v53 = vcombine.high %v15416_v43, %v15416_v43  ;;  %v4749_v54 = vcombine.high %v13324_v47, %v13324_v47  ;;  %v15446_v55 = vrot.slane %v13324_v47, %v15380_v56  ;;  %v15453_v58 = vrot.slane %v4725_v50, %v15380_v56  ;;  %vm18827_vm12 = vmor %vm1464_vm3, %vm1471_vm7  ;;  %s13018_s21 = sshll.u32 %s417_s10, 4  ;;  %p19741_p13 = scmp.ne.s32.totalorder %s19572_s9, 0  ;;  %s19420_s21 = int_to_ptr.vmem [resolvable:$true] %s13018_s21 }
 0x112   : > { %v15450_v57 = vcombine.high %v15429_v48, %v15429_v48  ;;  %v15457_v59 = vcombine.high %v15436_v51, %v15436_v51  ;;  %v5172_v60 = vshll.u32 %v15433_v49, 16  ;;  %v15465_v61 = vcombine.high %v15439_v52, %v15439_v52  ;;  %s14903_s25 = scalar_lea.vmem %s19420_s21, 1024  ;;  %s15001_s19 = smov [#allocation18]  }
 0x113   : > { %v15468_v62 = vrot.slane %v4749_v54, %v15380_v56  ;;  %v15472_v63 = vcombine.high %v15446_v55, %v15446_v55  ;;  %v15477_v1 = vcombine.high %v15453_v58, %v15453_v58  ;;  %v6932_v4 = vrot.slane %v15413_v40, %v15380_v56  ;;  %p14904_p4 = scmp.ne.s32.totalorder %s19420_s21, %s14903_s25  ;;  %s14907_s24 = sshll.u32 %s15001_s19, 4  ;;  %s14908_s24 = int_to_ptr.vmem [resolvable:$false] %s14907_s24 }
 0x114   : > { %v5180_v2 = vshll.u32 %v15450_v57, 16  ;;  %v6946_v8 = vrot.slane %v15429_v48, %v15380_v56  ;;  %v6960_v11 = vrot.slane %v15433_v49, %v15380_v56  ;;  %v6974_v12 = vrot.slane %v15450_v57, %v15380_v56  ;;  %s14909_s13 = scalar_lea.vmem %s14908_s24, 2048  ;;  %p14910_p2 = scmp.lt.s32.totalorder %s19420_s21, %s14908_s24 }
 0x115   : > { %v15485_v5 = vcombine.high %v15468_v62, %v15468_v62  ;;  %v15494_v10 = vrot.slane %v6932_v4, %v15380_v56  ;;  %v6988_v16 = vrot.slane %v15416_v43, %v15380_v56  ;;  %v7002_v18 = vrot.slane %v15439_v52, %v15380_v56  ;;  %p14905_p1 = pnand %p14904_p4, %p19741_p13  ;;  %p14911_p8 = scmp.lt.s32.totalorder %s14909_s13, %s14903_s25 }
 0x116   : > { %v6953_v15 = vrot.slane %v6946_v8, %v15380_v56  ;;  %v6967_v20 = vrot.slane %v6960_v11, %v15380_v56  ;;  %v6981_v21 = vrot.slane %v6974_v12, %v15380_v56  ;;  %v7016_v23 = vrot.slane %v15443_v53, %v15380_v56 }
 0x117   : > { %v7030_v24 = vrot.slane %v15465_v61, %v15380_v56  ;;  %v6995_v26 = vrot.slane %v6988_v16, %v15380_v56  ;;  %v7009_v27 = vrot.slane %v7002_v18, %v15380_v56  ;;  %v7044_v29 = vrot.slane %v15436_v51, %v15380_v56  ;;  %p14906_p3 = pneg %p14905_p1  ;;  %p14912_p6 = por %p14911_p8, %p14910_p2 }
 0x118   : > { %v7058_v30 = vrot.slane %v15453_v58, %v15380_v56  ;;  %vm1475_vm14 = vsmask.f32 6424  ;;  %v7023_v33 = vrot.slane %v7016_v23, %v15380_v56  ;;  %v7072_v35 = vrot.slane %v15457_v59, %v15380_v56 }
 0x119   : > { %v7037_v34 = vrot.slane %v7030_v24, %v15380_v56  ;;  %v7086_v36 = vrot.slane %v15477_v1, %v15380_v56  ;;  %v7051_v37 = vrot.slane %v7044_v29, %v15380_v56  ;;  %v7100_v39 = vrot.slane %v15446_v55, %v15380_v56  ;;  %vm1476_vm10 = vmor %vm15544_vm4, %vm1475_vm14  ;;  %p14913_p11 = pnand %p14912_p6, %p14906_p3 }
 0x11a   : > { %v7065_v38 = vrot.slane %v7058_v30, %v15380_v56  ;;  %v7114_v41 = vrot.slane %v15468_v62, %v15380_v56  ;;  %v7079_v42 = vrot.slane %v7072_v35, %v15380_v56  ;;  %v7128_v47 = vrot.slane %v15472_v63, %v15380_v56 }
 0x11b   : > { %v7093_v44 = vrot.slane %v7086_v36, %v15380_v56  ;;  %v7142_v50 = vrot.slane %v15485_v5, %v15380_v56  ;;  %vm1477_vm5 = vsmask.f32 7452  ;;  %vm3156_vm6 = vcmask 1045509  }
 0x11c   : > { %v7107_v4 = vrot.slane %v7100_v39, %v15380_v56  ;;  %v7121_v8 = vrot.slane %v7114_v41, %v15380_v56  ;;  %v7822_v11 = vunpack.c.l.b16 %v15494_v10  ;;  %v7823_v12 = vunpack.c.l.b16 %v6953_v15  ;;  %vm15567_vm11 = vmor %vm1476_vm10, %vm1477_vm5 }
 0x11d   : > { %vm3159_vm8 = vcmask 1046534   ;;  %v7135_v16 = vrot.slane %v7128_v47, %v15380_v56  ;;  %v7149_v18 = vrot.slane %v7142_v50, %v15380_v56  ;;  %v7824_v23 = vunpack.c.l.b16 %v6967_v20 }
 0x11e   : > { %v7825_v24 = vunpack.c.l.b16 %v6981_v21  ;;  %vm3162_vm9 = vcmask 1047559   ;;  %v7826_v25 = vunpack.c.l.b16 %v6995_v26  ;;  %v7827_v29 = vunpack.c.l.b16 %v7009_v27 }
 0x11f   : > { %v7828_v30 = vunpack.c.l.b16 %v7023_v33  ;;  %v7829_v35 = vunpack.c.l.b16 %v7037_v34  ;;  %v7830_v36 = vunpack.c.l.b16 %v7051_v37  ;;  %v7831_v14 = vunpack.c.l.b16 %v7065_v38 }
 0x120   : > { %v7832_v39 = vunpack.c.l.b16 %v7079_v42  ;;  %v7833_v7 = vunpack.c.l.b16 %v7093_v44  ;;  %v7834_v41 = vunpack.c.l.b16 %v7107_v4  ;;  %v7835_v9 = vunpack.c.l.b16 %v7121_v8 }
 0x121   : > { %v7836_v10 = vunpack.c.l.b16 %v7135_v16  ;;  %v7837_v15 = vunpack.c.l.b16 %v7149_v18  ;;  %v7886_v3 = vrot.slane %v7823_v12, 7  ;;  %v7888_v6 = vrot.slane %v7824_v23, 6 }
 0x122   : > { %v7890_v47 = vrot.slane %v7825_v24, 5  ;;  %v7892_v0 = vrot.slane %v7826_v25, 4  ;;  %v7894_v50 = vrot.slane %v7827_v29, 3  ;;  %v7896_v20 = vrot.slane %v7828_v30, 2 }
 0x123   : > { %v7898_v21 = vrot.slane %v7829_v35, 1  ;;  %v7900_v46 = vrot.slane %v7831_v14, 7  ;;  %v7887_v26 = vsel %vm3144_vm13, %v7886_v3, %v7822_v11  ;;  %v7902_v27 = vrot.slane %v7832_v39, 6 }
 0x124   : > { %v7904_v33 = vrot.slane %v7833_v7, 5  ;;  %v7906_v34 = vrot.slane %v7834_v41, 4  ;;  %v7889_v37 = vsel %vm3147_vm15, %v7888_v6, %v7887_v26  ;;  %v7908_v42 = vrot.slane %v7835_v9, 3 }
 0x125   : > { %v7901_v38 = vsel %vm3144_vm13, %v7900_v46, %v7830_v36  ;;  %v7910_v44 = vrot.slane %v7836_v10, 2  ;;  %v7891_v4 = vsel %vm428_vm1, %v7890_v47, %v7889_v37  ;;  %v7912_v14 = vrot.slane %v7837_v15, 1 }
 0x126   : > { %v7903_v8 = vsel %vm3147_vm15, %v7902_v27, %v7901_v38  ;;  %v5151_v3 = vshrl.u32 %v4653_v45, 16  ;;  %v7893_v7 = vsel %vm3153_vm0, %v7892_v0, %v7891_v4  ;;  %v5156_v46 = vshll.u32 %v15413_v40, 16 }
 0x127   : > { %v7905_v54 = vsel %vm428_vm1, %v7904_v33, %v7903_v8  ;;  %v5159_v9 = vshrl.u32 %v15413_v40, 16  ;;  %v7895_v11 = vsel %vm3156_vm6, %v7894_v50, %v7893_v7  ;;  %v5164_v32 = vshll.u32 %v15429_v48, 16 }
 0x128   : > { %v7907_v12 = vsel %vm3153_vm0, %v7906_v34, %v7905_v54  ;;  %v5167_v45 = vshrl.u32 %v15429_v48, 16  ;;  %v7897_v0 = vsel %vm3159_vm8, %v7896_v20, %v7895_v11  ;;  %v5158_v18 = vsel %vm15567_vm11, %v5151_v3, %v5156_v46 }
 0x129   : > { %v7909_v16 = vsel %vm3156_vm6, %v7908_v42, %v7907_v12  ;;  %v5175_v23 = vshrl.u32 %v15433_v49, 16  ;;  %v7899_v24 = vsel %vm3162_vm9, %v7898_v21, %v7897_v0  ;;  %v5166_v25 = vsel %vm15567_vm11, %v5159_v9, %v5164_v32 }
 0x12a   : > { %v7911_v40 = vsel %vm3159_vm8, %v7910_v44, %v7909_v16  ;;  %v5174_v48 = vsel %vm15567_vm11, %v5167_v45, %v5172_v60  ;;  %v5183_v35 = vshrl.u32 %v15450_v57, 16  ;;  %v5188_v36 = vshll.u32 %v15416_v43, 16 }
 0x12b   : > { %v7913_v29 = vsel %vm3162_vm9, %v7912_v14, %v7911_v40  ;;  %v5182_v30 = vsel %vm15567_vm11, %v5175_v23, %v5180_v2  ;;  %v5191_v41 = vshrl.u32 %v15416_v43, 16  ;;  %v5196_v10 = vshll.u32 %v15439_v52, 16 }
 0x12c   : > { %v8280_v39 = vpack.c.b16 %v7913_v29, %v7899_v24  ;;  %v5199_v49 = vshrl.u32 %v15439_v52, 16  ;;  %v5190_v60 = vsel %vm15567_vm11, %v5183_v35, %v5188_v36  ;;  %v5207_v15 = vshrl.u32 %v15443_v53, 16 }
 0x12d   : > { %v19595_v47 = vcombine.high %v15410_v28, %v15410_v28  ;;  %v5221_v57 = vshll.u32 %v15436_v51, 16  ;;  %v5198_v50 = vsel %vm15567_vm11, %v5191_v41, %v5196_v10  ;;  %v19596_v43 = vshll.u32 %v15443_v53, 16 }
 0x12e   : > { %8479 = vmatprep.mubr.bf16.mxu0 %v8280_v39  ;;  %v5224_v20 = vshrl.u32 %v15436_v51, 16  ;;  %v5229_v21 = vshll.u32 %v15453_v58, 16  ;;  %v19597_v26 = vshll.u32 %v15465_v61, 16  ;;  %v5232_v33 = vshrl.u32 %v15453_v58, 16 }
 0x12f   : > { %v5216_v2 = vshrl.u32 %v19595_v47, 16  ;;  %v5206_v52 = vsel %vm15567_vm11, %v5199_v49, %v19596_v43  ;;  %v5240_v34 = vshrl.u32 %v15457_v59, 16  ;;  %v5248_v37 = vshrl.u32 %v15477_v1, 16 }
 0x130   : > { %v5214_v28 = vsel %vm15567_vm11, %v5207_v15, %v19597_v26  ;;  %v5231_v53 = vsel %vm15567_vm11, %v5224_v20, %v5229_v21  ;;  %v5253_v51 = vshll.u32 %v15446_v55, 16  ;;  %v5256_v38 = vshrl.u32 %v15446_v55, 16 }
 0x131   : > { %v5223_v27 = vsel %vm15567_vm11, %v5216_v2, %v5221_v57  ;;  %v19598_v42 = vshll.u32 %v15457_v59, 16  ;;  %v19599_v4 = vshll.u32 %v15477_v1, 16  ;;  %v5261_v8 = vshll.u32 %v15468_v62, 16 }
 0x132   : > { %v5264_v14 = vshrl.u32 %v15468_v62, 16  ;;  %v5255_v3 = vsel %vm15567_vm11, %v5248_v37, %v5253_v51  ;;  %v5272_v7 = vshrl.u32 %v15472_v63, 16  ;;  %v5860_v55 = vrot.slane %v5158_v18, %v15380_v56 }
 0x133   : > { %v5239_v44 = vsel %vm15567_vm11, %v5232_v33, %v19598_v42  ;;  %v5247_v58 = vsel %vm15567_vm11, %v5240_v34, %v19599_v4  ;;  %v5874_v59 = vrot.slane %v5166_v25, %v15380_v56  ;;  %v5263_v54 = vsel %vm15567_vm11, %v5256_v38, %v5261_v8 }
 0x134   : > { %v19600_v1 = vshll.u32 %v15472_v63, 16  ;;  %v5888_v9 = vrot.slane %v5174_v48, %v15380_v56  ;;  %v5902_v62 = vrot.slane %v5182_v30, %v15380_v56  ;;  %v19601_v11 = vshll.u32 %v15485_v5, 16 }
 0x135   : > { %v5867_v32 = vrot.slane %v5860_v55, %v15380_v56  ;;  %v15657_v45 = vrot.slane %v5874_v59, %v15380_v56  ;;  %v5916_v0 = vrot.slane %v5190_v60, %v15380_v56  ;;  %v5930_v18 = vrot.slane %v5198_v50, %v15380_v56 }
 0x136   : > { %v5271_v46 = vsel %vm15567_vm11, %v5264_v14, %v19600_v1  ;;  %v5279_v12 = vsel %vm15567_vm11, %v5272_v7, %v19601_v11  ;;  %v15661_v63 = vrot.slane %v5888_v9, %v15380_v56  ;;  %v15664_v16 = vrot.slane %v5902_v62, %v15380_v56 }
 0x137   : > { %v5944_v23 = vrot.slane %v5206_v52, %v15380_v56  ;;  %v15669_v24 = vrot.slane %v5916_v0, %v15380_v56  ;;  %v5958_v40 = vrot.slane %v5214_v28, %v15380_v56  ;;  %v5972_v25 = vrot.slane %v5223_v27, %v15380_v56 }
 0x138   : > { %v5986_v48 = vrot.slane %v5231_v53, %v15380_v56  ;;  %v15675_v29 = vrot.slane %v5930_v18, %v15380_v56  ;;  %v6000_v35 = vrot.slane %v5239_v44, %v15380_v56  ;;  %v6014_v36 = vrot.slane %v5247_v58, %v15380_v56 }
 0x139   : > { %v15678_v30 = vrot.slane %v5944_v23, %v15380_v56  ;;  %v15683_v39 = vrot.slane %v5958_v40, %v15380_v56  ;;  %v5979_v41 = vrot.slane %v5972_v25, %v15380_v56  ;;  %v6028_v49 = vrot.slane %v5255_v3, %v15380_v56 }
 0x13a   : > { %v15687_v10 = vrot.slane %v5986_v48, %v15380_v56  ;;  %v15691_v60 = vrot.slane %v6000_v35, %v15380_v56  ;;  %v15694_v15 = vrot.slane %v6014_v36, %v15380_v56  ;;  %v6042_v47 = vrot.slane %v5263_v54, %v15380_v56 }
 0x13b   : > { %v6056_v2 = vrot.slane %v5271_v46, %v15380_v56  ;;  %v15699_v57 = vrot.slane %v6028_v49, %v15380_v56  ;;  %v6070_v50 = vrot.slane %v5279_v12, %v15380_v56  ;;  %v6750_v43 = vunpack.c.l.b16 %v5867_v32 }
 0x13c   : > { %v6751_v52 = vunpack.c.l.b16 %v15657_v45  ;;  %v15704_v20 = vrot.slane %v6042_v47, %v15380_v56  ;;  %v6752_v26 = vunpack.c.l.b16 %v15661_v63  ;;  %v6753_v28 = vunpack.c.l.b16 %v15664_v16 }
 0x13d   : > { %v15707_v21 = vrot.slane %v6056_v2, %v15380_v56  ;;  %v15712_v27 = vrot.slane %v6070_v50, %v15380_v56  ;;  %v6754_v33 = vunpack.c.l.b16 %v15669_v24  ;;  %v6755_v34 = vunpack.c.l.b16 %v15675_v29  ;;  %v14524_v50 = vld [vmem:[#allocation10] sm:$0xff]  }
 0x13e   : > { %v6756_v53 = vunpack.c.l.b16 %v15678_v30  ;;  %v6757_v37 = vunpack.c.l.b16 %v15683_v39  ;;  %v6758_v51 = vunpack.c.l.b16 %v5979_v41  ;;  %v6759_v38 = vunpack.c.l.b16 %v15687_v10 }
 0x13f   : > { %v6760_v42 = vunpack.c.l.b16 %v15691_v60  ;;  %v6761_v44 = vunpack.c.l.b16 %v15694_v15  ;;  %v6762_v4 = vunpack.c.l.b16 %v15699_v57  ;;  %v6763_v58 = vunpack.c.l.b16 %v15704_v20 }
 0x140   : > { %v6764_v8 = vunpack.c.l.b16 %v15707_v21  ;;  %v6765_v14 = vunpack.c.l.b16 %v15712_v27  ;;  %v6814_v3 = vrot.slane %v6751_v52, 7  ;;  %v6816_v7 = vrot.slane %v6752_v26, 6  ;;  %v14530_v27 = vld [vmem:[#allocation10 + $0x10] sm:$0xff]  }
 0x141   : > { %v6818_v55 = vrot.slane %v6753_v28, 5  ;;  %v6820_v59 = vrot.slane %v6754_v33, 4  ;;  %v6822_v54 = vrot.slane %v6755_v34, 3  ;;  %v6824_v1 = vrot.slane %v6756_v53, 2 }
 0x142   : > { %v6826_v46 = vrot.slane %v6757_v37, 1  ;;  %v6815_v9 = vsel %vm3144_vm13, %v6814_v3, %v6750_v43  ;;  %v6828_v62 = vrot.slane %v6759_v38, 7  ;;  %v6830_v11 = vrot.slane %v6760_v42, 6 }
 0x143   : > { %v6832_v12 = vrot.slane %v6761_v44, 5  ;;  %v6817_v32 = vsel %vm3147_vm15, %v6816_v7, %v6815_v9  ;;  %v6834_v45 = vrot.slane %v6762_v4, 4  ;;  %v6836_v0 = vrot.slane %v6763_v58, 3 }
 0x144   : > { %v6838_v63 = vrot.slane %v6764_v8, 2  ;;  %v6819_v16 = vsel %vm428_vm1, %v6818_v55, %v6817_v32  ;;  %v6829_v18 = vsel %vm3144_vm13, %v6828_v62, %v6758_v51  ;;  %v6840_v23 = vrot.slane %v6765_v14, 1  ;;  %v13326_v7 = vld.sshfl [vmem:[#allocation2 + $0x54] sm:$0x33 pattern:$0x75316420] }
 0x145   : > { %v5790_v24 = vshrl.u32 %v15465_v61, 16  ;;  %v6821_v40 = vsel %vm3153_vm0, %v6820_v59, %v6819_v16  ;;  %v6831_v25 = vsel %vm3147_vm15, %v6830_v11, %v6829_v18  ;;  %v5798_v48 = vshrl.u32 %v15485_v5, 16 }
 0x146   : > { %v8118_v29 = vrot.slane %v6752_v26, 7  ;;  %v6823_v30 = vsel %vm3156_vm6, %v6822_v54, %v6821_v40  ;;  %v6833_v35 = vsel %vm428_vm1, %v6832_v12, %v6831_v25  ;;  %v8120_v39 = vrot.slane %v6753_v28, 6 }
 0x147   : > { %v5797_v36 = vsel %vm15567_vm11, %v5790_v24, %v15393_v13  ;;  %v6825_v41 = vsel %vm3159_vm8, %v6824_v1, %v6823_v30  ;;  %v6835_v61 = vsel %vm3153_vm0, %v6834_v45, %v6833_v35  ;;  %v5805_v49 = vsel %vm15567_vm11, %v5798_v48, %v15398_v19  ;;  %v13327_v1 = vld.sshfl [vmem:[#allocation2 + $0x58] sm:$0x33 pattern:$0x75316420] }
 0x148   : > { %v8004_v5 = vrot.slane %v5797_v36, %v15380_v56  ;;  %v6827_v60 = vsel %vm3162_vm9, %v6826_v46, %v6825_v41  ;;  %v6837_v15 = vsel %vm3156_vm6, %v6836_v0, %v6835_v61  ;;  %v8018_v47 = vrot.slane %v5805_v49, %v15380_v56  ;;  %v14526_v46 = vld [vmem:[#allocation10 + $0x48] sm:$0xff]   ;;  %v14532_v48 = vld [vmem:[#allocation10 + $0x58] sm:$0xff]  }
 0x149   : > { %v8119_v2 = vsel %vm3144_vm13, %v8118_v29, %v6751_v52  ;;  %v6839_v13 = vsel %vm3159_vm8, %v6838_v63, %v6837_v15  ;;  %v8122_v26 = vrot.slane %v6754_v33, 5  ;;  %v8124_v51 = vrot.slane %v6755_v34, 4  ;;  %v13329_v33 = vld.sshfl [vmem:[#allocation2 + $0x74] sm:$0x33 pattern:$0x75316420] }
 0x14a   : > { %v8011_v43 = vrot.slane %v8004_v5, %v15380_v56  ;;  %v8121_v20 = vsel %vm3147_vm15, %v8120_v39, %v8119_v2  ;;  %v6841_v19 = vsel %vm3162_vm9, %v6840_v23, %v6839_v13  ;;  %v8025_v28 = vrot.slane %v8018_v47, %v15380_v56  ;;  %v14527_v0 = vld [vmem:[#allocation10 + $0x8] sm:$0xff]   ;;  %v14529_v23 = vld [vmem:[#allocation10 + $0x50] sm:$0xff]   ;;  %v14533_v2 = vld [vmem:[#allocation10 + $0x18] sm:$0xff]  }
 0x14b   : > { %v8126_v3 = vrot.slane %v6756_v53, 3  ;;  %v8279_v55 = vpack.c.b16 %v6841_v19, %v6827_v60  ;;  %v8123_v54 = vsel %vm428_vm1, %v8122_v26, %v8121_v20  ;;  %v8128_v52 = vrot.slane %v6757_v37, 2 }
 0x14c   : > { %v8110_v59 = vunpack.c.l.b16 %v8011_v43  ;;  %v8111_v9 = vunpack.c.l.b16 %v8025_v28  ;;  %v8125_v62 = vsel %vm3153_vm0, %v8124_v51, %v8123_v54  ;;  %v8132_v11 = vrot.slane %v6760_v42, 7  ;;  %v14535_v54 = vld [vmem:[#allocation10 + $0x60] sm:$0xff]  }
 0x14d   : > { %v8134_v12 = vrot.slane %v6761_v44, 6  ;;  %8480 = vmatmul.mubr.bf16.vlgmr.msra.gmra.mrb[0].mxu0 %v8279_v55  ;;  %v8127_v32 = vsel %vm3156_vm6, %v8126_v3, %v8125_v62  ;;  %v8136_v34 = vrot.slane %v6762_v4, 5  ;;  %v8138_v53 = vrot.slane %v6763_v58, 4 }
 0x14e   : > { %v8130_v45 = vrot.slane %v8110_v59, 1  ;;  %13831 = vmatpush3.bf16.msra.mxu0 %v14524_v50  ;;  %v8129_v37 = vsel %vm3159_vm8, %v8128_v52, %v8127_v32  ;;  %v8133_v63 = vsel %vm3144_vm13, %v8132_v11, %v6759_v38  ;;  %v8140_v42 = vrot.slane %v6764_v8, 3  ;;  %v13330_v58 = vld.sshfl [vmem:[#allocation2 + $0x78] sm:$0x33 pattern:$0x75316420] }
 0x14f   : > { %v8142_v44 = vrot.slane %v6765_v14, 2  ;;  %v8135_v57 = vsel %vm3147_vm15, %v8134_v12, %v8133_v63  ;;  %v8144_v4 = vrot.slane %v8111_v9, 1  ;;  %v4789_v18 = vcombine.high %v13326_v7, %v13326_v7  ;;  %13832 = vmatprep.subr.bf16.mxu0 %v14526_v46 }
 0x150   : > { %v8131_v16 = vsel %vm3162_vm9, %v8130_v45, %v8129_v37  ;;  %v8137_v24 = vsel %vm428_vm1, %v8136_v34, %v8135_v57  ;;  %v15778_v10 = vrot.slane %v13326_v7, %v15380_v56  ;;  %v4813_v38 = vcombine.high %v13327_v1, %v13327_v1 }
 0x151   : > { %v15781_v21 = vrot.slane %v13327_v1, %v15380_v56  ;;  %v8139_v8 = vsel %vm3153_vm0, %v8138_v53, %v8137_v24  ;;  %v15785_v14 = vrot.slane %v4789_v18, %v15380_v56  ;;  %v4853_v40 = vcombine.high %v13329_v33, %v13329_v33 }
 0x152   : > { %v15788_v25 = vrot.slane %v13329_v33, %v15380_v56  ;;  %v8141_v29 = vsel %vm3156_vm6, %v8140_v42, %v8139_v8  ;;  %v15793_v30 = vcombine.high %v15778_v10, %v15778_v10  ;;  %v15796_v35 = vrot.slane %v4813_v38, %v15380_v56  ;;  %13833 = vmatpush3.bf16.msra.mxu0 %v14527_v0  ;;  %v14539_v8 = vld [vmem:[#allocation10 + $0x28] sm:$0xff]  }
 0x153   : > { %v15800_v36 = vcombine.high %v15781_v21, %v15781_v21  ;;  %v8143_v39 = vsel %vm3159_vm8, %v8142_v44, %v8141_v29  ;;  %v15805_v41 = vcombine.high %v15785_v14, %v15785_v14  ;;  %v15808_v61 = vrot.slane %v4853_v40, %v15380_v56  ;;  %13834 = vmatprep.subr.bf16.mxu0 %v14529_v23 }
 0x154   : > { %v15812_v49 = vcombine.high %v15788_v25, %v15788_v25  ;;  %v8145_v5 = vsel %vm3162_vm9, %v8144_v4, %v8143_v39  ;;  %v15817_v60 = vcombine.high %v15796_v35, %v15796_v35  ;;  %v4877_v15 = vcombine.high %v13330_v58, %v13330_v58 }
 0x155   : > { %v15820_v47 = vrot.slane %v13330_v58, %v15380_v56  ;;  %v8281_v13 = vpack.c.b16 %v8145_v5, %v8131_v16  ;;  %v15824_v50 = vcombine.high %v15808_v61, %v15808_v61  ;;  %v5289_v43 = vshrl.u32 %v15778_v10, 16  ;;  %v14536_v58 = vld [vmem:[#allocation10 + $0x20] sm:$0xff]  }
 0x156   : > { %v5294_v20 = vshll.u32 %v15785_v14, 16  ;;  %v15829_v26 = vrot.slane %v4877_v15, %v15380_v56  ;;  %v5297_v28 = vshrl.u32 %v15785_v14, 16  ;;  %v5302_v51 = vshll.u32 %v15793_v30, 16  ;;  %13835 = vmatpush3.bf16.msra.mxu0 %v14530_v27  ;;  %v14538_v27 = vld [vmem:[#allocation10 + $0x68] sm:$0xff]  }
 0x157   : > { %v15833_v19 = vcombine.high %v15820_v47, %v15820_v47  ;;  %14118 = vmatprep.mubr.bf16.mxu1 %v8281_v13  ;;  %v5305_v7 = vshrl.u32 %v15793_v30, 16  ;;  %v5310_v55 = vshll.u32 %v15805_v41, 16  ;;  %v5313_v59 = vshrl.u32 %v15805_v41, 16  ;;  %13836 = vmatprep.subr.bf16.mxu0 %v14532_v48 }
 0x158   : > { %v5296_v3 = vsel %vm15567_vm11, %v5289_v43, %v5294_v20  ;;  %v15844_v52 = vcombine.high %v15829_v26, %v15829_v26  ;;  %v5304_v1 = vsel %vm15567_vm11, %v5297_v28, %v5302_v51  ;;  %v5318_v46 = vshll.u32 %v15781_v21, 16 }
 0x159   : > { %v5321_v9 = vshrl.u32 %v15781_v21, 16  ;;  %v5312_v62 = vsel %vm15567_vm11, %v5305_v7, %v5310_v55  ;;  %v5326_v11 = vshll.u32 %v15796_v35, 16  ;;  %v5329_v12 = vshrl.u32 %v15796_v35, 16 }
 0x15a   : > { %v5334_v33 = vshll.u32 %v15800_v36, 16  ;;  %v5320_v32 = vsel %vm15567_vm11, %v5313_v59, %v5318_v46  ;;  %v5337_v45 = vshrl.u32 %v15800_v36, 16  ;;  %v5342_v34 = vshll.u32 %v15817_v60, 16  ;;  %13837 = vmatpush3.bf16.msra.mxu0 %v14533_v2 }
 0x15b   : > { %v5354_v53 = vshrl.u32 %v15788_v25, 16  ;;  %v5328_v0 = vsel %vm15567_vm11, %v5321_v9, %v5326_v11  ;;  %v5359_v63 = vshll.u32 %v15808_v61, 16  ;;  %v5362_v42 = vshrl.u32 %v15808_v61, 16  ;;  %13838 = vmatprep.subr.bf16.mxu0 %v14535_v54 }
 0x15c   : > { %v5336_v37 = vsel %vm15567_vm11, %v5329_v12, %v5334_v33  ;;  %v5344_v44 = vsel %vm15567_vm11, %v5337_v45, %v5342_v34  ;;  %v5367_v16 = vshll.u32 %v15812_v49, 16  ;;  %v5370_v57 = vshrl.u32 %v15812_v49, 16 }
 0x15d   : > { %v5375_v4 = vshll.u32 %v15824_v50, 16  ;;  %v5361_v18 = vsel %vm15567_vm11, %v5354_v53, %v5359_v63  ;;  %v5378_v23 = vshrl.u32 %v15824_v50, 16  ;;  %v5383_v24 = vshll.u32 %v15820_v47, 16 }
 0x15e   : > { %v5386_v38 = vshrl.u32 %v15820_v47, 16  ;;  %v5369_v40 = vsel %vm15567_vm11, %v5362_v42, %v5367_v16  ;;  %v5391_v29 = vshll.u32 %v15829_v26, 16  ;;  %v5394_v39 = vshrl.u32 %v15829_v26, 16  ;;  %13839 = vmatpush3.bf16.msra.mxu0 %v14536_v58 }
 0x15f   : > { %v5377_v48 = vsel %vm15567_vm11, %v5370_v57, %v5375_v4  ;;  %v5385_v5 = vsel %vm15567_vm11, %v5378_v23, %v5383_v24  ;;  %v5399_v15 = vshll.u32 %v15833_v19, 16  ;;  %v5402_v2 = vshrl.u32 %v15833_v19, 16  ;;  %13840 = vmatprep.subr.bf16.mxu0 %v14538_v27 }
 0x160   : > { %v5407_v13 = vshll.u32 %v15844_v52, 16  ;;  %v5393_v43 = vsel %vm15567_vm11, %v5386_v38, %v5391_v29  ;;  %v5806_v20 = vshrl.u32 %v15817_v60, 16  ;;  %v5814_v28 = vshrl.u32 %v15844_v52, 16 }
 0x161   : > { %v6098_v51 = vrot.slane %v5296_v3, %v15380_v56  ;;  %v5401_v7 = vsel %vm15567_vm11, %v5394_v39, %v5399_v15  ;;  %v6112_v59 = vrot.slane %v5304_v1, %v15380_v56  ;;  %v6126_v54 = vrot.slane %v5312_v62, %v15380_v56 }
 0x162   : > { %v5409_v55 = vsel %vm15567_vm11, %v5402_v2, %v5407_v13  ;;  %v5813_v46 = vsel %vm15567_vm11, %v5806_v20, %v15402_v22  ;;  %v5821_v9 = vsel %vm15567_vm11, %v5814_v28, %v15404_v31  ;;  %v6140_v11 = vrot.slane %v5320_v32, %v15380_v56  ;;  %13841 = vmatpush3.bf16.msra.mxu0 %v14539_v8 }
 0x163   : > { %v15905_v3 = vrot.slane %v6098_v51, %v15380_v56  ;;  %v15909_v12 = vrot.slane %v6112_v59, %v15380_v56  ;;  %v15912_v1 = vrot.slane %v6126_v54, %v15380_v56  ;;  %v6154_v62 = vrot.slane %v5328_v0, %v15380_v56 }
 0x164   : > { %v6168_v22 = vrot.slane %v5336_v37, %v15380_v56  ;;  %v15917_v33 = vrot.slane %v6140_v11, %v15380_v56  ;;  %v6182_v31 = vrot.slane %v5344_v44, %v15380_v56  ;;  %v6210_v45 = vrot.slane %v5361_v18, %v15380_v56 }
 0x165   : > { %v6224_v32 = vrot.slane %v5369_v40, %v15380_v56  ;;  %v15923_v34 = vrot.slane %v6154_v62, %v15380_v56  ;;  %v6238_v63 = vrot.slane %v5377_v48, %v15380_v56  ;;  %v6252_v0 = vrot.slane %v5385_v5, %v15380_v56 }
 0x166   : > { %v15926_v53 = vrot.slane %v6168_v22, %v15380_v56  ;;  %v15931_v37 = vrot.slane %v6182_v31, %v15380_v56  ;;  %v15934_v42 = vrot.slane %v6210_v45, %v15380_v56  ;;  %v6266_v16 = vrot.slane %v5393_v43, %v15380_v56 }
 0x167   : > { %v15937_v44 = vrot.slane %v6224_v32, %v15380_v56  ;;  %v15941_v57 = vrot.slane %v6238_v63, %v15380_v56  ;;  %v15944_v4 = vrot.slane %v6252_v0, %v15380_v56  ;;  %v6280_v58 = vrot.slane %v5401_v7, %v15380_v56 }
 0x168   : > { %v6294_v18 = vrot.slane %v5409_v55, %v15380_v56  ;;  %v15949_v23 = vrot.slane %v6266_v16, %v15380_v56  ;;  %v6767_v24 = vunpack.c.l.b16 %v15905_v3  ;;  %v6768_v38 = vunpack.c.l.b16 %v15909_v12 }
 0x169   : > { %v6769_v27 = vunpack.c.l.b16 %v15912_v1  ;;  %v15955_v8 = vrot.slane %v6280_v58, %v15380_v56  ;;  %v6770_v48 = vunpack.c.l.b16 %v15917_v33  ;;  %v6771_v29 = vunpack.c.l.b16 %v15923_v34  ;;  %v576_v1 = vld [vmem:[%s15331_s17 + $0xa0] sm:$0xff]  ;;  %v577_v34 = vld [vmem:[%s15331_s17 + $0xa8] sm:$0xff] }
 0x16a   : > { %v15958_v40 = vrot.slane %v6294_v18, %v15380_v56  ;;  %v6772_v39 = vunpack.c.l.b16 %v15926_v53  ;;  %v6773_v5 = vunpack.c.l.b16 %v15931_v37  ;;  %v6775_v15 = vunpack.c.l.b16 %v15934_v42  ;;  %v580_v42 = vld [vmem:[%s15331_s17 + $0xc0] sm:$0xff] }
 0x16b   : > { %v19488_v2 = vunpack.c.l.b16 %v15937_v44  ;;  %v19483_v13 = vunpack.c.l.b16 %v15941_v57  ;;  %v19487_v43 = vunpack.c.l.b16 %v15944_v4  ;;  %v19484_v20 = vunpack.c.l.b16 %v15949_v23 }
 0x16c   : > { %v19485_v28 = vunpack.c.l.b16 %v15955_v8  ;;  %v19486_v51 = vunpack.c.l.b16 %v15958_v40  ;;  %v8032_v7 = vrot.slane %v5813_v46, %v15380_v56  ;;  %v8046_v55 = vrot.slane %v5821_v9, %v15380_v56 }
 0x16d   : > { %v8146_v59 = vrot.slane %v6768_v38, 7  ;;  %v8148_v54 = vrot.slane %v6769_v27, 6  ;;  %v8150_v11 = vrot.slane %v6770_v48, 5  ;;  %v8152_v62 = vrot.slane %v6771_v29, 4 }
 0x16e   : > { %v8154_v22 = vrot.slane %v6772_v39, 3  ;;  %v8039_v31 = vrot.slane %v8032_v7, %v15380_v56  ;;  %v8053_v46 = vrot.slane %v8046_v55, %v15380_v56  ;;  %v8156_v45 = vrot.slane %v6773_v5, 2 }
 0x16f   : > { %v8147_v9 = vsel %vm3144_vm13, %v8146_v59, %v6767_v24  ;;  %v8160_v63 = vrot.slane %v19488_v2, 7  ;;  %v8162_v0 = vrot.slane %v19483_v13, 6  ;;  %v8164_v16 = vrot.slane %v19487_v43, 5  ;;  %v446_v43 = vld [vmem:[#allocation2 + $0x50] sm:$0x8] }
 0x170   : > { %v8149_v32 = vsel %vm3147_vm15, %v8148_v54, %v8147_v9  ;;  %v8112_v58 = vunpack.c.l.b16 %v8039_v31  ;;  %v8113_v18 = vunpack.c.l.b16 %v8053_v46  ;;  %v8166_v55 = vrot.slane %v19484_v20, 4 }
 0x171   : > { %v8151_v7 = vsel %vm428_vm1, %v8150_v11, %v8149_v32  ;;  %v8161_v54 = vsel %vm3144_vm13, %v8160_v63, %v6775_v15  ;;  %v8168_v9 = vrot.slane %v19485_v28, 3  ;;  %v8170_v13 = vrot.slane %v19486_v51, 2 }
 0x172   : > { %v8153_v59 = vsel %vm3153_vm0, %v8152_v62, %v8151_v7  ;;  %v8158_v46 = vrot.slane %v8112_v58, 1  ;;  %v8163_v11 = vsel %vm3147_vm15, %v8162_v0, %v8161_v54  ;;  %v8172_v32 = vrot.slane %v8113_v18, 1  ;;  %v14541_v58 = vld [vmem:[#allocation10 + $0x70] sm:$0xff]  }
 0x173   : > { %v8155_v31 = vsel %vm3156_vm6, %v8154_v22, %v8153_v59  ;;  %v8165_v62 = vsel %vm428_vm1, %v8164_v16, %v8163_v11  ;;  %v7156_v7 = vrot.slane %v15778_v10, %v15380_v56  ;;  %v7170_v63 = vrot.slane %v15785_v14, %v15380_v56  ;;  %13842 = vmatprep.subr.bf16.mxu0 %v14541_v58 }
 0x174   : > { %v8157_v20 = vsel %vm3159_vm8, %v8156_v45, %v8155_v31  ;;  %v8167_v51 = vsel %vm3153_vm0, %v8166_v55, %v8165_v62  ;;  %v7184_v22 = vrot.slane %v15793_v30, %v15380_v56  ;;  %v7198_v0 = vrot.slane %v15805_v41, %v15380_v56  ;;  %v14528_v55 = vld [vmem:[#allocation10 + $0x88] sm:$0xff]  }
 0x175   : > { %v8159_v28 = vsel %vm3162_vm9, %v8158_v46, %v8157_v20  ;;  %v8169_v45 = vsel %vm3156_vm6, %v8168_v9, %v8167_v51  ;;  %v16024_v16 = vrot.slane %v7156_v7, %v15380_v56  ;;  %v7177_v18 = vrot.slane %v7170_v63, %v15380_v56  ;;  %v14531_v63 = vld [vmem:[#allocation10 + $0x90] sm:$0xff]  }
 0x176   : > { %v7212_v14 = vrot.slane %v15781_v21, %v15380_v56  ;;  %v8171_v20 = vsel %vm3159_vm8, %v8170_v13, %v8169_v45  ;;  %v7191_v59 = vrot.slane %v7184_v22, %v15380_v56  ;;  %v7205_v30 = vrot.slane %v7198_v0, %v15380_v56  ;;  %v14669_v22 = vld [vmem:[#allocation10 + $0x80] sm:$0xff]  }
 0x177   : > { %v7226_v41 = vrot.slane %v15796_v35, %v15380_v56  ;;  %v8173_v51 = vsel %vm3162_vm9, %v8172_v32, %v8171_v20  ;;  %v7240_v9 = vrot.slane %v15800_v36, %v15380_v56  ;;  %v7254_v21 = vrot.slane %v15817_v60, %v15380_v56 }
 0x178   : > { %v7219_v54 = vrot.slane %v7212_v14, %v15380_v56  ;;  %v8284_v13 = vpack.c.b16 %v8173_v51, %v8159_v28  ;;  %v7268_v46 = vrot.slane %v15788_v25, %v15380_v56  ;;  %v7282_v35 = vrot.slane %v15808_v61, %v15380_v56 }
 0x179   : > { %v7233_v31 = vrot.slane %v7226_v41, %v15380_v56  ;;  %v7247_v11 = vrot.slane %v7240_v9, %v15380_v56  ;;  %v7261_v32 = vrot.slane %v7254_v21, %v15380_v56  ;;  %v7296_v62 = vrot.slane %v15812_v49, %v15380_v56 }
 0x17a   : > { %v7310_v36 = vrot.slane %v15824_v50, %v15380_v56  ;;  %14119 = vmatmul.mubr.bf16.vlgmr.msra.gmra.mrb[0].mxu1 %v8284_v13  ;;  %v7275_v60 = vrot.slane %v7268_v46, %v15380_v56  ;;  %v7289_v28 = vrot.slane %v7282_v35, %v15380_v56  ;;  %v7324_v7 = vrot.slane %v15820_v47, %v15380_v56  ;;  %v14534_v35 = vld [vmem:[#allocation10 + $0x98] sm:$0xff]  }
 0x17b   : > { %v7338_v61 = vrot.slane %v15829_v26, %v15380_v56  ;;  %14127 = vmatpush3.bf16.msra.mxu1 %v14669_v22  ;;  %v7303_v0 = vrot.slane %v7296_v62, %v15380_v56  ;;  %v7352_v50 = vrot.slane %v15833_v19, %v15380_v56  ;;  %v7366_v58 = vrot.slane %v15844_v52, %v15380_v56 }
 0x17c   : > { %v7317_v49 = vrot.slane %v7310_v36, %v15380_v56  ;;  %14128 = vmatprep.subr.bf16.mxu1 %v14528_v55  ;;  %v7331_v45 = vrot.slane %v7324_v7, %v15380_v56  ;;  %v7838_v26 = vunpack.c.l.b16 %v16024_v16  ;;  %v7839_v14 = vunpack.c.l.b16 %v7177_v18 }
 0x17d   : > { %v7345_v47 = vrot.slane %v7338_v61, %v15380_v56  ;;  %v7359_v20 = vrot.slane %v7352_v50, %v15380_v56  ;;  %v7373_v41 = vrot.slane %v7366_v58, %v15380_v56  ;;  %v7840_v51 = vunpack.c.l.b16 %v7191_v59 }
 0x17e   : > { %v7841_v9 = vunpack.c.l.b16 %v7205_v30  ;;  %v7842_v21 = vunpack.c.l.b16 %v7219_v54  ;;  %v7843_v13 = vunpack.c.l.b16 %v7233_v31  ;;  %v7844_v19 = vunpack.c.l.b16 %v7247_v11  ;;  %v452_v54 = vld [vmem:[#allocation2 + $0x70] sm:$0x8] }
 0x17f   : > { %v7845_v46 = vunpack.c.l.b16 %v7261_v32  ;;  %14129 = vmatpush3.bf16.msra.mxu1 %v14528_v55  ;;  %v7846_v52 = vunpack.c.l.b16 %v7275_v60  ;;  %v7847_v62 = vunpack.c.l.b16 %v7289_v28  ;;  %v7848_v36 = vunpack.c.l.b16 %v7303_v0 }
 0x180   : > { %v7849_v7 = vunpack.c.l.b16 %v7317_v49  ;;  %v7850_v61 = vunpack.c.l.b16 %v7331_v45  ;;  %v7851_v22 = vunpack.c.l.b16 %v7345_v47  ;;  %v7852_v16 = vunpack.c.l.b16 %v7359_v20  ;;  %14130 = vmatprep.subr.bf16.mxu1 %v14531_v63  ;;  %v14537_v49 = vld [vmem:[#allocation10 + $0xa0] sm:$0xff]  }
 0x181   : > { %v7853_v18 = vunpack.c.l.b16 %v7373_v41  ;;  %v7914_v50 = vrot.slane %v7839_v14, 7  ;;  %v7916_v58 = vrot.slane %v7840_v51, 6  ;;  %v7918_v59 = vrot.slane %v7841_v9, 5 }
 0x182   : > { %v7920_v30 = vrot.slane %v7842_v21, 4  ;;  %v7922_v31 = vrot.slane %v7843_v13, 3  ;;  %v7924_v11 = vrot.slane %v7844_v19, 2  ;;  %v7926_v32 = vrot.slane %v7845_v46, 1 }
 0x183   : > { %v7928_v2 = vrot.slane %v7847_v62, 7  ;;  %v7915_v55 = vsel %vm3144_vm13, %v7914_v50, %v7838_v26  ;;  %v7930_v60 = vrot.slane %v7848_v36, 6  ;;  %v7932_v28 = vrot.slane %v7849_v7, 5  ;;  %14131 = vmatpush3.bf16.msra.mxu1 %v14531_v63 }
 0x184   : > { %v7934_v0 = vrot.slane %v7850_v61, 4  ;;  %v7917_v45 = vsel %vm3147_vm15, %v7916_v58, %v7915_v55  ;;  %v7936_v14 = vrot.slane %v7851_v22, 3  ;;  %v7938_v20 = vrot.slane %v7852_v16, 2  ;;  %14132 = vmatprep.subr.bf16.mxu1 %v14534_v35  ;;  %v14540_v22 = vld [vmem:[#allocation10 + $0xa8] sm:$0xff]   ;;  %v584_v55 = vld [vmem:[%s15331_s17 + $0xe0] sm:$0xff] }
 0x185   : > { %v7929_v47 = vsel %vm3144_vm13, %v7928_v2, %v7846_v52  ;;  %v7919_v41 = vsel %vm428_vm1, %v7918_v59, %v7917_v45  ;;  %v7940_v9 = vrot.slane %v7853_v18, 1  ;;  %v447_v26 = vsel %vm15354_vm2, 0, %v446_v43  ;;  %v573_v16 = vld [vmem:[%s15331_s17 + $0x88] sm:$0xff] }
 0x186   : > { %v7931_v51 = vsel %vm3147_vm15, %v7930_v60, %v7929_v47  ;;  %v7921_v21 = vsel %vm3153_vm0, %v7920_v30, %v7919_v41  ;;  %448 = vst [vmem:[#allocation2 + $0x50] sm:$0x8] %v447_v26  ;;  %v453_v13 = vsel %vm15354_vm2, 0, %v452_v54  ;;  %v5286_v2 = vshll.u32 %v15778_v10, 16  ;;  %v464_v30 = vld [vmem:[#allocation2 + $0xb0] sm:$0x8] }
 0x187   : > { %v7933_v63 = vsel %vm428_vm1, %v7932_v28, %v7931_v51  ;;  %v7923_v19 = vsel %vm3156_vm6, %v7922_v31, %v7921_v21  ;;  %454 = vst [vmem:[#allocation2 + $0x70] sm:$0x8] %v453_v13  ;;  %v5351_v43 = vshll.u32 %v15788_v25, 16  ;;  %v16085_v52 = vrot.slane %v6767_v24, 7  ;;  %14133 = vmatpush3.bf16.msra.mxu1 %v14534_v35 }
 0x188   : > { %v7935_v46 = vsel %vm3153_vm0, %v7934_v0, %v7933_v63  ;;  %v7925_v62 = vsel %vm3159_vm8, %v7924_v11, %v7923_v19  ;;  %v16091_v7 = vrot.slane %v6768_v38, 6  ;;  %v16095_v61 = vrot.slane %v6769_v27, 5  ;;  %14134 = vmatprep.subr.bf16.mxu1 %v14537_v49  ;;  %v572_v38 = vld [vmem:[%s15331_s17 + $0x80] sm:$0xff]  ;;  %v585_v63 = vld [vmem:[%s15331_s17 + $0xe8] sm:$0xff] }
 0x189   : > { %v7937_v36 = vsel %vm3156_vm6, %v7936_v14, %v7935_v46  ;;  %v7927_v3 = vsel %vm3162_vm9, %v7926_v32, %v7925_v62  ;;  %v16101_v35 = vrot.slane %v6770_v48, 4  ;;  %v16105_v12 = vrot.slane %v6771_v29, 3  ;;  %v458_v48 = vld [vmem:[#allocation2 + $0x90] sm:$0x8]  ;;  %v14670_v32 = vld [vmem:[#allocation7] ss:$0 sm:$0xff] }
 0x18a   : > { %v7939_v24 = vsel %vm3159_vm8, %v7938_v20, %v7937_v36  ;;  %v16113_v18 = vrot.slane %v6772_v39, 2  ;;  %v16117_v50 = vrot.slane %v6773_v5, 1  ;;  %v16121_v33 = vrot.slane %v6775_v15, 7  ;;  %v14671_v14 = vld [vmem:[#allocation9] ss:$0 sm:$0xff] }
 0x18b   : > { %v7941_v27 = vsel %vm3162_vm9, %v7940_v9, %v7939_v24  ;;  %v19602_v58 = vunpack.c.l.b16 %v15937_v44  ;;  %v19603_v53 = vunpack.c.l.b16 %v15941_v57  ;;  %v19604_v37 = vunpack.c.l.b16 %v15944_v4  ;;  %14135 = vmatpush3.bf16.msra.mxu1 %v14537_v49  ;;  %v13411_v36 = vld.sshfl [vmem:[#allocation2 + $0x9c] sm:$0x1 pattern:$0x75316420] }
 0x18c   : > { %v8283_v29 = vpack.c.b16 %v7941_v27, %v7927_v3  ;;  %v19605_v15 = vunpack.c.l.b16 %v15949_v23  ;;  %v19606_v44 = vunpack.c.l.b16 %v15955_v8  ;;  %v19607_v57 = vunpack.c.l.b16 %v15958_v40  ;;  %14136 = vmatprep.subr.bf16.mxu1 %v14540_v22  ;;  %v581_v8 = vld [vmem:[%s15331_s17 + $0xc8] sm:$0xff] }
 0x18d   : > { %v16126_v59 = vrot.slane %v19602_v58, 6  ;;  %v16130_v39 = vrot.slane %v19603_v53, 5  ;;  %v16134_v5 = vrot.slane %v19604_v37, 4  ;;  %v610_v4 = vmul.f32 %v14670_v32, %v572_v38 }
 0x18e   : > { %v16139_v54 = vrot.slane %v19605_v15, 3  ;;  %v16143_v31 = vrot.slane %v19606_v44, 2  ;;  %v16147_v11 = vrot.slane %v19607_v57, 1  ;;  %8487 = vmatprep.mubr.bf16.mxu0 %v8283_v29  ;;  %v611_v28 = vmul.f32 %v14670_v32, %v573_v16 }
 0x18f   : > { %v13325_v60 = vld.sshfl [vmem:[#allocation2 + $0x50] sm:$0x33 pattern:$0x75316420]  ;;  %v614_v0 = vmul.f32 %v14670_v32, %v576_v1  ;;  %v615_v49 = vmul.f32 %v14670_v32, %v577_v34  ;;  %v459_v23 = vsel %vm15354_vm2, 0, %v458_v48  ;;  %v648_v40 = vadd.f32 %v14671_v14, %v610_v4  ;;  %14137 = vmatpush3.bf16.msra.mxu1 %v14540_v22 }
 0x190   : > { %v13328_v45 = vld.sshfl [vmem:[#allocation2 + $0x70] sm:$0x33 pattern:$0x75316420]  ;;  %v4773_v47 = vcombine.high %v13325_v60, %v13325_v60  ;;  %460 = vst [vmem:[#allocation2 + $0x90] sm:$0x8] %v459_v23  ;;  %v618_v41 = vmul.f32 %v14670_v32, %v580_v42  ;;  %v649_v9 = vadd.f32 %v14671_v14, %v611_v28  ;;  %v619_v46 = vmul.f32 %v14670_v32, %v581_v8 }
 0x191   : > { %v465_v20 = vsel %vm15354_vm2, 0, %v464_v30  ;;  %v4837_v51 = vcombine.high %v13328_v45, %v13328_v45  ;;  %v652_v26 = vadd.f32 %v14671_v14, %v614_v0  ;;  %v653_v21 = vadd.f32 %v14671_v14, %v615_v49  ;;  %v13412_v29 = vld.sshfl [vmem:[#allocation2 + $0xbc] sm:$0x1 pattern:$0x75316420] }
 0x192   : > { %466 = vst [vmem:[#allocation2 + $0xb0] sm:$0x8] %v465_v20  ;;  %v4780_v13 = vrot.slane %v4773_v47, %v15380_v56  ;;  %v680_v19 = vmax.f32 %v648_v40, 0.0  ;;  %v622_v62 = vmul.f32 %v14670_v32, %v584_v55  ;;  %v681_v24 = vmax.f32 %v649_v9, 0.0  ;;  %v470_v20 = vld [vmem:[#allocation2 + $0xd0] sm:$0x8] }
 0x193   : > { %v4844_v3 = vrot.slane %v4837_v51, %v15380_v56  ;;  %v684_v38 = vmax.f32 %v652_v26, 0.0  ;;  %v685_v16 = vmax.f32 %v653_v21, 0.0  ;;  %v623_v34 = vmul.f32 %v14670_v32, %v585_v63  ;;  %v14542_v51 = vld [vmem:[#allocation10 + $0x30] sm:$0xff]  }
 0x194   : > { %v4781_v1 = vcombine.high %v4780_v13, %v4780_v13  ;;  %v13753_v27 = vpack.c.bf16 %v680_v19, %v680_v19  ;;  %v656_v48 = vadd.f32 %v14671_v14, %v618_v41  ;;  %v13754_v53 = vpack.c.bf16 %v681_v24, %v681_v24  ;;  %v476_v41 = vld [vmem:[#allocation2 + $0xf0] sm:$0x8]  ;;  %13843 = vmatpush3.bf16.msra.mxu0 %v14542_v51 }
 0x195   : > { %v4845_v58 = vcombine.high %v4844_v3, %v4844_v3  ;;  %v13757_v22 = vpack.c.bf16 %v684_v38, %v684_v38  ;;  %v13758_v37 = vpack.c.bf16 %v685_v16, %v685_v16  ;;  %v657_v42 = vadd.f32 %v14671_v14, %v619_v46 }
 0x196   : > { %v5281_v30 = vshrl.u32 %v4781_v1, 16  ;;  %841 = vst [vmem:[#allocation2 + $0x94] sm:$0xf] %v13753_v27  ;;  %v660_v15 = vadd.f32 %v14671_v14, %v622_v62  ;;  %v661_v44 = vadd.f32 %v14671_v14, %v623_v34  ;;  %842 = vst [vmem:[#allocation2 + $0x98] sm:$0xf] %v13754_v53  ;;  %v688_v55 = vmax.f32 %v656_v48, 0.0 }
 0x197   : > { %v5346_v57 = vshrl.u32 %v4845_v58, 16  ;;  %845 = vst [vmem:[#allocation2 + $0xb4] sm:$0xf] %v13757_v22  ;;  %846 = vst [vmem:[#allocation2 + $0xb8] sm:$0xf] %v13758_v37  ;;  %v5747_v60 = vrot.slane %v13411_v36, %v15380_v56  ;;  %v5761_v32 = vrot.slane %v13412_v29, %v15380_v56  ;;  %v689_v23 = vmax.f32 %v657_v42, 0.0 }
 0x198   : > { %v13331_v4 = vld.sshfl [vmem:[#allocation2 + $0x90] sm:$0x33 pattern:$0x75316420]  ;;  %v5288_v28 = vsel %vm15567_vm11, %v5281_v30, %v5286_v2  ;;  %v692_v8 = vmax.f32 %v660_v15, 0.0  ;;  %v693_v40 = vmax.f32 %v661_v44, 0.0  ;;  %v13761_v9 = vpack.c.bf16 %v688_v55, %v688_v55 }
 0x199   : > { %v13334_v0 = vld.sshfl [vmem:[#allocation2 + $0xb0] sm:$0x33 pattern:$0x75316420]  ;;  %v4901_v49 = vcombine.high %v13331_v4, %v13331_v4  ;;  %v5353_v45 = vsel %vm15567_vm11, %v5346_v57, %v5351_v43  ;;  %v6084_v47 = vrot.slane %v5288_v28, %v15380_v56  ;;  %v13762_v26 = vpack.c.bf16 %v689_v23, %v689_v23 }
 0x19a   : > { %v4965_v14 = vcombine.high %v13334_v0, %v13334_v0  ;;  %v6196_v10 = vrot.slane %v5353_v45, %v15380_v56  ;;  %v13765_v63 = vpack.c.bf16 %v692_v8, %v692_v8  ;;  %v13766_v13 = vpack.c.bf16 %v693_v40, %v693_v40  ;;  %849 = vst [vmem:[#allocation2 + $0xd4] sm:$0xf] %v13761_v9 }
 0x19b   : > { %v4908_v2 = vrot.slane %v4901_v49, %v15380_v56  ;;  %v6091_v21 = vrot.slane %v6084_v47, %v15380_v56  ;;  %850 = vst [vmem:[#allocation2 + $0xd8] sm:$0xf] %v13762_v26  ;;  %v471_v46 = vsel %vm15354_vm2, 0, %v470_v20  ;;  %v477_v62 = vsel %vm15354_vm2, 0, %v476_v41 }
 0x19c   : > { %v4972_v25 = vrot.slane %v4965_v14, %v15380_v56  ;;  %v6203_v43 = vrot.slane %v6196_v10, %v15380_v56  ;;  %853 = vst [vmem:[#allocation2 + $0xf4] sm:$0xf] %v13765_v63  ;;  %854 = vst [vmem:[#allocation2 + $0xf8] sm:$0xf] %v13766_v13  ;;  %v16178_v38 = vshll.u32 %v5747_v60, 16  ;;  %v16180_v16 = vshll.u32 %v5761_v32, 16 }
 0x19d   : > { %v4909_v19 = vcombine.high %v4908_v2, %v4908_v2  ;;  %v6766_v36 = vunpack.c.l.b16 %v6091_v21  ;;  %v13332_v3 = vld.sshfl [vmem:[#allocation2 + $0x94] sm:$0x33 pattern:$0x75316420]  ;;  %472 = vst [vmem:[#allocation2 + $0xd0] sm:$0x8] %v471_v46 }
 0x19e   : > { %v4973_v24 = vcombine.high %v4972_v25, %v4972_v25  ;;  %478 = vst [vmem:[#allocation2 + $0xf0] sm:$0x8] %v477_v62  ;;  %v6774_v1 = vunpack.c.l.b16 %v6203_v43  ;;  %v13333_v27 = vld.sshfl [vmem:[#allocation2 + $0x98] sm:$0x33 pattern:$0x75316420]  ;;  %v4917_v34 = vcombine.high %v13332_v3, %v13332_v3  ;;  %v16183_v48 = vrot.slane %v13332_v3, %v15380_v56 }
 0x19f   : > { %v16185_v29 = vshrl.u32 %v4909_v19, 16  ;;  %v6843_v58 = vsel %vm3144_vm13, %v16085_v52, %v6766_v36  ;;  %v13335_v53 = vld.sshfl [vmem:[#allocation2 + $0xb4] sm:$0x33 pattern:$0x75316420]  ;;  %v4941_v22 = vcombine.high %v13333_v27, %v13333_v27  ;;  %v16190_v37 = vrot.slane %v13333_v27, %v15380_v56  ;;  %v14543_v52 = vld [vmem:[#allocation10 + $0xb0] sm:$0xff]  }
 0x1a0   : > { %v16192_v30 = vshrl.u32 %v4973_v24, 16  ;;  %v6845_v42 = vsel %vm3147_vm15, %v16091_v7, %v6843_v58  ;;  %v6857_v15 = vsel %vm3144_vm13, %v16121_v33, %v6774_v1  ;;  %v16199_v44 = vrot.slane %v4917_v34, %v15380_v56  ;;  %v13336_v60 = vld.sshfl [vmem:[#allocation2 + $0xb8] sm:$0x33 pattern:$0x75316420]  ;;  %14138 = vmatprep.subr.bf16.mxu1 %v14543_v52 }
 0x1a1   : > { %v16203_v57 = vcombine.high %v16183_v48, %v16183_v48  ;;  %v6847_v4 = vsel %vm428_vm1, %v16095_v61, %v6845_v42  ;;  %v6859_v55 = vsel %vm3147_vm15, %v16126_v59, %v6857_v15  ;;  %v16210_v7 = vrot.slane %v4941_v22, %v15380_v56  ;;  %14139 = vmatpush3.bf16.msra.mxu1 %v14543_v52  ;;  %v14544_v22 = vld [vmem:[#allocation10 + $0x78] sm:$0xff]  }
 0x1a2   : > { %v16214_v33 = vcombine.high %v16190_v37, %v16190_v37  ;;  %v6849_v32 = vsel %vm3153_vm0, %v16101_v35, %v6847_v4  ;;  %v6861_v28 = vsel %vm428_vm1, %v16130_v39, %v6859_v55  ;;  %v16222_v61 = vcombine.high %v16199_v44, %v16199_v44  ;;  %v14545_v42 = vld [vmem:[#allocation10 + $0x38] sm:$0xff]   ;;  %13844 = vmatprep.subr.bf16.mxu0 %v14544_v22 }
 0x1a3   : > { %v4981_v0 = vcombine.high %v13335_v53, %v13335_v53  ;;  %v6851_v59 = vsel %vm3156_vm6, %v16105_v12, %v6849_v32  ;;  %v6863_v49 = vsel %vm3153_vm0, %v16134_v5, %v6861_v28  ;;  %v16230_v23 = vcombine.high %v16210_v7, %v16210_v7  ;;  %v14546_v15 = vld [vmem:[#allocation10 + $0xb8] sm:$0xff]   ;;  %13845 = vmatpush3.bf16.msra.mxu0 %v14545_v42 }
 0x1a4   : > { %v16233_v35 = vrot.slane %v13335_v53, %v15380_v56  ;;  %v6853_v39 = vsel %vm3159_vm8, %v16113_v18, %v6851_v59  ;;  %v6865_v8 = vsel %vm3156_vm6, %v16139_v54, %v6863_v49  ;;  %v5005_v12 = vcombine.high %v13336_v60, %v13336_v60  ;;  %14140 = vmatprep.subr.bf16.mxu1 %v14546_v15 }
 0x1a5   : > { %v16240_v45 = vrot.slane %v4981_v0, %v15380_v56  ;;  %v6855_v5 = vsel %vm3162_vm9, %v16117_v50, %v6853_v39  ;;  %v6867_v47 = vsel %vm3159_vm8, %v16143_v31, %v6865_v8  ;;  %v16251_v40 = vrot.slane %v13336_v60, %v15380_v56  ;;  %14141 = vmatpush3.bf16.msra.mxu1 %v14546_v15 }
 0x1a6   : > { %v16248_v14 = vcombine.high %v16233_v35, %v16233_v35  ;;  %v6869_v18 = vsel %vm3162_vm9, %v16147_v11, %v6867_v47  ;;  %v16260_v20 = vrot.slane %v5005_v12, %v15380_v56  ;;  %v7380_v50 = vrot.slane %v16183_v48, %v15380_v56 }
 0x1a7   : > { %v16257_v54 = vcombine.high %v16240_v45, %v16240_v45  ;;  %v8282_v31 = vpack.c.b16 %v6869_v18, %v6855_v5  ;;  %v16266_v41 = vcombine.high %v16251_v40, %v16251_v40  ;;  %v7394_v51 = vrot.slane %v16199_v44, %v15380_v56 }
 0x1a8   : > { %v7408_v11 = vrot.slane %v16203_v57, %v15380_v56  ;;  %v16274_v10 = vcombine.high %v16260_v20, %v16260_v20  ;;  %v7387_v2 = vrot.slane %v7380_v50, %v15380_v56  ;;  %v7422_v9 = vrot.slane %v16222_v61, %v15380_v56 }
 0x1a9   : > { %v7436_v26 = vrot.slane %v16190_v37, %v15380_v56  ;;  %8488 = vmatmul.mubr.bf16.gmra.mrb[4].mxu0 %v8282_v31  ;;  %v7401_v21 = vrot.slane %v7394_v51, %v15380_v56  ;;  %v7450_v63 = vrot.slane %v16210_v7, %v15380_v56  ;;  %v7464_v13 = vrot.slane %v16214_v33, %v15380_v56 }
 0x1aa   : > { %v7415_v25 = vrot.slane %v7408_v11, %v15380_v56  ;;  %v7429_v43 = vrot.slane %v7422_v9, %v15380_v56  ;;  %v7478_v46 = vrot.slane %v16230_v23, %v15380_v56  ;;  %v7492_v62 = vrot.slane %v16233_v35, %v15380_v56 }
 0x1ab   : > { %v7443_v19 = vrot.slane %v7436_v26, %v15380_v56  ;;  %v7457_v36 = vrot.slane %v7450_v63, %v15380_v56  ;;  %v7471_v3 = vrot.slane %v7464_v13, %v15380_v56  ;;  %v7506_v24 = vrot.slane %v16240_v45, %v15380_v56 }
 0x1ac   : > { %v7520_v1 = vrot.slane %v16248_v14, %v15380_v56  ;;  %v7485_v27 = vrot.slane %v7478_v46, %v15380_v56  ;;  %v7499_v34 = vrot.slane %v7492_v62, %v15380_v56  ;;  %v7534_v58 = vrot.slane %v16257_v54, %v15380_v56 }
 0x1ad   : > { %v7548_v53 = vrot.slane %v16251_v40, %v15380_v56  ;;  %v7513_v52 = vrot.slane %v7506_v24, %v15380_v56  ;;  %v7562_v55 = vrot.slane %v16260_v20, %v15380_v56  ;;  %v7576_v60 = vrot.slane %v16266_v41, %v15380_v56 }
 0x1ae   : > { %v7527_v4 = vrot.slane %v7520_v1, %v15380_v56  ;;  %v7541_v32 = vrot.slane %v7534_v58, %v15380_v56  ;;  %v7590_v0 = vrot.slane %v16274_v10, %v15380_v56  ;;  %v7854_v59 = vunpack.c.l.b16 %v7387_v2 }
 0x1af   : > { %v7555_v28 = vrot.slane %v7548_v53, %v15380_v56  ;;  %v7569_v49 = vrot.slane %v7562_v55, %v15380_v56  ;;  %v7583_v39 = vrot.slane %v7576_v60, %v15380_v56  ;;  %v7855_v8 = vunpack.c.l.b16 %v7401_v21 }
 0x1b0   : > { %v7856_v12 = vunpack.c.l.b16 %v7415_v25  ;;  %v7597_v5 = vrot.slane %v7590_v0, %v15380_v56  ;;  %v7857_v47 = vunpack.c.l.b16 %v7429_v43  ;;  %v7858_v18 = vunpack.c.l.b16 %v7443_v19 }
 0x1b1   : > { %v7859_v50 = vunpack.c.l.b16 %v7457_v36  ;;  %v7860_v31 = vunpack.c.l.b16 %v7471_v3  ;;  %v7861_v51 = vunpack.c.l.b16 %v7485_v27  ;;  %v7862_v11 = vunpack.c.l.b16 %v7499_v34 }
 0x1b2   : > { %v7863_v9 = vunpack.c.l.b16 %v7513_v52  ;;  %v7864_v2 = vunpack.c.l.b16 %v7527_v4  ;;  %v7865_v26 = vunpack.c.l.b16 %v7541_v32  ;;  %v7866_v63 = vunpack.c.l.b16 %v7555_v28 }
 0x1b3   : > { %v7867_v13 = vunpack.c.l.b16 %v7569_v49  ;;  %v7868_v46 = vunpack.c.l.b16 %v7583_v39  ;;  %v7869_v62 = vunpack.c.l.b16 %v7597_v5  ;;  %v7942_v24 = vrot.slane %v7855_v8, 7 }
 0x1b4   : > { %v7944_v21 = vrot.slane %v7856_v12, 6  ;;  %v7946_v25 = vrot.slane %v7857_v47, 5  ;;  %v7948_v1 = vrot.slane %v7858_v18, 4  ;;  %v7950_v58 = vrot.slane %v7859_v50, 3 }
 0x1b5   : > { %v7952_v53 = vrot.slane %v7860_v31, 2  ;;  %v7943_v43 = vsel %vm3144_vm13, %v7942_v24, %v7854_v59  ;;  %v7954_v19 = vrot.slane %v7861_v51, 1  ;;  %v7956_v36 = vrot.slane %v7863_v9, 7 }
 0x1b6   : > { %v7958_v3 = vrot.slane %v7864_v2, 6  ;;  %v7945_v27 = vsel %vm3147_vm15, %v7944_v21, %v7943_v43  ;;  %v7960_v34 = vrot.slane %v7865_v26, 5  ;;  %v7962_v22 = vrot.slane %v7866_v63, 4 }
 0x1b7   : > { %v7964_v42 = vrot.slane %v7867_v13, 3  ;;  %v7947_v15 = vsel %vm428_vm1, %v7946_v25, %v7945_v27  ;;  %v7957_v52 = vsel %vm3144_vm13, %v7956_v36, %v7862_v11  ;;  %v7966_v4 = vrot.slane %v7868_v46, 2 }
 0x1b8   : > { %v7968_v55 = vrot.slane %v7869_v62, 1  ;;  %v7949_v60 = vsel %vm3153_vm0, %v7948_v1, %v7947_v15  ;;  %v7959_v32 = vsel %vm3147_vm15, %v7958_v3, %v7957_v52  ;;  %v5416_v28 = vshll.u32 %v16183_v48, 16 }
 0x1b9   : > { %v5419_v0 = vshrl.u32 %v16183_v48, 16  ;;  %v7951_v59 = vsel %vm3156_vm6, %v7950_v58, %v7949_v60  ;;  %v7961_v49 = vsel %vm428_vm1, %v7960_v34, %v7959_v32  ;;  %v5424_v39 = vshll.u32 %v16199_v44, 16 }
 0x1ba   : > { %v5427_v8 = vshrl.u32 %v16199_v44, 16  ;;  %v7953_v12 = vsel %vm3159_vm8, %v7952_v53, %v7951_v59  ;;  %v7963_v5 = vsel %vm3153_vm0, %v7962_v22, %v7961_v49  ;;  %v5418_v47 = vsel %vm15567_vm11, %v16185_v29, %v5416_v28 }
 0x1bb   : > { %v5432_v18 = vshll.u32 %v16203_v57, 16  ;;  %v7955_v48 = vsel %vm3162_vm9, %v7954_v19, %v7953_v12  ;;  %v7965_v50 = vsel %vm3156_vm6, %v7964_v42, %v7963_v5  ;;  %v5426_v31 = vsel %vm15567_vm11, %v5419_v0, %v5424_v39 }
 0x1bc   : > { %v5435_v51 = vshrl.u32 %v16203_v57, 16  ;;  %v7967_v44 = vsel %vm3159_vm8, %v7966_v4, %v7965_v50  ;;  %v5440_v9 = vshll.u32 %v16222_v61, 16  ;;  %v5443_v29 = vshrl.u32 %v16222_v61, 16 }
 0x1bd   : > { %v5434_v11 = vsel %vm15567_vm11, %v5427_v8, %v5432_v18  ;;  %v7969_v2 = vsel %vm3162_vm9, %v7968_v55, %v7967_v44  ;;  %v5448_v26 = vshll.u32 %v16190_v37, 16  ;;  %v5451_v63 = vshrl.u32 %v16190_v37, 16 }
 0x1be   : > { %v5456_v13 = vshll.u32 %v16210_v7, 16  ;;  %v8286_v46 = vpack.c.b16 %v7969_v2, %v7955_v48  ;;  %v5442_v57 = vsel %vm15567_vm11, %v5435_v51, %v5440_v9  ;;  %v5459_v62 = vshrl.u32 %v16210_v7, 16 }
 0x1bf   : > { %v5464_v24 = vshll.u32 %v16214_v33, 16  ;;  %v5450_v21 = vsel %vm15567_vm11, %v5443_v29, %v5448_v26  ;;  %v5467_v25 = vshrl.u32 %v16214_v33, 16  ;;  %v5472_v37 = vshll.u32 %v16230_v23, 16  ;;  %v14547_v29 = vld [vmem:[#allocation10 + $0x1c0] sm:$0xff]  }
 0x1c0   : > { %v5458_v61 = vsel %vm15567_vm11, %v5451_v63, %v5456_v13  ;;  %8495 = vmatprep.mubr.bf16.mxu0 %v8286_v46  ;;  %v5481_v58 = vshll.u32 %v16233_v35, 16  ;;  %v5484_v7 = vshrl.u32 %v16233_v35, 16  ;;  %v5489_v53 = vshll.u32 %v16240_v45, 16  ;;  %13882 = vmatprep.subr.bf16.mxu0 %v14547_v29 }
 0x1c1   : > { %v5466_v1 = vsel %vm15567_vm11, %v5459_v62, %v5464_v24  ;;  %v5474_v43 = vsel %vm15567_vm11, %v5467_v25, %v5472_v37  ;;  %v5492_v19 = vshrl.u32 %v16240_v45, 16  ;;  %v5497_v36 = vshll.u32 %v16248_v14, 16 }
 0x1c2   : > { %v5500_v33 = vshrl.u32 %v16248_v14, 16  ;;  %v5483_v3 = vsel %vm15567_vm11, %v16192_v30, %v5481_v58  ;;  %v5491_v27 = vsel %vm15567_vm11, %v5484_v7, %v5489_v53  ;;  %v5505_v35 = vshll.u32 %v16257_v54, 16 }
 0x1c3   : > { %v5508_v34 = vshrl.u32 %v16257_v54, 16  ;;  %v5499_v22 = vsel %vm15567_vm11, %v5492_v19, %v5497_v36  ;;  %v5513_v45 = vshll.u32 %v16251_v40, 16  ;;  %v5516_v42 = vshrl.u32 %v16251_v40, 16 }
 0x1c4   : > { %v5521_v14 = vshll.u32 %v16260_v20, 16  ;;  %v5507_v15 = vsel %vm15567_vm11, %v5500_v33, %v5505_v35  ;;  %v5524_v30 = vshrl.u32 %v16260_v20, 16  ;;  %v5529_v52 = vshll.u32 %v16266_v41, 16 }
 0x1c5   : > { %v5532_v4 = vshrl.u32 %v16266_v41, 16  ;;  %v5515_v54 = vsel %vm15567_vm11, %v5508_v34, %v5513_v45  ;;  %v5537_v60 = vshll.u32 %v16274_v10, 16  ;;  %v6308_v40 = vrot.slane %v5418_v47, %v15380_v56 }
 0x1c6   : > { %v5523_v55 = vsel %vm15567_vm11, %v5516_v42, %v5521_v14  ;;  %v5531_v32 = vsel %vm15567_vm11, %v5524_v30, %v5529_v52  ;;  %v6322_v28 = vrot.slane %v5426_v31, %v15380_v56  ;;  %v6336_v20 = vrot.slane %v5434_v11, %v15380_v56 }
 0x1c7   : > { %v6350_v0 = vrot.slane %v5442_v57, %v15380_v56  ;;  %v5539_v41 = vsel %vm15567_vm11, %v5532_v4, %v5537_v60  ;;  %v6315_v59 = vrot.slane %v6308_v40, %v15380_v56  ;;  %v6364_v49 = vrot.slane %v5450_v21, %v15380_v56 }
 0x1c8   : > { %v6378_v39 = vrot.slane %v5458_v61, %v15380_v56  ;;  %v16404_v8 = vrot.slane %v6322_v28, %v15380_v56  ;;  %v16407_v12 = vrot.slane %v6336_v20, %v15380_v56  ;;  %v6392_v47 = vrot.slane %v5466_v1, %v15380_v56 }
 0x1c9   : > { %v16410_v5 = vrot.slane %v6350_v0, %v15380_v56  ;;  %v16414_v18 = vrot.slane %v6364_v49, %v15380_v56  ;;  %v6406_v50 = vrot.slane %v5474_v43, %v15380_v56  ;;  %v6420_v31 = vrot.slane %v5483_v3, %v15380_v56 }
 0x1ca   : > { %v16417_v48 = vrot.slane %v6378_v39, %v15380_v56  ;;  %v16422_v51 = vrot.slane %v6392_v47, %v15380_v56  ;;  %v6434_v44 = vrot.slane %v5491_v27, %v15380_v56  ;;  %v6448_v11 = vrot.slane %v5499_v22, %v15380_v56 }
 0x1cb   : > { %v6462_v9 = vrot.slane %v5507_v15, %v15380_v56  ;;  %v16428_v2 = vrot.slane %v6406_v50, %v15380_v56  ;;  %v6427_v26 = vrot.slane %v6420_v31, %v15380_v56  ;;  %v6476_v63 = vrot.slane %v5515_v54, %v15380_v56  ;;  %v13338_v15 = vld.sshfl [vmem:[#allocation2 + $0xd4] sm:$0x33 pattern:$0x75316420] }
 0x1cc   : > { %v6490_v13 = vrot.slane %v5523_v55, %v15380_v56  ;;  %v16434_v46 = vrot.slane %v6434_v44, %v15380_v56  ;;  %v16437_v57 = vrot.slane %v6448_v11, %v15380_v56  ;;  %v6504_v24 = vrot.slane %v5531_v32, %v15380_v56  ;;  %v13339_v55 = vld.sshfl [vmem:[#allocation2 + $0xd8] sm:$0x33 pattern:$0x75316420] }
 0x1cd   : > { %19608 = vst [vmem:[#allocation26_spill] sm:$0xff] %v16428_v2  ;;  %v16440_v62 = vrot.slane %v6462_v9, %v15380_v56  ;;  %v16444_v21 = vrot.slane %v6476_v63, %v15380_v56  ;;  %v6518_v25 = vrot.slane %v5539_v41, %v15380_v56  ;;  %v6782_v37 = vunpack.c.l.b16 %v6315_v59 }
 0x1ce   : > { %19609 = vst [vmem:[#allocation27_spill] sm:$0xff] %v16434_v46  ;;  %19610 = vst [vmem:[#allocation28_spill] sm:$0xff] %v16437_v57  ;;  %v16447_v61 = vrot.slane %v6490_v13, %v15380_v56  ;;  %v16451_v1 = vrot.slane %v6504_v24, %v15380_v56  ;;  %v19500_v58 = vunpack.c.l.b16 %v16404_v8  ;;  %v19502_v7 = vunpack.c.l.b16 %v16407_v12 }
 0x1cf   : > { %19611 = vst [vmem:[#allocation29_spill] sm:$0xff] %v16440_v62  ;;  %19612 = vst [vmem:[#allocation30_spill] sm:$0xff] %v16444_v21  ;;  %v19501_v53 = vunpack.c.l.b16 %v16410_v5  ;;  %v16457_v43 = vrot.slane %v6518_v25, %v15380_v56  ;;  %v19499_v19 = vunpack.c.l.b16 %v16414_v18  ;;  %v19498_v36 = vunpack.c.l.b16 %v16417_v48 }
 0x1d0   : > { %19613 = vst [vmem:[#allocation31_spill] sm:$0xff] %v16447_v61  ;;  %19614 = vst [vmem:[#allocation32_spill] sm:$0xff] %v16451_v1  ;;  %v19497_v33 = vunpack.c.l.b16 %v16422_v51  ;;  %v19496_v3 = vunpack.c.l.b16 %v16428_v2  ;;  %v6790_v27 = vunpack.c.l.b16 %v6427_v26  ;;  %v19491_v35 = vunpack.c.l.b16 %v16434_v46 }
 0x1d1   : > { %19615 = vst [vmem:[#allocation33_spill] sm:$0xff] %v16457_v43  ;;  %v19495_v34 = vunpack.c.l.b16 %v16437_v57  ;;  %v19494_v22 = vunpack.c.l.b16 %v16440_v62  ;;  %v19493_v45 = vunpack.c.l.b16 %v16444_v21  ;;  %v19492_v42 = vunpack.c.l.b16 %v16447_v61 }
 0x1d2   : > { %v19490_v14 = vunpack.c.l.b16 %v16451_v1  ;;  %v19489_v30 = vunpack.c.l.b16 %v16457_v43  ;;  %v6870_v52 = vrot.slane %v19500_v58, 7  ;;  %v6872_v4 = vrot.slane %v19502_v7, 6 }
 0x1d3   : > { %v6874_v54 = vrot.slane %v19501_v53, 5  ;;  %v6876_v60 = vrot.slane %v19499_v19, 4  ;;  %v6878_v40 = vrot.slane %v19498_v36, 3  ;;  %v6880_v32 = vrot.slane %v19497_v33, 2 }
 0x1d4   : > { %v6882_v28 = vrot.slane %v19496_v3, 1  ;;  %v6871_v20 = vsel %vm3144_vm13, %v6870_v52, %v6782_v37  ;;  %v6884_v0 = vrot.slane %v19491_v35, 7  ;;  %v6886_v41 = vrot.slane %v19495_v34, 6 }
 0x1d5   : > { %v6888_v59 = vrot.slane %v19494_v22, 5  ;;  %v6873_v49 = vsel %vm3147_vm15, %v6872_v4, %v6871_v20  ;;  %v6890_v39 = vrot.slane %v19493_v45, 4  ;;  %v6892_v47 = vrot.slane %v19492_v42, 3 }
 0x1d6   : > { %v6894_v50 = vrot.slane %v19490_v14, 2  ;;  %v6875_v31 = vsel %vm428_vm1, %v6874_v54, %v6873_v49  ;;  %v6885_v44 = vsel %vm3144_vm13, %v6884_v0, %v6790_v27  ;;  %v6896_v11 = vrot.slane %v19489_v30, 1  ;;  %v13341_v37 = vld.sshfl [vmem:[#allocation2 + $0xf4] sm:$0x33 pattern:$0x75316420] }
 0x1d7   : > { %v5045_v9 = vcombine.high %v13338_v15, %v13338_v15  ;;  %v6877_v29 = vsel %vm3153_vm0, %v6876_v60, %v6875_v31  ;;  %v6887_v26 = vsel %vm3147_vm15, %v6886_v41, %v6885_v44  ;;  %v16505_v63 = vrot.slane %v13338_v15, %v15380_v56  ;;  %v13342_v60 = vld.sshfl [vmem:[#allocation2 + $0xf8] sm:$0x33 pattern:$0x75316420] }
 0x1d8   : > { %v5069_v13 = vcombine.high %v13339_v55, %v13339_v55  ;;  %v6879_v24 = vsel %vm3156_vm6, %v6878_v40, %v6877_v29  ;;  %v6889_v25 = vsel %vm428_vm1, %v6888_v59, %v6887_v26  ;;  %v16513_v27 = vrot.slane %v13339_v55, %v15380_v56 }
 0x1d9   : > { %v16510_v52 = vrot.slane %v5045_v9, %v15380_v56  ;;  %v6881_v4 = vsel %vm3159_vm8, %v6880_v32, %v6879_v24  ;;  %v6891_v54 = vsel %vm3153_vm0, %v6890_v39, %v6889_v25  ;;  %v16519_v15 = vcombine.high %v16505_v63, %v16505_v63 }
 0x1da   : > { %v16522_v40 = vrot.slane %v5069_v13, %v15380_v56  ;;  %v6883_v20 = vsel %vm3162_vm9, %v6882_v28, %v6881_v4  ;;  %v6893_v0 = vsel %vm3156_vm6, %v6892_v47, %v6891_v54  ;;  %v16532_v32 = vcombine.high %v16513_v27, %v16513_v27 }
 0x1db   : > { %v16528_v55 = vcombine.high %v16510_v52, %v16510_v52  ;;  %v6895_v41 = vsel %vm3159_vm8, %v6894_v50, %v6893_v0  ;;  %v5109_v49 = vcombine.high %v13341_v37, %v13341_v37  ;;  %v16540_v39 = vrot.slane %v13341_v37, %v15380_v56 }
 0x1dc   : > { %v16537_v59 = vcombine.high %v16522_v40, %v16522_v40  ;;  %v6897_v28 = vsel %vm3162_vm9, %v6896_v11, %v6895_v41  ;;  %v5133_v47 = vcombine.high %v13342_v60, %v13342_v60  ;;  %v16544_v31 = vrot.slane %v13342_v60, %v15380_v56 }
 0x1dd   : > { %v7604_v44 = vrot.slane %v16505_v63, %v15380_v56  ;;  %v8285_v9 = vpack.c.b16 %v6897_v28, %v6883_v20  ;;  %v16549_v50 = vrot.slane %v5109_v49, %v15380_v56  ;;  %v16553_v29 = vcombine.high %v16540_v39, %v16540_v39 }
 0x1de   : > { %v7618_v26 = vrot.slane %v16510_v52, %v15380_v56  ;;  %v16558_v11 = vrot.slane %v5133_v47, %v15380_v56  ;;  %v16562_v13 = vcombine.high %v16544_v31, %v16544_v31  ;;  %v7632_v25 = vrot.slane %v16519_v15, %v15380_v56 }
 0x1df   : > { %v7611_v24 = vrot.slane %v7604_v44, %v15380_v56  ;;  %8496 = vmatmul.mubr.bf16.gmra.mrb[8].mxu0 %v8285_v9  ;;  %v16569_v37 = vcombine.high %v16549_v50, %v16549_v50  ;;  %v7646_v54 = vrot.slane %v16528_v55, %v15380_v56  ;;  %v7660_v60 = vrot.slane %v16513_v27, %v15380_v56 }
 0x1e0   : > { %v7625_v4 = vrot.slane %v7618_v26, %v15380_v56  ;;  %v16578_v20 = vcombine.high %v16558_v11, %v16558_v11  ;;  %v7639_v0 = vrot.slane %v7632_v25, %v15380_v56  ;;  %v7674_v41 = vrot.slane %v16522_v40, %v15380_v56 }
 0x1e1   : > { %v7688_v49 = vrot.slane %v16532_v32, %v15380_v56  ;;  %v7653_v28 = vrot.slane %v7646_v54, %v15380_v56  ;;  %v7667_v47 = vrot.slane %v7660_v60, %v15380_v56  ;;  %v7702_v44 = vrot.slane %v16537_v59, %v15380_v56 }
 0x1e2   : > { %v7716_v9 = vrot.slane %v16540_v39, %v15380_v56  ;;  %v7681_v26 = vrot.slane %v7674_v41, %v15380_v56  ;;  %v7730_v30 = vrot.slane %v16549_v50, %v15380_v56  ;;  %v7744_v14 = vrot.slane %v16553_v29, %v15380_v56 }
 0x1e3   : > { %v7695_v25 = vrot.slane %v7688_v49, %v15380_v56  ;;  %v7709_v54 = vrot.slane %v7702_v44, %v15380_v56  ;;  %v7758_v35 = vrot.slane %v16569_v37, %v15380_v56  ;;  %v7772_v42 = vrot.slane %v16544_v31, %v15380_v56 }
 0x1e4   : > { %v7723_v60 = vrot.slane %v7716_v9, %v15380_v56  ;;  %v7737_v41 = vrot.slane %v7730_v30, %v15380_v56  ;;  %v7751_v49 = vrot.slane %v7744_v14, %v15380_v56  ;;  %v7786_v45 = vrot.slane %v16558_v11, %v15380_v56 }
 0x1e5   : > { %v7800_v22 = vrot.slane %v16562_v13, %v15380_v56  ;;  %v7765_v44 = vrot.slane %v7758_v35, %v15380_v56  ;;  %v7779_v9 = vrot.slane %v7772_v42, %v15380_v56  ;;  %v7814_v34 = vrot.slane %v16578_v20, %v15380_v56 }
 0x1e6   : > { %v7870_v3 = vunpack.c.l.b16 %v7611_v24  ;;  %v7793_v33 = vrot.slane %v7786_v45, %v15380_v56  ;;  %v7871_v36 = vunpack.c.l.b16 %v7625_v4  ;;  %v7872_v14 = vunpack.c.l.b16 %v7639_v0  ;;  %v13340_v4 = vld.sshfl [vmem:[#allocation2 + $0xf0] sm:$0x33 pattern:$0x75316420] }
 0x1e7   : > { %v7807_v30 = vrot.slane %v7800_v22, %v15380_v56  ;;  %v7821_v19 = vrot.slane %v7814_v34, %v15380_v56  ;;  %v7873_v58 = vunpack.c.l.b16 %v7653_v28  ;;  %v7874_v53 = vunpack.c.l.b16 %v7667_v47  ;;  %v13337_v22 = vld.sshfl [vmem:[#allocation2 + $0xd0] sm:$0x33 pattern:$0x75316420] }
 0x1e8   : > { %v7875_v7 = vunpack.c.l.b16 %v7681_v26  ;;  %v7876_v17 = vunpack.c.l.b16 %v7695_v25  ;;  %v7877_v43 = vunpack.c.l.b16 %v7709_v54  ;;  %v7878_v35 = vunpack.c.l.b16 %v7723_v60 }
 0x1e9   : > { %v7879_v1 = vunpack.c.l.b16 %v7737_v41  ;;  %v7880_v42 = vunpack.c.l.b16 %v7751_v49  ;;  %v7881_v46 = vunpack.c.l.b16 %v7765_v44  ;;  %v7882_v61 = vunpack.c.l.b16 %v7779_v9 }
 0x1ea   : > { %v7883_v21 = vunpack.c.l.b16 %v7793_v33  ;;  %v7884_v24 = vunpack.c.l.b16 %v7807_v30  ;;  %v7885_v62 = vunpack.c.l.b16 %v7821_v19  ;;  %v7970_v45 = vrot.slane %v7871_v36, 7 }
 0x1eb   : > { %v7972_v57 = vrot.slane %v7872_v14, 6  ;;  %v7974_v0 = vrot.slane %v7873_v58, 5  ;;  %v7976_v2 = vrot.slane %v7874_v53, 4  ;;  %v7978_v34 = vrot.slane %v7875_v7, 3 }
 0x1ec   : > { %v7980_v28 = vrot.slane %v7876_v17, 2  ;;  %v7971_v47 = vsel %vm3144_vm13, %v7970_v45, %v7870_v3  ;;  %v7982_v26 = vrot.slane %v7877_v43, 1  ;;  %v7984_v25 = vrot.slane %v7879_v1, 7 }
 0x1ed   : > { %v7986_v54 = vrot.slane %v7880_v42, 6  ;;  %v7973_v60 = vsel %vm3147_vm15, %v7972_v57, %v7971_v47  ;;  %v7988_v41 = vrot.slane %v7881_v46, 5  ;;  %v7990_v49 = vrot.slane %v7882_v61, 4 }
 0x1ee   : > { %v7992_v33 = vrot.slane %v7883_v21, 3  ;;  %v7975_v19 = vsel %vm428_vm1, %v7974_v0, %v7973_v60  ;;  %v7985_v36 = vsel %vm3144_vm13, %v7984_v25, %v7878_v35  ;;  %v7994_v44 = vrot.slane %v7884_v24, 2  ;;  %v14549_v21 = vld [vmem:[#allocation10 + $0x200] sm:$0xff]  }
 0x1ef   : > { %v7996_v9 = vrot.slane %v7885_v62, 1  ;;  %v7977_v58 = vsel %vm3153_vm0, %v7976_v2, %v7975_v19  ;;  %v7987_v17 = vsel %vm3147_vm15, %v7986_v54, %v7985_v36  ;;  %v5029_v7 = vcombine.high %v13337_v22, %v13337_v22  ;;  %14150 = vmatprep.subr.bf16.mxu1 %v14549_v21 }
 0x1f0   : > { %v5093_v53 = vcombine.high %v13340_v4, %v13340_v4  ;;  %v7979_v1 = vsel %vm3156_vm6, %v7978_v34, %v7977_v58  ;;  %v7989_v43 = vsel %vm428_vm1, %v7988_v41, %v7987_v17  ;;  %v5546_v46 = vshll.u32 %v16505_v63, 16 }
 0x1f1   : > { %v5549_v57 = vshrl.u32 %v16505_v63, 16  ;;  %v7981_v61 = vsel %vm3159_vm8, %v7980_v28, %v7979_v1  ;;  %v7991_v3 = vsel %vm3153_vm0, %v7990_v49, %v7989_v43  ;;  %v5036_v62 = vrot.slane %v5029_v7, %v15380_v56 }
 0x1f2   : > { %v5100_v2 = vrot.slane %v5093_v53, %v15380_v56  ;;  %v7983_v30 = vsel %vm3162_vm9, %v7982_v26, %v7981_v61  ;;  %v7993_v14 = vsel %vm3156_vm6, %v7992_v33, %v7991_v3  ;;  %v5554_v35 = vshll.u32 %v16510_v52, 16 }
 0x1f3   : > { %v5557_v42 = vshrl.u32 %v16510_v52, 16  ;;  %v7995_v63 = vsel %vm3159_vm8, %v7994_v44, %v7993_v14  ;;  %v5037_v24 = vcombine.high %v5036_v62, %v5036_v62  ;;  %v5562_v22 = vshll.u32 %v16519_v15, 16 }
 0x1f4   : > { %v5101_v45 = vcombine.high %v5100_v2, %v5100_v2  ;;  %v7997_v4 = vsel %vm3162_vm9, %v7996_v9, %v7995_v63  ;;  %v5556_v0 = vsel %vm15567_vm11, %v5549_v57, %v5554_v35  ;;  %v5565_v34 = vshrl.u32 %v16519_v15, 16 }
 0x1f5   : > { %v5570_v28 = vshll.u32 %v16528_v55, 16  ;;  %v8289_v47 = vpack.c.b16 %v7997_v4, %v7983_v30  ;;  %v5541_v26 = vshrl.u32 %v5037_v24, 16  ;;  %v5564_v52 = vsel %vm15567_vm11, %v5557_v42, %v5562_v22 }
 0x1f6   : > { %v5573_v25 = vshrl.u32 %v16528_v55, 16  ;;  %v5578_v60 = vshll.u32 %v16513_v27, 16  ;;  %v5581_v41 = vshrl.u32 %v16513_v27, 16  ;;  %v5586_v49 = vshll.u32 %v16522_v40, 16 }
 0x1f7   : > { %v5572_v54 = vsel %vm15567_vm11, %v5565_v34, %v5570_v28  ;;  %8503 = vmatprep.mubr.bf16.mxu0 %v8289_v47  ;;  %v5548_v15 = vsel %vm15567_vm11, %v5541_v26, %v5546_v46  ;;  %v5589_v33 = vshrl.u32 %v16522_v40, 16  ;;  %v5594_v19 = vshll.u32 %v16532_v32, 16 }
 0x1f8   : > { %v5597_v36 = vshrl.u32 %v16532_v32, 16  ;;  %v5580_v55 = vsel %vm15567_vm11, %v5573_v25, %v5578_v60  ;;  %v5588_v44 = vsel %vm15567_vm11, %v5581_v41, %v5586_v49  ;;  %v5602_v27 = vshll.u32 %v16537_v59, 16 }
 0x1f9   : > { %v5606_v9 = vshrl.u32 %v5101_v45, 16  ;;  %v5596_v58 = vsel %vm15567_vm11, %v5589_v33, %v5594_v19  ;;  %v5611_v17 = vshll.u32 %v16540_v39, 16  ;;  %v5614_v40 = vshrl.u32 %v16540_v39, 16 }
 0x1fa   : > { %v5619_v7 = vshll.u32 %v16549_v50, 16  ;;  %v5604_v32 = vsel %vm15567_vm11, %v5597_v36, %v5602_v27  ;;  %v5622_v53 = vshrl.u32 %v16549_v50, 16  ;;  %v5627_v1 = vshll.u32 %v16553_v29, 16 }
 0x1fb   : > { %v5630_v43 = vshrl.u32 %v16553_v29, 16  ;;  %v5613_v46 = vsel %vm15567_vm11, %v5606_v9, %v5611_v17  ;;  %v5635_v21 = vshll.u32 %v16569_v37, 16  ;;  %v5638_v39 = vshrl.u32 %v16569_v37, 16 }
 0x1fc   : > { %v5621_v57 = vsel %vm15567_vm11, %v5614_v40, %v5619_v7  ;;  %v5629_v61 = vsel %vm15567_vm11, %v5622_v53, %v5627_v1  ;;  %v5643_v3 = vshll.u32 %v16544_v31, 16  ;;  %v5646_v50 = vshrl.u32 %v16544_v31, 16 }
 0x1fd   : > { %v5651_v62 = vshll.u32 %v16558_v11, 16  ;;  %v5637_v29 = vsel %vm15567_vm11, %v5630_v43, %v5635_v21  ;;  %v5654_v2 = vshrl.u32 %v16558_v11, 16  ;;  %v5659_v30 = vshll.u32 %v16562_v13, 16 }
 0x1fe   : > { %v5662_v14 = vshrl.u32 %v16562_v13, 16  ;;  %v5645_v37 = vsel %vm15567_vm11, %v5638_v39, %v5643_v3  ;;  %v5667_v42 = vshll.u32 %v16578_v20, 16  ;;  %v6532_v31 = vrot.slane %v5548_v15, %v15380_v56 }
 0x1ff   : > { %v5653_v35 = vsel %vm15567_vm11, %v5646_v50, %v5651_v62  ;;  %v5661_v63 = vsel %vm15567_vm11, %v5654_v2, %v5659_v30  ;;  %v6546_v24 = vrot.slane %v5556_v0, %v15380_v56  ;;  %v6560_v11 = vrot.slane %v5564_v52, %v15380_v56 }
 0x200   : > { %v6574_v45 = vrot.slane %v5572_v54, %v15380_v56  ;;  %v5669_v13 = vsel %vm15567_vm11, %v5662_v14, %v5667_v42  ;;  %v6539_v22 = vrot.slane %v6532_v31, %v15380_v56  ;;  %v6588_v4 = vrot.slane %v5580_v55, %v15380_v56 }
 0x201   : > { %v6602_v34 = vrot.slane %v5588_v44, %v15380_v56  ;;  %v16702_v28 = vrot.slane %v6546_v24, %v15380_v56  ;;  %v16705_v47 = vrot.slane %v6560_v11, %v15380_v56  ;;  %v6616_v26 = vrot.slane %v5596_v58, %v15380_v56 }
 0x202   : > { %v16708_v0 = vrot.slane %v6574_v45, %v15380_v56  ;;  %v16712_v52 = vrot.slane %v6588_v4, %v15380_v56  ;;  %v6630_v54 = vrot.slane %v5604_v32, %v15380_v56  ;;  %v6644_v60 = vrot.slane %v5613_v46, %v15380_v56 }
 0x203   : > { %v16715_v25 = vrot.slane %v6602_v34, %v15380_v56  ;;  %v16720_v41 = vrot.slane %v6616_v26, %v15380_v56  ;;  %v6658_v49 = vrot.slane %v5621_v57, %v15380_v56  ;;  %v6672_v15 = vrot.slane %v5629_v61, %v15380_v56 }
 0x204   : > { %v6686_v33 = vrot.slane %v5637_v29, %v15380_v56  ;;  %v16726_v19 = vrot.slane %v6630_v54, %v15380_v56  ;;  %v6651_v36 = vrot.slane %v6644_v60, %v15380_v56  ;;  %v6700_v55 = vrot.slane %v5645_v37, %v15380_v56 }
 0x205   : > { %v6714_v44 = vrot.slane %v5653_v35, %v15380_v56  ;;  %v16732_v27 = vrot.slane %v6658_v49, %v15380_v56  ;;  %v16735_v9 = vrot.slane %v6672_v15, %v15380_v56  ;;  %v6728_v17 = vrot.slane %v5661_v63, %v15380_v56 }
 0x206   : > { %v16738_v58 = vrot.slane %v6686_v33, %v15380_v56  ;;  %v16742_v40 = vrot.slane %v6700_v55, %v15380_v56  ;;  %v6742_v32 = vrot.slane %v5669_v13, %v15380_v56  ;;  %v6798_v53 = vunpack.c.l.b16 %v6539_v22 }
 0x207   : > { %v16745_v7 = vrot.slane %v6714_v44, %v15380_v56  ;;  %v16749_v1 = vrot.slane %v6728_v17, %v15380_v56  ;;  %v6799_v43 = vunpack.c.l.b16 %v16702_v28  ;;  %v6800_v46 = vunpack.c.l.b16 %v16705_v47 }
 0x208   : > { %v6801_v57 = vunpack.c.l.b16 %v16708_v0  ;;  %v16755_v21 = vrot.slane %v6742_v32, %v15380_v56  ;;  %v6802_v39 = vunpack.c.l.b16 %v16712_v52  ;;  %v6803_v61 = vunpack.c.l.b16 %v16715_v25 }
 0x209   : > { %v6804_v3 = vunpack.c.l.b16 %v16720_v41  ;;  %v6805_v50 = vunpack.c.l.b16 %v16726_v19  ;;  %v6806_v62 = vunpack.c.l.b16 %v6651_v36  ;;  %v6807_v29 = vunpack.c.l.b16 %v16732_v27 }
 0x20a   : > { %v6808_v2 = vunpack.c.l.b16 %v16735_v9  ;;  %v6809_v30 = vunpack.c.l.b16 %v16738_v58  ;;  %v6810_v14 = vunpack.c.l.b16 %v16742_v40  ;;  %v6811_v37 = vunpack.c.l.b16 %v16745_v7 }
 0x20b   : > { %v19513_v35 = vunpack.c.l.b16 %v16749_v1  ;;  %v6813_v42 = vunpack.c.l.b16 %v16755_v21  ;;  %v6898_v31 = vrot.slane %v6799_v43, 7  ;;  %v6900_v63 = vrot.slane %v6800_v46, 6 }
 0x20c   : > { %v6902_v24 = vrot.slane %v6801_v57, 5  ;;  %v6904_v11 = vrot.slane %v6802_v39, 4  ;;  %v6906_v45 = vrot.slane %v6803_v61, 3  ;;  %v6908_v13 = vrot.slane %v6804_v3, 2 }
 0x20d   : > { %v6910_v22 = vrot.slane %v6805_v50, 1  ;;  %v6899_v4 = vsel %vm3144_vm13, %v6898_v31, %v6798_v53  ;;  %v6912_v34 = vrot.slane %v6807_v29, 7  ;;  %v6914_v26 = vrot.slane %v6808_v2, 6 }
 0x20e   : > { %v6916_v54 = vrot.slane %v6809_v30, 5  ;;  %v6901_v60 = vsel %vm3147_vm15, %v6900_v63, %v6899_v4  ;;  %v6918_v49 = vrot.slane %v6810_v14, 4  ;;  %v6920_v15 = vrot.slane %v6811_v37, 3 }
 0x20f   : > { %v6922_v33 = vrot.slane %v19513_v35, 2  ;;  %v6903_v36 = vsel %vm428_vm1, %v6902_v24, %v6901_v60  ;;  %v6913_v55 = vsel %vm3144_vm13, %v6912_v34, %v6806_v62  ;;  %v6924_v44 = vrot.slane %v6813_v42, 1 }
 0x210   : > { %v5822_v17 = vshrl.u32 %v16230_v23, 16  ;;  %v6905_v32 = vsel %vm3153_vm0, %v6904_v11, %v6903_v36  ;;  %v6915_v53 = vsel %vm3147_vm15, %v6914_v26, %v6913_v55  ;;  %v5830_v31 = vshrl.u32 %v16274_v10, 16 }
 0x211   : > { %v19616_v63 = vunpack.c.l.b16 %v16407_v12  ;;  %v6907_v35 = vsel %vm3156_vm6, %v6906_v45, %v6905_v32  ;;  %v6917_v24 = vsel %vm428_vm1, %v6916_v54, %v6915_v53  ;;  %v19617_v34 = vunpack.c.l.b16 %v16410_v5 }
 0x212   : > { %v5829_v62 = vsel %vm15567_vm11, %v5822_v17, %v16178_v38  ;;  %v6909_v11 = vsel %vm3159_vm8, %v6908_v13, %v6907_v35  ;;  %v6919_v26 = vsel %vm3153_vm0, %v6918_v49, %v6917_v24  ;;  %v5837_v10 = vsel %vm15567_vm11, %v5830_v31, %v16180_v16 }
 0x213   : > { %v8174_v4 = vrot.slane %v19616_v63, 7  ;;  %v8176_v23 = vrot.slane %v19617_v34, 6  ;;  %v8060_v12 = vrot.slane %v5829_v62, %v15380_v56  ;;  %v6911_v45 = vsel %vm3162_vm9, %v6910_v22, %v6909_v11  ;;  %v19622_v63 = vld [vmem:[#allocation26_spill] sm:$0xff] }
 0x214   : > { %v6921_v54 = vsel %vm3156_vm6, %v6920_v15, %v6919_v26  ;;  %v8074_v60 = vrot.slane %v5837_v10, %v15380_v56  ;;  %v19618_v38 = vunpack.c.l.b16 %v16404_v8  ;;  %v19619_v16 = vunpack.c.l.b16 %v16414_v18  ;;  %v13413_v62 = vld.sshfl [vmem:[#allocation2 + $0xdc] sm:$0x1 pattern:$0x75316420]  ;;  %v19626_v26 = vld [vmem:[#allocation29_spill] sm:$0xff] }
 0x215   : > { %v6923_v35 = vsel %vm3159_vm8, %v6922_v33, %v6921_v54  ;;  %v8067_v13 = vrot.slane %v8060_v12, %v15380_v56  ;;  %v19620_v15 = vunpack.c.l.b16 %v16417_v48  ;;  %v19621_v8 = vunpack.c.l.b16 %v16422_v51  ;;  %v13414_v12 = vld.sshfl [vmem:[#allocation2 + $0xfc] sm:$0x1 pattern:$0x75316420]  ;;  %v19628_v54 = vld [vmem:[#allocation30_spill] sm:$0xff] }
 0x216   : > { %v8175_v5 = vsel %vm3144_vm13, %v8174_v4, %v19618_v38  ;;  %v8178_v36 = vrot.slane %v19619_v16, 5  ;;  %v6925_v55 = vsel %vm3162_vm9, %v6924_v44, %v6923_v35  ;;  %v8081_v22 = vrot.slane %v8074_v60, %v15380_v56  ;;  %v19624_v44 = vld [vmem:[#allocation28_spill] sm:$0xff]  ;;  %v19632_v16 = vld [vmem:[#allocation27_spill] sm:$0xff] }
 0x217   : > { %v8177_v49 = vsel %vm3147_vm15, %v8176_v23, %v8175_v5  ;;  %v8180_v17 = vrot.slane %v19620_v15, 4  ;;  %v8182_v32 = vrot.slane %v19621_v8, 3  ;;  %v8288_v53 = vpack.c.b16 %v6925_v55, %v6911_v45  ;;  %v19630_v5 = vld [vmem:[#allocation31_spill] sm:$0xff]  ;;  %v19636_v8 = vld [vmem:[#allocation33_spill] sm:$0xff] }
 0x218   : > { %v8114_v31 = vunpack.c.l.b16 %v8067_v13  ;;  %v8179_v33 = vsel %vm428_vm1, %v8178_v36, %v8177_v49  ;;  %v19623_v4 = vunpack.c.l.b16 %v19622_v63  ;;  %v8115_v18 = vunpack.c.l.b16 %v8081_v22  ;;  %v19634_v22 = vld [vmem:[#allocation32_spill] sm:$0xff] }
 0x219   : > { %v8181_v34 = vsel %vm3153_vm0, %v8180_v17, %v8179_v33  ;;  %v19625_v23 = vunpack.c.l.b16 %v19624_v44  ;;  %v19627_v48 = vunpack.c.l.b16 %v19626_v26  ;;  %8504 = vmatmul.mubr.bf16.gmra.mrb[12].mxu0 %v8288_v53  ;;  %v19629_v60 = vunpack.c.l.b16 %v19628_v54 }
 0x21a   : > { %v8184_v24 = vrot.slane %v19623_v4, 2  ;;  %v8183_v51 = vsel %vm3156_vm6, %v8182_v32, %v8181_v34  ;;  %v8186_v45 = vrot.slane %v8114_v31, 1  ;;  %v19631_v35 = vunpack.c.l.b16 %v19630_v5 }
 0x21b   : > { %v8188_v11 = vrot.slane %v19625_v23, 7  ;;  %v8190_v10 = vrot.slane %v19627_v48, 6  ;;  %v8192_v38 = vrot.slane %v19629_v60, 5  ;;  %v19633_v36 = vunpack.c.l.b16 %v19632_v16  ;;  %v558_v60 = vld [vmem:[%s15331_s17 + $0x10] sm:$0xff] }
 0x21c   : > { %v8194_v13 = vrot.slane %v19631_v35, 4  ;;  %v8185_v49 = vsel %vm3159_vm8, %v8184_v24, %v8183_v51  ;;  %v19635_v15 = vunpack.c.l.b16 %v19634_v22  ;;  %v19637_v53 = vunpack.c.l.b16 %v19636_v8  ;;  %v13217_v22 = vld.sshfl [vmem:[#allocation2 + $0x8] sm:$0x33 pattern:$0x75316420] }
 0x21d   : > { %v8189_v55 = vsel %vm3144_vm13, %v8188_v11, %v19633_v36  ;;  %v8187_v32 = vsel %vm3162_vm9, %v8186_v45, %v8185_v49  ;;  %v8200_v63 = vrot.slane %v8115_v18, 1  ;;  %v5775_v4 = vrot.slane %v13413_v62, %v15380_v56 }
 0x21e   : > { %v8196_v17 = vrot.slane %v19635_v15, 3  ;;  %v8198_v33 = vrot.slane %v19637_v53, 2  ;;  %v8191_v31 = vsel %vm3147_vm15, %v8190_v10, %v8189_v55  ;;  %v5789_v24 = vrot.slane %v13414_v12, %v15380_v56 }
 0x21f   : > { %v8193_v34 = vsel %vm428_vm1, %v8192_v38, %v8191_v31  ;;  %v5838_v44 = vshrl.u32 %v16537_v59, 16  ;;  %v5846_v23 = vshrl.u32 %v16578_v20, 16  ;;  %v5843_v26 = vshll.u32 %v5775_v4, 16  ;;  %v559_v38 = vld [vmem:[%s15331_s17 + $0x18] sm:$0xff] }
 0x220   : > { %v8195_v11 = vsel %vm3153_vm0, %v8194_v13, %v8193_v34  ;;  %v8202_v48 = vrot.slane %v6800_v46, 7  ;;  %v8204_v10 = vrot.slane %v6801_v57, 6  ;;  %v5851_v62 = vshll.u32 %v5789_v24, 16 }
 0x221   : > { %v8197_v18 = vsel %vm3156_vm6, %v8196_v17, %v8195_v11  ;;  %v8206_v51 = vrot.slane %v6802_v39, 5  ;;  %v8208_v59 = vrot.slane %v6803_v61, 4  ;;  %v5845_v12 = vsel %vm15567_vm11, %v5838_v44, %v5843_v26  ;;  %v13216_v13 = vld.sshfl [vmem:[#allocation2 + $0x4] sm:$0x33 pattern:$0x75316420] }
 0x222   : > { %v8199_v20 = vsel %vm3159_vm8, %v8198_v33, %v8197_v18  ;;  %v8203_v47 = vsel %vm3144_vm13, %v8202_v48, %v6799_v43  ;;  %v8210_v0 = vrot.slane %v6804_v3, 3  ;;  %v5853_v25 = vsel %vm15567_vm11, %v5846_v23, %v5851_v62  ;;  %v16920_v17 = vld [vmem:[#allocation9] ss:$0 sm:$0xff] }
 0x223   : > { %v8201_v52 = vsel %vm3162_vm9, %v8200_v63, %v8199_v20  ;;  %v8088_v46 = vrot.slane %v5845_v12, %v15380_v56  ;;  %v8205_v57 = vsel %vm3147_vm15, %v8204_v10, %v8203_v47  ;;  %v8102_v61 = vrot.slane %v5853_v25, %v15380_v56 }
 0x224   : > { %v8287_v39 = vpack.c.b16 %v8201_v52, %v8187_v32  ;;  %v8207_v28 = vsel %vm428_vm1, %v8206_v51, %v8205_v57  ;;  %v8212_v43 = vrot.slane %v6805_v50, 2  ;;  %v8216_v45 = vrot.slane %v6808_v2, 7 }
 0x225   : > { %v8095_v41 = vrot.slane %v8088_v46, %v15380_v56  ;;  %v8209_v3 = vsel %vm3153_vm0, %v8208_v59, %v8207_v28  ;;  %v8218_v54 = vrot.slane %v6809_v30, 6  ;;  %v8109_v5 = vrot.slane %v8102_v61, %v15380_v56 }
 0x226   : > { %14122 = vmatprep.mubr.bf16.mxu1 %v8287_v39  ;;  %v8211_v35 = vsel %vm3156_vm6, %v8210_v0, %v8209_v3  ;;  %v8220_v19 = vrot.slane %v6810_v14, 5  ;;  %v8222_v50 = vrot.slane %v6811_v37, 4  ;;  %v8217_v58 = vsel %vm3144_vm13, %v8216_v45, %v6807_v29  ;;  %v16914_v14 = vld [vmem:[#allocation7] ss:$0 sm:$0xff] }
 0x227   : > { %v8116_v49 = vunpack.c.l.b16 %v8095_v41  ;;  %v8213_v9 = vsel %vm3159_vm8, %v8212_v43, %v8211_v35  ;;  %v19638_v2 = vunpack.c.l.b16 %v16749_v1  ;;  %v8117_v16 = vunpack.c.l.b16 %v8109_v5 }
 0x228   : > { %v8219_v36 = vsel %vm3147_vm15, %v8218_v54, %v8217_v58  ;;  %v8226_v40 = vrot.slane %v6813_v42, 2  ;;  %v596_v7 = vmul.f32 %v16914_v14, %v558_v60  ;;  %v597_v27 = vmul.f32 %v16914_v14, %v559_v38  ;;  %v431_v38 = vld [vmem:[#allocation2] sm:$0x8] }
 0x229   : > { %v8224_v30 = vrot.slane %v19638_v2, 3  ;;  %v8214_v37 = vrot.slane %v8116_v49, 1  ;;  %v8221_v55 = vsel %vm428_vm1, %v8220_v19, %v8219_v36  ;;  %v975_v29 = vcombine.high %v13216_v13, %v13216_v13 }
 0x22a   : > { %v8223_v1 = vsel %vm3153_vm0, %v8222_v50, %v8221_v55  ;;  %v8228_v15 = vrot.slane %v8117_v16, 1  ;;  %v634_v8 = vadd.f32 %v16920_v17, %v596_v7  ;;  %v16924_v21 = vrot.slane %v13216_v13, %v15380_v56 }
 0x22b   : > { %v8215_v42 = vsel %vm3162_vm9, %v8214_v37, %v8213_v9  ;;  %v8225_v53 = vsel %vm3156_vm6, %v8224_v30, %v8223_v1  ;;  %v635_v33 = vadd.f32 %v16920_v17, %v597_v27  ;;  %v16930_v32 = vrot.slane %v975_v29, %v15380_v56 }
 0x22c   : > { %v8227_v31 = vsel %vm3159_vm8, %v8226_v40, %v8225_v53  ;;  %v666_v63 = vmax.f32 %v634_v8, 0.0  ;;  %v16935_v4 = vcombine.high %v16924_v21, %v16924_v21  ;;  %v999_v34 = vcombine.high %v13217_v22, %v13217_v22 }
 0x22d   : > { %v8229_v24 = vsel %vm3162_vm9, %v8228_v15, %v8227_v31  ;;  %v667_v44 = vmax.f32 %v635_v33, 0.0  ;;  %v16940_v23 = vcombine.high %v16930_v32, %v16930_v32  ;;  %v16943_v11 = vrot.slane %v13217_v22, %v15380_v56 }
 0x22e   : > { %v8290_v26 = vpack.c.b16 %v8229_v24, %v8215_v42  ;;  %v13739_v48 = vpack.c.bf16 %v666_v63, %v666_v63  ;;  %v16946_v10 = vrot.slane %v999_v34, %v15380_v56  ;;  %v1501_v18 = vshll.u32 %v16935_v4, 16 }
 0x22f   : > { %v13740_v62 = vpack.c.bf16 %v667_v44, %v667_v44  ;;  %v16951_v51 = vcombine.high %v16943_v11, %v16943_v11  ;;  %v1504_v59 = vshrl.u32 %v16935_v4, 16  ;;  %v1509_v20 = vshll.u32 %v16940_v23, 16 }
 0x230   : > { %14123 = vmatmul.mubr.bf16.gmra.mrb[4].mxu1 %v8290_v26  ;;  %827 = vst [vmem:[#allocation2 + $0x24] sm:$0xf] %v13739_v48  ;;  %v16957_v12 = vcombine.high %v16946_v10, %v16946_v10  ;;  %v1512_v47 = vshrl.u32 %v16940_v23, 16  ;;  %v3268_v0 = vrot.slane %v16924_v21, %v15380_v56  ;;  %v3282_v52 = vrot.slane %v16930_v32, %v15380_v56 }
 0x231   : > { %828 = vst [vmem:[#allocation2 + $0x28] sm:$0xf] %v13740_v62  ;;  %v1533_v25 = vshll.u32 %v16951_v51, 16  ;;  %v1536_v46 = vshrl.u32 %v16951_v51, 16  ;;  %v3296_v57 = vrot.slane %v16935_v4, %v15380_v56  ;;  %v3310_v39 = vrot.slane %v16940_v23, %v15380_v56 }
 0x232   : > { %v1541_v61 = vshll.u32 %v16957_v12, 16  ;;  %v3275_v28 = vrot.slane %v3268_v0, %v15380_v56  ;;  %v3289_v43 = vrot.slane %v3282_v52, %v15380_v56  ;;  %v3324_v41 = vrot.slane %v16943_v11, %v15380_v56 }
 0x233   : > { %v3303_v3 = vrot.slane %v3296_v57, %v15380_v56  ;;  %v3317_v45 = vrot.slane %v3310_v39, %v15380_v56  ;;  %v3338_v54 = vrot.slane %v16946_v10, %v15380_v56  ;;  %v3352_v60 = vrot.slane %v16951_v51, %v15380_v56 }
 0x234   : > { %v3331_v5 = vrot.slane %v3324_v41, %v15380_v56  ;;  %v3366_v35 = vrot.slane %v16957_v12, %v15380_v56  ;;  %v4158_v19 = vunpack.c.l.b16 %v3275_v28  ;;  %v4159_v50 = vunpack.c.l.b16 %v3289_v43 }
 0x235   : > { %v3345_v13 = vrot.slane %v3338_v54, %v15380_v56  ;;  %v3359_v49 = vrot.slane %v3352_v60, %v15380_v56  ;;  %v4160_v9 = vunpack.c.l.b16 %v3303_v3  ;;  %v4161_v58 = vunpack.c.l.b16 %v3317_v45 }
 0x236   : > { %v3373_v2 = vrot.slane %v3366_v35, %v15380_v56  ;;  %v4162_v30 = vunpack.c.l.b16 %v3331_v5  ;;  %v4222_v16 = vrot.slane %v4159_v50, 7  ;;  %v432_v40 = vsel %vm15354_vm2, 0, %v431_v38 }
 0x237   : > { %v13219_v7 = vld.sshfl [vmem:[#allocation2 + $0x24] sm:$0x33 pattern:$0x75316420]  ;;  %v4163_v37 = vunpack.c.l.b16 %v3345_v13  ;;  %v4164_v55 = vunpack.c.l.b16 %v3359_v49  ;;  %v4224_v27 = vrot.slane %v4160_v9, 6  ;;  %v4226_v22 = vrot.slane %v4161_v58, 5 }
 0x238   : > { %433 = vst [vmem:[#allocation2] sm:$0x8] %v432_v40  ;;  %v13220_v29 = vld.sshfl [vmem:[#allocation2 + $0x28] sm:$0x33 pattern:$0x75316420]  ;;  %v1039_v1 = vcombine.high %v13219_v7, %v13219_v7  ;;  %v16990_v15 = vrot.slane %v13219_v7, %v15380_v56  ;;  %v4165_v8 = vunpack.c.l.b16 %v3373_v2  ;;  %v4223_v42 = vsel %vm3144_vm13, %v4222_v16, %v4158_v19 }
 0x239   : > { %v1063_v53 = vcombine.high %v13220_v29, %v13220_v29  ;;  %v16994_v33 = vrot.slane %v13220_v29, %v15380_v56  ;;  %v4225_v31 = vsel %vm3147_vm15, %v4224_v27, %v4223_v42  ;;  %v4228_v63 = vrot.slane %v4162_v30, 4 }
 0x23a   : > { %v16998_v34 = vrot.slane %v1039_v1, %v15380_v56  ;;  %v17002_v24 = vcombine.high %v16990_v15, %v16990_v15  ;;  %v3380_v44 = vrot.slane %v16990_v15, %v15380_v56  ;;  %v4227_v26 = vsel %vm428_vm1, %v4226_v22, %v4225_v31 }
 0x23b   : > { %v17008_v48 = vrot.slane %v1063_v53, %v15380_v56  ;;  %v17012_v62 = vcombine.high %v16994_v33, %v16994_v33  ;;  %v3436_v0 = vrot.slane %v16994_v33, %v15380_v56  ;;  %v4229_v52 = vsel %vm3153_vm0, %v4228_v63, %v4227_v26  ;;  %v437_v26 = vld [vmem:[#allocation2 + $0x20] sm:$0x8] }
 0x23c   : > { %v17019_v57 = vcombine.high %v16998_v34, %v16998_v34  ;;  %v1566_v39 = vshll.u32 %v17002_v24, 16  ;;  %v1569_v28 = vshrl.u32 %v17002_v24, 16  ;;  %v3387_v43 = vrot.slane %v3380_v44, %v15380_v56 }
 0x23d   : > { %v17026_v41 = vcombine.high %v17008_v48, %v17008_v48  ;;  %v1601_v45 = vshrl.u32 %v17012_v62, 16  ;;  %v3394_v54 = vrot.slane %v16998_v34, %v15380_v56  ;;  %v3408_v5 = vrot.slane %v17002_v24, %v15380_v56 }
 0x23e   : > { %v1574_v60 = vshll.u32 %v17019_v57, 16  ;;  %v1577_v38 = vshrl.u32 %v17019_v57, 16  ;;  %v3422_v35 = vrot.slane %v17019_v57, %v15380_v56  ;;  %v3443_v13 = vrot.slane %v3436_v0, %v15380_v56 }
 0x23f   : > { %v1606_v19 = vshll.u32 %v17026_v41, 16  ;;  %v3401_v50 = vrot.slane %v3394_v54, %v15380_v56  ;;  %v3450_v49 = vrot.slane %v17008_v48, %v15380_v56  ;;  %v3415_v9 = vrot.slane %v3408_v5, %v15380_v56  ;;  %v13215_v3 = vld.sshfl [vmem:[#allocation2] sm:$0x33 pattern:$0x75316420] }
 0x240   : > { %v3429_v58 = vrot.slane %v3422_v35, %v15380_v56  ;;  %v3464_v2 = vrot.slane %v17012_v62, %v15380_v56  ;;  %v3478_v30 = vrot.slane %v17026_v41, %v15380_v56  ;;  %v4166_v40 = vunpack.c.l.b16 %v3387_v43 }
 0x241   : > { %v3457_v16 = vrot.slane %v3450_v49, %v15380_v56  ;;  %v4167_v7 = vunpack.c.l.b16 %v3401_v50  ;;  %v4170_v27 = vunpack.c.l.b16 %v3443_v13  ;;  %v4168_v1 = vunpack.c.l.b16 %v3415_v9 }
 0x242   : > { %v3471_v22 = vrot.slane %v3464_v2, %v15380_v56  ;;  %v3485_v29 = vrot.slane %v3478_v30, %v15380_v56  ;;  %v4169_v42 = vunpack.c.l.b16 %v3429_v58  ;;  %v4230_v31 = vrot.slane %v4163_v37, 3 }
 0x243   : > { %v4171_v53 = vunpack.c.l.b16 %v3457_v16  ;;  %v4232_v63 = vrot.slane %v4164_v55, 2  ;;  %v4234_v44 = vrot.slane %v4165_v8, 1  ;;  %v4236_v5 = vrot.slane %v4167_v7, 7 }
 0x244   : > { %v4172_v0 = vunpack.c.l.b16 %v3471_v22  ;;  %v4173_v54 = vunpack.c.l.b16 %v3485_v29  ;;  %v4238_v35 = vrot.slane %v4168_v1, 6  ;;  %v4231_v43 = vsel %vm3156_vm6, %v4230_v31, %v4229_v52 }
 0x245   : > { %v4240_v50 = vrot.slane %v4169_v42, 5  ;;  %v4242_v13 = vrot.slane %v4170_v27, 4  ;;  %v4244_v49 = vrot.slane %v4171_v53, 3  ;;  %v4233_v2 = vsel %vm3159_vm8, %v4232_v63, %v4231_v43 }
 0x246   : > { %v4237_v9 = vsel %vm3144_vm13, %v4236_v5, %v4166_v40  ;;  %v4246_v58 = vrot.slane %v4172_v0, 2  ;;  %v4248_v30 = vrot.slane %v4173_v54, 1  ;;  %v4235_v37 = vsel %vm3162_vm9, %v4234_v44, %v4233_v2 }
 0x247   : > { %v4239_v55 = vsel %vm3147_vm15, %v4238_v35, %v4237_v9  ;;  %v438_v8 = vsel %vm15354_vm2, 0, %v437_v26  ;;  %v959_v16 = vcombine.high %v13215_v3, %v13215_v3  ;;  %v1485_v52 = vshll.u32 %v16924_v21, 16 }
 0x248   : > { %v4241_v7 = vsel %vm428_vm1, %v4240_v50, %v4239_v55  ;;  %439 = vst [vmem:[#allocation2 + $0x20] sm:$0x8] %v438_v8  ;;  %v1488_v27 = vshrl.u32 %v16924_v21, 16  ;;  %v1493_v22 = vshll.u32 %v16930_v32, 16  ;;  %v1496_v1 = vshrl.u32 %v16930_v32, 16 }
 0x249   : > { %v4243_v40 = vsel %vm3153_vm0, %v4242_v13, %v4241_v7  ;;  %v966_v29 = vrot.slane %v959_v16, %v15380_v56  ;;  %v1511_v3 = vsel %vm15567_vm11, %v1504_v59, %v1509_v20  ;;  %v1517_v53 = vshll.u32 %v16943_v11, 16 }
 0x24a   : > { %v4245_v42 = vsel %vm3156_vm6, %v4244_v49, %v4243_v40  ;;  %v1495_v21 = vsel %vm15567_vm11, %v1488_v27, %v1493_v22  ;;  %v1520_v31 = vshrl.u32 %v16943_v11, 16  ;;  %v1503_v32 = vsel %vm15567_vm11, %v1496_v1, %v1501_v18 }
 0x24b   : > { %v4247_v63 = vsel %vm3159_vm8, %v4246_v58, %v4245_v42  ;;  %v967_v44 = vcombine.high %v966_v29, %v966_v29  ;;  %v1525_v26 = vshll.u32 %v16946_v10, 16  ;;  %v1519_v20 = vsel %vm15567_vm11, %v1512_v47, %v1517_v53 }
 0x24c   : > { %v17084_v59 = vsel %vm3162_vm9, %v4248_v30, %v4247_v63  ;;  %v1528_v11 = vshrl.u32 %v16946_v10, 16  ;;  %v1543_v4 = vsel %vm15567_vm11, %v1536_v46, %v1541_v61  ;;  %v1550_v23 = vshll.u32 %v16990_v15, 16 }
 0x24d   : > { %19640 = vst [vmem:[#allocation26_spill] sm:$0xff] %v17084_v59  ;;  %v8578_v18 = vpack.c.b16 %v17084_v59, %v4235_v37  ;;  %v1480_v0 = vshrl.u32 %v967_v44, 16  ;;  %v1527_v54 = vsel %vm15567_vm11, %v1520_v31, %v1525_v26  ;;  %v1553_v47 = vshrl.u32 %v16990_v15, 16 }
 0x24e   : > { %v1535_v10 = vsel %vm15567_vm11, %v1528_v11, %v1533_v25  ;;  %v1558_v5 = vshll.u32 %v16998_v34, 16  ;;  %v1561_v35 = vshrl.u32 %v16998_v34, 16  ;;  %v1576_v51 = vsel %vm15567_vm11, %v1569_v28, %v1574_v60 }
 0x24f   : > { %8777 = vmatprep.mubr.bf16.mxu0 %v8578_v18  ;;  %v13218_v46 = vld.sshfl [vmem:[#allocation2 + $0x20] sm:$0x33 pattern:$0x75316420]  ;;  %v1487_v61 = vsel %vm15567_vm11, %v1480_v0, %v1485_v52  ;;  %v1582_v25 = vshll.u32 %v16994_v33, 16  ;;  %v1585_v15 = vshrl.u32 %v16994_v33, 16  ;;  %v1608_v33 = vsel %vm15567_vm11, %v1601_v45, %v1606_v19 }
 0x250   : > { %v1023_v43 = vcombine.high %v13218_v46, %v13218_v46  ;;  %v1560_v34 = vsel %vm15567_vm11, %v1553_v47, %v1558_v5  ;;  %v1568_v50 = vsel %vm15567_vm11, %v1561_v35, %v1566_v39  ;;  %v1590_v13 = vshll.u32 %v17008_v48, 16 }
 0x251   : > { %v1584_v28 = vsel %vm15567_vm11, %v1577_v38, %v1582_v25  ;;  %v1593_v60 = vshrl.u32 %v17008_v48, 16  ;;  %v2189_v24 = vrot.slane %v1487_v61, %v15380_v56  ;;  %v2203_v57 = vrot.slane %v1495_v21, %v15380_v56 }
 0x252   : > { %v1030_v39 = vrot.slane %v1023_v43, %v15380_v56  ;;  %v1592_v49 = vsel %vm15567_vm11, %v1585_v15, %v1590_v13  ;;  %v2217_v38 = vrot.slane %v1503_v32, %v15380_v56  ;;  %v19641_v48 = vshll.u32 %v17012_v62, 16 }
 0x253   : > { %v2196_v9 = vrot.slane %v2189_v24, %v15380_v56  ;;  %v2231_v45 = vrot.slane %v1511_v3, %v15380_v56  ;;  %v2245_v19 = vrot.slane %v1519_v20, %v15380_v56  ;;  %v17150_v30 = vrot.slane %v2203_v57, %v15380_v56  ;;  %v13304_v57 = vld.sshfl [vmem:[#allocation2 + $0x2c] sm:$0x1 pattern:$0x75316420] }
 0x254   : > { %v1600_v2 = vsel %vm15567_vm11, %v1593_v60, %v19641_v48  ;;  %v1031_v58 = vcombine.high %v1030_v39, %v1030_v39  ;;  %v17153_v37 = vrot.slane %v2217_v38, %v15380_v56  ;;  %v2259_v55 = vrot.slane %v1527_v54, %v15380_v56  ;;  %v13303_v60 = vld.sshfl [vmem:[#allocation2 + $0xc] sm:$0x1 pattern:$0x75316420] }
 0x255   : > { %v17157_v62 = vrot.slane %v2231_v45, %v15380_v56  ;;  %v17160_v8 = vrot.slane %v2245_v19, %v15380_v56  ;;  %v2273_v16 = vrot.slane %v1535_v10, %v15380_v56  ;;  %v2287_v7 = vrot.slane %v1543_v4, %v15380_v56 }
 0x256   : > { %v1545_v52 = vshrl.u32 %v1031_v58, 16  ;;  %v17165_v27 = vrot.slane %v2259_v55, %v15380_v56  ;;  %v2315_v22 = vrot.slane %v1560_v34, %v15380_v56  ;;  %v2329_v40 = vrot.slane %v1568_v50, %v15380_v56 }
 0x257   : > { %v17170_v29 = vrot.slane %v2273_v16, %v15380_v56  ;;  %v17173_v1 = vrot.slane %v2287_v7, %v15380_v56  ;;  %v2343_v3 = vrot.slane %v1576_v51, %v15380_v56  ;;  %v2357_v42 = vrot.slane %v1584_v28, %v15380_v56 }
 0x258   : > { %v1552_v21 = vsel %vm15567_vm11, %v1545_v52, %v1550_v23  ;;  %v17180_v53 = vrot.slane %v2315_v22, %v15380_v56  ;;  %v17183_v31 = vrot.slane %v2329_v40, %v15380_v56  ;;  %v2371_v63 = vrot.slane %v1592_v49, %v15380_v56 }
 0x259   : > { %v2301_v44 = vrot.slane %v1552_v21, %v15380_v56  ;;  %v17188_v32 = vrot.slane %v2343_v3, %v15380_v56  ;;  %v17191_v26 = vrot.slane %v2357_v42, %v15380_v56  ;;  %v2385_v20 = vrot.slane %v1600_v2, %v15380_v56 }
 0x25a   : > { %v17195_v11 = vrot.slane %v2371_v63, %v15380_v56  ;;  %v2399_v4 = vrot.slane %v1608_v33, %v15380_v56  ;;  %v3079_v18 = vunpack.c.l.b16 %v2196_v9  ;;  %v3080_v0 = vunpack.c.l.b16 %v17150_v30 }
 0x25b   : > { %v2308_v54 = vrot.slane %v2301_v44, %v15380_v56  ;;  %v17201_v23 = vrot.slane %v2385_v20, %v15380_v56  ;;  %v3081_v10 = vunpack.c.l.b16 %v17153_v37  ;;  %v3082_v47 = vunpack.c.l.b16 %v17157_v62 }
 0x25c   : > { %v17206_v5 = vrot.slane %v2399_v4, %v15380_v56  ;;  %v3083_v35 = vunpack.c.l.b16 %v17160_v8  ;;  %v3084_v46 = vunpack.c.l.b16 %v17165_v27  ;;  %v3085_v61 = vunpack.c.l.b16 %v17170_v29 }
 0x25d   : > { %v3086_v51 = vunpack.c.l.b16 %v17173_v1  ;;  %v3087_v25 = vunpack.c.l.b16 %v2308_v54  ;;  %v3088_v15 = vunpack.c.l.b16 %v17180_v53  ;;  %v3089_v43 = vunpack.c.l.b16 %v17183_v31 }
 0x25e   : > { %v3090_v34 = vunpack.c.l.b16 %v17188_v32  ;;  %v3091_v50 = vunpack.c.l.b16 %v17191_v26  ;;  %v3092_v13 = vunpack.c.l.b16 %v17195_v11  ;;  %v3093_v28 = vunpack.c.l.b16 %v17201_v23  ;;  %v13305_v32 = vld.sshfl [vmem:[#allocation2 + $0x4c] sm:$0x1 pattern:$0x75316420] }
 0x25f   : > { %v3094_v33 = vunpack.c.l.b16 %v17206_v5  ;;  %v3143_v24 = vrot.slane %v3080_v0, 7  ;;  %v3146_v39 = vrot.slane %v3081_v10, 6  ;;  %v3149_v49 = vrot.slane %v3082_v47, 5 }
 0x260   : > { %v3152_v38 = vrot.slane %v3083_v35, 4  ;;  %v3155_v48 = vrot.slane %v3084_v46, 3  ;;  %v3158_v2 = vrot.slane %v3085_v61, 2  ;;  %v3161_v9 = vrot.slane %v3086_v51, 1 }
 0x261   : > { %v3145_v45 = vsel %vm3144_vm13, %v3143_v24, %v3079_v18  ;;  %v3164_v19 = vrot.slane %v3088_v15, 7  ;;  %v3166_v58 = vrot.slane %v3089_v43, 6  ;;  %v3168_v30 = vrot.slane %v3090_v34, 5 }
 0x262   : > { %v3148_v37 = vsel %vm3147_vm15, %v3146_v39, %v3145_v45  ;;  %v3170_v55 = vrot.slane %v3091_v50, 4  ;;  %v3172_v62 = vrot.slane %v3092_v13, 3  ;;  %v3174_v8 = vrot.slane %v3093_v28, 2 }
 0x263   : > { %v3151_v16 = vsel %vm428_vm1, %v3149_v49, %v3148_v37  ;;  %v3165_v7 = vsel %vm3144_vm13, %v3164_v19, %v3087_v25  ;;  %v3176_v52 = vrot.slane %v3094_v33, 1  ;;  %v2020_v27 = vrot.slane %v13303_v60, %v15380_v56 }
 0x264   : > { %v3154_v22 = vsel %vm3153_vm0, %v3152_v38, %v3151_v16  ;;  %v3167_v40 = vsel %vm3147_vm15, %v3166_v58, %v3165_v7  ;;  %v2034_v29 = vrot.slane %v13304_v57, %v15380_v56  ;;  %v2119_v3 = vshrl.u32 %v16957_v12, 16  ;;  %v14550_v58 = vld [vmem:[#allocation10 + $0x1c8] sm:$0xff]   ;;  %v563_v16 = vld [vmem:[%s15331_s17 + $0x38] sm:$0xff] }
 0x265   : > { %v3157_v42 = vsel %vm3156_vm6, %v3155_v48, %v3154_v22  ;;  %v3169_v21 = vsel %vm428_vm1, %v3168_v30, %v3167_v40  ;;  %v2124_v31 = vshll.u32 %v2020_v27, 16  ;;  %v2127_v63 = vshrl.u32 %v17026_v41, 16  ;;  %v566_v7 = vld [vmem:[%s15331_s17 + $0x50] sm:$0xff]  ;;  %v567_v40 = vld [vmem:[%s15331_s17 + $0x58] sm:$0xff] }
 0x266   : > { %v3160_v44 = vsel %vm3159_vm8, %v3158_v2, %v3157_v42  ;;  %v3171_v20 = vsel %vm3153_vm0, %v3170_v55, %v3169_v21  ;;  %v2132_v4 = vshll.u32 %v2034_v29, 16  ;;  %v4454_v18 = vrot.slane %v3081_v10, 7  ;;  %v14548_v10 = vld [vmem:[#allocation10 + $0x180] sm:$0xff]   ;;  %v14553_v29 = vld [vmem:[#allocation10 + $0x1d0] sm:$0xff]  }
 0x267   : > { %v3163_v54 = vsel %vm3162_vm9, %v3161_v9, %v3160_v44  ;;  %v3173_v25 = vsel %vm3156_vm6, %v3172_v62, %v3171_v20  ;;  %v2126_v12 = vsel %vm15567_vm11, %v2119_v3, %v2124_v31  ;;  %v4456_v60 = vrot.slane %v3082_v47, 6  ;;  %v13306_v3 = vld.sshfl [vmem:[#allocation2 + $0x6c] sm:$0x1 pattern:$0x75316420] }
 0x268   : > { %v3175_v24 = vsel %vm3159_vm8, %v3174_v8, %v3173_v25  ;;  %v2134_v39 = vsel %vm15567_vm11, %v2127_v63, %v2132_v4  ;;  %v4340_v41 = vrot.slane %v2126_v12, %v15380_v56  ;;  %v4455_v49 = vsel %vm3144_vm13, %v4454_v18, %v3080_v0  ;;  %v443_v44 = vld [vmem:[#allocation2 + $0x40] sm:$0x8]  ;;  %v14554_v20 = vld [vmem:[#allocation10 + $0x190] sm:$0xff]  }
 0x269   : > { %v17257_v57 = vsel %vm3162_vm9, %v3176_v52, %v3175_v24  ;;  %v4354_v38 = vrot.slane %v2134_v39, %v15380_v56  ;;  %v4457_v48 = vsel %vm3147_vm15, %v4456_v60, %v4455_v49  ;;  %v4458_v2 = vrot.slane %v3083_v35, 5  ;;  %v449_v12 = vld [vmem:[#allocation2 + $0x60] sm:$0x8]  ;;  %v14556_v60 = vld [vmem:[#allocation10 + $0x1d8] sm:$0xff]   ;;  %v570_v24 = vld [vmem:[%s15331_s17 + $0x70] sm:$0xff] }
 0x26a   : > { %19642 = vst [vmem:[#allocation28_spill] sm:$0xff] %v17257_v57  ;;  %v8577_v47 = vpack.c.b16 %v17257_v57, %v3163_v54  ;;  %v4347_v9 = vrot.slane %v4340_v41, %v15380_v56  ;;  %v4460_v45 = vrot.slane %v3084_v46, 4  ;;  %v4462_v19 = vrot.slane %v3085_v61, 3  ;;  %v562_v61 = vld [vmem:[%s15331_s17 + $0x30] sm:$0xff] }
 0x26b   : > { %v4361_v0 = vrot.slane %v4354_v38, %v15380_v56  ;;  %v4459_v30 = vsel %vm428_vm1, %v4458_v2, %v4457_v48  ;;  %v4464_v37 = vrot.slane %v3086_v51, 2  ;;  %v4468_v55 = vrot.slane %v3089_v43, 7  ;;  %v571_v38 = vld [vmem:[%s15331_s17 + $0x78] sm:$0xff]  ;;  %v574_v48 = vld [vmem:[%s15331_s17 + $0x90] sm:$0xff]  ;;  %v455_v2 = vld [vmem:[#allocation2 + $0x80] sm:$0x8] }
 0x26c   : > { %8778 = vmatmul.mubr.bf16.vlgmr.msra.gmra.mrb[16].mxu0 %v8577_v47  ;;  %v4446_v62 = vunpack.c.l.b16 %v4347_v9  ;;  %v4461_v35 = vsel %vm3153_vm0, %v4460_v45, %v4459_v30  ;;  %v4470_v8 = vrot.slane %v3090_v34, 6  ;;  %v4472_v46 = vrot.slane %v3091_v50, 5  ;;  %v14551_v34 = vld [vmem:[#allocation10 + $0x188] sm:$0xff]  }
 0x26d   : > { %13883 = vmatpush3.bf16.msra.mxu0 %v14548_v10  ;;  %v4447_v52 = vunpack.c.l.b16 %v4361_v0  ;;  %v4463_v1 = vsel %vm3156_vm6, %v4462_v19, %v4461_v35  ;;  %v4469_v51 = vsel %vm3144_vm13, %v4468_v55, %v3088_v15  ;;  %v4474_v43 = vrot.slane %v3092_v13, 4  ;;  %v461_v0 = vld [vmem:[#allocation2 + $0xa0] sm:$0x8]  ;;  %v14557_v35 = vld [vmem:[#allocation10 + $0x198] sm:$0xff]  }
 0x26e   : > { %v4465_v26 = vsel %vm3159_vm8, %v4464_v37, %v4463_v1  ;;  %v4466_v27 = vrot.slane %v4446_v62, 1  ;;  %v4471_v50 = vsel %vm3147_vm15, %v4470_v8, %v4469_v51  ;;  %v4476_v22 = vrot.slane %v3093_v28, 3  ;;  %13884 = vmatprep.subr.bf16.mxu0 %v14550_v58  ;;  %v575_v58 = vld [vmem:[%s15331_s17 + $0x98] sm:$0xff]  ;;  %v578_v8 = vld [vmem:[%s15331_s17 + $0xb0] sm:$0xff] }
 0x26f   : > { %v4473_v53 = vsel %vm428_vm1, %v4472_v46, %v4471_v50  ;;  %v4478_v15 = vrot.slane %v3094_v33, 2  ;;  %v4480_v11 = vrot.slane %v4447_v52, 1  ;;  %v600_v13 = vmul.f32 %v16914_v14, %v562_v61  ;;  %v579_v46 = vld [vmem:[%s15331_s17 + $0xb8] sm:$0xff]  ;;  %v14559_v52 = vld [vmem:[#allocation10 + $0x1e0] sm:$0xff]   ;;  %v582_v51 = vld [vmem:[%s15331_s17 + $0xd0] sm:$0xff] }
 0x270   : > { %v4467_v42 = vsel %vm3162_vm9, %v4466_v27, %v4465_v26  ;;  %v4475_v21 = vsel %vm3153_vm0, %v4474_v43, %v4473_v53  ;;  %v601_v31 = vmul.f32 %v16914_v14, %v563_v16  ;;  %v604_v23 = vmul.f32 %v16914_v14, %v566_v7  ;;  %v583_v27 = vld [vmem:[%s15331_s17 + $0xd8] sm:$0xff] }
 0x271   : > { %v4477_v28 = vsel %vm3156_vm6, %v4476_v22, %v4475_v21  ;;  %v605_v63 = vmul.f32 %v16914_v14, %v567_v40  ;;  %v638_v5 = vadd.f32 %v16920_v17, %v600_v13  ;;  %v2048_v33 = vrot.slane %v13305_v32, %v15380_v56  ;;  %13885 = vmatpush3.bf16.msra.mxu0 %v14551_v34 }
 0x272   : > { %v4479_v4 = vsel %vm3159_vm8, %v4478_v15, %v4477_v28  ;;  %v639_v18 = vadd.f32 %v16920_v17, %v601_v31  ;;  %v642_v54 = vadd.f32 %v16920_v17, %v604_v23  ;;  %v2062_v25 = vrot.slane %v13306_v3, %v15380_v56  ;;  %13886 = vmatprep.subr.bf16.mxu0 %v14553_v29 }
 0x273   : > { %v17304_v39 = vsel %vm3162_vm9, %v4480_v11, %v4479_v4  ;;  %v643_v41 = vadd.f32 %v16920_v17, %v605_v63  ;;  %v670_v49 = vmax.f32 %v638_v5, 0.0  ;;  %v17307_v10 = vshll.u32 %v2048_v33, 16 }
 0x274   : > { %19643 = vst [vmem:[#allocation29_spill] sm:$0xff] %v17304_v39  ;;  %v8579_v47 = vpack.c.b16 %v17304_v39, %v4467_v42  ;;  %v671_v9 = vmax.f32 %v639_v18, 0.0  ;;  %v674_v45 = vmax.f32 %v642_v54, 0.0  ;;  %v17312_v19 = vshll.u32 %v2062_v25, 16  ;;  %v467_v18 = vld [vmem:[#allocation2 + $0xc0] sm:$0x8] }
 0x275   : > { %v675_v30 = vmax.f32 %v643_v41, 0.0  ;;  %v13743_v37 = vpack.c.bf16 %v670_v49, %v670_v49  ;;  %v444_v55 = vsel %vm15354_vm2, 0, %v443_v44  ;;  %v450_v62 = vsel %vm15354_vm2, 0, %v449_v12  ;;  %13887 = vmatpush3.bf16.msra.mxu0 %v14554_v20 }
 0x276   : > { %14142 = vmatprep.mubr.bf16.mxu1 %v8579_v47  ;;  %v13744_v61 = vpack.c.bf16 %v671_v9, %v671_v9  ;;  %v13747_v16 = vpack.c.bf16 %v674_v45, %v674_v45  ;;  %445 = vst [vmem:[#allocation2 + $0x40] sm:$0x8] %v444_v55  ;;  %451 = vst [vmem:[#allocation2 + $0x60] sm:$0x8] %v450_v62  ;;  %13888 = vmatprep.subr.bf16.mxu0 %v14556_v60  ;;  %v456_v1 = vsel %vm15354_vm2, 0, %v455_v2  ;;  %v14560_v55 = vld [vmem:[#allocation10 + $0x1a0] sm:$0xff]  }
 0x277   : > { %v608_v7 = vmul.f32 %v16914_v14, %v570_v24  ;;  %v13748_v43 = vpack.c.bf16 %v675_v30, %v675_v30  ;;  %831 = vst [vmem:[#allocation2 + $0x44] sm:$0xf] %v13743_v37  ;;  %v609_v32 = vmul.f32 %v16914_v14, %v571_v38  ;;  %v612_v34 = vmul.f32 %v16914_v14, %v574_v48 }
 0x278   : > { %v613_v26 = vmul.f32 %v16914_v14, %v575_v58  ;;  %457 = vst [vmem:[#allocation2 + $0x80] sm:$0x8] %v456_v1  ;;  %832 = vst [vmem:[#allocation2 + $0x48] sm:$0xf] %v13744_v61  ;;  %v462_v22 = vsel %vm15354_vm2, 0, %v461_v0  ;;  %v616_v40 = vmul.f32 %v16914_v14, %v578_v8  ;;  %v617_v29 = vmul.f32 %v16914_v14, %v579_v46 }
 0x279   : > { %835 = vst [vmem:[#allocation2 + $0x64] sm:$0xf] %v13747_v16  ;;  %v646_v50 = vadd.f32 %v16920_v17, %v608_v7  ;;  %836 = vst [vmem:[#allocation2 + $0x68] sm:$0xf] %v13748_v43  ;;  %13889 = vmatpush3.bf16.msra.mxu0 %v14557_v35  ;;  %v647_v53 = vadd.f32 %v16920_v17, %v609_v32  ;;  %v650_v15 = vadd.f32 %v16920_v17, %v612_v34  ;;  %v14562_v7 = vld [vmem:[#allocation10 + $0x1e8] sm:$0xff]  }
 0x27a   : > { %v651_v11 = vadd.f32 %v16920_v17, %v613_v26  ;;  %463 = vst [vmem:[#allocation2 + $0xa0] sm:$0x8] %v462_v22  ;;  %v620_v13 = vmul.f32 %v16914_v14, %v582_v51  ;;  %13890 = vmatprep.subr.bf16.mxu0 %v14559_v52  ;;  %v621_v42 = vmul.f32 %v16914_v14, %v583_v27  ;;  %v468_v45 = vsel %vm15354_vm2, 0, %v467_v18  ;;  %v14563_v32 = vld [vmem:[#allocation10 + $0x1a8] sm:$0xff]  }
 0x27b   : > { %v678_v3 = vmax.f32 %v646_v50, 0.0  ;;  %v654_v21 = vadd.f32 %v16920_v17, %v616_v40  ;;  %v655_v31 = vadd.f32 %v16920_v17, %v617_v29  ;;  %v679_v23 = vmax.f32 %v647_v53, 0.0  ;;  %469 = vst [vmem:[#allocation2 + $0xc0] sm:$0x8] %v468_v45 }
 0x27c   : > { %v682_v28 = vmax.f32 %v650_v15, 0.0  ;;  %v683_v63 = vmax.f32 %v651_v11, 0.0  ;;  %v658_v5 = vadd.f32 %v16920_v17, %v620_v13  ;;  %v659_v44 = vadd.f32 %v16920_v17, %v621_v42 }
 0x27d   : > { %v13751_v33 = vpack.c.bf16 %v678_v3, %v678_v3  ;;  %v686_v20 = vmax.f32 %v654_v21, 0.0  ;;  %v687_v4 = vmax.f32 %v655_v31, 0.0  ;;  %v13221_v54 = vld.sshfl [vmem:[#allocation2 + $0x40] sm:$0x33 pattern:$0x75316420]  ;;  %v13752_v25 = vpack.c.bf16 %v679_v23, %v679_v23  ;;  %13891 = vmatpush3.bf16.msra.mxu0 %v14560_v55 }
 0x27e   : > { %v13755_v12 = vpack.c.bf16 %v682_v28, %v682_v28  ;;  %v13756_v60 = vpack.c.bf16 %v683_v63, %v683_v63  ;;  %v690_v14 = vmax.f32 %v658_v5, 0.0  ;;  %v13222_v24 = vld.sshfl [vmem:[#allocation2 + $0x44] sm:$0x33 pattern:$0x75316420]  ;;  %v1087_v41 = vcombine.high %v13221_v54, %v13221_v54  ;;  %13892 = vmatprep.subr.bf16.mxu0 %v14562_v7 }
 0x27f   : > { %839 = vst [vmem:[#allocation2 + $0x84] sm:$0xf] %v13751_v33  ;;  %v691_v49 = vmax.f32 %v659_v44, 0.0  ;;  %v13759_v38 = vpack.c.bf16 %v686_v20, %v686_v20  ;;  %v13760_v48 = vpack.c.bf16 %v687_v4, %v687_v4  ;;  %v1103_v47 = vcombine.high %v13222_v24, %v13222_v24  ;;  %840 = vst [vmem:[#allocation2 + $0x88] sm:$0xf] %v13752_v25 }
 0x280   : > { %v13223_v2 = vld.sshfl [vmem:[#allocation2 + $0x48] sm:$0x33 pattern:$0x75316420]  ;;  %v17344_v9 = vrot.slane %v13222_v24, %v15380_v56  ;;  %843 = vst [vmem:[#allocation2 + $0xa4] sm:$0xf] %v13755_v12  ;;  %v13763_v17 = vpack.c.bf16 %v690_v14, %v690_v14  ;;  %v17352_v37 = vrot.slane %v1087_v41, %v15380_v56 }
 0x281   : > { %844 = vst [vmem:[#allocation2 + $0xa8] sm:$0xf] %v13756_v60  ;;  %v13225_v58 = vld.sshfl [vmem:[#allocation2 + $0x64] sm:$0x33 pattern:$0x75316420]  ;;  %v1127_v0 = vcombine.high %v13223_v2, %v13223_v2  ;;  %v17349_v30 = vrot.slane %v13223_v2, %v15380_v56  ;;  %v13764_v62 = vpack.c.bf16 %v691_v49, %v691_v49  ;;  %v17355_v8 = vrot.slane %v1103_v47, %v15380_v56 }
 0x282   : > { %847 = vst [vmem:[#allocation2 + $0xc4] sm:$0xf] %v13759_v38  ;;  %848 = vst [vmem:[#allocation2 + $0xc8] sm:$0xf] %v13760_v48  ;;  %v17359_v46 = vcombine.high %v17344_v9, %v17344_v9  ;;  %v1167_v61 = vcombine.high %v13225_v58, %v13225_v58  ;;  %v17362_v16 = vrot.slane %v13225_v58, %v15380_v56  ;;  %v1618_v50 = vshrl.u32 %v17344_v9, 16 }
 0x283   : > { %v13226_v35 = vld.sshfl [vmem:[#allocation2 + $0x68] sm:$0x33 pattern:$0x75316420]  ;;  %851 = vst [vmem:[#allocation2 + $0xe4] sm:$0xf] %v13763_v17  ;;  %v17365_v52 = vrot.slane %v1127_v0, %v15380_v56  ;;  %v17369_v1 = vcombine.high %v17349_v30, %v17349_v30  ;;  %v17376_v34 = vcombine.high %v17355_v8, %v17355_v8  ;;  %13893 = vmatpush3.bf16.msra.mxu0 %v14563_v32 }
 0x284   : > { %v1191_v51 = vcombine.high %v13226_v35, %v13226_v35  ;;  %v17372_v43 = vrot.slane %v13226_v35, %v15380_v56  ;;  %852 = vst [vmem:[#allocation2 + $0xe8] sm:$0xf] %v13764_v62  ;;  %v17379_v26 = vrot.slane %v1167_v61, %v15380_v56  ;;  %v17383_v27 = vcombine.high %v17362_v16, %v17362_v16 }
 0x285   : > { %v17388_v22 = vcombine.high %v17365_v52, %v17365_v52  ;;  %v1623_v53 = vshll.u32 %v17355_v8, 16  ;;  %v1626_v11 = vshrl.u32 %v17355_v8, 16  ;;  %v1631_v13 = vshll.u32 %v17359_v46, 16 }
 0x286   : > { %v17391_v40 = vrot.slane %v1191_v51, %v15380_v56  ;;  %v17395_v29 = vcombine.high %v17372_v43, %v17372_v43  ;;  %v17400_v15 = vcombine.high %v17379_v26, %v17379_v26  ;;  %v1634_v3 = vshrl.u32 %v17359_v46, 16 }
 0x287   : > { %v1625_v21 = vsel %vm15567_vm11, %v1618_v50, %v1623_v53  ;;  %v1639_v31 = vshll.u32 %v17376_v34, 16  ;;  %v1642_v23 = vshrl.u32 %v17376_v34, 16  ;;  %v1633_v28 = vsel %vm15567_vm11, %v1626_v11, %v1631_v13 }
 0x288   : > { %v17407_v42 = vcombine.high %v17391_v40, %v17391_v40  ;;  %v1647_v63 = vshll.u32 %v17349_v30, 16  ;;  %v1650_v5 = vshrl.u32 %v17349_v30, 16  ;;  %v1655_v33 = vshll.u32 %v17365_v52, 16 }
 0x289   : > { %v1641_v44 = vsel %vm15567_vm11, %v1634_v3, %v1639_v31  ;;  %v1658_v20 = vshrl.u32 %v17365_v52, 16  ;;  %v1663_v4 = vshll.u32 %v17369_v1, 16  ;;  %v1666_v18 = vshrl.u32 %v17369_v1, 16 }
 0x28a   : > { %v1649_v54 = vsel %vm15567_vm11, %v1642_v23, %v1647_v63  ;;  %v1657_v25 = vsel %vm15567_vm11, %v1650_v5, %v1655_v33  ;;  %v1671_v12 = vshll.u32 %v17388_v22, 16  ;;  %v1683_v60 = vshrl.u32 %v17362_v16, 16 }
 0x28b   : > { %v1665_v14 = vsel %vm15567_vm11, %v1658_v20, %v1663_v4  ;;  %v1688_v24 = vshll.u32 %v17379_v26, 16  ;;  %v1691_v41 = vshrl.u32 %v17379_v26, 16  ;;  %v1696_v49 = vshll.u32 %v17383_v27, 16 }
 0x28c   : > { %v1673_v38 = vsel %vm15567_vm11, %v1666_v18, %v1671_v12  ;;  %v1699_v48 = vshrl.u32 %v17383_v27, 16  ;;  %v1704_v2 = vshll.u32 %v17400_v15, 16  ;;  %v1707_v47 = vshrl.u32 %v17400_v15, 16 }
 0x28d   : > { %v1690_v17 = vsel %vm15567_vm11, %v1683_v60, %v1688_v24  ;;  %v1698_v45 = vsel %vm15567_vm11, %v1691_v41, %v1696_v49  ;;  %v1712_v58 = vshll.u32 %v17372_v43, 16  ;;  %v1715_v0 = vshrl.u32 %v17372_v43, 16 }
 0x28e   : > { %v1706_v55 = vsel %vm15567_vm11, %v1699_v48, %v1704_v2  ;;  %v1720_v62 = vshll.u32 %v17391_v40, 16  ;;  %v1723_v35 = vshrl.u32 %v17391_v40, 16  ;;  %v1728_v61 = vshll.u32 %v17395_v29, 16 }
 0x28f   : > { %v1714_v7 = vsel %vm15567_vm11, %v1707_v47, %v1712_v58  ;;  %v1731_v51 = vshrl.u32 %v17395_v29, 16  ;;  %v1736_v32 = vshll.u32 %v17407_v42, 16  ;;  %v2135_v50 = vshrl.u32 %v17388_v22, 16 }
 0x290   : > { %v1722_v53 = vsel %vm15567_vm11, %v1715_v0, %v1720_v62  ;;  %v1730_v11 = vsel %vm15567_vm11, %v1723_v35, %v1728_v61  ;;  %v2143_v13 = vshrl.u32 %v17407_v42, 16  ;;  %v2427_v3 = vrot.slane %v1625_v21, %v15380_v56 }
 0x291   : > { %v1738_v31 = vsel %vm15567_vm11, %v1731_v51, %v1736_v32  ;;  %v2142_v23 = vsel %vm15567_vm11, %v2135_v50, %v17307_v10  ;;  %v2441_v63 = vrot.slane %v1633_v28, %v15380_v56  ;;  %v2455_v5 = vrot.slane %v1641_v44, %v15380_v56  ;;  %v14565_v50 = vld [vmem:[#allocation10 + $0x1f0] sm:$0xff]  }
 0x292   : > { %v2150_v33 = vsel %vm15567_vm11, %v2143_v13, %v17312_v19  ;;  %v17472_v20 = vrot.slane %v2427_v3, %v15380_v56  ;;  %v2469_v21 = vrot.slane %v1649_v54, %v15380_v56  ;;  %v2483_v4 = vrot.slane %v1657_v25, %v15380_v56  ;;  %13894 = vmatprep.subr.bf16.mxu0 %v14565_v50 }
 0x293   : > { %v17477_v18 = vrot.slane %v2441_v63, %v15380_v56  ;;  %v17480_v10 = vrot.slane %v2455_v5, %v15380_v56  ;;  %v2497_v28 = vrot.slane %v1665_v14, %v15380_v56  ;;  %v2511_v44 = vrot.slane %v1673_v38, %v15380_v56 }
 0x294   : > { %v17485_v12 = vrot.slane %v2469_v21, %v15380_v56  ;;  %v17488_v19 = vrot.slane %v2483_v4, %v15380_v56  ;;  %v2539_v54 = vrot.slane %v1690_v17, %v15380_v56  ;;  %v2553_v25 = vrot.slane %v1698_v45, %v15380_v56 }
 0x295   : > { %v17493_v60 = vrot.slane %v2497_v28, %v15380_v56  ;;  %v17496_v24 = vrot.slane %v2511_v44, %v15380_v56  ;;  %v2567_v14 = vrot.slane %v1706_v55, %v15380_v56  ;;  %v2581_v41 = vrot.slane %v1714_v7, %v15380_v56 }
 0x296   : > { %v17501_v49 = vrot.slane %v2539_v54, %v15380_v56  ;;  %v17504_v38 = vrot.slane %v2553_v25, %v15380_v56  ;;  %v2595_v48 = vrot.slane %v1722_v53, %v15380_v56  ;;  %v2609_v2 = vrot.slane %v1730_v11, %v15380_v56 }
 0x297   : > { %v17509_v47 = vrot.slane %v2567_v14, %v15380_v56  ;;  %v17512_v17 = vrot.slane %v2581_v41, %v15380_v56  ;;  %v2623_v45 = vrot.slane %v1738_v31, %v15380_v56  ;;  %v3096_v58 = vunpack.c.l.b16 %v17472_v20 }
 0x298   : > { %v17517_v0 = vrot.slane %v2595_v48, %v15380_v56  ;;  %v17520_v55 = vrot.slane %v2609_v2, %v15380_v56  ;;  %v3097_v62 = vunpack.c.l.b16 %v17477_v18  ;;  %v3098_v35 = vunpack.c.l.b16 %v17480_v10 }
 0x299   : > { %v17525_v61 = vrot.slane %v2623_v45, %v15380_v56  ;;  %v19517_v7 = vunpack.c.l.b16 %v17485_v12  ;;  %v19514_v51 = vunpack.c.l.b16 %v17488_v19  ;;  %v19515_v32 = vunpack.c.l.b16 %v17493_v60 }
 0x29a   : > { %v19516_v53 = vunpack.c.l.b16 %v17496_v24  ;;  %v19524_v11 = vunpack.c.l.b16 %v17501_v49  ;;  %v19518_v13 = vunpack.c.l.b16 %v17504_v38  ;;  %v19523_v3 = vunpack.c.l.b16 %v17509_v47 }
 0x29b   : > { %v19519_v31 = vunpack.c.l.b16 %v17512_v17  ;;  %v19520_v63 = vunpack.c.l.b16 %v17517_v0  ;;  %v19522_v5 = vunpack.c.l.b16 %v17520_v55  ;;  %v19521_v21 = vunpack.c.l.b16 %v17525_v61 }
 0x29c   : > { %v4368_v4 = vrot.slane %v2142_v23, %v15380_v56  ;;  %v4382_v28 = vrot.slane %v2150_v33, %v15380_v56  ;;  %v4482_v44 = vrot.slane %v3097_v62, 7  ;;  %v4484_v54 = vrot.slane %v3098_v35, 6 }
 0x29d   : > { %v4486_v25 = vrot.slane %v19517_v7, 5  ;;  %v4488_v14 = vrot.slane %v19514_v51, 4  ;;  %v4490_v41 = vrot.slane %v19515_v32, 3  ;;  %v4492_v23 = vrot.slane %v19516_v53, 2 }
 0x29e   : > { %v4375_v33 = vrot.slane %v4368_v4, %v15380_v56  ;;  %v4389_v48 = vrot.slane %v4382_v28, %v15380_v56  ;;  %v4483_v2 = vsel %vm3144_vm13, %v4482_v44, %v3096_v58  ;;  %v4496_v45 = vrot.slane %v19518_v13, 7 }
 0x29f   : > { %v4485_v50 = vsel %vm3147_vm15, %v4484_v54, %v4483_v2  ;;  %v4498_v51 = vrot.slane %v19523_v3, 6  ;;  %v4500_v32 = vrot.slane %v19519_v31, 5  ;;  %v4502_v4 = vrot.slane %v19520_v63, 4 }
 0x2a0   : > { %v4448_v53 = vunpack.c.l.b16 %v4375_v33  ;;  %v4449_v28 = vunpack.c.l.b16 %v4389_v48  ;;  %v4487_v7 = vsel %vm428_vm1, %v4486_v25, %v4485_v50  ;;  %v4497_v44 = vsel %vm3144_vm13, %v4496_v45, %v19524_v11 }
 0x2a1   : > { %v4489_v13 = vsel %vm3153_vm0, %v4488_v14, %v4487_v7  ;;  %v4499_v54 = vsel %vm3147_vm15, %v4498_v51, %v4497_v44  ;;  %v4504_v2 = vrot.slane %v19522_v5, 3  ;;  %v4506_v31 = vrot.slane %v19521_v21, 2 }
 0x2a2   : > { %v4491_v63 = vsel %vm3156_vm6, %v4490_v41, %v4489_v13  ;;  %v4494_v33 = vrot.slane %v4448_v53, 1  ;;  %v4501_v48 = vsel %vm428_vm1, %v4500_v32, %v4499_v54  ;;  %v4508_v25 = vrot.slane %v4449_v28, 1  ;;  %v14552_v28 = vld [vmem:[#allocation10 + $0x208] sm:$0xff]  }
 0x2a3   : > { %v4493_v50 = vsel %vm3159_vm8, %v4492_v23, %v4491_v63  ;;  %v4503_v45 = vsel %vm3153_vm0, %v4502_v4, %v4501_v48  ;;  %v3492_v7 = vrot.slane %v17344_v9, %v15380_v56  ;;  %v3506_v51 = vrot.slane %v17355_v8, %v15380_v56 }
 0x2a4   : > { %v17585_v14 = vsel %vm3162_vm9, %v4494_v33, %v4493_v50  ;;  %v4505_v44 = vsel %vm3156_vm6, %v4504_v2, %v4503_v45  ;;  %v3520_v53 = vrot.slane %v17359_v46, %v15380_v56  ;;  %v3534_v32 = vrot.slane %v17376_v34, %v15380_v56 }
 0x2a5   : > { %19644 = vst [vmem:[#allocation30_spill] sm:$0xff] %v17585_v14  ;;  %v4507_v13 = vsel %vm3159_vm8, %v4506_v31, %v4505_v44  ;;  %v17594_v63 = vrot.slane %v3492_v7, %v15380_v56  ;;  %v3513_v41 = vrot.slane %v3506_v51, %v15380_v56  ;;  %v3548_v8 = vrot.slane %v17349_v30, %v15380_v56  ;;  %v14674_v7 = vld [vmem:[#allocation10 + $0x200] sm:$0xff]  }
 0x2a6   : > { %v17600_v23 = vsel %vm3162_vm9, %v4508_v25, %v4507_v13  ;;  %v3527_v4 = vrot.slane %v3520_v53, %v15380_v56  ;;  %v3541_v46 = vrot.slane %v3534_v32, %v15380_v56  ;;  %v3562_v34 = vrot.slane %v17365_v52, %v15380_v56  ;;  %v14555_v13 = vld [vmem:[#allocation10 + $0x210] sm:$0xff]  }
 0x2a7   : > { %19645 = vst [vmem:[#allocation31_spill] sm:$0xff] %v17600_v23  ;;  %v8582_v31 = vpack.c.b16 %v17600_v23, %v17585_v14  ;;  %v3555_v54 = vrot.slane %v3548_v8, %v15380_v56  ;;  %v3576_v2 = vrot.slane %v17369_v1, %v15380_v56  ;;  %v3590_v30 = vrot.slane %v17388_v22, %v15380_v56  ;;  %v18139_v14 = vpop.f32.mrb[0].mxu0 }
 0x2a8   : > { %v3569_v33 = vrot.slane %v3562_v34, %v15380_v56  ;;  %v3604_v48 = vrot.slane %v17362_v16, %v15380_v56  ;;  %v3618_v52 = vrot.slane %v17379_v26, %v15380_v56  ;;  %v3632_v25 = vrot.slane %v17383_v27, %v15380_v56  ;;  %19669 = vst [vmem:[#allocation42_spill] sm:$0xff] %v18139_v14 }
 0x2a9   : > { %14143 = vmatmul.mubr.bf16.vlgmr.msra.gmra.mrb[0].mxu1 %v8582_v31  ;;  %v3583_v50 = vrot.slane %v3576_v2, %v15380_v56  ;;  %v3597_v45 = vrot.slane %v3590_v30, %v15380_v56  ;;  %v3646_v1 = vrot.slane %v17400_v15, %v15380_v56  ;;  %v3660_v22 = vrot.slane %v17372_v43, %v15380_v56 }
 0x2aa   : > { %14151 = vmatpush3.bf16.msra.mxu1 %v14674_v7  ;;  %v3611_v51 = vrot.slane %v3604_v48, %v15380_v56  ;;  %v3625_v26 = vrot.slane %v3618_v52, %v15380_v56  ;;  %v3639_v44 = vrot.slane %v3632_v25, %v15380_v56  ;;  %v3674_v27 = vrot.slane %v17391_v40, %v15380_v56 }
 0x2ab   : > { %14152 = vmatprep.subr.bf16.mxu1 %v14552_v28  ;;  %v3653_v53 = vrot.slane %v3646_v1, %v15380_v56  ;;  %v3667_v32 = vrot.slane %v3660_v22, %v15380_v56  ;;  %v3688_v15 = vrot.slane %v17395_v29, %v15380_v56  ;;  %v3702_v43 = vrot.slane %v17407_v42, %v15380_v56 }
 0x2ac   : > { %v3681_v8 = vrot.slane %v3674_v27, %v15380_v56  ;;  %v4174_v34 = vunpack.c.l.b16 %v17594_v63  ;;  %v4175_v31 = vunpack.c.l.b16 %v3513_v41  ;;  %v4176_v2 = vunpack.c.l.b16 %v3527_v4  ;;  %v14558_v27 = vld [vmem:[#allocation10 + $0x218] sm:$0xff]  }
 0x2ad   : > { %v3695_v40 = vrot.slane %v3688_v15, %v15380_v56  ;;  %v3709_v30 = vrot.slane %v3702_v43, %v15380_v56  ;;  %v4177_v48 = vunpack.c.l.b16 %v3541_v46  ;;  %v4178_v52 = vunpack.c.l.b16 %v3555_v54  ;;  %v13224_v54 = vld.sshfl [vmem:[#allocation2 + $0x60] sm:$0x33 pattern:$0x75316420] }
 0x2ae   : > { %14153 = vmatpush3.bf16.msra.mxu1 %v14552_v28  ;;  %v4179_v25 = vunpack.c.l.b16 %v3569_v33  ;;  %v4180_v1 = vunpack.c.l.b16 %v3583_v50  ;;  %v4181_v29 = vunpack.c.l.b16 %v3597_v45  ;;  %v4182_v22 = vunpack.c.l.b16 %v3611_v51 }
 0x2af   : > { %v4183_v7 = vunpack.c.l.b16 %v3625_v26  ;;  %v4184_v42 = vunpack.c.l.b16 %v3639_v44  ;;  %v4185_v21 = vunpack.c.l.b16 %v3653_v53  ;;  %v4186_v5 = vunpack.c.l.b16 %v3667_v32  ;;  %14154 = vmatprep.subr.bf16.mxu1 %v14555_v13  ;;  %v14561_v32 = vld [vmem:[#allocation10 + $0x220] sm:$0xff]  }
 0x2b0   : > { %v4187_v63 = vunpack.c.l.b16 %v3681_v8  ;;  %v4188_v41 = vunpack.c.l.b16 %v3695_v40  ;;  %v4189_v4 = vunpack.c.l.b16 %v3709_v30  ;;  %v4250_v3 = vrot.slane %v4175_v31, 7 }
 0x2b1   : > { %v4252_v15 = vrot.slane %v4176_v2, 6  ;;  %v4254_v11 = vrot.slane %v4177_v48, 5  ;;  %v4256_v43 = vrot.slane %v4178_v52, 4  ;;  %v4258_v46 = vrot.slane %v4179_v25, 3 }
 0x2b2   : > { %v4251_v28 = vsel %vm3144_vm13, %v4250_v3, %v4174_v34  ;;  %v4260_v33 = vrot.slane %v4180_v1, 2  ;;  %v4262_v50 = vrot.slane %v4181_v29, 1  ;;  %v4264_v45 = vrot.slane %v4183_v7, 7  ;;  %14155 = vmatpush3.bf16.msra.mxu1 %v14555_v13  ;;  %v14564_v29 = vld [vmem:[#allocation10 + $0x228] sm:$0xff]  }
 0x2b3   : > { %v4253_v51 = vsel %vm3147_vm15, %v4252_v15, %v4251_v28  ;;  %v4266_v26 = vrot.slane %v4184_v42, 6  ;;  %v4268_v44 = vrot.slane %v4185_v21, 5  ;;  %v4270_v53 = vrot.slane %v4186_v5, 4  ;;  %14156 = vmatprep.subr.bf16.mxu1 %v14558_v27 }
 0x2b4   : > { %v4255_v8 = vsel %vm428_vm1, %v4254_v11, %v4253_v51  ;;  %v4265_v31 = vsel %vm3144_vm13, %v4264_v45, %v4182_v22  ;;  %v4272_v2 = vrot.slane %v4187_v63, 3  ;;  %v4274_v40 = vrot.slane %v4188_v41, 2  ;;  %v13231_v45 = vld.sshfl [vmem:[#allocation2 + $0xa4] sm:$0x33 pattern:$0x75316420] }
 0x2b5   : > { %v4257_v30 = vsel %vm3153_vm0, %v4256_v43, %v4255_v8  ;;  %v4267_v3 = vsel %vm3147_vm15, %v4266_v26, %v4265_v31  ;;  %v4276_v34 = vrot.slane %v4189_v4, 1  ;;  %v1095_v13 = vcombine.high %v17352_v37, %v17352_v37  ;;  %v13228_v4 = vld.sshfl [vmem:[#allocation2 + $0x84] sm:$0x33 pattern:$0x75316420] }
 0x2b6   : > { %v4259_v48 = vsel %vm3156_vm6, %v4258_v46, %v4257_v30  ;;  %v4269_v5 = vsel %vm428_vm1, %v4268_v44, %v4267_v3  ;;  %v1151_v21 = vcombine.high %v13224_v54, %v13224_v54  ;;  %v1615_v52 = vshll.u32 %v17344_v9, 16  ;;  %14157 = vmatpush3.bf16.msra.mxu1 %v14558_v27  ;;  %v13229_v54 = vld.sshfl [vmem:[#allocation2 + $0x88] sm:$0x33 pattern:$0x75316420] }
 0x2b7   : > { %v4261_v11 = vsel %vm3159_vm8, %v4260_v33, %v4259_v48  ;;  %v4271_v25 = vsel %vm3153_vm0, %v4270_v53, %v4269_v5  ;;  %v1610_v1 = vshrl.u32 %v1095_v13, 16  ;;  %14158 = vmatprep.subr.bf16.mxu1 %v14561_v32  ;;  %v1680_v42 = vshll.u32 %v17362_v16, 16 }
 0x2b8   : > { %v17655_v22 = vsel %vm3162_vm9, %v4262_v50, %v4261_v11  ;;  %v4273_v37 = vsel %vm3156_vm6, %v4272_v2, %v4271_v25  ;;  %v1158_v7 = vrot.slane %v1151_v21, %v15380_v56  ;;  %v3178_v27 = vrot.slane %v3096_v58, 7 }
 0x2b9   : > { %19646 = vst [vmem:[#allocation27_spill] sm:$0xff] %v17655_v22  ;;  %v4275_v63 = vsel %vm3159_vm8, %v4274_v40, %v4273_v37  ;;  %v1617_v9 = vsel %vm15567_vm11, %v1610_v1, %v1615_v52  ;;  %v3180_v41 = vrot.slane %v3097_v62, 6  ;;  %v3182_v16 = vrot.slane %v3098_v35, 5 }
 0x2ba   : > { %v17668_v15 = vsel %vm3162_vm9, %v4276_v34, %v4275_v63  ;;  %v1159_v43 = vcombine.high %v1158_v7, %v1158_v7  ;;  %v2413_v46 = vrot.slane %v1617_v9, %v15380_v56  ;;  %14159 = vmatpush3.bf16.msra.mxu1 %v14561_v32  ;;  %v19648_v20 = vunpack.c.l.b16 %v17485_v12  ;;  %v13232_v1 = vld.sshfl [vmem:[#allocation2 + $0xa8] sm:$0x33 pattern:$0x75316420] }
 0x2bb   : > { %19647 = vst [vmem:[#allocation32_spill] sm:$0xff] %v17668_v15  ;;  %v8581_v28 = vpack.c.b16 %v17668_v15, %v17655_v22  ;;  %v19649_v18 = vunpack.c.l.b16 %v17488_v19  ;;  %v19650_v33 = vunpack.c.l.b16 %v17493_v60  ;;  %14160 = vmatprep.subr.bf16.mxu1 %v14564_v29  ;;  %v19651_v35 = vunpack.c.l.b16 %v17496_v24  ;;  %v18143_v15 = vpop.f32.mrb[1].mxu0 }
 0x2bc   : > { %v3184_v58 = vrot.slane %v19648_v20, 4  ;;  %v1675_v51 = vshrl.u32 %v1159_v43, 16  ;;  %v2420_v10 = vrot.slane %v2413_v46, %v15380_v56  ;;  %v19652_v44 = vunpack.c.l.b16 %v17501_v49  ;;  %19670 = vst [vmem:[#allocation43_spill] sm:$0xff] %v18143_v15 }
 0x2bd   : > { %v3186_v62 = vrot.slane %v19649_v18, 3  ;;  %v3188_v50 = vrot.slane %v19650_v33, 2  ;;  %v3190_v26 = vrot.slane %v19651_v35, 1  ;;  %8785 = vmatprep.mubr.bf16.mxu0 %v8581_v28  ;;  %v19653_v12 = vunpack.c.l.b16 %v17504_v38  ;;  %v14566_v18 = vld [vmem:[#allocation10 + $0x1b0] sm:$0xff]  }
 0x2be   : > { %v3192_v53 = vrot.slane %v19652_v44, 7  ;;  %v19654_v19 = vunpack.c.l.b16 %v17509_v47  ;;  %v19655_v60 = vunpack.c.l.b16 %v17512_v17  ;;  %v19656_v2 = vunpack.c.l.b16 %v17517_v0  ;;  %14161 = vmatpush3.bf16.msra.mxu1 %v14564_v29  ;;  %13895 = vmatpush3.bf16.msra.mxu0 %v14566_v18 }
 0x2bf   : > { %v3194_v32 = vrot.slane %v19653_v12, 6  ;;  %v1682_v24 = vsel %vm15567_vm11, %v1675_v51, %v1680_v42  ;;  %v3095_v30 = vunpack.c.l.b16 %v2420_v10  ;;  %v19657_v49 = vunpack.c.l.b16 %v17520_v55 }
 0x2c0   : > { %v3196_v8 = vrot.slane %v19654_v19, 5  ;;  %v3198_v31 = vrot.slane %v19655_v60, 4  ;;  %v3200_v40 = vrot.slane %v19656_v2, 3  ;;  %v1231_v34 = vcombine.high %v13228_v4, %v13228_v4 }
 0x2c1   : > { %v3202_v3 = vrot.slane %v19657_v49, 2  ;;  %v2525_v38 = vrot.slane %v1682_v24, %v15380_v56  ;;  %v17700_v47 = vrot.slane %v13228_v4, %v15380_v56  ;;  %v1255_v13 = vcombine.high %v13229_v54, %v13229_v54 }
 0x2c2   : > { %v17703_v17 = vrot.slane %v13229_v54, %v15380_v56  ;;  %v3179_v0 = vsel %vm3144_vm13, %v3178_v27, %v3095_v30  ;;  %v17707_v48 = vrot.slane %v1231_v34, %v15380_v56  ;;  %v1295_v5 = vcombine.high %v13231_v45, %v13231_v45 }
 0x2c3   : > { %v17710_v55 = vrot.slane %v13231_v45, %v15380_v56  ;;  %v2532_v21 = vrot.slane %v2525_v38, %v15380_v56  ;;  %v3181_v52 = vsel %vm3147_vm15, %v3180_v41, %v3179_v0  ;;  %v19658_v11 = vunpack.c.l.b16 %v17525_v61 }
 0x2c4   : > { %v17717_v29 = vrot.slane %v1255_v13, %v15380_v56  ;;  %v3183_v37 = vsel %vm428_vm1, %v3182_v16, %v3181_v52  ;;  %v17722_v7 = vcombine.high %v17700_v47, %v17700_v47  ;;  %v17726_v42 = vcombine.high %v17707_v48, %v17707_v48 }
 0x2c5   : > { %v3204_v25 = vrot.slane %v19658_v11, 1  ;;  %v17729_v63 = vrot.slane %v1295_v5, %v15380_v56  ;;  %v3103_v9 = vunpack.c.l.b16 %v2532_v21  ;;  %v3185_v61 = vsel %vm3153_vm0, %v3184_v58, %v3183_v37 }
 0x2c6   : > { %v17734_v27 = vcombine.high %v17703_v17, %v17703_v17  ;;  %v17738_v41 = vcombine.high %v17717_v29, %v17717_v29  ;;  %v3187_v4 = vsel %vm3156_vm6, %v3186_v62, %v3185_v61  ;;  %v17743_v43 = vcombine.high %v17710_v55, %v17710_v55 }
 0x2c7   : > { %v1319_v46 = vcombine.high %v13232_v1, %v13232_v1  ;;  %v17746_v16 = vrot.slane %v13232_v1, %v15380_v56  ;;  %v3189_v54 = vsel %vm3159_vm8, %v3188_v50, %v3187_v4  ;;  %v3193_v28 = vsel %vm3144_vm13, %v3192_v53, %v3103_v9 }
 0x2c8   : > { %v3716_v20 = vrot.slane %v17700_v47, %v15380_v56  ;;  %v3730_v58 = vrot.slane %v17707_v48, %v15380_v56  ;;  %v17755_v62 = vsel %vm3162_vm9, %v3190_v26, %v3189_v54  ;;  %v3195_v33 = vsel %vm3147_vm15, %v3194_v32, %v3193_v28 }
 0x2c9   : > { %19659 = vst [vmem:[#allocation33_spill] sm:$0xff] %v17755_v62  ;;  %v17760_v45 = vcombine.high %v17729_v63, %v17729_v63  ;;  %v17763_v50 = vrot.slane %v1319_v46, %v15380_v56  ;;  %v3197_v51 = vsel %vm428_vm1, %v3196_v8, %v3195_v33  ;;  %v17768_v10 = vcombine.high %v17746_v16, %v17746_v16  ;;  %v14567_v46 = vld [vmem:[#allocation10 + $0x230] sm:$0xff]  }
 0x2ca   : > { %v17771_v35 = vrot.slane %v3716_v20, %v15380_v56  ;;  %v3737_v26 = vrot.slane %v3730_v58, %v15380_v56  ;;  %v3199_v44 = vsel %vm3153_vm0, %v3198_v31, %v3197_v51  ;;  %v3744_v12 = vrot.slane %v17722_v7, %v15380_v56  ;;  %14162 = vmatprep.subr.bf16.mxu1 %v14567_v46 }
 0x2cb   : > { %v17777_v53 = vcombine.high %v17763_v50, %v17763_v50  ;;  %v3758_v32 = vrot.slane %v17726_v42, %v15380_v56  ;;  %v3201_v19 = vsel %vm3156_vm6, %v3200_v40, %v3199_v44  ;;  %v3772_v8 = vrot.slane %v17703_v17, %v15380_v56  ;;  %14163 = vmatpush3.bf16.msra.mxu1 %v14567_v46 }
 0x2cc   : > { %v3786_v60 = vrot.slane %v17717_v29, %v15380_v56  ;;  %v3800_v31 = vrot.slane %v17734_v27, %v15380_v56  ;;  %v3203_v2 = vsel %vm3159_vm8, %v3202_v3, %v3201_v19  ;;  %v3751_v24 = vrot.slane %v3744_v12, %v15380_v56  ;;  %v14568_v12 = vld [vmem:[#allocation10 + $0x1f8] sm:$0xff]  }
 0x2cd   : > { %v3765_v30 = vrot.slane %v3758_v32, %v15380_v56  ;;  %v3814_v49 = vrot.slane %v17738_v41, %v15380_v56  ;;  %v17796_v40 = vsel %vm3162_vm9, %v3204_v25, %v3203_v2  ;;  %v3779_v34 = vrot.slane %v3772_v8, %v15380_v56  ;;  %v14569_v32 = vld [vmem:[#allocation10 + $0x1b8] sm:$0xff]   ;;  %13896 = vmatprep.subr.bf16.mxu0 %v14568_v12 }
 0x2ce   : > { %19660 = vst [vmem:[#allocation25_spill] sm:$0xff] %v17796_v40  ;;  %v3793_v38 = vrot.slane %v3786_v60, %v15380_v56  ;;  %v3807_v13 = vrot.slane %v3800_v31, %v15380_v56  ;;  %v8580_v0 = vpack.c.b16 %v17796_v40, %v17755_v62  ;;  %v3828_v5 = vrot.slane %v17710_v55, %v15380_v56  ;;  %v14570_v19 = vld [vmem:[#allocation10 + $0x238] sm:$0xff]   ;;  %v18146_v62 = vpop.f32.mrb[2].mxu0 }
 0x2cf   : > { %v3821_v3 = vrot.slane %v3814_v49, %v15380_v56  ;;  %v3842_v21 = vrot.slane %v17729_v63, %v15380_v56  ;;  %v3856_v52 = vrot.slane %v17743_v43, %v15380_v56  ;;  %v3870_v11 = vrot.slane %v17760_v45, %v15380_v56  ;;  %14164 = vmatprep.subr.bf16.mxu1 %v14570_v19  ;;  %v18148_v14 = vpop.f32.mrb[3].mxu0 }
 0x2d0   : > { %v3884_v25 = vrot.slane %v17746_v16, %v15380_v56  ;;  %v3898_v1 = vrot.slane %v17763_v50, %v15380_v56  ;;  %8786 = vmatmul.mubr.bf16.gmra.mrb[20].mxu0 %v8580_v0  ;;  %v3835_v37 = vrot.slane %v3828_v5, %v15380_v56  ;;  %v3912_v61 = vrot.slane %v17768_v10, %v15380_v56 }
 0x2d1   : > { %v3849_v9 = vrot.slane %v3842_v21, %v15380_v56  ;;  %v3926_v4 = vrot.slane %v17777_v53, %v15380_v56  ;;  %v3863_v54 = vrot.slane %v3856_v52, %v15380_v56  ;;  %v3877_v28 = vrot.slane %v3870_v11, %v15380_v56  ;;  %13897 = vmatpush3.bf16.msra.mxu0 %v14569_v32 }
 0x2d2   : > { %v3891_v20 = vrot.slane %v3884_v25, %v15380_v56  ;;  %v3905_v58 = vrot.slane %v3898_v1, %v15380_v56  ;;  %v3919_v18 = vrot.slane %v3912_v61, %v15380_v56  ;;  %v4190_v51 = vunpack.c.l.b16 %v17771_v35  ;;  %14165 = vmatpush3.bf16.msra.mxu1 %v14570_v19  ;;  %19671 = vst [vmem:[#allocation44_spill] sm:$0xff] %v18146_v62 }
 0x2d3   : > { %v3933_v33 = vrot.slane %v3926_v4, %v15380_v56  ;;  %v4191_v44 = vunpack.c.l.b16 %v3737_v26  ;;  %v4192_v8 = vunpack.c.l.b16 %v3751_v24  ;;  %v4193_v60 = vunpack.c.l.b16 %v3765_v30  ;;  %v13227_v24 = vld.sshfl [vmem:[#allocation2 + $0x80] sm:$0x33 pattern:$0x75316420]  ;;  %19672 = vst [vmem:[#allocation45_spill] sm:$0xff] %v18148_v14 }
 0x2d4   : > { %v4194_v31 = vunpack.c.l.b16 %v3779_v34  ;;  %v4195_v2 = vunpack.c.l.b16 %v3793_v38  ;;  %v4196_v49 = vunpack.c.l.b16 %v3807_v13  ;;  %v4197_v0 = vunpack.c.l.b16 %v3821_v3  ;;  %v13230_v30 = vld.sshfl [vmem:[#allocation2 + $0xa0] sm:$0x33 pattern:$0x75316420] }
 0x2d5   : > { %v4198_v5 = vunpack.c.l.b16 %v3835_v37  ;;  %v4199_v21 = vunpack.c.l.b16 %v3849_v9  ;;  %v4200_v52 = vunpack.c.l.b16 %v3863_v54  ;;  %v4201_v11 = vunpack.c.l.b16 %v3877_v28  ;;  %v473_v14 = vld [vmem:[#allocation2 + $0xe0] sm:$0x8] }
 0x2d6   : > { %v4202_v25 = vunpack.c.l.b16 %v3891_v20  ;;  %v4203_v35 = vunpack.c.l.b16 %v3905_v58  ;;  %v4204_v26 = vunpack.c.l.b16 %v3919_v18  ;;  %v4205_v1 = vunpack.c.l.b16 %v3933_v33 }
 0x2d7   : > { %v4278_v61 = vrot.slane %v4191_v44, 7  ;;  %v4280_v4 = vrot.slane %v4192_v8, 6  ;;  %v4282_v34 = vrot.slane %v4193_v60, 5  ;;  %v4284_v38 = vrot.slane %v4194_v31, 4 }
 0x2d8   : > { %v4286_v46 = vrot.slane %v4195_v2, 3  ;;  %v4288_v13 = vrot.slane %v4196_v49, 2  ;;  %v4290_v37 = vrot.slane %v4197_v0, 1  ;;  %v4292_v9 = vrot.slane %v4199_v21, 7 }
 0x2d9   : > { %v4279_v3 = vsel %vm3144_vm13, %v4278_v61, %v4190_v51  ;;  %v4294_v54 = vrot.slane %v4200_v52, 6  ;;  %v4296_v20 = vrot.slane %v4201_v11, 5  ;;  %v4298_v58 = vrot.slane %v4202_v25, 4 }
 0x2da   : > { %v4281_v28 = vsel %vm3147_vm15, %v4280_v4, %v4279_v3  ;;  %v4300_v18 = vrot.slane %v4203_v35, 3  ;;  %v4293_v44 = vsel %vm3144_vm13, %v4292_v9, %v4198_v5  ;;  %v4302_v12 = vrot.slane %v4204_v26, 2 }
 0x2db   : > { %v4283_v33 = vsel %vm428_vm1, %v4282_v34, %v4281_v28  ;;  %v4304_v32 = vrot.slane %v4205_v1, 1  ;;  %v4295_v19 = vsel %vm3147_vm15, %v4294_v54, %v4293_v44  ;;  %v1215_v60 = vcombine.high %v13227_v24, %v13227_v24 }
 0x2dc   : > { %v4285_v8 = vsel %vm3153_vm0, %v4284_v38, %v4283_v33  ;;  %v1279_v51 = vcombine.high %v13230_v30, %v13230_v30  ;;  %v4297_v2 = vsel %vm428_vm1, %v4296_v20, %v4295_v19  ;;  %v1745_v49 = vshll.u32 %v17700_v47, 16 }
 0x2dd   : > { %v4287_v31 = vsel %vm3156_vm6, %v4286_v46, %v4285_v8  ;;  %v1748_v0 = vshrl.u32 %v17700_v47, 16  ;;  %v4299_v5 = vsel %vm3153_vm0, %v4298_v58, %v4297_v2  ;;  %v1222_v52 = vrot.slane %v1215_v60, %v15380_v56 }
 0x2de   : > { %v4289_v21 = vsel %vm3159_vm8, %v4288_v13, %v4287_v31  ;;  %v1286_v11 = vrot.slane %v1279_v51, %v15380_v56  ;;  %v4301_v35 = vsel %vm3156_vm6, %v4300_v18, %v4299_v5  ;;  %v1753_v26 = vshll.u32 %v17707_v48, 16 }
 0x2df   : > { %v17844_v25 = vsel %vm3162_vm9, %v4290_v37, %v4289_v21  ;;  %v1756_v1 = vshrl.u32 %v17707_v48, 16  ;;  %v4303_v61 = vsel %vm3159_vm8, %v4302_v12, %v4301_v35  ;;  %v1223_v47 = vcombine.high %v1222_v52, %v1222_v52 }
 0x2e0   : > { %19661 = vst [vmem:[#allocation34_spill] sm:$0xff] %v17844_v25  ;;  %v1287_v4 = vcombine.high %v1286_v11, %v1286_v11  ;;  %v1761_v24 = vshll.u32 %v17722_v7, 16  ;;  %v17852_v30 = vsel %vm3162_vm9, %v4304_v32, %v4303_v61  ;;  %v1755_v34 = vsel %vm15567_vm11, %v1748_v0, %v1753_v26 }
 0x2e1   : > { %19662 = vst [vmem:[#allocation35_spill] sm:$0xff] %v17852_v30  ;;  %v1764_v38 = vshrl.u32 %v17722_v7, 16  ;;  %v1769_v46 = vshll.u32 %v17726_v42, 16  ;;  %v8584_v13 = vpack.c.b16 %v17852_v30, %v17844_v25  ;;  %v1740_v48 = vshrl.u32 %v1223_v47, 16 }
 0x2e2   : > { %v1763_v3 = vsel %vm15567_vm11, %v1756_v1, %v1761_v24  ;;  %v1772_v37 = vshrl.u32 %v17726_v42, 16  ;;  %v1777_v54 = vshll.u32 %v17703_v17, 16  ;;  %v1780_v28 = vshrl.u32 %v17703_v17, 16 }
 0x2e3   : > { %v1771_v9 = vsel %vm15567_vm11, %v1764_v38, %v1769_v46  ;;  %v1785_v7 = vshll.u32 %v17717_v29, 16  ;;  %8793 = vmatprep.mubr.bf16.mxu0 %v8584_v13  ;;  %v1747_v20 = vsel %vm15567_vm11, %v1740_v48, %v1745_v49  ;;  %v1788_v58 = vshrl.u32 %v17717_v29, 16 }
 0x2e4   : > { %v1793_v18 = vshll.u32 %v17734_v27, 16  ;;  %v1796_v33 = vshrl.u32 %v17734_v27, 16  ;;  %v1779_v42 = vsel %vm15567_vm11, %v1772_v37, %v1777_v54  ;;  %v1801_v17 = vshll.u32 %v17738_v41, 16 }
 0x2e5   : > { %v1787_v44 = vsel %vm15567_vm11, %v1780_v28, %v1785_v7  ;;  %v1805_v12 = vshrl.u32 %v1287_v4, 16  ;;  %v1810_v8 = vshll.u32 %v17710_v55, 16  ;;  %v1813_v29 = vshrl.u32 %v17710_v55, 16 }
 0x2e6   : > { %v1795_v32 = vsel %vm15567_vm11, %v1788_v58, %v1793_v18  ;;  %v1818_v19 = vshll.u32 %v17729_v63, 16  ;;  %v1803_v27 = vsel %vm15567_vm11, %v1796_v33, %v1801_v17  ;;  %v1821_v60 = vshrl.u32 %v17729_v63, 16 }
 0x2e7   : > { %v1826_v51 = vshll.u32 %v17743_v43, 16  ;;  %v1829_v31 = vshrl.u32 %v17743_v43, 16  ;;  %v1812_v2 = vsel %vm15567_vm11, %v1805_v12, %v1810_v8  ;;  %v1834_v0 = vshll.u32 %v17760_v45, 16 }
 0x2e8   : > { %v1820_v49 = vsel %vm15567_vm11, %v1813_v29, %v1818_v19  ;;  %v1837_v55 = vshrl.u32 %v17760_v45, 16  ;;  %v1842_v5 = vshll.u32 %v17746_v16, 16  ;;  %v1845_v63 = vshrl.u32 %v17746_v16, 16 }
 0x2e9   : > { %v1828_v21 = vsel %vm15567_vm11, %v1821_v60, %v1826_v51  ;;  %v1850_v52 = vshll.u32 %v17763_v50, 16  ;;  %v1836_v43 = vsel %vm15567_vm11, %v1829_v31, %v1834_v0  ;;  %v1853_v11 = vshrl.u32 %v17763_v50, 16 }
 0x2ea   : > { %v1858_v35 = vshll.u32 %v17768_v10, 16  ;;  %v1861_v26 = vshrl.u32 %v17768_v10, 16  ;;  %v1844_v45 = vsel %vm15567_vm11, %v1837_v55, %v1842_v5  ;;  %v1866_v61 = vshll.u32 %v17777_v53, 16 }
 0x2eb   : > { %v1852_v1 = vsel %vm15567_vm11, %v1845_v63, %v1850_v52  ;;  %v2637_v16 = vrot.slane %v1747_v20, %v15380_v56  ;;  %v2651_v4 = vrot.slane %v1755_v34, %v15380_v56  ;;  %v2665_v50 = vrot.slane %v1763_v3, %v15380_v56 }
 0x2ec   : > { %v1860_v47 = vsel %vm15567_vm11, %v1853_v11, %v1858_v35  ;;  %v2679_v24 = vrot.slane %v1771_v9, %v15380_v56  ;;  %v1868_v10 = vsel %vm15567_vm11, %v1861_v26, %v1866_v61  ;;  %v2693_v46 = vrot.slane %v1779_v42, %v15380_v56 }
 0x2ed   : > { %v2644_v38 = vrot.slane %v2637_v16, %v15380_v56  ;;  %v2707_v13 = vrot.slane %v1787_v44, %v15380_v56  ;;  %v17921_v48 = vrot.slane %v2651_v4, %v15380_v56  ;;  %v17924_v37 = vrot.slane %v2665_v50, %v15380_v56 }
 0x2ee   : > { %v17927_v34 = vrot.slane %v2679_v24, %v15380_v56  ;;  %v2721_v3 = vrot.slane %v1795_v32, %v15380_v56  ;;  %v17931_v9 = vrot.slane %v2693_v46, %v15380_v56  ;;  %v2735_v28 = vrot.slane %v1803_v27, %v15380_v56 }
 0x2ef   : > { %v17934_v54 = vrot.slane %v2707_v13, %v15380_v56  ;;  %v2749_v7 = vrot.slane %v1812_v2, %v15380_v56  ;;  %v2763_v58 = vrot.slane %v1820_v49, %v15380_v56  ;;  %v2777_v18 = vrot.slane %v1828_v21, %v15380_v56 }
 0x2f0   : > { %v17939_v20 = vrot.slane %v2721_v3, %v15380_v56  ;;  %v2791_v33 = vrot.slane %v1836_v43, %v15380_v56  ;;  %v17945_v42 = vrot.slane %v2735_v28, %v15380_v56  ;;  %v2805_v17 = vrot.slane %v1844_v45, %v15380_v56 }
 0x2f1   : > { %v2756_v44 = vrot.slane %v2749_v7, %v15380_v56  ;;  %v2819_v12 = vrot.slane %v1852_v1, %v15380_v56  ;;  %v17951_v32 = vrot.slane %v2763_v58, %v15380_v56  ;;  %v17954_v8 = vrot.slane %v2777_v18, %v15380_v56 }
 0x2f2   : > { %v17957_v29 = vrot.slane %v2791_v33, %v15380_v56  ;;  %v2833_v19 = vrot.slane %v1860_v47, %v15380_v56  ;;  %v17961_v27 = vrot.slane %v2805_v17, %v15380_v56  ;;  %v2847_v51 = vrot.slane %v1868_v10, %v15380_v56  ;;  %v13234_v47 = vld.sshfl [vmem:[#allocation2 + $0xc4] sm:$0x33 pattern:$0x75316420] }
 0x2f3   : > { %19663 = vst [vmem:[#allocation36_spill] sm:$0xff] %v17951_v32  ;;  %v17964_v60 = vrot.slane %v2819_v12, %v15380_v56  ;;  %v3111_v31 = vunpack.c.l.b16 %v2644_v38  ;;  %v19535_v49 = vunpack.c.l.b16 %v17921_v48  ;;  %v19538_v0 = vunpack.c.l.b16 %v17924_v37  ;;  %v13235_v38 = vld.sshfl [vmem:[#allocation2 + $0xc8] sm:$0x33 pattern:$0x75316420] }
 0x2f4   : > { %v17968_v2 = vrot.slane %v2833_v19, %v15380_v56  ;;  %v19537_v55 = vunpack.c.l.b16 %v17927_v34  ;;  %v17974_v21 = vrot.slane %v2847_v51, %v15380_v56  ;;  %v19536_v5 = vunpack.c.l.b16 %v17931_v9 }
 0x2f5   : > { %19664 = vst [vmem:[#allocation37_spill] sm:$0xff] %v17964_v60  ;;  %v19534_v63 = vunpack.c.l.b16 %v17934_v54  ;;  %v19533_v52 = vunpack.c.l.b16 %v17939_v20  ;;  %v19532_v43 = vunpack.c.l.b16 %v17945_v42  ;;  %v3119_v11 = vunpack.c.l.b16 %v2756_v44 }
 0x2f6   : > { %19665 = vst [vmem:[#allocation38_spill] sm:$0xff] %v17968_v2  ;;  %19666 = vst [vmem:[#allocation39_spill] sm:$0xff] %v17974_v21  ;;  %v19525_v35 = vunpack.c.l.b16 %v17951_v32  ;;  %v19530_v26 = vunpack.c.l.b16 %v17954_v8  ;;  %v19526_v45 = vunpack.c.l.b16 %v17957_v29  ;;  %v19527_v1 = vunpack.c.l.b16 %v17961_v27 }
 0x2f7   : > { %v19528_v61 = vunpack.c.l.b16 %v17964_v60  ;;  %v19529_v16 = vunpack.c.l.b16 %v17968_v2  ;;  %v19531_v4 = vunpack.c.l.b16 %v17974_v21  ;;  %v3206_v50 = vrot.slane %v19535_v49, 7 }
 0x2f8   : > { %v3208_v24 = vrot.slane %v19538_v0, 6  ;;  %v3210_v10 = vrot.slane %v19537_v55, 5  ;;  %v3212_v46 = vrot.slane %v19536_v5, 4  ;;  %v3214_v13 = vrot.slane %v19534_v63, 3 }
 0x2f9   : > { %v3216_v3 = vrot.slane %v19533_v52, 2  ;;  %v3218_v28 = vrot.slane %v19532_v43, 1  ;;  %v3207_v7 = vsel %vm3144_vm13, %v3206_v50, %v3111_v31  ;;  %v3220_v58 = vrot.slane %v19525_v35, 7 }
 0x2fa   : > { %v3222_v18 = vrot.slane %v19530_v26, 6  ;;  %v3224_v33 = vrot.slane %v19526_v45, 5  ;;  %v3209_v44 = vsel %vm3147_vm15, %v3208_v24, %v3207_v7  ;;  %v3226_v17 = vrot.slane %v19527_v1, 4 }
 0x2fb   : > { %v3228_v12 = vrot.slane %v19528_v61, 3  ;;  %v3230_v19 = vrot.slane %v19529_v16, 2  ;;  %v3211_v51 = vsel %vm428_vm1, %v3210_v10, %v3209_v44  ;;  %v3221_v31 = vsel %vm3144_vm13, %v3220_v58, %v3119_v11  ;;  %v13237_v26 = vld.sshfl [vmem:[#allocation2 + $0xe4] sm:$0x33 pattern:$0x75316420] }
 0x2fc   : > { %v3232_v50 = vrot.slane %v19531_v4, 1  ;;  %v1359_v35 = vcombine.high %v13234_v47, %v13234_v47  ;;  %v3213_v45 = vsel %vm3153_vm0, %v3212_v46, %v3211_v51  ;;  %v3223_v24 = vsel %vm3147_vm15, %v3222_v18, %v3221_v31  ;;  %v13238_v18 = vld.sshfl [vmem:[#allocation2 + $0xe8] sm:$0x33 pattern:$0x75316420] }
 0x2fd   : > { %v18022_v7 = vrot.slane %v13234_v47, %v15380_v56  ;;  %v1383_v1 = vcombine.high %v13235_v38, %v13235_v38  ;;  %v3215_v61 = vsel %vm3156_vm6, %v3214_v13, %v3213_v45  ;;  %v3225_v16 = vsel %vm428_vm1, %v3224_v33, %v3223_v24 }
 0x2fe   : > { %v18027_v10 = vrot.slane %v1359_v35, %v15380_v56  ;;  %v18030_v11 = vrot.slane %v13235_v38, %v15380_v56  ;;  %v3217_v58 = vsel %vm3159_vm8, %v3216_v3, %v3215_v61  ;;  %v3227_v46 = vsel %vm3153_vm0, %v3226_v17, %v3225_v16 }
 0x2ff   : > { %v18036_v47 = vcombine.high %v18022_v7, %v18022_v7  ;;  %v18039_v45 = vrot.slane %v1383_v1, %v15380_v56  ;;  %v18042_v13 = vsel %vm3162_vm9, %v3218_v28, %v3217_v58  ;;  %v3229_v35 = vsel %vm3156_vm6, %v3228_v12, %v3227_v46 }
 0x300   : > { %19667 = vst [vmem:[#allocation40_spill] sm:$0xff] %v18042_v13  ;;  %v18047_v38 = vcombine.high %v18027_v10, %v18027_v10  ;;  %v18051_v61 = vcombine.high %v18030_v11, %v18030_v11  ;;  %v3231_v16 = vsel %vm3159_vm8, %v3230_v19, %v3229_v35  ;;  %v1423_v1 = vcombine.high %v13237_v26, %v13237_v26 }
 0x301   : > { %v18056_v3 = vcombine.high %v18039_v45, %v18039_v45  ;;  %v18059_v28 = vrot.slane %v13237_v26, %v15380_v56  ;;  %v18062_v33 = vsel %vm3162_vm9, %v3232_v50, %v3231_v16  ;;  %v1447_v44 = vcombine.high %v13238_v18, %v13238_v18 }
 0x302   : > { %19668 = vst [vmem:[#allocation41_spill] sm:$0xff] %v18062_v33  ;;  %v18065_v17 = vrot.slane %v13238_v18, %v15380_v56  ;;  %v3940_v12 = vrot.slane %v18022_v7, %v15380_v56  ;;  %v8583_v19 = vpack.c.b16 %v18062_v33, %v18042_v13  ;;  %v18072_v51 = vrot.slane %v1423_v1, %v15380_v56 }
 0x303   : > { %v18076_v26 = vcombine.high %v18059_v28, %v18059_v28  ;;  %v3954_v31 = vrot.slane %v18027_v10, %v15380_v56  ;;  %v18081_v50 = vrot.slane %v1447_v44, %v15380_v56  ;;  %v3968_v46 = vrot.slane %v18036_v47, %v15380_v56 }
 0x304   : > { %v18085_v24 = vcombine.high %v18065_v17, %v18065_v17  ;;  %v18088_v58 = vrot.slane %v3940_v12, %v15380_v56  ;;  %8794 = vmatmul.mubr.bf16.gmra.mrb[24].mxu0 %v8583_v19  ;;  %v18094_v18 = vcombine.high %v18072_v51, %v18072_v51  ;;  %v3982_v16 = vrot.slane %v18047_v38, %v15380_v56 }
 0x305   : > { %v3961_v35 = vrot.slane %v3954_v31, %v15380_v56  ;;  %v3996_v1 = vrot.slane %v18030_v11, %v15380_v56  ;;  %v18103_v44 = vcombine.high %v18081_v50, %v18081_v50  ;;  %v3975_v12 = vrot.slane %v3968_v46, %v15380_v56 }
 0x306   : > { %v4010_v19 = vrot.slane %v18039_v45, %v15380_v56  ;;  %v4024_v4 = vrot.slane %v18051_v61, %v15380_v56  ;;  %v3989_v31 = vrot.slane %v3982_v16, %v15380_v56  ;;  %v4038_v52 = vrot.slane %v18056_v3, %v15380_v56 }
 0x307   : > { %v4003_v43 = vrot.slane %v3996_v1, %v15380_v56  ;;  %v4052_v63 = vrot.slane %v18059_v28, %v15380_v56  ;;  %v4066_v5 = vrot.slane %v18072_v51, %v15380_v56  ;;  %v4080_v55 = vrot.slane %v18076_v26, %v15380_v56 }
 0x308   : > { %v4017_v49 = vrot.slane %v4010_v19, %v15380_v56  ;;  %v4031_v46 = vrot.slane %v4024_v4, %v15380_v56  ;;  %v4045_v16 = vrot.slane %v4038_v52, %v15380_v56  ;;  %v4094_v0 = vrot.slane %v18094_v18, %v15380_v56 }
 0x309   : > { %v4059_v1 = vrot.slane %v4052_v63, %v15380_v56  ;;  %v4108_v33 = vrot.slane %v18065_v17, %v15380_v56  ;;  %v4073_v19 = vrot.slane %v4066_v5, %v15380_v56  ;;  %v4087_v4 = vrot.slane %v4080_v55, %v15380_v56 }
 0x30a   : > { %v4122_v23 = vrot.slane %v18081_v50, %v15380_v56  ;;  %v4136_v30 = vrot.slane %v18085_v24, %v15380_v56  ;;  %v4101_v52 = vrot.slane %v4094_v0, %v15380_v56  ;;  %v4150_v13 = vrot.slane %v18103_v44, %v15380_v56 }
 0x30b   : > { %v4115_v63 = vrot.slane %v4108_v33, %v15380_v56  ;;  %v4206_v40 = vunpack.c.l.b16 %v18088_v58  ;;  %v4207_v39 = vunpack.c.l.b16 %v3961_v35  ;;  %v4208_v25 = vunpack.c.l.b16 %v3975_v12  ;;  %v18150_v12 = vpop.f32.mrb[4].mxu0 }
 0x30c   : > { %v4129_v5 = vrot.slane %v4122_v23, %v15380_v56  ;;  %v4143_v55 = vrot.slane %v4136_v30, %v15380_v56  ;;  %v4157_v22 = vrot.slane %v4150_v13, %v15380_v56  ;;  %v4209_v0 = vunpack.c.l.b16 %v3989_v31  ;;  %19673 = vst [vmem:[#allocation46_spill] sm:$0xff] %v18150_v12 }
 0x30d   : > { %v4210_v59 = vunpack.c.l.b16 %v4003_v43  ;;  %v4211_v33 = vunpack.c.l.b16 %v4017_v49  ;;  %v4212_v57 = vunpack.c.l.b16 %v4031_v46  ;;  %v4213_v21 = vunpack.c.l.b16 %v4045_v16  ;;  %v13233_v43 = vld.sshfl [vmem:[#allocation2 + $0xc0] sm:$0x33 pattern:$0x75316420]  ;;  %v18152_v49 = vpop.f32.mrb[5].mxu0 }
 0x30e   : > { %v4214_v58 = vunpack.c.l.b16 %v4059_v1  ;;  %v4215_v2 = vunpack.c.l.b16 %v4073_v19  ;;  %v4216_v23 = vunpack.c.l.b16 %v4087_v4  ;;  %v4217_v32 = vunpack.c.l.b16 %v4101_v52  ;;  %19674 = vst [vmem:[#allocation47_spill] sm:$0xff] %v18152_v49  ;;  %v18154_v19 = vpop.f32.mrb[6].mxu0 }
 0x30f   : > { %v4218_v30 = vunpack.c.l.b16 %v4115_v63  ;;  %v4219_v35 = vunpack.c.l.b16 %v4129_v5  ;;  %v4220_v15 = vunpack.c.l.b16 %v4143_v55  ;;  %v4221_v60 = vunpack.c.l.b16 %v4157_v22  ;;  %v18157_v12 = vpop.f32.mrb[7].mxu0 }
 0x310   : > { %v4306_v13 = vrot.slane %v4207_v39, 7  ;;  %v4308_v31 = vrot.slane %v4208_v25, 6  ;;  %v4310_v62 = vrot.slane %v4209_v0, 5  ;;  %v4312_v46 = vrot.slane %v4210_v59, 4  ;;  %v18160_v49 = vpop.f32.mrb[8].mxu0 }
 0x311   : > { %v4314_v16 = vrot.slane %v4211_v33, 3  ;;  %v4316_v1 = vrot.slane %v4212_v57, 2  ;;  %v4318_v52 = vrot.slane %v4213_v21, 1  ;;  %v4320_v63 = vrot.slane %v4215_v2, 7 }
 0x312   : > { %v4307_v4 = vsel %vm3144_vm13, %v4306_v13, %v4206_v40  ;;  %v4322_v5 = vrot.slane %v4216_v23, 6  ;;  %v4324_v22 = vrot.slane %v4217_v32, 5  ;;  %v4326_v25 = vrot.slane %v4218_v30, 4  ;;  %v18164_v40 = vpop.f32.mrb[9].mxu0 }
 0x313   : > { %v4309_v39 = vsel %vm3147_vm15, %v4308_v31, %v4307_v4  ;;  %v4328_v55 = vrot.slane %v4219_v35, 3  ;;  %v4321_v57 = vsel %vm3144_vm13, %v4320_v63, %v4214_v58  ;;  %v4330_v0 = vrot.slane %v4220_v15, 2  ;;  %v18170_v30 = vpop.f32.mrb[10].mxu0 }
 0x314   : > { %v4311_v59 = vsel %vm428_vm1, %v4310_v62, %v4309_v39  ;;  %v4332_v33 = vrot.slane %v4221_v60, 1  ;;  %v4323_v21 = vsel %vm3147_vm15, %v4322_v5, %v4321_v57  ;;  %v474_v23 = vsel %vm15354_vm2, 0, %v473_v14  ;;  %v18176_v58 = vpop.f32.mrb[11].mxu0 }
 0x315   : > { %v4313_v2 = vsel %vm3153_vm0, %v4312_v46, %v4311_v59  ;;  %v1343_v32 = vcombine.high %v13233_v43, %v13233_v43  ;;  %v4325_v62 = vsel %vm428_vm1, %v4324_v22, %v4323_v21  ;;  %475 = vst [vmem:[#allocation2 + $0xe0] sm:$0x8] %v474_v23  ;;  %v1875_v15 = vshll.u32 %v18022_v7, 16  ;;  %v18182_v46 = vpop.f32.mrb[12].mxu0 }
 0x316   : > { %v4315_v35 = vsel %vm3156_vm6, %v4314_v16, %v4313_v2  ;;  %v1878_v60 = vshrl.u32 %v18022_v7, 16  ;;  %v4327_v31 = vsel %vm3153_vm0, %v4326_v25, %v4325_v62  ;;  %v1883_v43 = vshll.u32 %v18027_v10, 16  ;;  %v18190_v5 = vpop.f32.mrb[13].mxu0 }
 0x317   : > { %v4317_v13 = vsel %vm3159_vm8, %v4316_v1, %v4315_v35  ;;  %v1350_v14 = vrot.slane %v1343_v32, %v15380_v56  ;;  %v4329_v4 = vsel %vm3156_vm6, %v4328_v55, %v4327_v31  ;;  %v1886_v63 = vshrl.u32 %v18027_v10, 16  ;;  %19675 = vst [vmem:[#allocation48_spill] sm:$0xff] %v18190_v5  ;;  %v18196_v59 = vpop.f32.mrb[14].mxu0 }
 0x318   : > { %v18185_v16 = vsel %vm3162_vm9, %v4318_v52, %v4317_v13  ;;  %v1891_v7 = vshll.u32 %v18036_v47, 16  ;;  %v4331_v1 = vsel %vm3159_vm8, %v4330_v0, %v4329_v4  ;;  %v1885_v22 = vsel %vm15567_vm11, %v1878_v60, %v1883_v43  ;;  %19676 = vst [vmem:[#allocation49_spill] sm:$0xff] %v18196_v59  ;;  %v18205_v2 = vpop.f32.mrb[15].mxu0 }
 0x319   : > { %v1351_v39 = vcombine.high %v1350_v14, %v1350_v14  ;;  %v1894_v25 = vshrl.u32 %v18036_v47, 16  ;;  %v18199_v52 = vsel %vm3162_vm9, %v4332_v33, %v4331_v1  ;;  %v1899_v55 = vshll.u32 %v18047_v38, 16  ;;  %19678 = vst [vmem:[#allocation51_spill] sm:$0xff] %v18205_v2 }
 0x31a   : > { %19677 = vst [vmem:[#allocation50_spill] sm:$0xff] %v18199_v52  ;;  %v1893_v10 = vsel %vm15567_vm11, %v1886_v63, %v1891_v7  ;;  %v1902_v57 = vshrl.u32 %v18047_v38, 16  ;;  %v8587_v0 = vpack.c.b16 %v18199_v52, %v18185_v16  ;;  %v1907_v47 = vshll.u32 %v18030_v11, 16 }
 0x31b   : > { %v1870_v21 = vshrl.u32 %v1351_v39, 16  ;;  %v1910_v23 = vshrl.u32 %v18030_v11, 16  ;;  %v1901_v33 = vsel %vm15567_vm11, %v1894_v25, %v1899_v55  ;;  %v1915_v32 = vshll.u32 %v18039_v45, 16 }
 0x31c   : > { %v1918_v35 = vshrl.u32 %v18039_v45, 16  ;;  %v1923_v62 = vshll.u32 %v18051_v61, 16  ;;  %8801 = vmatprep.mubr.bf16.mxu0 %v8587_v0  ;;  %v13236_v38 = vld.sshfl [vmem:[#allocation2 + $0xe0] sm:$0x33 pattern:$0x75316420]  ;;  %v1909_v13 = vsel %vm15567_vm11, %v1902_v57, %v1907_v47 }
 0x31d   : > { %v1877_v60 = vsel %vm15567_vm11, %v1870_v21, %v1875_v15  ;;  %v1926_v31 = vshrl.u32 %v18051_v61, 16  ;;  %v1931_v11 = vshll.u32 %v18056_v3, 16  ;;  %v1407_v14 = vcombine.high %v13236_v38, %v13236_v38 }
 0x31e   : > { %v1917_v43 = vsel %vm15567_vm11, %v1910_v23, %v1915_v32  ;;  %v1925_v45 = vsel %vm15567_vm11, %v1918_v35, %v1923_v62  ;;  %v1940_v4 = vshll.u32 %v18059_v28, 16  ;;  %v1943_v15 = vshrl.u32 %v18059_v28, 16 }
 0x31f   : > { %v1933_v63 = vsel %vm15567_vm11, %v1926_v31, %v1931_v11  ;;  %v1948_v7 = vshll.u32 %v18072_v51, 16  ;;  %v1951_v61 = vshrl.u32 %v18072_v51, 16  ;;  %v1414_v1 = vrot.slane %v1407_v14, %v15380_v56 }
 0x320   : > { %v1956_v39 = vshll.u32 %v18076_v26, 16  ;;  %v1959_v25 = vshrl.u32 %v18076_v26, 16  ;;  %v1964_v55 = vshll.u32 %v18094_v18, 16  ;;  %v1967_v0 = vshrl.u32 %v18094_v18, 16 }
 0x321   : > { %v1950_v57 = vsel %vm15567_vm11, %v1943_v15, %v1948_v7  ;;  %v1972_v21 = vshll.u32 %v18065_v17, 16  ;;  %v1975_v28 = vshrl.u32 %v18065_v17, 16  ;;  %v1415_v47 = vcombine.high %v1414_v1, %v1414_v1  ;;  %v19738_v6 = vld [vmem:[#allocation50_spill] sm:$0xff] }
 0x322   : > { %v1958_v51 = vsel %vm15567_vm11, %v1951_v61, %v1956_v39  ;;  %v1966_v23 = vsel %vm15567_vm11, %v1959_v25, %v1964_v55  ;;  %v1980_v26 = vshll.u32 %v18081_v50, 16  ;;  %v1983_v35 = vshrl.u32 %v18081_v50, 16 }
 0x323   : > { %v1974_v32 = vsel %vm15567_vm11, %v1967_v0, %v1972_v21  ;;  %v1988_v18 = vshll.u32 %v18085_v24, 16  ;;  %v1991_v62 = vshrl.u32 %v18085_v24, 16  ;;  %v1935_v38 = vshrl.u32 %v1415_v47, 16 }
 0x324   : > { %v1982_v17 = vsel %vm15567_vm11, %v1975_v28, %v1980_v26  ;;  %v1996_v31 = vshll.u32 %v18103_v44, 16  ;;  %v2861_v11 = vrot.slane %v1877_v60, %v15380_v56  ;;  %v2875_v15 = vrot.slane %v1885_v22, %v15380_v56 }
 0x325   : > { %v1990_v14 = vsel %vm15567_vm11, %v1983_v35, %v1988_v18  ;;  %v2889_v7 = vrot.slane %v1893_v10, %v15380_v56  ;;  %v2903_v50 = vrot.slane %v1901_v33, %v15380_v56  ;;  %v1942_v24 = vsel %vm15567_vm11, %v1935_v38, %v1940_v4 }
 0x326   : > { %v1998_v61 = vsel %vm15567_vm11, %v1991_v62, %v1996_v31  ;;  %v2868_v1 = vrot.slane %v2861_v11, %v15380_v56  ;;  %v2917_v39 = vrot.slane %v1909_v13, %v15380_v56  ;;  %v18267_v60 = vrot.slane %v2875_v15, %v15380_v56 }
 0x327   : > { %v18270_v25 = vrot.slane %v2889_v7, %v15380_v56  ;;  %v18273_v22 = vrot.slane %v2903_v50, %v15380_v56  ;;  %v2931_v10 = vrot.slane %v1917_v43, %v15380_v56  ;;  %v2945_v4 = vrot.slane %v1925_v45, %v15380_v56 }
 0x328   : > { %v18277_v33 = vrot.slane %v2917_v39, %v15380_v56  ;;  %v2959_v55 = vrot.slane %v1933_v63, %v15380_v56  ;;  %v2973_v13 = vrot.slane %v1942_v24, %v15380_v56  ;;  %v2987_v21 = vrot.slane %v1950_v57, %v15380_v56 }
 0x329   : > { %v18283_v0 = vrot.slane %v2931_v10, %v15380_v56  ;;  %v3001_v28 = vrot.slane %v1958_v51, %v15380_v56  ;;  %v3015_v47 = vrot.slane %v1966_v23, %v15380_v56  ;;  %v18289_v43 = vrot.slane %v2945_v4, %v15380_v56 }
 0x32a   : > { %v18292_v26 = vrot.slane %v2959_v55, %v15380_v56  ;;  %v2980_v45 = vrot.slane %v2973_v13, %v15380_v56  ;;  %v3029_v63 = vrot.slane %v1974_v32, %v15380_v56  ;;  %v18297_v35 = vrot.slane %v2987_v21, %v15380_v56 }
 0x32b   : > { %v18300_v18 = vrot.slane %v3001_v28, %v15380_v56  ;;  %v18303_v57 = vrot.slane %v3015_v47, %v15380_v56  ;;  %v3043_v51 = vrot.slane %v1982_v17, %v15380_v56  ;;  %v3057_v62 = vrot.slane %v1990_v14, %v15380_v56 }
 0x32c   : > { %v18307_v23 = vrot.slane %v3029_v63, %v15380_v56  ;;  %v3071_v38 = vrot.slane %v1998_v61, %v15380_v56  ;;  %v3127_v31 = vunpack.c.l.b16 %v2868_v1  ;;  %v19556_v11 = vunpack.c.l.b16 %v18267_v60 }
 0x32d   : > { %v18312_v32 = vrot.slane %v3043_v51, %v15380_v56  ;;  %v19557_v15 = vunpack.c.l.b16 %v18270_v25  ;;  %v19558_v7 = vunpack.c.l.b16 %v18273_v22  ;;  %v18318_v50 = vrot.slane %v3057_v62, %v15380_v56  ;;  %v13307_v51 = vld.sshfl [vmem:[#allocation2 + $0x8c] sm:$0x1 pattern:$0x75316420] }
 0x32e   : > { %v18321_v17 = vrot.slane %v3071_v38, %v15380_v56  ;;  %v19559_v14 = vunpack.c.l.b16 %v18277_v33  ;;  %v19561_v24 = vunpack.c.l.b16 %v18283_v0  ;;  %v19562_v61 = vunpack.c.l.b16 %v18289_v43  ;;  %v13308_v62 = vld.sshfl [vmem:[#allocation2 + $0xac] sm:$0x1 pattern:$0x75316420] }
 0x32f   : > { %v19563_v1 = vunpack.c.l.b16 %v18292_v26  ;;  %v3135_v39 = vunpack.c.l.b16 %v2980_v45  ;;  %v19564_v10 = vunpack.c.l.b16 %v18297_v35  ;;  %v19565_v4 = vunpack.c.l.b16 %v18300_v18 }
 0x330   : > { %v3234_v63 = vrot.slane %v19556_v11, 7  ;;  %v3236_v45 = vrot.slane %v19557_v15, 6  ;;  %v3238_v38 = vrot.slane %v19558_v7, 5  ;;  %v3240_v13 = vrot.slane %v19559_v14, 4 }
 0x331   : > { %v3242_v21 = vrot.slane %v19561_v24, 3  ;;  %v3244_v47 = vrot.slane %v19562_v61, 2  ;;  %v3246_v11 = vrot.slane %v19563_v1, 1  ;;  %v3248_v15 = vrot.slane %v19564_v10, 7 }
 0x332   : > { %v3235_v28 = vsel %vm3144_vm13, %v3234_v63, %v3127_v31  ;;  %v3250_v7 = vrot.slane %v19565_v4, 6  ;;  %v19679_v14 = vunpack.c.l.b16 %v18303_v57  ;;  %v19680_v24 = vunpack.c.l.b16 %v18307_v23 }
 0x333   : > { %v3237_v55 = vsel %vm3147_vm15, %v3236_v45, %v3235_v28  ;;  %v19681_v61 = vunpack.c.l.b16 %v18312_v32  ;;  %v3249_v1 = vsel %vm3144_vm13, %v3248_v15, %v3135_v39  ;;  %v19682_v10 = vunpack.c.l.b16 %v18318_v50 }
 0x334   : > { %v3252_v52 = vrot.slane %v19679_v14, 5  ;;  %v3254_v2 = vrot.slane %v19680_v24, 4  ;;  %v3239_v63 = vsel %vm428_vm1, %v3238_v38, %v3237_v55  ;;  %v19683_v4 = vunpack.c.l.b16 %v18321_v17 }
 0x335   : > { %v3256_v31 = vrot.slane %v19681_v61, 3  ;;  %v3258_v59 = vrot.slane %v19682_v10, 2  ;;  %v3241_v28 = vsel %vm3153_vm0, %v3240_v13, %v3239_v63  ;;  %v3251_v14 = vsel %vm3147_vm15, %v3250_v7, %v3249_v1 }
 0x336   : > { %v3260_v5 = vrot.slane %v19683_v4, 1  ;;  %v2076_v45 = vrot.slane %v13307_v51, %v15380_v56  ;;  %v2090_v24 = vrot.slane %v13308_v62, %v15380_v56  ;;  %v3243_v61 = vsel %vm3156_vm6, %v3242_v21, %v3241_v28 }
 0x337   : > { %v3253_v55 = vsel %vm428_vm1, %v3252_v52, %v3251_v14  ;;  %v2151_v15 = vshrl.u32 %v17738_v41, 16  ;;  %v2159_v39 = vshrl.u32 %v17777_v53, 16  ;;  %v3245_v10 = vsel %vm3159_vm8, %v3244_v47, %v3243_v61 }
 0x338   : > { %v3255_v4 = vsel %vm3153_vm0, %v3254_v2, %v3253_v55  ;;  %v2156_v38 = vshll.u32 %v2076_v45, 16  ;;  %v2164_v13 = vshll.u32 %v2090_v24, 16  ;;  %v18377_v7 = vsel %vm3162_vm9, %v3246_v11, %v3245_v10  ;;  %v13309_v10 = vld.sshfl [vmem:[#allocation2 + $0xcc] sm:$0x1 pattern:$0x75316420] }
 0x339   : > { %v3257_v1 = vsel %vm3156_vm6, %v3256_v31, %v3255_v4  ;;  %v19684_v51 = vunpack.c.l.b16 %v17924_v37  ;;  %v19685_v52 = vunpack.c.l.b16 %v17927_v34  ;;  %v19686_v47 = vunpack.c.l.b16 %v17931_v9 }
 0x33a   : > { %v3259_v41 = vsel %vm3159_vm8, %v3258_v59, %v3257_v1  ;;  %v2158_v53 = vsel %vm15567_vm11, %v2151_v15, %v2156_v38  ;;  %v2166_v2 = vsel %vm15567_vm11, %v2159_v39, %v2164_v13  ;;  %v19687_v34 = vunpack.c.l.b16 %v17921_v48 }
 0x33b   : > { %v4510_v21 = vrot.slane %v19684_v51, 7  ;;  %v4512_v62 = vrot.slane %v19685_v52, 6  ;;  %v4514_v11 = vrot.slane %v19686_v47, 5  ;;  %v18392_v63 = vsel %vm3162_vm9, %v3260_v5, %v3259_v41  ;;  %v19694_v41 = vld [vmem:[#allocation37_spill] sm:$0xff] }
 0x33c   : > { %v4396_v37 = vrot.slane %v2158_v53, %v15380_v56  ;;  %v4410_v31 = vrot.slane %v2166_v2, %v15380_v56  ;;  %v8586_v28 = vpack.c.b16 %v18392_v63, %v18377_v7  ;;  %v19688_v45 = vunpack.c.l.b16 %v17934_v54  ;;  %v13310_v2 = vld.sshfl [vmem:[#allocation2 + $0xec] sm:$0x1 pattern:$0x75316420] }
 0x33d   : > { %v4511_v59 = vsel %vm3144_vm13, %v4510_v21, %v19687_v34  ;;  %v19689_v24 = vunpack.c.l.b16 %v17939_v20  ;;  %v19690_v48 = vunpack.c.l.b16 %v17945_v42  ;;  %v19691_v38 = vunpack.c.l.b16 %v17954_v8 }
 0x33e   : > { %v4513_v14 = vsel %vm3147_vm15, %v4512_v62, %v4511_v59  ;;  %v4516_v9 = vrot.slane %v19688_v45, 4  ;;  %v4403_v61 = vrot.slane %v4396_v37, %v15380_v56  ;;  %v4417_v55 = vrot.slane %v4410_v31, %v15380_v56  ;;  %8802 = vmatmul.mubr.bf16.gmra.mrb[28].mxu0 %v8586_v28  ;;  %v19698_v31 = vld [vmem:[#allocation38_spill] sm:$0xff]  ;;  %v19700_v59 = vld [vmem:[#allocation39_spill] sm:$0xff] }
 0x33f   : > { %v4518_v5 = vrot.slane %v19689_v24, 3  ;;  %v4515_v15 = vsel %vm428_vm1, %v4514_v11, %v4513_v14  ;;  %v4520_v39 = vrot.slane %v19690_v48, 2  ;;  %v4524_v54 = vrot.slane %v19691_v38, 7  ;;  %v19696_v11 = vld [vmem:[#allocation36_spill] sm:$0xff] }
 0x340   : > { %v4517_v4 = vsel %vm3153_vm0, %v4516_v9, %v4515_v15  ;;  %v19692_v13 = vunpack.c.l.b16 %v17957_v29  ;;  %v19693_v1 = vunpack.c.l.b16 %v17961_v27  ;;  %v4450_v21 = vunpack.c.l.b16 %v4403_v61  ;;  %v19702_v48 = vld [vmem:[#allocation28_spill] sm:$0xff] }
 0x341   : > { %v4451_v52 = vunpack.c.l.b16 %v4417_v55  ;;  %v4519_v62 = vsel %vm3156_vm6, %v4518_v5, %v4517_v4  ;;  %v19695_v42 = vunpack.c.l.b16 %v19694_v41  ;;  %v19697_v37 = vunpack.c.l.b16 %v19696_v11 }
 0x342   : > { %v4526_v20 = vrot.slane %v19692_v13, 6  ;;  %v4528_v51 = vrot.slane %v19693_v1, 5  ;;  %v4521_v47 = vsel %vm3159_vm8, %v4520_v39, %v4519_v62  ;;  %v19699_v29 = vunpack.c.l.b16 %v19698_v31  ;;  %v19703_v39 = vld [vmem:[#allocation33_spill] sm:$0xff]  ;;  %v18440_v1 = vpop.f32.mrb[16].mxu0 }
 0x343   : > { %v4530_v53 = vrot.slane %v19695_v42, 4  ;;  %v4525_v8 = vsel %vm3144_vm13, %v4524_v54, %v19697_v37  ;;  %v19701_v27 = vunpack.c.l.b16 %v19700_v59  ;;  %v4522_v14 = vrot.slane %v4450_v21, 1 }
 0x344   : > { %v4532_v34 = vrot.slane %v19699_v29, 3  ;;  %v4527_v45 = vsel %vm3147_vm15, %v4526_v20, %v4525_v8  ;;  %v4536_v9 = vrot.slane %v4451_v52, 1  ;;  %v2104_v24 = vrot.slane %v13309_v10, %v15380_v56  ;;  %v18448_v52 = vpop.f32.mrb[17].mxu0 }
 0x345   : > { %v4534_v28 = vrot.slane %v19701_v27, 2  ;;  %v4529_v5 = vsel %vm428_vm1, %v4528_v51, %v4527_v45  ;;  %v2118_v61 = vrot.slane %v13310_v2, %v15380_v56  ;;  %v2167_v55 = vshrl.u32 %v18056_v3, 16 }
 0x346   : > { %v2175_v15 = vshrl.u32 %v18103_v44, 16  ;;  %v9376_v4 = vpack.c.b16 %v19703_v39, %v19702_v48  ;;  %v4531_v38 = vsel %vm3153_vm0, %v4530_v53, %v4529_v5  ;;  %v2172_v54 = vshll.u32 %v2104_v24, 16 }
 0x347   : > { %v19704_v13 = vunpack.c.l.b16 %v18270_v25  ;;  %v18443_v10 = vsel %vm3162_vm9, %v4522_v14, %v4521_v47  ;;  %v4533_v51 = vsel %vm3156_vm6, %v4532_v34, %v4531_v38  ;;  %v2180_v21 = vshll.u32 %v2118_v61, 16  ;;  %v18458_v47 = vpop.f32.mrb[18].mxu0 }
 0x348   : > { %v19705_v3 = vunpack.c.l.b16 %v18273_v22  ;;  %v4535_v62 = vsel %vm3159_vm8, %v4534_v28, %v4533_v51  ;;  %v2174_v41 = vsel %vm15567_vm11, %v2167_v55, %v2172_v54  ;;  %v19706_v25 = vunpack.c.l.b16 %v18267_v60  ;;  %v18467_v31 = vpop.f32.mrb[19].mxu0 }
 0x349   : > { %v4538_v20 = vrot.slane %v19704_v13, 7  ;;  %v19707_v53 = vunpack.c.l.b16 %v18277_v33  ;;  %v18461_v11 = vsel %vm3162_vm9, %v4536_v9, %v4535_v62  ;;  %v2182_v22 = vsel %vm15567_vm11, %v2175_v15, %v2180_v21 }
 0x34a   : > { %v4540_v44 = vrot.slane %v19705_v3, 6  ;;  %v4424_v37 = vrot.slane %v2174_v41, %v15380_v56  ;;  %v8585_v60 = vpack.c.b16 %v18461_v11, %v18443_v10  ;;  %v4438_v33 = vrot.slane %v2182_v22, %v15380_v56 }
 0x34b   : > { %v4539_v42 = vsel %vm3144_vm13, %v4538_v20, %v19706_v25  ;;  %v4542_v2 = vrot.slane %v19707_v53, 5  ;;  %v19708_v34 = vunpack.c.l.b16 %v18283_v0  ;;  %v19709_v28 = vunpack.c.l.b16 %v18289_v43  ;;  %v19718_v25 = vld [vmem:[#allocation26_spill] sm:$0xff] }
 0x34c   : > { %v4541_v8 = vsel %vm3147_vm15, %v4540_v44, %v4539_v42  ;;  %v4431_v27 = vrot.slane %v4424_v37, %v15380_v56  ;;  %v19710_v45 = vunpack.c.l.b16 %v18292_v26  ;;  %v19711_v24 = vunpack.c.l.b16 %v18300_v18  ;;  %14146 = vmatprep.mubr.bf16.mxu1 %v8585_v60  ;;  %v19719_v42 = vld [vmem:[#allocation27_spill] sm:$0xff]  ;;  %v19720_v37 = vld [vmem:[#allocation32_spill] sm:$0xff] }
 0x34d   : > { %v4543_v29 = vsel %vm428_vm1, %v4542_v2, %v4541_v8  ;;  %v4544_v59 = vrot.slane %v19708_v34, 4  ;;  %v4546_v14 = vrot.slane %v19709_v28, 3  ;;  %v4445_v61 = vrot.slane %v4438_v33, %v15380_v56  ;;  %v19721_v8 = vld [vmem:[#allocation34_spill] sm:$0xff] }
 0x34e   : > { %v4548_v9 = vrot.slane %v19710_v45, 2  ;;  %v4552_v5 = vrot.slane %v19711_v24, 7  ;;  %v19712_v0 = vunpack.c.l.b16 %v18303_v57  ;;  %v19713_v48 = vunpack.c.l.b16 %v18307_v23  ;;  %v586_v23 = vld [vmem:[%s15331_s17 + $0xf0] sm:$0xff]  ;;  %v19724_v24 = vld [vmem:[#allocation25_spill] sm:$0xff] }
 0x34f   : > { %v4545_v55 = vsel %vm3153_vm0, %v4544_v59, %v4543_v29  ;;  %v4452_v39 = vunpack.c.l.b16 %v4431_v27  ;;  %v19714_v38 = vunpack.c.l.b16 %v18297_v35  ;;  %v19715_v54 = vunpack.c.l.b16 %v18312_v32  ;;  %v587_v32 = vld [vmem:[%s15331_s17 + $0xf8] sm:$0xff]  ;;  %v14675_v29 = vld [vmem:[#allocation7] ss:$0 sm:$0xff]  ;;  %v479_v59 = vld [vmem:[#allocation2 + $0x100] sm:$0x8] }
 0x350   : > { %v4554_v15 = vrot.slane %v19712_v0, 6  ;;  %v4556_v43 = vrot.slane %v19713_v48, 5  ;;  %v4547_v26 = vsel %vm3156_vm6, %v4546_v14, %v4545_v55  ;;  %v4453_v20 = vunpack.c.l.b16 %v4445_v61  ;;  %v19722_v14 = vld [vmem:[#allocation29_spill] sm:$0xff]  ;;  %v19723_v45 = vld [vmem:[#allocation30_spill] sm:$0xff]  ;;  %v14676_v55 = vld [vmem:[#allocation9] ss:$0 sm:$0xff] }
 0x351   : > { %v4553_v18 = vsel %vm3144_vm13, %v4552_v5, %v19714_v38  ;;  %v4558_v13 = vrot.slane %v19715_v54, 4  ;;  %v4549_v51 = vsel %vm3159_vm8, %v4548_v9, %v4547_v26  ;;  %v19716_v21 = vunpack.c.l.b16 %v18318_v50  ;;  %v19725_v5 = vld [vmem:[#allocation40_spill] sm:$0xff]  ;;  %v19727_v38 = vld [vmem:[#allocation42_spill] sm:$0xff] }
 0x352   : > { %v4555_v57 = vsel %vm3147_vm15, %v4554_v15, %v4553_v18  ;;  %v4550_v44 = vrot.slane %v4452_v39, 1  ;;  %v19717_v41 = vunpack.c.l.b16 %v18321_v17  ;;  %v9377_v53 = vpack.c.b16 %v19719_v42, %v19718_v25  ;;  %v19728_v18 = vld [vmem:[#allocation43_spill] sm:$0xff]  ;;  %v19734_v42 = vld [vmem:[#allocation49_spill] sm:$0xff] }
 0x353   : > { %v4560_v3 = vrot.slane %v19716_v21, 3  ;;  %v4557_v62 = vsel %vm428_vm1, %v4556_v43, %v4555_v57  ;;  %v4564_v22 = vrot.slane %v4453_v20, 1  ;;  %v9380_v60 = vpack.c.b16 %v19721_v8, %v19720_v37  ;;  %v19726_v43 = vld [vmem:[#allocation35_spill] sm:$0xff]  ;;  %v19730_v20 = vld [vmem:[#allocation45_spill] sm:$0xff]  ;;  %v19731_v57 = vld [vmem:[#allocation46_spill] sm:$0xff] }
 0x354   : > { %v4562_v35 = vrot.slane %v19717_v41, 2  ;;  %v4559_v2 = vsel %vm3153_vm0, %v4558_v13, %v4557_v62  ;;  %v4551_v50 = vsel %vm3162_vm9, %v4550_v44, %v4549_v51  ;;  %9576 = vmatprep.mubr.bf16.mxu0 %v9377_v53  ;;  %v624_v34 = vmul.f32 %v14675_v29, %v586_v23  ;;  %v19729_v13 = vld [vmem:[#allocation44_spill] sm:$0xff]  ;;  %v19732_v21 = vld [vmem:[#allocation47_spill] sm:$0xff] }
 0x355   : > { %v4561_v33 = vsel %vm3156_vm6, %v4560_v3, %v4559_v2  ;;  %9577 = vmatmul.mubr.bf16.vlgmr.msra.gmra.mrb[32].mxu0 %v9376_v4  ;;  %v625_v27 = vmul.f32 %v14675_v29, %v587_v32  ;;  %v9378_v9 = vpack.c.b16 %v19723_v45, %v19722_v14  ;;  %v9379_v61 = vpack.c.b16 %v19725_v5, %v19724_v24  ;;  %v19735_v53 = vld [vmem:[#allocation51_spill] sm:$0xff] }
 0x356   : > { %v4563_v17 = vsel %vm3159_vm8, %v4562_v35, %v4561_v33  ;;  %9584 = vmatprep.mubr.bf16.mxu0 %v9380_v60  ;;  %v662_v0 = vadd.f32 %v14676_v55, %v624_v34  ;;  %v9383_v39 = vpack.c.b16 %v18185_v16, %v19726_v43  ;;  %v480_v4 = vsel %vm15354_vm2, 0, %v479_v59  ;;  %v19733_v35 = vld [vmem:[#allocation48_spill] sm:$0xff] }
 0x357   : > { %v18512_v28 = vsel %vm3162_vm9, %v4564_v22, %v4563_v17  ;;  %v663_v48 = vadd.f32 %v14676_v55, %v625_v27  ;;  %481 = vst [vmem:[#allocation2 + $0x100] sm:$0x8] %v480_v4  ;;  %v13796_v54 = vadd.f32 %v19728_v18, %v19727_v38  ;;  %v13799_v51 = vadd.f32 %v19730_v20, %v19729_v13  ;;  %v13482_v22 = vld.sshfl [vmem:[#allocation2 + $0x10c] sm:$0x1 pattern:$0x75316420] }
 0x358   : > { %v8588_v15 = vpack.c.b16 %v18512_v28, %v4551_v50  ;;  %v694_v26 = vmax.f32 %v662_v0, 0.0  ;;  %v18529_v3 = vadd.f32 %v19732_v21, %v19731_v57  ;;  %v18533_v16 = vadd.f32 %v18157_v12, %v18154_v19 }
 0x359   : > { %v695_v23 = vmax.f32 %v663_v48, 0.0  ;;  %v18537_v44 = vadd.f32 %v18164_v40, %v18160_v49  ;;  %v18541_v62 = vadd.f32 %v18176_v58, %v18170_v30  ;;  %v18545_v25 = vadd.f32 %v19733_v35, %v18182_v46  ;;  %v19736_v30 = vld [vmem:[#allocation31_spill] sm:$0xff] }
 0x35a   : > { %14147 = vmatmul.mubr.bf16.gmra.mrb[4].mxu1 %v8588_v15  ;;  %v13767_v41 = vpack.c.bf16 %v694_v26, %v694_v26  ;;  %v18549_v32 = vadd.f32 %v19735_v53, %v19734_v42  ;;  %v13848_v12 = vadd.f32 %v18448_v52, %v18440_v1  ;;  %v13851_v49 = vadd.f32 %v18467_v31, %v18458_v47  ;;  %v19737_v47 = vld [vmem:[#allocation41_spill] sm:$0xff] }
 0x35b   : > { %14166 = vmatprep.mubr.bf16.mxu1 %v9378_v9  ;;  %v13768_v19 = vpack.c.bf16 %v695_v23, %v695_v23  ;;  %v9381_v58 = vpack.c.b16 %v18443_v10, %v19736_v30  ;;  %v9384_v2 = vpack.c.b16 %v4551_v50, %v18461_v11  ;;  %v9021_v52 = vrot.slane %v13482_v22, %v15380_v56 }
 0x35c   : > { %855 = vst [vmem:[#allocation2 + $0x104] sm:$0xf] %v13767_v41  ;;  %v18555_v40 = vadd.f32 %v13848_v12, %v13796_v54  ;;  %v18559_v46 = vadd.f32 %v13851_v49, %v13799_v51  ;;  %v9382_v31 = vpack.c.b16 %v18377_v7, %v19737_v47 }
 0x35d   : > { %9585 = vmatmul.mubr.bf16.gmra.mrb[36].mxu0 %v9379_v61  ;;  %856 = vst [vmem:[#allocation2 + $0x108] sm:$0xf] %v13768_v19  ;;  %v9027_v34 = vshll.u32 %v9021_v52, 16 }
 0x35e   : > { %9592 = vmatprep.mubr.bf16.mxu0 %v9383_v39  ;;  %v13471_v37 = vld.sshfl [vmem:[#allocation2 + $0x100] sm:$0x33 pattern:$0x75316420] }
 0x35f   : > { %v8885_v1 = vcombine.high %v13471_v37, %v13471_v37 }
 0x361   : > { %v18566_v8 = vrot.slane %v8885_v1, %v15380_v56 }
 0x362   : > { %14167 = vmatmul.mubr.bf16.vlgmr.msra.gmra.mrb[0].mxu1 %v9381_v58 }
 0x363   : > { %14170 = vmatprep.mubr.bf16.mxu1 %v9384_v2  ;;  %v13472_v10 = vld.sshfl [vmem:[#allocation2 + $0x104] sm:$0x33 pattern:$0x75316420]  ;;  %v8893_v59 = vcombine.high %v18566_v8, %v18566_v8 }
 0x364   : > { %v13473_v60 = vld.sshfl [vmem:[#allocation2 + $0x108] sm:$0x33 pattern:$0x75316420]  ;;  %v8901_v33 = vcombine.high %v13472_v10, %v13472_v10  ;;  %v18569_v29 = vrot.slane %v13472_v10, %v15380_v56 }
 0x365   : > { %v8925_v11 = vcombine.high %v13473_v60, %v13473_v60  ;;  %v18572_v50 = vrot.slane %v13473_v60, %v15380_v56  ;;  %9593 = vmatmul.mubr.bf16.gmra.mrb[40].mxu0 %v9382_v31 }
 0x366   : > { %v18577_v7 = vrot.slane %v8901_v33, %v15380_v56  ;;  %v18581_v17 = vcombine.high %v18569_v29, %v18569_v29  ;;  %v8951_v27 = vshrl.u32 %v18569_v29, 16  ;;  %v9170_v14 = vrot.slane %v18569_v29, %v15380_v56 }
 0x367   : > { %v18587_v45 = vrot.slane %v8925_v11, %v15380_v56  ;;  %v18591_v9 = vcombine.high %v18572_v50, %v18572_v50  ;;  %v8980_v24 = vshll.u32 %v18572_v50, 16  ;;  %v8983_v5 = vshrl.u32 %v18572_v50, 16 }
 0x368   : > { %v18597_v61 = vcombine.high %v18577_v7, %v18577_v7  ;;  %v8956_v55 = vshll.u32 %v18577_v7, 16  ;;  %v8959_v0 = vshrl.u32 %v18577_v7, 16  ;;  %v8964_v15 = vshll.u32 %v18581_v17, 16 }
 0x369   : > { %v18604_v48 = vcombine.high %v18587_v45, %v18587_v45  ;;  %v8967_v43 = vshrl.u32 %v18581_v17, 16  ;;  %v8988_v39 = vshll.u32 %v18587_v45, 16  ;;  %v8991_v4 = vshrl.u32 %v18587_v45, 16 }
 0x36a   : > { %v8958_v26 = vsel %vm15567_vm11, %v8951_v27, %v8956_v55  ;;  %v8966_v38 = vsel %vm15567_vm11, %v8959_v0, %v8964_v15  ;;  %v8972_v18 = vshll.u32 %v18597_v61, 16  ;;  %v8975_v54 = vshrl.u32 %v18597_v61, 16 }
 0x36b   : > { %v8990_v13 = vsel %vm15567_vm11, %v8983_v5, %v8988_v39  ;;  %v8996_v20 = vshll.u32 %v18591_v9, 16  ;;  %v8999_v51 = vshrl.u32 %v18591_v9, 16  ;;  %v9004_v57 = vshll.u32 %v18604_v48, 16 }
 0x36c   : > { %v8974_v21 = vsel %vm15567_vm11, %v8967_v43, %v8972_v18  ;;  %v8982_v23 = vsel %vm15567_vm11, %v8975_v54, %v8980_v24  ;;  %v9022_v41 = vshrl.u32 %v18604_v48, 16  ;;  %v9050_v35 = vrot.slane %v8958_v26, %v15380_v56 }
 0x36d   : > { %v8998_v42 = vsel %vm15567_vm11, %v8991_v4, %v8996_v20  ;;  %v9006_v53 = vsel %vm15567_vm11, %v8999_v51, %v9004_v57  ;;  %v9064_v12 = vrot.slane %v8966_v38, %v15380_v56  ;;  %v9078_v19 = vrot.slane %v8974_v21, %v15380_v56 }
 0x36e   : > { %v9029_v49 = vsel %vm15567_vm11, %v9022_v41, %v9027_v34  ;;  %v18635_v30 = vrot.slane %v9050_v35, %v15380_v56  ;;  %v9092_v58 = vrot.slane %v8982_v23, %v15380_v56  ;;  %v9106_v2 = vrot.slane %v8990_v13, %v15380_v56 }
 0x36f   : > { %v18640_v22 = vrot.slane %v9064_v12, %v15380_v56  ;;  %v18643_v37 = vrot.slane %v9078_v19, %v15380_v56  ;;  %v9120_v1 = vrot.slane %v8998_v42, %v15380_v56  ;;  %v9134_v52 = vrot.slane %v9006_v53, %v15380_v56 }
 0x370   : > { %v18648_v47 = vrot.slane %v9092_v58, %v15380_v56  ;;  %v18651_v31 = vrot.slane %v9106_v2, %v15380_v56  ;;  %v9143_v10 = vunpack.c.l.b16 %v18635_v30  ;;  %v9304_v60 = vrot.slane %v9029_v49, %v15380_v56 }
 0x371   : > { %v18656_v33 = vrot.slane %v9120_v1, %v15380_v56  ;;  %v18659_v11 = vrot.slane %v9134_v52, %v15380_v56  ;;  %v9144_v34 = vunpack.c.l.b16 %v18640_v22  ;;  %v9145_v27 = vunpack.c.l.b16 %v18643_v37 }
 0x372   : > { %v9146_v24 = vunpack.c.l.b16 %v18648_v47  ;;  %v9147_v5 = vunpack.c.l.b16 %v18651_v31  ;;  %v9311_v55 = vrot.slane %v9304_v60, %v15380_v56  ;;  %v9177_v0 = vrot.slane %v9170_v14, %v15380_v56 }
 0x373   : > { %v9148_v15 = vunpack.c.l.b16 %v18656_v33  ;;  %v9149_v43 = vunpack.c.l.b16 %v18659_v11  ;;  %v9313_v39 = vrot.slane %v9144_v34, 7  ;;  %v9315_v4 = vrot.slane %v9145_v27, 6 }
 0x374   : > { %v9312_v26 = vunpack.c.l.b16 %v9311_v55  ;;  %v9317_v38 = vrot.slane %v9146_v24, 5  ;;  %v9319_v18 = vrot.slane %v9147_v5, 4  ;;  %v9184_v14 = vrot.slane %v18577_v7, %v15380_v56 }
 0x375   : > { %v9314_v54 = vsel %vm3144_vm13, %v9313_v39, %v9143_v10  ;;  %v9321_v13 = vrot.slane %v9148_v15, 3  ;;  %v9323_v20 = vrot.slane %v9149_v43, 2  ;;  %v9198_v51 = vrot.slane %v18581_v17, %v15380_v56 }
 0x376   : > { %v9316_v57 = vsel %vm3147_vm15, %v9315_v4, %v9314_v54  ;;  %v9325_v21 = vrot.slane %v9312_v26, 1  ;;  %v9191_v23 = vrot.slane %v9184_v14, %v15380_v56  ;;  %v9212_v7 = vrot.slane %v18597_v61, %v15380_v56 }
 0x377   : > { %v9318_v41 = vsel %vm428_vm1, %v9317_v38, %v9316_v57  ;;  %v9205_v35 = vrot.slane %v9198_v51, %v15380_v56  ;;  %v9226_v42 = vrot.slane %v18572_v50, %v15380_v56  ;;  %v9240_v53 = vrot.slane %v18587_v45, %v15380_v56 }
 0x378   : > { %v9320_v17 = vsel %vm3153_vm0, %v9319_v18, %v9318_v41  ;;  %v9219_v12 = vrot.slane %v9212_v7, %v15380_v56  ;;  %v9254_v19 = vrot.slane %v18591_v9, %v15380_v56  ;;  %v9268_v61 = vrot.slane %v18604_v48, %v15380_v56 }
 0x379   : > { %v9322_v49 = vsel %vm3156_vm6, %v9321_v13, %v9320_v17  ;;  %v9233_v58 = vrot.slane %v9226_v42, %v15380_v56  ;;  %v9247_v2 = vrot.slane %v9240_v53, %v15380_v56  ;;  %v9276_v50 = vunpack.c.l.b16 %v9177_v0 }
 0x37a   : > { %v9324_v1 = vsel %vm3159_vm8, %v9323_v20, %v9322_v49  ;;  %v9261_v45 = vrot.slane %v9254_v19, %v15380_v56  ;;  %v9275_v52 = vrot.slane %v9268_v61, %v15380_v56  ;;  %v9277_v60 = vunpack.c.l.b16 %v9191_v23 }
 0x37b   : > { %v9326_v55 = vsel %vm3162_vm9, %v9325_v21, %v9324_v1  ;;  %v9278_v9 = vunpack.c.l.b16 %v9205_v35  ;;  %v9279_v39 = vunpack.c.l.b16 %v9219_v12  ;;  %v9280_v4 = vunpack.c.l.b16 %v9233_v58 }
 0x37c   : > { %v9387_v48 = vpack.c.b16 %v9326_v55, %v18512_v28  ;;  %v9281_v26 = vunpack.c.l.b16 %v9247_v2  ;;  %v9282_v38 = vunpack.c.l.b16 %v9261_v45  ;;  %v9283_v18 = vunpack.c.l.b16 %v9275_v52  ;;  %v14571_v55 = vld [vmem:[#allocation15 + $0x100] sm:$0xff]  }
 0x37d   : > { %v9284_v14 = vrot.slane %v9277_v60, 7  ;;  %v9286_v54 = vrot.slane %v9278_v9, 6  ;;  %v9288_v0 = vrot.slane %v9279_v39, 5  ;;  %v9290_v13 = vrot.slane %v9280_v4, 4  ;;  %v14572_v9 = vld [vmem:[#allocation15 + $0xc0] sm:$0xff]   ;;  %13934 = vmatprep.subr.bf16.mxu0 %v14571_v55  ;;  %v14575_v4 = vld [vmem:[#allocation15 + $0xc8] sm:$0xff]  }
 0x37e   : > { %14171 = vmatmul.mubr.bf16.gmra.mrb[4].mxu1 %v9387_v48  ;;  %v8943_v20 = vshrl.u32 %v8893_v59, 16  ;;  %v9292_v57 = vrot.slane %v9281_v26, 3  ;;  %v8948_v21 = vshll.u32 %v18569_v29, 16  ;;  %v9294_v28 = vrot.slane %v9282_v38, 2  ;;  %v14573_v39 = vld [vmem:[#allocation15 + $0x140] sm:$0xff]   ;;  %13935 = vmatpush3.bf16.msra.mxu0 %v14572_v9  ;;  %v14576_v26 = vld [vmem:[#allocation15 + $0x148] sm:$0xff]  }
 0x37f   : > { %v9285_v51 = vsel %vm3144_vm13, %v9284_v14, %v9276_v50  ;;  %v9296_v41 = vrot.slane %v9283_v18, 1  ;;  %v9150_v29 = vrot.slane %v9143_v10, 7  ;;  %v9152_v19 = vrot.slane %v9144_v34, 6  ;;  %14174 = vmatprep.subr.bf16.mxu1 %v14573_v39  ;;  %v14578_v18 = vld [vmem:[#allocation15 + $0xd0] sm:$0xff]  }
 0x380   : > { %v9287_v23 = vsel %vm3147_vm15, %v9286_v54, %v9285_v51  ;;  %v8950_v35 = vsel %vm15567_vm11, %v8943_v20, %v8948_v21  ;;  %v9154_v58 = vrot.slane %v9145_v27, 5  ;;  %v9156_v2 = vrot.slane %v9146_v24, 4  ;;  %14175 = vmatpush3.bf16.msra.mxu1 %v14573_v39  ;;  %v14579_v20 = vld [vmem:[#allocation15 + $0x150] sm:$0xff]   ;;  %v513_v51 = vld [vmem:[#allocation3 + $0xc] sm:$0x8] }
 0x381   : > { %v9289_v7 = vsel %vm428_vm1, %v9288_v0, %v9287_v23  ;;  %v9036_v53 = vrot.slane %v8950_v35, %v15380_v56  ;;  %v9158_v30 = vrot.slane %v9147_v5, 3  ;;  %v9160_v22 = vrot.slane %v9148_v15, 2  ;;  %14176 = vmatprep.subr.bf16.mxu1 %v14576_v26  ;;  %v14583_v35 = vld [vmem:[#allocation15 + $0x120] sm:$0xff]  }
 0x382   : > { %v9291_v42 = vsel %vm3153_vm0, %v9290_v13, %v9289_v7  ;;  %v9162_v37 = vrot.slane %v9149_v43, 1  ;;  %v514_v21 = vsel %vm15354_vm2, 0, %v513_v51  ;;  %v516_v7 = vld [vmem:[#allocation3 + $0x18] sm:$0x8] }
 0x383   : > { %v9293_v8 = vsel %vm3156_vm6, %v9292_v57, %v9291_v42  ;;  %v9043_v17 = vrot.slane %v9036_v53, %v15380_v56  ;;  %v14580_v57 = vld [vmem:[#allocation15 + $0x118] sm:$0xff]   ;;  %515 = vst [vmem:[#allocation3 + $0xc] sm:$0x8] %v514_v21  ;;  %v14584_v42 = vld [vmem:[#allocation15 + $0xe0] sm:$0xff]  }
 0x384   : > { %v9295_v59 = vsel %vm3159_vm8, %v9294_v28, %v9293_v8  ;;  %14177 = vmatpush3.bf16.msra.mxu1 %v14576_v26  ;;  %v14581_v28 = vld [vmem:[#allocation15 + $0xd8] sm:$0xff]   ;;  %v510_v53 = vld [vmem:[#allocation3] sm:$0x8]  ;;  %v9763_v26 = vld [vmem:[#allocation3 + $0x4] sm:$0xf] }
 0x385   : > { %v9297_v12 = vsel %vm3162_vm9, %v9296_v41, %v9295_v59  ;;  %v9142_v49 = vunpack.c.l.b16 %v9043_v17  ;;  %14178 = vmatprep.subr.bf16.mxu1 %v14579_v20  ;;  %v14582_v41 = vld [vmem:[#allocation15 + $0x158] sm:$0xff]   ;;  %v14585_v8 = vld [vmem:[#allocation15 + $0x160] sm:$0xff]   ;;  %v14586_v17 = vld [vmem:[#allocation15 + $0x128] sm:$0xff]  }
 0x386   : > { %v9386_v61 = vpack.c.b16 %v9297_v12, %v19738_v6  ;;  %v519_v59 = vld [vmem:[#allocation3 + $0x24] sm:$0x8] }
 0x387   : > { %v9151_v50 = vsel %vm3144_vm13, %v9150_v29, %v9142_v49  ;;  %v14587_v29 = vld [vmem:[#allocation15 + $0xe8] sm:$0xff]   ;;  %v520_v12 = vsel %vm15354_vm2, 0, %v519_v59  ;;  %v14589_v49 = vld [vmem:[#allocation15 + $0x130] sm:$0xff]  }
 0x388   : > { %9600 = vmatprep.mubr.bf16.mxu0 %v9386_v61  ;;  %v9153_v10 = vsel %vm3147_vm15, %v9152_v19, %v9151_v50  ;;  %14179 = vmatpush3.bf16.msra.mxu1 %v14579_v20  ;;  %v522_v19 = vld [vmem:[#allocation3 + $0x30] sm:$0x8]  ;;  %521 = vst [vmem:[#allocation3 + $0x24] sm:$0x8] %v520_v12  ;;  %v14588_v61 = vld [vmem:[#allocation15 + $0x168] sm:$0xff]  }
 0x389   : > { %v9155_v34 = vsel %vm428_vm1, %v9154_v58, %v9153_v10  ;;  %14180 = vmatprep.subr.bf16.mxu1 %v14582_v41  ;;  %v523_v6 = vsel %vm15354_vm2, 0, %v522_v19  ;;  %v14590_v58 = vld [vmem:[#allocation15 + $0xf0] sm:$0xff]   ;;  %v525_v50 = vld [vmem:[#allocation3 + $0x3c] sm:$0x8] }
 0x38a   : > { %v9157_v27 = vsel %vm3153_vm0, %v9156_v2, %v9155_v34  ;;  %524 = vst [vmem:[#allocation3 + $0x30] sm:$0x8] %v523_v6  ;;  %v14591_v2 = vld [vmem:[#allocation15 + $0x170] sm:$0xff]   ;;  %v526_v10 = vsel %vm15354_vm2, 0, %v525_v50  ;;  %v528_v34 = vld [vmem:[#allocation3 + $0x48] sm:$0x8] }
 0x38b   : > { %v9159_v47 = vsel %vm3156_vm6, %v9158_v30, %v9157_v27  ;;  %v14592_v30 = vld [vmem:[#allocation15 + $0x138] sm:$0xff]   ;;  %527 = vst [vmem:[#allocation3 + $0x3c] sm:$0x8] %v526_v10 }
 0x38c   : > { %v9161_v24 = vsel %vm3159_vm8, %v9160_v22, %v9159_v47  ;;  %14181 = vmatpush3.bf16.msra.mxu1 %v14582_v41  ;;  %v14600_v22 = vld [vmem:[#allocation15 + $0xf8] sm:$0xff]   ;;  %v14602_v47 = vld [vmem:[#allocation15 + $0x40] sm:$0xff]  }
 0x38d   : > { %v9163_v1 = vsel %vm3162_vm9, %v9162_v37, %v9161_v24  ;;  %14182 = vmatprep.subr.bf16.mxu1 %v14585_v8  ;;  %v529_v37 = vsel %vm15354_vm2, 0, %v528_v34  ;;  %v14601_v27 = vld [vmem:[#allocation15 + $0x178] sm:$0xff]   ;;  %v18776_v24 = vld [vmem:[#allocation15 + $0x80] sm:$0xff]  }
 0x38e   : > { %v9385_v31 = vpack.c.b16 %v9163_v1, %v18392_v63  ;;  %v14574_v63 = vld [vmem:[#allocation15 + $0x108] sm:$0xff]   ;;  %530 = vst [vmem:[#allocation3 + $0x48] sm:$0x8] %v529_v37  ;;  %v531_v1 = vld [vmem:[#allocation3 + $0x54] sm:$0x8] }
 0x38f   : > { %13936 = vmatprep.subr.bf16.mxu0 %v14574_v63 }
 0x390   : > { %9601 = vmatmul.mubr.bf16.gmra.mrb[44].mxu0 %v9385_v31  ;;  %14183 = vmatpush3.bf16.msra.mxu1 %v14585_v8  ;;  %v532_v31 = vsel %vm15354_vm2, 0, %v531_v1  ;;  %v18805_v1 = vld [vmem:[#allocation13] ss:$0 sm:$0xff] }
 0x391   : > { %13937 = vmatpush3.bf16.msra.mxu0 %v14575_v4  ;;  %14184 = vmatprep.subr.bf16.mxu1 %v14588_v61  ;;  %533 = vst [vmem:[#allocation3 + $0x54] sm:$0x8] %v532_v31 }
 0x394   : > { %14185 = vmatpush3.bf16.msra.mxu1 %v14588_v61  ;;  %v18800_v61 = vld [vmem:[#allocation12] ss:$0 sm:$0xff] }
 0x395   : > { %14186 = vmatprep.subr.bf16.mxu1 %v14591_v2 }
 0x398   : > { %14187 = vmatpush3.bf16.msra.mxu1 %v14591_v2 }
 0x399   : > { %14188 = vmatprep.subr.bf16.mxu1 %v14601_v27 }
 0x39c   : > { %14189 = vmatpush3.bf16.msra.mxu1 %v14601_v27 }
 0x39d   : > { %14198 = vmatprep.subr.bf16.mxu1 %v18776_v24 }
 0x3a3   : > { %v13852_v5 = vpop.f32.mrb[20].mxu0 }
 0x3a4   : > { %v13853_v45 = vpop.f32.mrb[21].mxu0 }
 0x3a5   : > { %v13854_v33 = vadd.f32 %v13853_v45, %v13852_v5  ;;  %v13855_v15 = vpop.f32.mrb[22].mxu0  ;;  %v534_v5 = vld [vmem:[#allocation3 + $0x60] sm:$0x8] }
 0x3a6   : > { %v13856_v52 = vpop.f32.mrb[23].mxu0  ;;  %v535_v45 = vsel %vm15354_vm2, 0, %v534_v5 }
 0x3a7   : > { %v18751_v60 = vadd.f32 %v13854_v33, %v18529_v3  ;;  %v13857_v11 = vadd.f32 %v13856_v52, %v13855_v15  ;;  %v14577_v3 = vld [vmem:[#allocation15 + $0x110] sm:$0xff]   ;;  %536 = vst [vmem:[#allocation3 + $0x60] sm:$0x8] %v535_v45  ;;  %v537_v33 = vld [vmem:[#allocation3 + $0x6c] sm:$0x8] }
 0x3a8   : > { %13938 = vmatprep.subr.bf16.mxu0 %v14577_v3  ;;  %v538_v15 = vsel %vm15354_vm2, 0, %v537_v33  ;;  %v13518_v3 = vcombine.low %v9763_v26, %v9763_v26 }
 0x3a9   : > { %v18754_v43 = vadd.f32 %v13857_v11, %v18533_v16  ;;  %13939 = vmatpush3.bf16.msra.mxu0 %v14578_v18  ;;  %539 = vst [vmem:[#allocation3 + $0x6c] sm:$0x8] %v538_v15 }
 0x3aa   : > { %13940 = vmatprep.subr.bf16.mxu0 %v14580_v57  ;;  %v9833_v51 = vshrl.u32 %v13518_v3, 16  ;;  %v9836_v57 = vshll.u32 %v13518_v3, 16 }
 0x3ac   : > { %v9835_v41 = vrot.slane %v9833_v51, 4 }
 0x3ad   : > { %13941 = vmatpush3.bf16.msra.mxu0 %v14581_v28 }
 0x3ae   : > { %13942 = vmatprep.subr.bf16.mxu0 %v14583_v35  ;;  %v9838_v35 = vrot.slane %v9836_v57, 5 }
 0x3b0   : > { %v9839_v19 = vor.u32 %v9838_v35, %v9835_v41 }
 0x3b1   : > { %13943 = vmatpush3.bf16.msra.mxu0 %v14584_v42 }
 0x3b2   : > { %13944 = vmatprep.subr.bf16.mxu0 %v14586_v17 }
 0x3b5   : > { %13945 = vmatpush3.bf16.msra.mxu0 %v14587_v29 }
 0x3b6   : > { %13946 = vmatprep.subr.bf16.mxu0 %v14589_v49 }
 0x3b9   : > { %13947 = vmatpush3.bf16.msra.mxu0 %v14590_v58 }
 0x3ba   : > { %13948 = vmatprep.subr.bf16.mxu0 %v14592_v30 }
 0x3bd   : > { %13949 = vmatpush3.bf16.msra.mxu0 %v14600_v22 }
 0x3be   : > { %13986 = vmatprep.subr.bf16.mxu0 %v14602_v47 }
 0x3d7   : > { %v13858_v48 = vpop.f32.mrb[24].mxu0 }
 0x3d8   : > { %v13859_v38 = vpop.f32.mrb[25].mxu0 }
 0x3d9   : > { %v13860_v14 = vadd.f32 %v13859_v38, %v13858_v48  ;;  %v13861_v54 = vpop.f32.mrb[26].mxu0  ;;  %v9764_v38 = vld [vmem:[#allocation3 + $0x8] sm:$0x1] }
 0x3da   : > { %v13862_v16 = vpop.f32.mrb[27].mxu0  ;;  %v13526_v36 = vcombine.low %v9763_v26, %v9764_v38 }
 0x3db   : > { %v18757_v0 = vadd.f32 %v13860_v14, %v18537_v44  ;;  %v13863_v13 = vadd.f32 %v13862_v16, %v13861_v54  ;;  %v517_v44 = vsel %vm15354_vm2, 0, %v516_v7 }
 0x3dc   : > { %518 = vst [vmem:[#allocation3 + $0x18] sm:$0x8] %v517_v44  ;;  %v9920_v28 = vrot.slane %v13526_v36, 5  ;;  %v9791_v44 = vld [vmem:[#allocation3 + $0x74] sm:$0x1] }
 0x3dd   : > { %v18762_v23 = vadd.f32 %v13863_v13, %v18541_v62  ;;  %v511_v62 = vsel %vm15354_vm2, 0, %v510_v53  ;;  %v18791_v13 = vld [vmem:[#allocation3 + $0x70] sm:$0xf]  ;;  %vm13536_vm2 = vcmask 1043456 }
 0x3de   : > { %512 = vst [vmem:[#allocation3] sm:$0x8] %v511_v62  ;;  %v18797_v62 = vcombine.high %v9920_v28, %v9920_v28  ;;  %v13672_v8 = vcombine.low %v18791_v13, %v9791_v44  ;;  %v13535_v58 = vcombine.low %v9920_v28, %v9920_v28  ;;  %v13537_v5 = vsel %vm13536_vm2, %v9763_v26, %v9839_v19 }
 0x3e0   : > { %v10012_v50 = vshrl.u32 %v18797_v62, 16  ;;  %v10988_v30 = vrot.slane %v13672_v8, 5 }
 0x3e2   : > { %v13674_v51 = vcombine.low %v10988_v30, %v10988_v30 }
 0x411   : > { %v13864_v52 = vpop.f32.mrb[28].mxu0 }
 0x412   : > { %v13865_v11 = vpop.f32.mrb[29].mxu0 }
 0x413   : > { %v13866_v55 = vadd.f32 %v13865_v11, %v13864_v52  ;;  %v13867_v9 = vpop.f32.mrb[30].mxu0  ;;  %v9762_v11 = vld [vmem:[#allocation3] sm:$0xf] }
 0x414   : > { %v13868_v39 = vpop.f32.mrb[31].mxu0 }
 0x415   : > { %v18786_v63 = vadd.f32 %v13866_v55, %v18545_v25  ;;  %v13869_v4 = vadd.f32 %v13868_v39, %v13867_v9  ;;  %v10007_v9 = vshrl.u32 %v13535_v58, 16  ;;  %v10014_v39 = vrot.slane %v10012_v50, 7 }
 0x417   : > { %v18789_v48 = vadd.f32 %v13869_v4, %v18549_v32  ;;  %v13671_v32 = vcombine.low %v18791_v13, %v18791_v13  ;;  %v13677_v4 = vcombine.high %v10988_v30, %v10988_v30  ;;  %v13575_v50 = vrot.slane %v10007_v9, 11 }
 0x419   : > { %v10978_v59 = vshrl.u32 %v13671_v32, 16  ;;  %v10981_v17 = vshll.u32 %v13671_v32, 16  ;;  %v11016_v44 = vshrl.u32 %v13677_v4, 16 }
 0x41b   : > { %v10980_v10 = vrot.slane %v10978_v59, 4  ;;  %v10983_v22 = vrot.slane %v10981_v17, 5  ;;  %v9789_v59 = vld [vmem:[#allocation3 + $0x6c] sm:$0xf] }
 0x41d   : > { %v10984_v38 = vor.u32 %v10983_v22, %v10980_v10 }
 0x41f   : > { %v13676_v41 = vsel %vm13536_vm2, %v18791_v13, %v10984_v38  ;;  %v11019_v13 = vshll.u32 %v13677_v4, 16  ;;  %v13673_v58 = vcombine.low %v9789_v59, %v10984_v38  ;;  %v18849_v4 = vld.sshfl [vmem:[#allocation2 + $0x14] sm:$0x33 pattern:$0x75316420] }
 0x428   : > { %v13898_v18 = vpop.f32.mrb[32].mxu0 }
 0x429   : > { %v13899_v14 = vpop.f32.mrb[33].mxu0 }
 0x42a   : > { %v13900_v54 = vadd.f32 %v13899_v14, %v13898_v18  ;;  %v13901_v16 = vpop.f32.mrb[34].mxu0 }
 0x42b   : > { %v13902_v20 = vpop.f32.mrb[35].mxu0 }
 0x42c   : > { %v14290_v25 = vadd.f32 %v18555_v40, %v13900_v54  ;;  %v13903_v21 = vadd.f32 %v13902_v20, %v13901_v16  ;;  %v13534_v16 = vcombine.low %v9762_v11, %v9839_v19  ;;  %v9999_v20 = vshrl.u32 %v13537_v5, 16 }
 0x42e   : > { %v14296_v7 = vadd.f32 %v18559_v46, %v13903_v21 }
 0x430   : > { %v13904_v42 = vpop.f32.mrb[36].mxu0 }
 0x431   : > { %v13905_v53 = vpop.f32.mrb[37].mxu0 }
 0x432   : > { %v13906_v29 = vadd.f32 %v13905_v53, %v13904_v42  ;;  %v13907_v40 = vpop.f32.mrb[38].mxu0 }
 0x433   : > { %v13908_v12 = vpop.f32.mrb[39].mxu0 }
 0x434   : > { %v14287_v46 = vadd.f32 %v18751_v60, %v13906_v29  ;;  %v13909_v49 = vadd.f32 %v13908_v12, %v13907_v40  ;;  %v10015_v29 = vshll.u32 %v18797_v62, 16  ;;  %v9994_v40 = vshrl.u32 %v13534_v16, 16 }
 0x435   : > { %v14168_v6 = vpop.f32.mrb[0].mxu1  ;;  %v10002_v12 = vshll.u32 %v13537_v5, 16  ;;  %v11006_v5 = vshll.u32 %v13676_v41, 16 }
 0x436   : > { %v9643_v2 = vpop.f32.mrb[1].mxu1  ;;  %v14288_v27 = vadd.f32 %v14287_v46, %v14168_v6  ;;  %v14293_v47 = vadd.f32 %v18754_v43, %v13909_v49  ;;  %v10001_v6 = vrot.slane %v9999_v20, 7  ;;  %v11011_v46 = vshrl.u32 %v13674_v51, 16 }
 0x437   : > { %v14291_v34 = vadd.f32 %v14290_v25, %v9643_v2  ;;  %v14169_v37 = vpop.f32.mrb[2].mxu1  ;;  %v11018_v49 = vrot.slane %v11016_v44, 7  ;;  %v11003_v2 = vshrl.u32 %v13676_v41, 16  ;;  %v10017_v30 = vor.u32 %v10015_v29, %v10014_v39 }
 0x438   : > { %v9646_v31 = vpop.f32.mrb[3].mxu1  ;;  %v9690_v33 = vmul.f32 %v14288_v27, %v18800_v61  ;;  %v14294_v15 = vadd.f32 %v14293_v47, %v14169_v37  ;;  %v13910_v52 = vpop.f32.mrb[40].mxu0  ;;  %v13574_v10 = vrot.slane %v9994_v40, 11  ;;  %v10004_v22 = vor.u32 %v10002_v12, %v10001_v6  ;;  %v9773_v37 = vld [vmem:[#allocation3 + $0x2c] sm:$0x1] }
 0x439   : > { %v9688_v60 = vmul.f32 %v14291_v34, %v18800_v61  ;;  %v14297_v45 = vadd.f32 %v14296_v7, %v9646_v31  ;;  %v13911_v55 = vpop.f32.mrb[41].mxu0  ;;  %v13679_v34 = vrot.slane %v11011_v46, 11  ;;  %v11021_v27 = vor.u32 %v11019_v13, %v11018_v49 }
 0x43a   : > { %v9704_v18 = vadd.f32 %v18805_v1, %v9690_v33  ;;  %v9691_v26 = vmul.f32 %v14294_v15, %v18800_v61  ;;  %v13913_v14 = vpop.f32.mrb[42].mxu0  ;;  %v13912_v36 = vadd.f32 %v13911_v55, %v13910_v52  ;;  %v18831_v47 = vshrl.u32 %v13673_v58, 16  ;;  %v9776_v15 = vld [vmem:[#allocation3 + $0x38] sm:$0x1] }
 0x43b   : > { %v9702_v43 = vadd.f32 %v18805_v1, %v9688_v60  ;;  %v9689_v3 = vmul.f32 %v14297_v45, %v18800_v61  ;;  %v13914_v54 = vpop.f32.mrb[43].mxu0  ;;  %v11005_v31 = vrot.slane %v11003_v2, 7  ;;  %v9770_v60 = vld [vmem:[#allocation3 + $0x20] sm:$0x1]  ;;  %v18839_v52 = vsel %vm18827_vm12, %v13575_v50, %v10017_v30 }
 0x43c   : > { %v9712_v21 = vmax.f32 %v9704_v18, 0.0  ;;  %v9705_v28 = vadd.f32 %v18805_v1, %v9691_v26  ;;  %v18817_v32 = vadd.f32 %v18757_v0, %v13912_v36  ;;  %v13915_v7 = vadd.f32 %v13914_v54, %v13913_v14 }
 0x43d   : > { %v9710_v57 = vmax.f32 %v9702_v43, 0.0  ;;  %v9703_v25 = vadd.f32 %v18805_v1, %v9689_v3  ;;  %v18847_v39 = vsel %vm18827_vm12, %v13574_v10, %v10004_v22  ;;  %v18861_v18 = vsel %vm18827_vm12, %v13679_v34, %v11021_v27 }
 0x43e   : > { %v13771_v53 = vpack.c.bf16 %v9712_v21, %v9712_v21  ;;  %v9713_v8 = vmax.f32 %v9705_v28, 0.0  ;;  %v18822_v17 = vadd.f32 %v18762_v23, %v13915_v7  ;;  %v9767_v23 = vld [vmem:[#allocation3 + $0x14] sm:$0x1]  ;;  %v13678_v26 = vrot.slane %v18831_v47, 11 }
 0x43f   : > { %v13769_v35 = vpack.c.bf16 %v9710_v57, %v9710_v57  ;;  %v9711_v42 = vmax.f32 %v9703_v25, 0.0  ;;  %v18864_v14 = vor.u32 %v11006_v5, %v11005_v31  ;;  %v11402_v20 = vcombine.high %v18849_v4, %v18849_v4 }
 0x440   : > { %9753 = vst [vmem:[#allocation3 + $0x28] sm:$0xf] %v13771_v53  ;;  %v13772_v19 = vpack.c.bf16 %v9713_v8, %v9713_v8 }
 0x441   : > { %9751 = vst [vmem:[#allocation3 + $0x10] sm:$0xf] %v13769_v35  ;;  %v13770_v0 = vpack.c.bf16 %v9711_v42, %v9711_v42 }
 0x442   : > { %9754 = vst [vmem:[#allocation3 + $0x34] sm:$0xf] %v13772_v19 }
 0x443   : > { %9752 = vst [vmem:[#allocation3 + $0x1c] sm:$0xf] %v13770_v0 }
 0x447   : > { %v18835_v33 = vld [vmem:[#allocation3 + $0x28] sm:$0xf] }
 0x448   : > { %v18833_v45 = vld [vmem:[#allocation3 + $0x10] sm:$0xf]  ;;  %v13529_v9 = vcombine.low %v18835_v33, %v9773_v37  ;;  %v18857_v3 = vcombine.low %v18835_v33, %v18835_v33 }
 0x449   : > { %v13519_v11 = vcombine.low %v18833_v45, %v18833_v45  ;;  %v13527_v55 = vcombine.low %v18833_v45, %v9767_v23  ;;  %v18853_v43 = vld [vmem:[#allocation3 + $0x34] sm:$0xf] }
 0x44a   : > { %v18851_v38 = vld [vmem:[#allocation3 + $0x1c] sm:$0xf]  ;;  %v13530_v54 = vcombine.low %v18853_v43, %v9776_v15  ;;  %v9923_v57 = vrot.slane %v13529_v9, 5  ;;  %v18874_v8 = vcombine.low %v18853_v43, %v18853_v43 }
 0x44b   : > { %v13528_v36 = vcombine.low %v18851_v38, %v9770_v60  ;;  %v9921_v16 = vrot.slane %v13527_v55, 5  ;;  %v13520_v51 = vcombine.low %v18851_v38, %v18851_v38  ;;  %v9841_v25 = vshrl.u32 %v13519_v11, 16 }
 0x44c   : > { %v9844_v21 = vshll.u32 %v13519_v11, 16  ;;  %v9924_v7 = vrot.slane %v13530_v54, 5  ;;  %v13550_v35 = vcombine.low %v9923_v57, %v9923_v57  ;;  %v13553_v42 = vcombine.high %v9923_v57, %v9923_v57 }
 0x44d   : > { %v9922_v28 = vrot.slane %v13528_v36, 5  ;;  %v13540_v44 = vcombine.low %v9921_v16, %v9921_v16  ;;  %v13543_v41 = vcombine.high %v9921_v16, %v9921_v16  ;;  %v9843_v53 = vrot.slane %v9841_v25, 4 }
 0x44e   : > { %v13555_v40 = vcombine.low %v9924_v7, %v9924_v7  ;;  %v9846_v12 = vrot.slane %v9844_v21, 5  ;;  %v13558_v0 = vcombine.high %v9924_v7, %v9924_v7  ;;  %v10085_v46 = vshrl.u32 %v13550_v35, 16 }
 0x44f   : > { %v13545_v59 = vcombine.low %v9922_v28, %v9922_v28  ;;  %v13548_v29 = vcombine.high %v9922_v28, %v9922_v28  ;;  %v10033_v19 = vshrl.u32 %v13540_v44, 16  ;;  %v10038_v6 = vshrl.u32 %v13543_v41, 16 }
 0x450   : > { %v10041_v49 = vshll.u32 %v13543_v41, 16  ;;  %v10090_v2 = vshrl.u32 %v13553_v42, 16  ;;  %v13581_v22 = vrot.slane %v10085_v46, 11  ;;  %v10093_v31 = vshll.u32 %v13553_v42, 16  ;;  %v9765_v41 = vld [vmem:[#allocation3 + $0xc] sm:$0xf] }
 0x451   : > { %v10059_v13 = vshrl.u32 %v13545_v59, 16  ;;  %v10064_v58 = vshrl.u32 %v13548_v29, 16  ;;  %v18876_v50 = vpop.f32.mrb[4].mxu1  ;;  %v13577_v30 = vrot.slane %v10033_v19, 11  ;;  %v10040_v23 = vrot.slane %v10038_v6, 7 }
 0x452   : > { %v10067_v10 = vshll.u32 %v13548_v29, 16  ;;  %v9659_v34 = vpop.f32.mrb[5].mxu1  ;;  %v10092_v27 = vrot.slane %v10090_v2, 7  ;;  %v10111_v5 = vshrl.u32 %v13555_v40, 16  ;;  %v10116_v9 = vshrl.u32 %v13558_v0, 16 }
 0x453   : > { %v10066_v37 = vrot.slane %v10064_v58, 7  ;;  %v18878_v60 = vpop.f32.mrb[6].mxu1  ;;  %v14303_v15 = vadd.f32 %v18817_v32, %v9659_v34  ;;  %v10043_v11 = vor.u32 %v10041_v49, %v10040_v23  ;;  %v13579_v55 = vrot.slane %v10059_v13, 11 }
 0x454   : > { %v9662_v36 = vpop.f32.mrb[7].mxu1  ;;  %v10095_v16 = vor.u32 %v10093_v31, %v10092_v27  ;;  %v10119_v57 = vshll.u32 %v13558_v0, 16  ;;  %v9847_v25 = vor.u32 %v9846_v12, %v9843_v53  ;;  %v13583_v7 = vrot.slane %v10111_v5, 11 }
 0x455   : > { %v10069_v54 = vor.u32 %v10067_v10, %v10066_v37  ;;  %v9692_v21 = vmul.f32 %v14303_v15, %v18800_v61  ;;  %v14309_v28 = vadd.f32 %v18822_v17, %v9662_v36  ;;  %v10118_v44 = vrot.slane %v10116_v9, 7 }
 0x456   : > { %v18885_v35 = vsel %vm18827_vm12, %v13577_v30, %v10043_v11  ;;  %v9849_v42 = vshrl.u32 %v13520_v51, 16  ;;  %v9852_v59 = vshll.u32 %v13520_v51, 16  ;;  %v10096_v17 = vsel %vm18827_vm12, %v13581_v22, %v10095_v16  ;;  %v9768_v51 = vld [vmem:[#allocation3 + $0x18] sm:$0xf]  ;;  %v14607_v22 = vld [vmem:[#allocation15 + $0x88] sm:$0xff]  }
 0x457   : > { %v10070_v32 = vsel %vm18827_vm12, %v13579_v55, %v10069_v54  ;;  %v9706_v29 = vadd.f32 %v18805_v1, %v9692_v21  ;;  %v9693_v53 = vmul.f32 %v14309_v28, %v18800_v61  ;;  %v10121_v40 = vor.u32 %v10119_v57, %v10118_v44 }
 0x458   : > { %v13601_v12 = vcombine.low %v18885_v35, %v10070_v32  ;;  %v9851_v0 = vrot.slane %v9849_v42, 4  ;;  %v9854_v19 = vrot.slane %v9852_v59, 5  ;;  %v13539_v6 = vcombine.low %v9765_v41, %v9847_v25 }
 0x459   : > { %v9714_v46 = vmax.f32 %v9706_v29, 0.0  ;;  %v9707_v49 = vadd.f32 %v18805_v1, %v9693_v53  ;;  %v18897_v13 = vsel %vm18827_vm12, %v13583_v7, %v10121_v40  ;;  %v13542_v58 = vsel %vm13536_vm2, %v18833_v45, %v9847_v25  ;;  %v9771_v40 = vld [vmem:[#allocation3 + $0x24] sm:$0xf] }
 0x45a   : > { %14190 = vmatprep.mubr.bf16.mxu1 %v13601_v12  ;;  %v13604_v2 = vcombine.low %v10096_v17, %v18897_v13  ;;  %v9855_v30 = vor.u32 %v9854_v19, %v9851_v0  ;;  %v10020_v23 = vshrl.u32 %v13539_v6, 16  ;;  %v10025_v10 = vshrl.u32 %v13542_v58, 16  ;;  %v9774_v12 = vld [vmem:[#allocation3 + $0x30] sm:$0xf] }
 0x45b   : > { %v13773_v34 = vpack.c.bf16 %v9714_v46, %v9714_v46  ;;  %v9715_v37 = vmax.f32 %v9707_v49, 0.0  ;;  %v10028_v27 = vshll.u32 %v13542_v58, 16  ;;  %v9857_v31 = vshrl.u32 %v18857_v3, 16 }
 0x45c   : > { %v13544_v5 = vcombine.low %v9768_v51, %v9855_v30  ;;  %v13547_v15 = vsel %vm13536_vm2, %v18851_v38, %v9855_v30  ;;  %v13576_v11 = vrot.slane %v10020_v23, 11  ;;  %v10027_v55 = vrot.slane %v10025_v10, 7  ;;  %14191 = vmatmul.mubr.bf16.vlgmr.msra.gmra.mrb[8].mxu1 %v13604_v2  ;;  %v14610_v38 = vld [vmem:[#allocation15 + $0x90] sm:$0xff]   ;;  %v14603_v2 = vld [vmem:[#allocation15] sm:$0xff]  }
 0x45d   : > { %9755 = vst [vmem:[#allocation3 + $0x40] sm:$0xf] %v13773_v34  ;;  %v13774_v45 = vpack.c.bf16 %v9715_v37, %v9715_v37  ;;  %v10051_v9 = vshrl.u32 %v13547_v15, 16  ;;  %14199 = vmatpush3.bf16.msra.mxu1 %v18776_v24  ;;  %v9859_v36 = vrot.slane %v9857_v31, 4  ;;  %v18908_v54 = vrot.slane %v18849_v4, %v15380_v56  ;;  %v14605_v37 = vld [vmem:[#allocation15 + $0x48] sm:$0xff]  }
 0x45e   : > { %v10030_v16 = vor.u32 %v10028_v27, %v10027_v55  ;;  %v10046_v57 = vshrl.u32 %v13544_v5, 16  ;;  %v9860_v25 = vshll.u32 %v18857_v3, 16  ;;  %v9865_v21 = vshrl.u32 %v18874_v8, 16  ;;  %14200 = vmatprep.subr.bf16.mxu1 %v14607_v22 }
 0x45f   : > { %9756 = vst [vmem:[#allocation3 + $0x4c] sm:$0xf] %v13774_v45  ;;  %v10053_v28 = vrot.slane %v10051_v9, 7  ;;  %v10054_v7 = vshll.u32 %v13547_v15, 16  ;;  %v9868_v44 = vshll.u32 %v18874_v8, 16  ;;  %v18917_v24 = vrot.slane %v11402_v20, %v15380_v56  ;;  %v14617_v8 = vld [vmem:[#allocation15 + $0x98] sm:$0xff]  }
 0x460   : > { %v18921_v41 = vsel %vm18827_vm12, %v13576_v11, %v10030_v16  ;;  %v13578_v3 = vrot.slane %v10046_v57, 11  ;;  %v9862_v42 = vrot.slane %v9860_v25, 5  ;;  %v9867_v59 = vrot.slane %v9865_v21, 4  ;;  %v9782_v15 = vld [vmem:[#allocation3 + $0x50] sm:$0x1]  ;;  %v14620_v11 = vld [vmem:[#allocation15 + $0xa0] sm:$0xff]  }
 0x461   : > { %v18923_v29 = vcombine.low %v10070_v32, %v10096_v17  ;;  %v10056_v53 = vor.u32 %v10054_v7, %v10053_v28  ;;  %v9870_v0 = vrot.slane %v9868_v44, 5  ;;  %14201 = vmatpush3.bf16.msra.mxu1 %v14607_v22  ;;  %v18930_v4 = vsel %vm18827_vm12, %v13678_v26, %v18864_v14  ;;  %v18938_v6 = vld.sshfl [vmem:[#allocation2 + $0x18] sm:$0x33 pattern:$0x75316420] }
 0x462   : > { %v9863_v20 = vor.u32 %v9862_v42, %v9859_v36  ;;  %14202 = vmatprep.subr.bf16.mxu1 %v14610_v38  ;;  %v13637_v19 = vcombine.low %v18839_v52, %v18885_v35  ;;  %v13635_v32 = vcombine.low %v18847_v39, %v18921_v41  ;;  %v13636_v17 = vcombine.high %v18847_v39, %v18921_v41  ;;  %v9779_v22 = vld [vmem:[#allocation3 + $0x44] sm:$0x1] }
 0x463   : > { %v18942_v47 = vsel %vm18827_vm12, %v13578_v3, %v10056_v53  ;;  %v9871_v26 = vor.u32 %v9870_v0, %v9867_v59  ;;  %v11417_v14 = vcombine.high %v18908_v54, %v18908_v54  ;;  %v11418_v46 = vcombine.high %v18917_v24, %v18917_v24  ;;  %v13916_v49 = vpop.f32.mrb[44].mxu0  ;;  %v14606_v3 = vld [vmem:[#allocation15 + $0x8] sm:$0xff]  }
 0x464   : > { %v13600_v51 = vcombine.high %v18921_v41, %v18942_v47  ;;  %v13599_v58 = vcombine.low %v18921_v41, %v18942_v47  ;;  %v13549_v30 = vcombine.low %v9771_v40, %v9863_v20  ;;  %v13552_v23 = vsel %vm13536_vm2, %v18835_v33, %v9863_v20  ;;  %v18954_v10 = vld [vmem:[#allocation3 + $0x40] sm:$0xf]  ;;  %v13917_v34 = vpop.f32.mrb[45].mxu0  ;;  %v14641_v41 = vld [vmem:[#allocation15 + $0x1d0] sm:$0xff]  }
 0x465   : > { %v13554_v27 = vcombine.low %v9774_v12, %v9871_v26  ;;  %v13557_v31 = vsel %vm13536_vm2, %v18853_v43, %v9871_v26  ;;  %v10077_v5 = vshrl.u32 %v13552_v23, 16  ;;  %14203 = vmatpush3.bf16.msra.mxu1 %v14610_v38  ;;  %v11426_v55 = vcombine.high %v18938_v6, %v18938_v6  ;;  %v13919_v9 = vpop.f32.mrb[46].mxu0  ;;  %v14608_v12 = vld [vmem:[#allocation15 + $0x50] sm:$0xff]  }
 0x466   : > { %v13918_v45 = vadd.f32 %v13917_v34, %v13916_v49  ;;  %10573 = vmatprep.mubr.bf16.mxu0 %v13600_v51  ;;  %v10072_v33 = vshrl.u32 %v13549_v30, 16  ;;  %v10080_v36 = vshll.u32 %v13552_v23, 16  ;;  %v10103_v16 = vshrl.u32 %v13557_v31, 16  ;;  %v18960_v57 = vld [vmem:[#allocation3 + $0x4c] sm:$0xf]  ;;  %14204 = vmatprep.subr.bf16.mxu1 %v14617_v8  ;;  %v13920_v25 = vpop.f32.mrb[47].mxu0 }
 0x467   : > { %10574 = vmatmul.mubr.bf16.vlgmr.msra.gmra.mrb[48].mxu0 %v13599_v58  ;;  %v10079_v21 = vrot.slane %v10077_v5, 7  ;;  %v10098_v43 = vshrl.u32 %v13554_v27, 16  ;;  %v10106_v28 = vshll.u32 %v13557_v31, 16  ;;  %v13523_v38 = vcombine.low %v18954_v10, %v18954_v10  ;;  %v14628_v34 = vld [vmem:[#allocation15 + $0xa8] sm:$0xff]   ;;  %v14609_v31 = vld [vmem:[#allocation15 + $0x10] sm:$0xff]  }
 0x468   : > { %v14299_v7 = vadd.f32 %v18786_v63, %v13918_v45  ;;  %v13921_v44 = vadd.f32 %v13920_v25, %v13919_v9  ;;  %13987 = vmatpush3.bf16.msra.mxu0 %v14603_v2  ;;  %v13580_v42 = vrot.slane %v10072_v33, 11  ;;  %v10105_v59 = vrot.slane %v10103_v16, 7 }
 0x469   : > { %13988 = vmatprep.subr.bf16.mxu0 %v14605_v37  ;;  %v10082_v53 = vor.u32 %v10080_v36, %v10079_v21  ;;  %v13582_v40 = vrot.slane %v10098_v43, 11  ;;  %v13531_v0 = vcombine.low %v18954_v10, %v9779_v22  ;;  %v13532_v20 = vcombine.low %v18960_v57, %v9782_v15  ;;  %14205 = vmatpush3.bf16.msra.mxu1 %v14617_v8  ;;  %v14615_v36 = vld [vmem:[#allocation15 + $0x58] sm:$0xff]  }
 0x46a   : > { %v14300_v26 = vadd.f32 %v14299_v7, %v18876_v50  ;;  %v14305_v49 = vadd.f32 %v18789_v48, %v13921_v44  ;;  %v10108_v51 = vor.u32 %v10106_v28, %v10105_v59  ;;  %v9873_v63 = vshrl.u32 %v13523_v38, 16  ;;  %14206 = vmatprep.subr.bf16.mxu1 %v14620_v11  ;;  %v14631_v28 = vld [vmem:[#allocation15 + $0xb0] sm:$0xff]  }
 0x46b   : > { %v18971_v58 = vsel %vm18827_vm12, %v13580_v42, %v10082_v53  ;;  %v9925_v2 = vrot.slane %v13531_v0, 5  ;;  %v9926_v30 = vrot.slane %v13532_v20, 5  ;;  %v9876_v23 = vshll.u32 %v13523_v38, 16 }
 0x46c   : > { %v9694_v22 = vmul.f32 %v14300_v26, %v18800_v61  ;;  %v14306_v37 = vadd.f32 %v14305_v49, %v18878_v60  ;;  %13989 = vmatpush3.bf16.msra.mxu0 %v14606_v3  ;;  %v18977_v50 = vsel %vm18827_vm12, %v13582_v40, %v10108_v51  ;;  %v9875_v48 = vrot.slane %v9873_v63, 4  ;;  %v13709_v42 = vld.sshfl [vmem:[#allocation2 + $0x34] sm:$0x33 pattern:$0x75316420]  ;;  %v14616_v40 = vld [vmem:[#allocation15 + $0x18] sm:$0xff]  }
 0x46d   : > { %v13603_v8 = vcombine.high %v18971_v58, %v18977_v50  ;;  %v13602_v27 = vcombine.low %v18971_v58, %v18977_v50  ;;  %13990 = vmatprep.subr.bf16.mxu0 %v14608_v12  ;;  %v13560_v5 = vcombine.low %v9925_v2, %v9925_v2  ;;  %v13563_v15 = vcombine.high %v9925_v2, %v9925_v2  ;;  %v14618_v51 = vld [vmem:[#allocation15 + $0x60] sm:$0xff]  }
 0x46e   : > { %v9708_v45 = vadd.f32 %v18805_v1, %v9694_v22  ;;  %v9695_v60 = vmul.f32 %v14306_v37, %v18800_v61  ;;  %v13565_v9 = vcombine.low %v9926_v30, %v9926_v30  ;;  %v13568_v33 = vcombine.high %v9926_v30, %v9926_v30  ;;  %14207 = vmatpush3.bf16.msra.mxu1 %v14620_v11  ;;  %v9777_v61 = vld [vmem:[#allocation3 + $0x3c] sm:$0xf] }
 0x46f   : > { %10581 = vmatprep.mubr.bf16.mxu0 %v13603_v8  ;;  %v13524_v16 = vcombine.low %v18960_v57, %v18960_v57  ;;  %v10137_v25 = vshrl.u32 %v13560_v5, 16  ;;  %v10142_v21 = vshrl.u32 %v13563_v15, 16  ;;  %v9878_v43 = vrot.slane %v9876_v23, 5  ;;  %14208 = vmatprep.subr.bf16.mxu1 %v14628_v34  ;;  %v14634_v23 = vld [vmem:[#allocation15 + $0xb8] sm:$0xff]  }
 0x470   : > { %v9716_v38 = vmax.f32 %v9708_v45, 0.0  ;;  %v9709_v7 = vadd.f32 %v18805_v1, %v9695_v60  ;;  %10582 = vmatmul.mubr.bf16.gmra.mrb[52].mxu0 %v13602_v27  ;;  %v10163_v44 = vshrl.u32 %v13565_v9, 16  ;;  %v10168_v3 = vshrl.u32 %v13568_v33, 16  ;;  %v9780_v9 = vld [vmem:[#allocation3 + $0x48] sm:$0xf] }
 0x471   : > { %13991 = vmatpush3.bf16.msra.mxu0 %v14609_v31  ;;  %v13585_v59 = vrot.slane %v10137_v25, 11  ;;  %v10144_v11 = vrot.slane %v10142_v21, 7  ;;  %v10145_v53 = vshll.u32 %v13563_v15, 16  ;;  %v9879_v12 = vor.u32 %v9878_v43, %v9875_v48  ;;  %v14619_v15 = vld [vmem:[#allocation15 + $0x20] sm:$0xff]  }
 0x472   : > { %v13775_v0 = vpack.c.bf16 %v9716_v38, %v9716_v38  ;;  %v9717_v20 = vmax.f32 %v9709_v7, 0.0  ;;  %v10170_v26 = vrot.slane %v10168_v3, 7  ;;  %v10171_v49 = vshll.u32 %v13568_v33, 16  ;;  %13992 = vmatprep.subr.bf16.mxu0 %v14615_v36  ;;  %14209 = vmatpush3.bf16.msra.mxu1 %v14628_v34  ;;  %v14625_v36 = vld [vmem:[#allocation15 + $0x68] sm:$0xff]   ;;  %v19005_v38 = vld [vmem:[#allocation15 + $0x200] sm:$0xff]  }
 0x473   : > { %v10147_v63 = vor.u32 %v10145_v53, %v10144_v11  ;;  %v9881_v1 = vshrl.u32 %v13524_v16, 16  ;;  %v9884_v2 = vshll.u32 %v13524_v16, 16  ;;  %v13559_v30 = vcombine.low %v9777_v61, %v9879_v12  ;;  %14210 = vmatprep.subr.bf16.mxu1 %v14631_v28  ;;  %v9785_v11 = vld [vmem:[#allocation3 + $0x5c] sm:$0x1]  ;;  %v14626_v53 = vld [vmem:[#allocation15 + $0x28] sm:$0xff]  }
 0x474   : > { %9757 = vst [vmem:[#allocation3 + $0x58] sm:$0xf] %v13775_v0  ;;  %v13776_v22 = vpack.c.bf16 %v9717_v20, %v9717_v20  ;;  %v13587_v37 = vrot.slane %v10163_v44, 11  ;;  %v10173_v8 = vor.u32 %v10171_v49, %v10170_v26  ;;  %v13562_v48 = vsel %vm13536_vm2, %v18954_v10, %v9879_v12 }
 0x475   : > { %13993 = vmatpush3.bf16.msra.mxu0 %v14616_v40  ;;  %v9883_v27 = vrot.slane %v9881_v1, 4  ;;  %v9886_v31 = vrot.slane %v9884_v2, 5  ;;  %v10124_v5 = vshrl.u32 %v13559_v30, 16  ;;  %v11450_v45 = vcombine.high %v13709_v42, %v13709_v42 }
 0x476   : > { %9758 = vst [vmem:[#allocation3 + $0x64] sm:$0xf] %v13776_v22  ;;  %v10148_v34 = vsel %vm18827_vm12, %v13585_v59, %v10147_v63  ;;  %v18994_v60 = vsel %vm18827_vm12, %v13587_v37, %v10173_v8  ;;  %v10129_v33 = vshrl.u32 %v13562_v48, 16  ;;  %13994 = vmatprep.subr.bf16.mxu0 %v14618_v51  ;;  %14211 = vmatpush3.bf16.msra.mxu1 %v14631_v28  ;;  %v10132_v21 = vshll.u32 %v13562_v48, 16  ;;  %v9788_v51 = vld [vmem:[#allocation3 + $0x68] sm:$0x1] }
 0x477   : > { %v18998_v10 = vrot.slane %v18938_v6, %v15380_v56  ;;  %v13607_v16 = vcombine.low %v10148_v34, %v18994_v60  ;;  %v9887_v25 = vor.u32 %v9886_v31, %v9883_v27  ;;  %14212 = vmatprep.subr.bf16.mxu1 %v14634_v23  ;;  %v19003_v43 = vcombine.high %v18942_v47, %v18971_v58  ;;  %v14629_v6 = vld [vmem:[#allocation15 + $0x70] sm:$0xff]   ;;  %v13710_v20 = vld.sshfl [vmem:[#allocation2 + $0x38] sm:$0x33 pattern:$0x75316420] }
 0x478   : > { %v13584_v7 = vrot.slane %v10124_v5, 11  ;;  %v10131_v44 = vrot.slane %v10129_v33, 7  ;;  %v19011_v28 = vrot.slane %v11426_v55, %v15380_v56  ;;  %v19014_v3 = vrot.slane %v13709_v42, %v15380_v56  ;;  %v14630_v22 = vld [vmem:[#allocation15 + $0x30] sm:$0xff]  }
 0x479   : > { %14194 = vmatprep.mubr.bf16.mxu1 %v13607_v16  ;;  %v13564_v61 = vcombine.low %v9780_v9, %v9887_v25  ;;  %v13567_v59 = vsel %vm13536_vm2, %v18960_v57, %v9887_v25  ;;  %13995 = vmatpush3.bf16.msra.mxu0 %v14619_v15  ;;  %v19019_v40 = vrot.slane %v11450_v45, %v15380_v56  ;;  %v14632_v15 = vld [vmem:[#allocation15 + $0x78] sm:$0xff]  }
 0x47a   : > { %v10134_v12 = vor.u32 %v10132_v21, %v10131_v44  ;;  %v10155_v0 = vshrl.u32 %v13567_v59, 16  ;;  %13996 = vmatprep.subr.bf16.mxu0 %v14625_v36  ;;  %14213 = vmatpush3.bf16.msra.mxu1 %v14634_v23  ;;  %v19022_v55 = vcombine.low %v18897_v13, %v10148_v34  ;;  %v19026_v42 = vcombine.low %v18942_v47, %v18971_v58 }
 0x47b   : > { %v10150_v57 = vshrl.u32 %v13564_v61, 16  ;;  %v10158_v26 = vshll.u32 %v13567_v59, 16  ;;  %v9784_v49 = vld [vmem:[#allocation3 + $0x58] sm:$0xf]  ;;  %14222 = vmatprep.subr.bf16.mxu1 %v19005_v38  ;;  %v11441_v63 = vcombine.high %v18998_v10, %v18998_v10  ;;  %v11442_v1 = vcombine.high %v19011_v28, %v19011_v28 }
 0x47c   : > { %v10135_v13 = vsel %vm18827_vm12, %v13584_v7, %v10134_v12  ;;  %v10157_v2 = vrot.slane %v10155_v0, 7  ;;  %v13525_v30 = vcombine.low %v9784_v49, %v9784_v49  ;;  %v13533_v47 = vcombine.low %v9784_v49, %v9785_v11 }
 0x47d   : > { %v13586_v58 = vrot.slane %v10150_v57, 11  ;;  %v19035_v23 = vld [vmem:[#allocation3 + $0x64] sm:$0xf]  ;;  %13997 = vmatpush3.bf16.msra.mxu0 %v14626_v53  ;;  %v11465_v37 = vcombine.high %v19014_v3, %v19014_v3  ;;  %v11466_v8 = vcombine.high %v19019_v40, %v19019_v40  ;;  %v11474_v48 = vcombine.high %v13710_v20, %v13710_v20  ;;  %v14633_v53 = vld [vmem:[#allocation15 + $0x38] sm:$0xff]  }
 0x47e   : > { %v10160_v27 = vor.u32 %v10158_v26, %v10157_v2  ;;  %v9927_v31 = vrot.slane %v13533_v47, 5  ;;  %v13591_v5 = vcombine.low %v19035_v23, %v9788_v51  ;;  %13998 = vmatprep.subr.bf16.mxu0 %v14629_v6  ;;  %v19043_v45 = vcombine.high %v18977_v50, %v10135_v13  ;;  %v14635_v57 = vld [vmem:[#allocation15 + $0x1c0] sm:$0xff]  }
 0x47f   : > { %v13590_v34 = vcombine.low %v19035_v23, %v19035_v23  ;;  %v9889_v9 = vshrl.u32 %v13525_v30, 16  ;;  %v9892_v33 = vshll.u32 %v13525_v30, 16  ;;  %v19048_v36 = vcombine.low %v18977_v50, %v10135_v13  ;;  %v9783_v50 = vld [vmem:[#allocation3 + $0x54] sm:$0xf] }
 0x480   : > { %v19052_v16 = vsel %vm18827_vm12, %v13586_v58, %v10160_v27  ;;  %v13570_v25 = vcombine.low %v9927_v31, %v9927_v31  ;;  %v13573_v21 = vcombine.high %v9927_v31, %v9927_v31  ;;  %v10265_v7 = vrot.slane %v13591_v5, 5 }
 0x481   : > { %v13606_v44 = vcombine.high %v10135_v13, %v19052_v16  ;;  %v13605_v61 = vcombine.low %v10135_v13, %v19052_v16  ;;  %v9891_v59 = vrot.slane %v9889_v9, 4  ;;  %v9894_v11 = vrot.slane %v9892_v33, 5  ;;  %13999 = vmatpush3.bf16.msra.mxu0 %v14630_v22 }
 0x482   : > { %v10189_v12 = vshrl.u32 %v13570_v25, 16  ;;  %v10194_v0 = vshrl.u32 %v13573_v21, 16  ;;  %v13593_v6 = vcombine.low %v10265_v7, %v10265_v7  ;;  %14000 = vmatprep.subr.bf16.mxu0 %v14632_v15  ;;  %v19057_v26 = vrot.slane %v13710_v20, %v15380_v56 }
 0x483   : > { %10589 = vmatprep.mubr.bf16.mxu0 %v13606_v44  ;;  %v13596_v51 = vcombine.high %v10265_v7, %v10265_v7  ;;  %v9895_v2 = vor.u32 %v9894_v11, %v9891_v59  ;;  %v10255_v30 = vshrl.u32 %v13590_v34, 16  ;;  %v10258_v47 = vshll.u32 %v13590_v34, 16 }
 0x484   : > { %10590 = vmatmul.mubr.bf16.gmra.mrb[56].mxu0 %v13605_v61  ;;  %v13589_v13 = vrot.slane %v10189_v12, 11  ;;  %v10196_v58 = vrot.slane %v10194_v0, 7  ;;  %v10197_v27 = vshll.u32 %v13573_v21, 16  ;;  %v19060_v22 = vrot.slane %v11474_v48, %v15380_v56  ;;  %v9786_v48 = vld [vmem:[#allocation3 + $0x60] sm:$0xf] }
 0x485   : > { %v10288_v31 = vshrl.u32 %v13593_v6, 16  ;;  %v10293_v5 = vshrl.u32 %v13596_v51, 16  ;;  %v13569_v9 = vcombine.low %v9783_v50, %v9895_v2  ;;  %v13572_v15 = vsel %vm13536_vm2, %v9784_v49, %v9895_v2  ;;  %14001 = vmatpush3.bf16.msra.mxu0 %v14633_v53 }
 0x486   : > { %v10199_v20 = vor.u32 %v10197_v27, %v10196_v58  ;;  %v10296_v33 = vshll.u32 %v13596_v51, 16  ;;  %v10181_v25 = vshrl.u32 %v13572_v15, 16  ;;  %v10184_v7 = vshll.u32 %v13572_v15, 16  ;;  %14038 = vmatprep.subr.bf16.mxu0 %v14635_v57 }
 0x487   : > { %v10295_v44 = vrot.slane %v10293_v5, 7  ;;  %v10176_v34 = vshrl.u32 %v13569_v9, 16  ;;  %v10257_v61 = vrot.slane %v10255_v30, 4  ;;  %v10260_v59 = vrot.slane %v10258_v47, 5 }
 0x488   : > { %v10200_v21 = vsel %vm18827_vm12, %v13589_v13, %v10199_v20  ;;  %v10183_v11 = vrot.slane %v10181_v25, 7  ;;  %v11801_v12 = vrot.slane %v18908_v54, %v15380_v56  ;;  %v11815_v49 = vrot.slane %v18917_v24, %v15380_v56 }
 0x489   : > { %v13598_v53 = vrot.slane %v10288_v31, 11  ;;  %v10298_v0 = vor.u32 %v10296_v33, %v10295_v44  ;;  %v13588_v6 = vrot.slane %v10176_v34, 11  ;;  %v10261_v50 = vor.u32 %v10260_v59, %v10257_v61 }
 0x48a   : > { %v10186_v57 = vor.u32 %v10184_v7, %v10183_v11  ;;  %v19070_v51 = vcombine.low %v18994_v60, %v10200_v21  ;;  %v11489_v2 = vcombine.high %v19057_v26, %v19057_v26  ;;  %v11490_v30 = vcombine.high %v19060_v22, %v19060_v22 }
 0x48b   : > { %v19078_v47 = vsel %vm18827_vm12, %v13598_v53, %v10298_v0  ;;  %v13592_v13 = vcombine.low %v9786_v48, %v10261_v50  ;;  %v13595_v58 = vsel %vm13536_vm2, %v19035_v23, %v10261_v50  ;;  %v19083_v27 = vrot.slane %v11801_v12, %v15380_v56 }
 0x48c   : > { %v13610_v60 = vcombine.low %v10200_v21, %v19078_v47  ;;  %v10187_v31 = vsel %vm18827_vm12, %v13588_v6, %v10186_v57  ;;  %v10280_v5 = vshrl.u32 %v13595_v58, 16  ;;  %v19089_v9 = vrot.slane %v11815_v49, %v15380_v56 }
 0x48d   : > { %v10275_v15 = vshrl.u32 %v13592_v13, 16  ;;  %v10283_v20 = vshll.u32 %v13595_v58, 16  ;;  %v11829_v33 = vrot.slane %v11417_v14, %v15380_v56  ;;  %v11843_v23 = vrot.slane %v11418_v46, %v15380_v56 }
 0x48e   : > { %14195 = vmatmul.mubr.bf16.gmra.mrb[12].mxu1 %v13610_v60  ;;  %v10282_v25 = vrot.slane %v10280_v5, 7  ;;  %v19100_v7 = vcombine.high %v19052_v16, %v10187_v31  ;;  %v19103_v44 = vcombine.low %v19052_v16, %v10187_v31  ;;  %v11857_v34 = vrot.slane %v18998_v10, %v15380_v56 }
 0x48f   : > { %14214 = vmatprep.mubr.bf16.mxu1 %v13637_v19  ;;  %v13597_v54 = vrot.slane %v10275_v15, 11  ;;  %v11871_v24 = vrot.slane %v19011_v28, %v15380_v56  ;;  %v11885_v14 = vrot.slane %v11441_v63, %v15380_v56  ;;  %v11899_v46 = vrot.slane %v11442_v1, %v15380_v56 }
 0x490   : > { %v10285_v16 = vor.u32 %v10283_v20, %v10282_v25  ;;  %v13682_v61 = vcombine.low %v19078_v47, %v18861_v18  ;;  %v11913_v52 = vrot.slane %v19014_v3, %v15380_v56  ;;  %v11927_v35 = vrot.slane %v19019_v40, %v15380_v56 }
 0x491   : > { %v11836_v19 = vrot.slane %v11829_v33, %v15380_v56  ;;  %v11850_v10 = vrot.slane %v11843_v23, %v15380_v56  ;;  %v11864_v63 = vrot.slane %v11857_v34, %v15380_v56  ;;  %v11941_v28 = vrot.slane %v11465_v37, %v15380_v56  ;;  %v14643_v33 = vld [vmem:[#allocation15 + $0x210] sm:$0xff]  }
 0x492   : > { %v19135_v1 = vsel %vm18827_vm12, %v13597_v54, %v10285_v16  ;;  %v11878_v59 = vrot.slane %v11871_v24, %v15380_v56  ;;  %v11892_v21 = vrot.slane %v11885_v14, %v15380_v56  ;;  %v11955_v48 = vrot.slane %v11466_v8, %v15380_v56  ;;  %v14640_v8 = vld [vmem:[#allocation15 + $0x208] sm:$0xff]   ;;  %v14636_v54 = vld [vmem:[#allocation15 + $0x180] sm:$0xff]  }
 0x493   : > { %v13609_v11 = vcombine.high %v10187_v31, %v19135_v1  ;;  %v13608_v12 = vcombine.low %v10187_v31, %v19135_v1  ;;  %v11906_v3 = vrot.slane %v11899_v46, %v15380_v56  ;;  %v11920_v37 = vrot.slane %v11913_v52, %v15380_v56 }
 0x494   : > { %v13681_v62 = vcombine.high %v19135_v1, %v18930_v4  ;;  %v11934_v49 = vrot.slane %v11927_v35, %v15380_v56  ;;  %v11969_v53 = vrot.slane %v19057_v26, %v15380_v56  ;;  %v11983_v40 = vrot.slane %v19060_v22, %v15380_v56 }
 0x495   : > { %10597 = vmatprep.mubr.bf16.mxu0 %v13609_v11  ;;  %v11948_v0 = vrot.slane %v11941_v28, %v15380_v56  ;;  %v11962_v6 = vrot.slane %v11955_v48, %v15380_v56  ;;  %v11997_v50 = vrot.slane %v11489_v2, %v15380_v56  ;;  %v12011_v57 = vrot.slane %v11490_v30, %v15380_v56  ;;  %v14646_v48 = vld [vmem:[#allocation15 + $0x218] sm:$0xff]  }
 0x496   : > { %10598 = vmatmul.mubr.bf16.gmra.mrb[60].mxu0 %v13608_v12  ;;  %14215 = vmatmul.mubr.bf16.vlgmr.msra.gmra.mrb[8].mxu1 %v18923_v29  ;;  %v11976_v13 = vrot.slane %v11969_v53, %v15380_v56  ;;  %v11990_v26 = vrot.slane %v11983_v40, %v15380_v56  ;;  %v12692_v58 = vunpack.c.l.b16 %v19089_v9  ;;  %v12693_v22 = vunpack.c.l.b16 %v11836_v19 }
 0x497   : > { %10874 = vmatprep.mubr.bf16.mxu0 %v13636_v17  ;;  %14218 = vmatprep.mubr.bf16.mxu1 %v19022_v55  ;;  %v12004_v2 = vrot.slane %v11997_v50, %v15380_v56  ;;  %v12018_v30 = vrot.slane %v12011_v57, %v15380_v56  ;;  %v12694_v60 = vunpack.c.l.b16 %v11850_v10  ;;  %v12695_v31 = vunpack.c.l.b16 %v11864_v63  ;;  %v14638_v10 = vld [vmem:[#allocation15 + $0x1c8] sm:$0xff]  }
 0x498   : > { %14223 = vmatpush3.bf16.msra.mxu1 %v19005_v38  ;;  %v12691_v5 = vunpack.c.l.b16 %v19083_v27  ;;  %v12696_v15 = vunpack.c.l.b16 %v11878_v59  ;;  %v12697_v20 = vunpack.c.l.b16 %v11892_v21  ;;  %v12700_v9 = vunpack.c.l.b16 %v11934_v49  ;;  %v13711_v27 = vld.sshfl [vmem:[#allocation2 + $0x54] sm:$0x33 pattern:$0x75316420] }
 0x499   : > { %14224 = vmatprep.subr.bf16.mxu1 %v14640_v8  ;;  %v12698_v23 = vunpack.c.l.b16 %v11906_v3  ;;  %v12701_v25 = vunpack.c.l.b16 %v11948_v0  ;;  %v12702_v17 = vunpack.c.l.b16 %v11962_v6  ;;  %v12703_v34 = vunpack.c.l.b16 %v11976_v13  ;;  %v14639_v0 = vld [vmem:[#allocation15 + $0x188] sm:$0xff]   ;;  %v13712_v13 = vld.sshfl [vmem:[#allocation2 + $0x58] sm:$0x33 pattern:$0x75316420] }
 0x49a   : > { %v12699_v24 = vunpack.c.l.b16 %v11920_v37  ;;  %v12704_v14 = vunpack.c.l.b16 %v11990_v26  ;;  %v12755_v46 = vrot.slane %v12692_v58, 7  ;;  %v12757_v16 = vrot.slane %v12693_v22, 6  ;;  %v13713_v58 = vld.sshfl [vmem:[#allocation2 + $0x74] sm:$0x33 pattern:$0x75316420] }
 0x49b   : > { %v12705_v52 = vunpack.c.l.b16 %v12004_v2  ;;  %v19170_v35 = vunpack.c.l.b16 %v12018_v30  ;;  %v12759_v38 = vrot.slane %v12694_v60, 5  ;;  %v12761_v19 = vrot.slane %v12695_v31, 4  ;;  %v14649_v2 = vld [vmem:[#allocation15 + $0x220] sm:$0xff]  }
 0x49c   : > { %14225 = vmatpush3.bf16.msra.mxu1 %v14640_v8  ;;  %v12756_v63 = vsel %vm3144_vm13, %v12755_v46, %v12691_v5  ;;  %v12763_v28 = vrot.slane %v12696_v15, 3  ;;  %v12769_v59 = vrot.slane %v12700_v9, 7  ;;  %v12771_v21 = vrot.slane %v12701_v25, 6 }
 0x49d   : > { %14226 = vmatprep.subr.bf16.mxu1 %v14643_v33  ;;  %v12758_v11 = vsel %vm3147_vm15, %v12757_v16, %v12756_v63  ;;  %v12765_v12 = vrot.slane %v12697_v20, 2  ;;  %v12773_v3 = vrot.slane %v12702_v17, 5  ;;  %v12775_v37 = vrot.slane %v12703_v34, 4 }
 0x49e   : > { %10875 = vmatmul.mubr.bf16.vlgmr.msra.gmra.mrb[64].mxu0 %v13635_v32  ;;  %14219 = vmatmul.mubr.bf16.gmra.mrb[12].mxu1 %v19070_v51  ;;  %v12760_v49 = vsel %vm428_vm1, %v12759_v38, %v12758_v11  ;;  %v12767_v53 = vrot.slane %v12698_v23, 1  ;;  %v12770_v40 = vsel %vm3144_vm13, %v12769_v59, %v12699_v24  ;;  %v12777_v8 = vrot.slane %v12704_v14, 3  ;;  %v14642_v23 = vld [vmem:[#allocation15 + $0x190] sm:$0xff]   ;;  %v14644_v24 = vld [vmem:[#allocation15 + $0x1d8] sm:$0xff]  }
 0x49f   : > { %10882 = vmatprep.mubr.bf16.mxu0 %v19003_v43  ;;  %14039 = vmatpush3.bf16.msra.mxu0 %v14636_v54  ;;  %v12762_v6 = vsel %vm3153_vm0, %v12761_v19, %v12760_v49  ;;  %v12772_v50 = vsel %vm3147_vm15, %v12771_v21, %v12770_v40  ;;  %v12779_v57 = vrot.slane %v12705_v52, 2  ;;  %v11498_v39 = vcombine.high %v13711_v27, %v13711_v27  ;;  %v14652_v52 = vld [vmem:[#allocation15 + $0x228] sm:$0xff]   ;;  %v14645_v21 = vld [vmem:[#allocation15 + $0x198] sm:$0xff]   ;;  %v14655_v40 = vld [vmem:[#allocation15 + $0x230] sm:$0xff]  }
 0x4a0   : > { %14040 = vmatprep.subr.bf16.mxu0 %v14638_v10  ;;  %14227 = vmatpush3.bf16.msra.mxu1 %v14643_v33  ;;  %v12764_v32 = vsel %vm3156_vm6, %v12763_v28, %v12762_v6  ;;  %v12774_v26 = vsel %vm428_vm1, %v12773_v3, %v12772_v50  ;;  %v11505_v22 = vrot.slane %v13711_v27, %v15380_v56  ;;  %v12781_v31 = vrot.slane %v19170_v35, 1  ;;  %v13714_v33 = vld.sshfl [vmem:[#allocation2 + $0x78] sm:$0x33 pattern:$0x75316420]  ;;  %v14647_v3 = vld [vmem:[#allocation15 + $0x1e0] sm:$0xff]  }
 0x4a1   : > { %14238 = vmatprep.mubr.bf16.mxu1 %v18923_v29  ;;  %14228 = vmatprep.subr.bf16.mxu1 %v14646_v48  ;;  %v12766_v30 = vsel %vm3159_vm8, %v12765_v12, %v12764_v32  ;;  %v12776_v60 = vsel %vm3153_vm0, %v12775_v37, %v12774_v26  ;;  %v11512_v5 = vrot.slane %v11498_v39, %v15380_v56  ;;  %v14648_v32 = vld [vmem:[#allocation15 + $0x1a0] sm:$0xff]  }
 0x4a2   : > { %v13680_v15 = vcombine.low %v19135_v1, %v18930_v4  ;;  %v19194_v20 = vsel %vm3162_vm9, %v12767_v53, %v12766_v30  ;;  %v12778_v9 = vsel %vm3156_vm6, %v12777_v8, %v12776_v60  ;;  %v11522_v29 = vcombine.high %v13712_v13, %v13712_v13  ;;  %v14650_v30 = vld [vmem:[#allocation15 + $0x1e8] sm:$0xff]  }
 0x4a3   : > { %14041 = vmatpush3.bf16.msra.mxu0 %v14639_v0  ;;  %v12780_v25 = vsel %vm3159_vm8, %v12779_v57, %v12778_v9  ;;  %v11513_v17 = vcombine.high %v11505_v22, %v11505_v22  ;;  %v11529_v34 = vrot.slane %v13712_v13, %v15380_v56  ;;  %v11546_v54 = vcombine.high %v13713_v58, %v13713_v58  ;;  %v14658_v9 = vld [vmem:[#allocation15 + $0x238] sm:$0xff]  }
 0x4a4   : > { %14042 = vmatprep.subr.bf16.mxu0 %v14641_v41  ;;  %14229 = vmatpush3.bf16.msra.mxu1 %v14646_v48  ;;  %v11514_v14 = vcombine.high %v11512_v5, %v11512_v5  ;;  %v11536_v46 = vrot.slane %v11522_v29, %v15380_v56  ;;  %v11553_v16 = vrot.slane %v13713_v58, %v15380_v56 }
 0x4a5   : > { %14230 = vmatprep.subr.bf16.mxu1 %v14649_v2  ;;  %v19202_v35 = vsel %vm3162_vm9, %v12781_v31, %v12780_v25  ;;  %v11537_v38 = vcombine.high %v11529_v34, %v11529_v34  ;;  %v11560_v19 = vrot.slane %v11546_v54, %v15380_v56  ;;  %v11570_v27 = vcombine.high %v13714_v33, %v13714_v33 }
 0x4a6   : > { %10883 = vmatmul.mubr.bf16.gmra.mrb[68].mxu0 %v19026_v42  ;;  %v11538_v10 = vcombine.high %v11536_v46, %v11536_v46  ;;  %v11561_v63 = vcombine.high %v11553_v16, %v11553_v16  ;;  %v11577_v28 = vrot.slane %v13714_v33, %v15380_v56  ;;  %v12025_v59 = vrot.slane %v11505_v22, %v15380_v56 }
 0x4a7   : > { %10890 = vmatprep.mubr.bf16.mxu0 %v19043_v45  ;;  %14043 = vmatpush3.bf16.msra.mxu0 %v14642_v23  ;;  %v11562_v48 = vcombine.high %v11560_v19, %v11560_v19  ;;  %v11584_v11 = vrot.slane %v11570_v27, %v15380_v56  ;;  %v12039_v12 = vrot.slane %v11512_v5, %v15380_v56 }
 0x4a8   : > { %14044 = vmatprep.subr.bf16.mxu0 %v14644_v24  ;;  %14231 = vmatpush3.bf16.msra.mxu1 %v14649_v2  ;;  %v11585_v37 = vcombine.high %v11577_v28, %v11577_v28  ;;  %v19212_v49 = vrot.slane %v12025_v59, %v15380_v56  ;;  %v12053_v53 = vrot.slane %v11513_v17, %v15380_v56 }
 0x4a9   : > { %14232 = vmatprep.subr.bf16.mxu1 %v14652_v52  ;;  %v11586_v8 = vcombine.high %v11584_v11, %v11584_v11  ;;  %v19216_v0 = vrot.slane %v12039_v12, %v15380_v56  ;;  %v12067_v6 = vrot.slane %v11514_v14, %v15380_v56  ;;  %v12081_v50 = vrot.slane %v11529_v34, %v15380_v56  ;;  %v14651_v14 = vld [vmem:[#allocation15 + $0x1a8] sm:$0xff]  }
 0x4aa   : > { %v12060_v57 = vrot.slane %v12053_v53, %v15380_v56  ;;  %v12095_v13 = vrot.slane %v11536_v46, %v15380_v56  ;;  %v12109_v39 = vrot.slane %v11537_v38, %v15380_v56  ;;  %v12123_v41 = vrot.slane %v11538_v10, %v15380_v56 }
 0x4ab   : > { %14045 = vmatpush3.bf16.msra.mxu0 %v14645_v21  ;;  %v12074_v26 = vrot.slane %v12067_v6, %v15380_v56  ;;  %v12088_v58 = vrot.slane %v12081_v50, %v15380_v56  ;;  %v12137_v22 = vrot.slane %v11553_v16, %v15380_v56  ;;  %v12151_v2 = vrot.slane %v11560_v19, %v15380_v56  ;;  %v14653_v19 = vld [vmem:[#allocation15 + $0x1f0] sm:$0xff]  }
 0x4ac   : > { %14046 = vmatprep.subr.bf16.mxu0 %v14647_v3  ;;  %14233 = vmatpush3.bf16.msra.mxu1 %v14652_v52  ;;  %v12102_v60 = vrot.slane %v12095_v13, %v15380_v56  ;;  %v12116_v31 = vrot.slane %v12109_v39, %v15380_v56  ;;  %v12130_v5 = vrot.slane %v12123_v41, %v15380_v56  ;;  %v12708_v52 = vunpack.c.l.b16 %v19216_v0  ;;  %v13715_v13 = vld.sshfl [vmem:[#allocation2 + $0x94] sm:$0x33 pattern:$0x75316420]  ;;  %v14656_v39 = vld [vmem:[#allocation15 + $0x1f8] sm:$0xff]  }
 0x4ad   : > { %14234 = vmatprep.subr.bf16.mxu1 %v14655_v40  ;;  %v19232_v33 = vrot.slane %v12137_v22, %v15380_v56  ;;  %v12158_v29 = vrot.slane %v12151_v2, %v15380_v56  ;;  %v12165_v23 = vrot.slane %v11561_v63, %v15380_v56  ;;  %v12179_v25 = vrot.slane %v11562_v48, %v15380_v56 }
 0x4ae   : > { %10891 = vmatmul.mubr.bf16.gmra.mrb[72].mxu0 %v19048_v36  ;;  %v12193_v17 = vrot.slane %v11577_v28, %v15380_v56  ;;  %v12207_v34 = vrot.slane %v11584_v11, %v15380_v56  ;;  %v12221_v54 = vrot.slane %v11585_v37, %v15380_v56  ;;  %v12235_v24 = vrot.slane %v11586_v8, %v15380_v56  ;;  %v19253_v8 = vld [vmem:[#allocation16] sm:$0xff]  }
 0x4af   : > { %10898 = vmatprep.mubr.bf16.mxu0 %v19100_v7  ;;  %14047 = vmatpush3.bf16.msra.mxu0 %v14648_v32  ;;  %v12172_v46 = vrot.slane %v12165_v23, %v15380_v56  ;;  %v12186_v16 = vrot.slane %v12179_v25, %v15380_v56  ;;  %v12709_v38 = vunpack.c.l.b16 %v12060_v57  ;;  %v12710_v28 = vunpack.c.l.b16 %v12074_v26 }
 0x4b0   : > { %14048 = vmatprep.subr.bf16.mxu0 %v14650_v30  ;;  %14235 = vmatpush3.bf16.msra.mxu1 %v14655_v40  ;;  %v12200_v27 = vrot.slane %v12193_v17, %v15380_v56  ;;  %v12214_v10 = vrot.slane %v12207_v34, %v15380_v56  ;;  %v12228_v63 = vrot.slane %v12221_v54, %v15380_v56  ;;  %v12711_v21 = vunpack.c.l.b16 %v12088_v58  ;;  %v14654_v40 = vld [vmem:[#allocation15 + $0x1b0] sm:$0xff]   ;;  %v14660_v54 = vld [vmem:[#allocation16 + $0x8] sm:$0xff]  }
 0x4b1   : > { %14236 = vmatprep.subr.bf16.mxu1 %v14658_v9  ;;  %v12242_v59 = vrot.slane %v12235_v24, %v15380_v56  ;;  %v12712_v48 = vunpack.c.l.b16 %v12102_v60  ;;  %v12713_v11 = vunpack.c.l.b16 %v12116_v31  ;;  %v12707_v12 = vunpack.c.l.b16 %v19212_v49  ;;  %v13716_v60 = vld.sshfl [vmem:[#allocation2 + $0x98] sm:$0x33 pattern:$0x75316420] }
 0x4b2   : > { %v19251_v3 = vunpack.c.l.b16 %v12130_v5  ;;  %v12716_v37 = vunpack.c.l.b16 %v12158_v29  ;;  %v12717_v53 = vunpack.c.l.b16 %v12172_v46  ;;  %v12715_v0 = vunpack.c.l.b16 %v19232_v33 }
 0x4b3   : > { %14049 = vmatpush3.bf16.msra.mxu0 %v14651_v14  ;;  %v12718_v6 = vunpack.c.l.b16 %v12186_v16  ;;  %v12719_v50 = vunpack.c.l.b16 %v12200_v27  ;;  %v12720_v57 = vunpack.c.l.b16 %v12214_v10  ;;  %v12721_v41 = vunpack.c.l.b16 %v12228_v63  ;;  %v13717_v10 = vld.sshfl [vmem:[#allocation2 + $0xb4] sm:$0x33 pattern:$0x75316420] }
 0x4b4   : > { %14050 = vmatprep.subr.bf16.mxu0 %v14653_v19  ;;  %14237 = vmatpush3.bf16.msra.mxu1 %v14658_v9  ;;  %v12783_v32 = vrot.slane %v12708_v52, 7  ;;  %v12785_v49 = vrot.slane %v12709_v38, 6  ;;  %v12787_v26 = vrot.slane %v12710_v28, 5  ;;  %v12722_v58 = vunpack.c.l.b16 %v12242_v59  ;;  %v14657_v9 = vld [vmem:[#allocation15 + $0x1b8] sm:$0xff]  }
 0x4b5   : > { %14270 = vmatprep.subr.bf16.mxu1 %v19253_v8  ;;  %v12789_v22 = vrot.slane %v12711_v21, 4  ;;  %v12791_v2 = vrot.slane %v12712_v48, 3  ;;  %v12793_v30 = vrot.slane %v12713_v11, 2  ;;  %v12797_v5 = vrot.slane %v12716_v37, 7 }
 0x4b6   : > { %10899 = vmatmul.mubr.bf16.gmra.mrb[76].mxu0 %v19103_v44  ;;  %v12784_v31 = vsel %vm3144_vm13, %v12783_v32, %v12707_v12  ;;  %v12799_v33 = vrot.slane %v12717_v53, 6  ;;  %v12801_v29 = vrot.slane %v12718_v6, 5  ;;  %v12795_v25 = vrot.slane %v19251_v3, 1  ;;  %v14661_v12 = vld [vmem:[#allocation16 + $0x10] sm:$0xff]  }
 0x4b7   : > { %14051 = vmatpush3.bf16.msra.mxu0 %v14654_v40  ;;  %11257 = vmatprep.mubr.bf16.mxu0 %v19003_v43  ;;  %v12786_v23 = vsel %vm3147_vm15, %v12785_v49, %v12784_v31  ;;  %v12803_v17 = vrot.slane %v12719_v50, 4  ;;  %v12805_v34 = vrot.slane %v12720_v57, 3  ;;  %v12798_v14 = vsel %vm3144_vm13, %v12797_v5, %v12715_v0  ;;  %v13718_v48 = vld.sshfl [vmem:[#allocation2 + $0xb8] sm:$0x33 pattern:$0x75316420] }
 0x4b8   : > { %14052 = vmatprep.subr.bf16.mxu0 %v14656_v39  ;;  %14239 = vmatmul.mubr.bf16.vlgmr.msra.gmra.mrb[8].mxu1 %v19022_v55  ;;  %v12788_v24 = vsel %vm428_vm1, %v12787_v26, %v12786_v23  ;;  %v12807_v46 = vrot.slane %v12721_v41, 2  ;;  %v11594_v16 = vcombine.high %v13715_v13, %v13715_v13  ;;  %v12800_v52 = vsel %vm3147_vm15, %v12799_v33, %v12798_v14  ;;  %v14664_v23 = vld [vmem:[#allocation16 + $0x20] sm:$0xff]  }
 0x4b9   : > { %14242 = vmatprep.mubr.bf16.mxu1 %v19070_v51  ;;  %14278 = vmatpush3.bf16.msra.mxu1 %v19253_v8  ;;  %v12790_v43 = vsel %vm3153_vm0, %v12789_v22, %v12788_v24  ;;  %v12809_v38 = vrot.slane %v12722_v58, 1  ;;  %v11601_v19 = vrot.slane %v13715_v13, %v15380_v56  ;;  %v12802_v27 = vsel %vm428_vm1, %v12801_v29, %v12800_v52 }
 0x4ba   : > { %14271 = vmatprep.subr.bf16.mxu1 %v14660_v54  ;;  %v12792_v55 = vsel %vm3156_vm6, %v12791_v2, %v12790_v43  ;;  %v11608_v63 = vrot.slane %v11594_v16, %v15380_v56  ;;  %v11618_v28 = vcombine.high %v13716_v60, %v13716_v60  ;;  %v12867_v51 = vpack.c.b16 %v19202_v35, %v19194_v20 }
 0x4bb   : > { %14053 = vmatpush3.bf16.msra.mxu0 %v14657_v9  ;;  %v12794_v59 = vsel %vm3159_vm8, %v12793_v30, %v12792_v55  ;;  %v12804_v21 = vsel %vm3153_vm0, %v12803_v17, %v12802_v27  ;;  %v11625_v11 = vrot.slane %v13716_v60, %v15380_v56  ;;  %v11609_v53 = vcombine.high %v11601_v19, %v11601_v19 }
 0x4bc   : > { %14246 = vmatprep.subr.bf16.mxu0 %v19253_v8  ;;  %v19280_v3 = vsel %vm3162_vm9, %v12795_v25, %v12794_v59  ;;  %v12806_v37 = vsel %vm3156_vm6, %v12805_v34, %v12804_v21  ;;  %v11632_v40 = vrot.slane %v11618_v28, %v15380_v56  ;;  %v11610_v6 = vcombine.high %v11608_v63, %v11608_v63 }
 0x4bd   : > { %14279 = vmatpush3.bf16.msra.mxu1 %v14660_v54  ;;  %v12808_v0 = vsel %vm3159_vm8, %v12807_v46, %v12806_v37  ;;  %v11642_v50 = vcombine.high %v13717_v10, %v13717_v10  ;;  %v11649_v57 = vrot.slane %v13717_v10, %v15380_v56  ;;  %v11633_v39 = vcombine.high %v11625_v11, %v11625_v11 }
 0x4be   : > { %11258 = vmatmul.mubr.bf16.vlgmr.msra.gmra.mrb[80].mxu0 %v19026_v42  ;;  %14272 = vmatprep.subr.bf16.mxu1 %v14661_v12  ;;  %v19288_v13 = vsel %vm3162_vm9, %v12809_v38, %v12808_v0  ;;  %v11666_v41 = vcombine.high %v13718_v48, %v13718_v48  ;;  %v11634_v32 = vcombine.high %v11632_v40, %v11632_v40  ;;  %v14663_v42 = vld [vmem:[#allocation16 + $0x18] sm:$0xff]  }
 0x4bf   : > { %11265 = vmatprep.mubr.bf16.mxu0 %v19043_v45  ;;  %14247 = vmatpush3.bf16.msra.mxu0 %v19253_v8  ;;  %v11656_v49 = vrot.slane %v11642_v50, %v15380_v56  ;;  %v11657_v26 = vcombine.high %v11649_v57, %v11649_v57  ;;  %v11673_v58 = vrot.slane %v13718_v48, %v15380_v56 }
 0x4c0   : > { %14248 = vmatprep.subr.bf16.mxu0 %v14660_v54  ;;  %14243 = vmatmul.mubr.bf16.gmra.mrb[12].mxu1 %v13682_v61  ;;  %v11680_v22 = vrot.slane %v11666_v41, %v15380_v56  ;;  %v12249_v2 = vrot.slane %v11601_v19, %v15380_v56  ;;  %v12263_v8 = vrot.slane %v11608_v63, %v15380_v56  ;;  %v14666_v63 = vld [vmem:[#allocation16 + $0x28] sm:$0xff]  }
 0x4c1   : > { %14280 = vmatpush3.bf16.msra.mxu1 %v14661_v12  ;;  %v11658_v45 = vcombine.high %v11656_v49, %v11656_v49  ;;  %v12277_v30 = vrot.slane %v11609_v53, %v15380_v56  ;;  %v12291_v60 = vrot.slane %v11610_v6, %v15380_v56  ;;  %v11681_v31 = vcombine.high %v11673_v58, %v11673_v58 }
 0x4c2   : > { %14273 = vmatprep.subr.bf16.mxu1 %v14663_v42  ;;  %v11682_v5 = vcombine.high %v11680_v22, %v11680_v22  ;;  %v19303_v18 = vrot.slane %v12249_v2, %v15380_v56  ;;  %v12305_v47 = vrot.slane %v11625_v11, %v15380_v56  ;;  %v12270_v61 = vrot.slane %v12263_v8, %v15380_v56 }
 0x4c3   : > { %14249 = vmatpush3.bf16.msra.mxu0 %v14660_v54  ;;  %v12284_v33 = vrot.slane %v12277_v30, %v15380_v56  ;;  %v12298_v29 = vrot.slane %v12291_v60, %v15380_v56  ;;  %v12319_v9 = vrot.slane %v11632_v40, %v15380_v56  ;;  %v12333_v17 = vrot.slane %v11633_v39, %v15380_v56  ;;  %v13719_v60 = vld.sshfl [vmem:[#allocation2 + $0xd4] sm:$0x33 pattern:$0x75316420] }
 0x4c4   : > { %14250 = vmatprep.subr.bf16.mxu0 %v14661_v12  ;;  %v12312_v25 = vrot.slane %v12305_v47, %v15380_v56  ;;  %v12347_v34 = vrot.slane %v11634_v32, %v15380_v56  ;;  %v12361_v24 = vrot.slane %v11649_v57, %v15380_v56  ;;  %v12375_v14 = vrot.slane %v11656_v49, %v15380_v56  ;;  %v14667_v32 = vld [vmem:[#allocation16 + $0x30] sm:$0xff]   ;;  %v13720_v47 = vld.sshfl [vmem:[#allocation2 + $0xd8] sm:$0x33 pattern:$0x75316420] }
 0x4c5   : > { %14281 = vmatpush3.bf16.msra.mxu1 %v14663_v42  ;;  %v12326_v54 = vrot.slane %v12319_v9, %v15380_v56  ;;  %v12389_v46 = vrot.slane %v11657_v26, %v15380_v56  ;;  %v12403_v16 = vrot.slane %v11658_v45, %v15380_v56  ;;  %v12340_v43 = vrot.slane %v12333_v17, %v15380_v56 }
 0x4c6   : > { %11266 = vmatmul.mubr.bf16.gmra.mrb[84].mxu0 %v19048_v36  ;;  %14274 = vmatprep.subr.bf16.mxu1 %v14664_v23  ;;  %v12354_v52 = vrot.slane %v12347_v34, %v15380_v56  ;;  %v19322_v38 = vrot.slane %v12361_v24, %v15380_v56  ;;  %v12723_v19 = vunpack.c.l.b16 %v19303_v18  ;;  %v12382_v55 = vrot.slane %v12375_v14, %v15380_v56 }
 0x4c7   : > { %11273 = vmatprep.mubr.bf16.mxu0 %v19100_v7  ;;  %14251 = vmatpush3.bf16.msra.mxu0 %v14661_v12  ;;  %v12396_v27 = vrot.slane %v12389_v46, %v15380_v56  ;;  %v12410_v10 = vrot.slane %v12403_v16, %v15380_v56  ;;  %v12724_v36 = vunpack.c.l.b16 %v12270_v61  ;;  %v12417_v28 = vrot.slane %v11673_v58, %v15380_v56 }
 0x4c8   : > { %14252 = vmatprep.subr.bf16.mxu0 %v14663_v42  ;;  %v12431_v59 = vrot.slane %v11680_v22, %v15380_v56  ;;  %v12445_v21 = vrot.slane %v11681_v31, %v15380_v56  ;;  %v12459_v48 = vrot.slane %v11682_v5, %v15380_v56  ;;  %v12725_v7 = vunpack.c.l.b16 %v12284_v33 }
 0x4c9   : > { %14282 = vmatpush3.bf16.msra.mxu1 %v14664_v23  ;;  %v12726_v11 = vunpack.c.l.b16 %v12298_v29  ;;  %v12727_v12 = vunpack.c.l.b16 %v12312_v25  ;;  %v12728_v37 = vunpack.c.l.b16 %v12326_v54  ;;  %v12424_v53 = vrot.slane %v12417_v28, %v15380_v56  ;;  %v14668_v25 = vld [vmem:[#allocation16 + $0x38] sm:$0xff]  }
 0x4ca   : > { %14275 = vmatprep.subr.bf16.mxu1 %v14666_v63  ;;  %v12438_v40 = vrot.slane %v12431_v59, %v15380_v56  ;;  %v12452_v0 = vrot.slane %v12445_v21, %v15380_v56  ;;  %v12466_v6 = vrot.slane %v12459_v48, %v15380_v56  ;;  %v12729_v50 = vunpack.c.l.b16 %v12340_v43  ;;  %v13722_v59 = vld.sshfl [vmem:[#allocation2 + $0xf8] sm:$0x33 pattern:$0x75316420] }
 0x4cb   : > { %14253 = vmatpush3.bf16.msra.mxu0 %v14663_v42  ;;  %v12730_v57 = vunpack.c.l.b16 %v12354_v52  ;;  %v12731_v39 = vunpack.c.l.b16 %v19322_v38  ;;  %v12732_v41 = vunpack.c.l.b16 %v12382_v55  ;;  %v12733_v49 = vunpack.c.l.b16 %v12396_v27  ;;  %v13721_v55 = vld.sshfl [vmem:[#allocation2 + $0xf4] sm:$0x33 pattern:$0x75316420] }
 0x4cc   : > { %14254 = vmatprep.subr.bf16.mxu0 %v14664_v23  ;;  %v12734_v26 = vunpack.c.l.b16 %v12410_v10  ;;  %v12735_v58 = vunpack.c.l.b16 %v12424_v53  ;;  %v12736_v22 = vunpack.c.l.b16 %v12438_v40  ;;  %v12737_v2 = vunpack.c.l.b16 %v12452_v0 }
 0x4cd   : > { %14283 = vmatpush3.bf16.msra.mxu1 %v14666_v63  ;;  %v12738_v45 = vunpack.c.l.b16 %v12466_v6  ;;  %v12811_v8 = vrot.slane %v12724_v36, 7  ;;  %v12813_v30 = vrot.slane %v12725_v7, 6  ;;  %v12815_v42 = vrot.slane %v12726_v11, 5 }
 0x4ce   : > { %11274 = vmatmul.mubr.bf16.gmra.mrb[88].mxu0 %v19103_v44  ;;  %14276 = vmatprep.subr.bf16.mxu1 %v14667_v32  ;;  %v12817_v31 = vrot.slane %v12727_v12, 4  ;;  %v12819_v5 = vrot.slane %v12728_v37, 3  ;;  %v12821_v18 = vrot.slane %v12729_v50, 2  ;;  %v12823_v33 = vrot.slane %v12730_v57, 1 }
 0x4cf   : > { %11281 = vmatprep.mubr.bf16.mxu0 %v13681_v62  ;;  %14255 = vmatpush3.bf16.msra.mxu0 %v14664_v23  ;;  %v12812_v61 = vsel %vm3144_vm13, %v12811_v8, %v12723_v19  ;;  %v12825_v29 = vrot.slane %v12732_v41, 7  ;;  %v12827_v9 = vrot.slane %v12733_v49, 6  ;;  %v12829_v17 = vrot.slane %v12734_v26, 5 }
 0x4d0   : > { %14256 = vmatprep.subr.bf16.mxu0 %v14666_v63  ;;  %v12814_v44 = vsel %vm3147_vm15, %v12813_v30, %v12812_v61  ;;  %v12831_v34 = vrot.slane %v12735_v58, 4  ;;  %v12833_v24 = vrot.slane %v12736_v22, 3  ;;  %v12835_v46 = vrot.slane %v12737_v2, 2 }
 0x4d1   : > { %14284 = vmatpush3.bf16.msra.mxu1 %v14667_v32  ;;  %v12816_v54 = vsel %vm428_vm1, %v12815_v42, %v12814_v44  ;;  %v12826_v14 = vsel %vm3144_vm13, %v12825_v29, %v12731_v39  ;;  %v12837_v62 = vrot.slane %v12738_v45, 1  ;;  %v11690_v43 = vcombine.high %v13719_v60, %v13719_v60 }
 0x4d2   : > { %14277 = vmatprep.subr.bf16.mxu1 %v14668_v25  ;;  %v12818_v23 = vsel %vm3153_vm0, %v12817_v31, %v12816_v54  ;;  %v12828_v16 = vsel %vm3147_vm15, %v12827_v9, %v12826_v14  ;;  %v11697_v52 = vrot.slane %v13719_v60, %v15380_v56  ;;  %v11714_v27 = vcombine.high %v13720_v47, %v13720_v47 }
 0x4d3   : > { %14257 = vmatpush3.bf16.msra.mxu0 %v14666_v63  ;;  %v12820_v38 = vsel %vm3156_vm6, %v12819_v5, %v12818_v23  ;;  %v12830_v19 = vsel %vm428_vm1, %v12829_v17, %v12828_v16  ;;  %v11721_v10 = vrot.slane %v13720_v47, %v15380_v56  ;;  %v11704_v21 = vrot.slane %v11690_v43, %v15380_v56 }
 0x4d4   : > { %14258 = vmatprep.subr.bf16.mxu0 %v14667_v32  ;;  %v12822_v36 = vsel %vm3159_vm8, %v12821_v18, %v12820_v38  ;;  %v12832_v28 = vsel %vm3153_vm0, %v12831_v34, %v12830_v19  ;;  %v11705_v48 = vcombine.high %v11697_v52, %v11697_v52  ;;  %v11728_v11 = vrot.slane %v11714_v27, %v15380_v56 }
 0x4d5   : > { %14285 = vmatpush3.bf16.msra.mxu1 %v14668_v25  ;;  %v12824_v63 = vsel %vm3162_vm9, %v12823_v33, %v12822_v36  ;;  %v12834_v7 = vsel %vm3156_vm6, %v12833_v24, %v12832_v28  ;;  %v11729_v12 = vcombine.high %v11721_v10, %v11721_v10  ;;  %v11706_v53 = vcombine.high %v11704_v21, %v11704_v21 }
 0x4d6   : > { %11282 = vmatmul.mubr.bf16.gmra.mrb[92].mxu0 %v13680_v15  ;;  %v12836_v37 = vsel %vm3159_vm8, %v12835_v46, %v12834_v7  ;;  %v11738_v40 = vcombine.high %v13721_v55, %v13721_v55  ;;  %v11745_v0 = vrot.slane %v13721_v55, %v15380_v56  ;;  %v11730_v50 = vcombine.high %v11728_v11, %v11728_v11 }
 0x4d7   : > { %14259 = vmatpush3.bf16.msra.mxu0 %v14667_v32  ;;  %14262 = vmatprep.mubr.bf16.mxu0 %v12867_v51  ;;  %v12838_v6 = vsel %vm3162_vm9, %v12837_v62, %v12836_v37  ;;  %v11762_v57 = vcombine.high %v13722_v59, %v13722_v59  ;;  %v11769_v15 = vrot.slane %v13722_v59, %v15380_v56 }
 0x4d8   : > { %14260 = vmatprep.subr.bf16.mxu0 %v14668_v25  ;;  %v12869_v39 = vpack.c.b16 %v12838_v6, %v12824_v63  ;;  %v11752_v4 = vrot.slane %v11738_v40, %v15380_v56  ;;  %v11753_v1 = vcombine.high %v11745_v0, %v11745_v0  ;;  %v12473_v49 = vrot.slane %v11697_v52, %v15380_v56 }
 0x4d9   : > { %v11776_v41 = vrot.slane %v11762_v57, %v15380_v56  ;;  %v12487_v32 = vrot.slane %v11704_v21, %v15380_v56  ;;  %v12501_v20 = vrot.slane %v11705_v48, %v15380_v56  ;;  %v12868_v35 = vpack.c.b16 %v19288_v13, %v19280_v3 }
 0x4da   : > { %14266 = vmatprep.mubr.bf16.mxu1 %v12869_v39  ;;  %v11754_v51 = vcombine.high %v11752_v4, %v11752_v4  ;;  %v12515_v26 = vrot.slane %v11706_v53, %v15380_v56  ;;  %v12529_v58 = vrot.slane %v11721_v10, %v15380_v56  ;;  %v11777_v22 = vcombine.high %v11769_v15, %v11769_v15 }
 0x4db   : > { %14261 = vmatpush3.bf16.msra.mxu0 %v14668_v25  ;;  %v11778_v2 = vcombine.high %v11776_v41, %v11776_v41  ;;  %v12480_v45 = vrot.slane %v12473_v49, %v15380_v56  ;;  %v12494_v8 = vrot.slane %v12487_v32, %v15380_v56  ;;  %v12508_v30 = vrot.slane %v12501_v20, %v15380_v56 }
 0x4dc   : > { %v12543_v60 = vrot.slane %v11728_v11, %v15380_v56  ;;  %v12557_v42 = vrot.slane %v11729_v12, %v15380_v56  ;;  %v12571_v3 = vrot.slane %v11730_v50, %v15380_v56  ;;  %v12585_v13 = vrot.slane %v11745_v0, %v15380_v56 }
 0x4dd   : > { %v12599_v31 = vrot.slane %v11752_v4, %v15380_v56  ;;  %v12613_v5 = vrot.slane %v11753_v1, %v15380_v56  ;;  %v12522_v18 = vrot.slane %v12515_v26, %v15380_v56  ;;  %v12536_v47 = vrot.slane %v12529_v58, %v15380_v56 }
 0x4de   : > { %14263 = vmatmul.mubr.bf16.vlgmr.msra.gmra.mrb[96].mxu0 %v12868_v35  ;;  %v12627_v61 = vrot.slane %v11754_v51, %v15380_v56  ;;  %v12641_v33 = vrot.slane %v11769_v15, %v15380_v56  ;;  %v12550_v29 = vrot.slane %v12543_v60, %v15380_v56  ;;  %v12564_v9 = vrot.slane %v12557_v42, %v15380_v56 }
 0x4df   : > { %v12578_v25 = vrot.slane %v12571_v3, %v15380_v56  ;;  %v12606_v44 = vrot.slane %v12599_v31, %v15380_v56  ;;  %v12620_v17 = vrot.slane %v12613_v5, %v15380_v56  ;;  %v12655_v24 = vrot.slane %v11776_v41, %v15380_v56 }
 0x4e0   : > { %v12634_v34 = vrot.slane %v12627_v61, %v15380_v56  ;;  %v12669_v54 = vrot.slane %v11777_v22, %v15380_v56  ;;  %v12592_v14 = vrot.slane %v12585_v13, %v15380_v56  ;;  %v12648_v46 = vrot.slane %v12641_v33, %v15380_v56 }
 0x4e1   : > { %v12683_v62 = vrot.slane %v11778_v2, %v15380_v56  ;;  %v12740_v23 = vunpack.c.l.b16 %v12494_v8  ;;  %v12662_v16 = vrot.slane %v12655_v24, %v15380_v56  ;;  %v12741_v52 = vunpack.c.l.b16 %v12508_v30 }
 0x4e2   : > { %v12676_v43 = vrot.slane %v12669_v54, %v15380_v56  ;;  %v12742_v38 = vunpack.c.l.b16 %v12522_v18  ;;  %v12739_v55 = vunpack.c.l.b16 %v12480_v45  ;;  %v12743_v27 = vunpack.c.l.b16 %v12536_v47 }
 0x4e3   : > { %v12690_v19 = vrot.slane %v12683_v62, %v15380_v56  ;;  %v12744_v10 = vunpack.c.l.b16 %v12550_v29  ;;  %v12745_v36 = vunpack.c.l.b16 %v12564_v9  ;;  %v12748_v28 = vunpack.c.l.b16 %v12606_v44 }
 0x4e4   : > { %v12749_v59 = vunpack.c.l.b16 %v12620_v17  ;;  %v12750_v21 = vunpack.c.l.b16 %v12634_v34  ;;  %v12746_v48 = vunpack.c.l.b16 %v12578_v25  ;;  %v12747_v63 = vunpack.c.l.b16 %v12592_v14 }
 0x4e5   : > { %v12751_v7 = vunpack.c.l.b16 %v12648_v46  ;;  %v12752_v11 = vunpack.c.l.b16 %v12662_v16  ;;  %v12753_v12 = vunpack.c.l.b16 %v12676_v43  ;;  %v12839_v37 = vrot.slane %v12740_v23, 7 }
 0x4e6   : > { %v12841_v53 = vrot.slane %v12741_v52, 6  ;;  %v12843_v40 = vrot.slane %v12742_v38, 5  ;;  %v12754_v0 = vunpack.c.l.b16 %v12690_v19  ;;  %v12845_v6 = vrot.slane %v12743_v27, 4 }
 0x4e7   : > { %v12847_v50 = vrot.slane %v12744_v10, 3  ;;  %v12853_v57 = vrot.slane %v12748_v28, 7  ;;  %v12840_v56 = vsel %vm3144_vm13, %v12839_v37, %v12739_v55  ;;  %v12855_v39 = vrot.slane %v12749_v59, 6 }
 0x4e8   : > { %v12857_v4 = vrot.slane %v12750_v21, 5  ;;  %v12859_v1 = vrot.slane %v12751_v7, 4  ;;  %v12842_v15 = vsel %vm3147_vm15, %v12841_v53, %v12840_v56  ;;  %v12849_v41 = vrot.slane %v12745_v36, 2 }
 0x4e9   : > { %v12854_v49 = vsel %vm3144_vm13, %v12853_v57, %v12747_v63  ;;  %v12861_v32 = vrot.slane %v12752_v11, 3  ;;  %v12844_v20 = vsel %vm428_vm1, %v12843_v40, %v12842_v15  ;;  %v12851_v35 = vrot.slane %v12746_v48, 1 }
 0x4ea   : > { %v12856_v51 = vsel %vm3147_vm15, %v12855_v39, %v12854_v49  ;;  %v12863_v26 = vrot.slane %v12753_v12, 2  ;;  %v12846_v58 = vsel %vm3153_vm0, %v12845_v6, %v12844_v20  ;;  %v12865_v2 = vrot.slane %v12754_v0, 1 }
 0x4eb   : > { %v12858_v22 = vsel %vm428_vm1, %v12857_v4, %v12856_v51  ;;  %v12848_v45 = vsel %vm3156_vm6, %v12847_v50, %v12846_v58 }
 0x4ec   : > { %v12860_v8 = vsel %vm3153_vm0, %v12859_v1, %v12858_v22  ;;  %v12850_v30 = vsel %vm3159_vm8, %v12849_v41, %v12848_v45 }
 0x4ed   : > { %v12862_v60 = vsel %vm3156_vm6, %v12861_v32, %v12860_v8  ;;  %v12852_v42 = vsel %vm3162_vm9, %v12851_v35, %v12850_v30 }
 0x4ee   : > { %v12864_v3 = vsel %vm3159_vm8, %v12863_v26, %v12862_v60 }
 0x4ef   : > { %v12866_v13 = vsel %vm3162_vm9, %v12865_v2, %v12864_v3 }
 0x4f0   : > { %v12870_v31 = vpack.c.b16 %v12866_v13, %v12852_v42 }
 0x4f2   : > { %14267 = vmatmul.mubr.bf16.vlgmr.msra.gmra.mrb[12].mxu1 %v12870_v31 }
 0x53a   : > { %v13950_v5 = vpop.f32.mrb[48].mxu0 }
 0x53b   : > { %v13951_v18 = vpop.f32.mrb[49].mxu0 }
 0x53c   : > { %v13952_v47 = vadd.f32 %v13951_v18, %v13950_v5  ;;  %v13953_v61 = vpop.f32.mrb[50].mxu0 }
 0x53d   : > { %v13954_v33 = vpop.f32.mrb[51].mxu0 }
 0x53e   : > { %v13955_v29 = vadd.f32 %v13954_v33, %v13953_v61 }
 0x543   : > { %v13956_v9 = vpop.f32.mrb[52].mxu0 }
 0x544   : > { %v13957_v25 = vpop.f32.mrb[53].mxu0 }
 0x545   : > { %v13958_v44 = vadd.f32 %v13957_v25, %v13956_v9  ;;  %v13959_v17 = vpop.f32.mrb[54].mxu0 }
 0x546   : > { %v13960_v34 = vpop.f32.mrb[55].mxu0 }
 0x547   : > { %v13961_v24 = vadd.f32 %v13960_v34, %v13959_v17 }
 0x557   : > { %v13962_v54 = vpop.f32.mrb[56].mxu0 }
 0x558   : > { %v13963_v14 = vpop.f32.mrb[57].mxu0 }
 0x559   : > { %v13964_v46 = vadd.f32 %v13963_v14, %v13962_v54  ;;  %v13965_v62 = vpop.f32.mrb[58].mxu0 }
 0x55a   : > { %v13966_v23 = vpop.f32.mrb[59].mxu0 }
 0x55b   : > { %v13967_v16 = vadd.f32 %v13966_v23, %v13965_v62 }
 0x569   : > { %v13968_v43 = vpop.f32.mrb[60].mxu0 }
 0x56a   : > { %v13969_v52 = vpop.f32.mrb[61].mxu0 }
 0x56b   : > { %v13970_v38 = vadd.f32 %v13969_v52, %v13968_v43  ;;  %v13971_v19 = vpop.f32.mrb[62].mxu0 }
 0x56c   : > { %v13972_v55 = vpop.f32.mrb[63].mxu0 }
 0x56d   : > { %v13973_v27 = vadd.f32 %v13972_v55, %v13971_v19 }
 0x571   : > { %v14002_v10 = vpop.f32.mrb[64].mxu0 }
 0x572   : > { %v14003_v36 = vpop.f32.mrb[65].mxu0 }
 0x573   : > { %v14004_v28 = vadd.f32 %v14003_v36, %v14002_v10  ;;  %v14005_v59 = vpop.f32.mrb[66].mxu0 }
 0x574   : > { %v14006_v21 = vpop.f32.mrb[67].mxu0 }
 0x575   : > { %v14314_v48 = vadd.f32 %v14004_v28, %v13952_v47  ;;  %v14007_v63 = vadd.f32 %v14006_v21, %v14005_v59 }
 0x577   : > { %v14322_v7 = vadd.f32 %v14007_v63, %v13955_v29 }
 0x579   : > { %v14008_v11 = vpop.f32.mrb[68].mxu0 }
 0x57a   : > { %v14009_v12 = vpop.f32.mrb[69].mxu0 }
 0x57b   : > { %v14010_v37 = vadd.f32 %v14009_v12, %v14008_v11  ;;  %v14011_v53 = vpop.f32.mrb[70].mxu0 }
 0x57c   : > { %v14012_v40 = vpop.f32.mrb[71].mxu0 }
 0x57d   : > { %v14310_v0 = vadd.f32 %v14010_v37, %v13958_v44  ;;  %v14013_v6 = vadd.f32 %v14012_v40, %v14011_v53 }
 0x57f   : > { %v14318_v50 = vadd.f32 %v14013_v6, %v13961_v24 }
 0x581   : > { %v14014_v57 = vpop.f32.mrb[72].mxu0 }
 0x582   : > { %v14015_v56 = vpop.f32.mrb[73].mxu0 }
 0x583   : > { %v14016_v39 = vadd.f32 %v14015_v56, %v14014_v57  ;;  %v14017_v4 = vpop.f32.mrb[74].mxu0 }
 0x584   : > { %v14018_v1 = vpop.f32.mrb[75].mxu0 }
 0x585   : > { %v14329_v15 = vadd.f32 %v14016_v39, %v13964_v46  ;;  %v14019_v41 = vadd.f32 %v14018_v1, %v14017_v4 }
 0x587   : > { %v14335_v49 = vadd.f32 %v14019_v41, %v13967_v16 }
 0x589   : > { %v14020_v32 = vpop.f32.mrb[76].mxu0 }
 0x58a   : > { %v14021_v20 = vpop.f32.mrb[77].mxu0 }
 0x58b   : > { %v14022_v35 = vadd.f32 %v14021_v20, %v14020_v32  ;;  %v14023_v51 = vpop.f32.mrb[78].mxu0  ;;  %v14240_v26 = vpop.f32.mrb[8].mxu1 }
 0x58c   : > { %v14024_v58 = vpop.f32.mrb[79].mxu0  ;;  %v11324_v22 = vpop.f32.mrb[9].mxu1 }
 0x58d   : > { %v14326_v2 = vadd.f32 %v14022_v35, %v13970_v38  ;;  %v14025_v45 = vadd.f32 %v14024_v58, %v14023_v51  ;;  %v14241_v8 = vpop.f32.mrb[10].mxu1 }
 0x58e   : > { %v11327_v30 = vpop.f32.mrb[11].mxu1 }
 0x58f   : > { %v14332_v60 = vadd.f32 %v14025_v45, %v13973_v27 }
 0x591   : > { %v14054_v42 = vpop.f32.mrb[80].mxu0 }
 0x592   : > { %v14055_v3 = vpop.f32.mrb[81].mxu0 }
 0x593   : > { %v14056_v13 = vadd.f32 %v14055_v3, %v14054_v42  ;;  %v14057_v31 = vpop.f32.mrb[82].mxu0 }
 0x594   : > { %v14058_v5 = vpop.f32.mrb[83].mxu0 }
 0x595   : > { %v14059_v18 = vadd.f32 %v14058_v5, %v14057_v31  ;;  %v14315_v47 = vadd.f32 %v14314_v48, %v14056_v13 }
 0x597   : > { %v14316_v61 = vadd.f32 %v14315_v47, %v11324_v22  ;;  %v14323_v33 = vadd.f32 %v14322_v7, %v14059_v18 }
 0x599   : > { %v14324_v29 = vadd.f32 %v14323_v33, %v11327_v30  ;;  %v14060_v9 = vpop.f32.mrb[84].mxu0 }
 0x59a   : > { %v14061_v25 = vpop.f32.mrb[85].mxu0 }
 0x59b   : > { %v14062_v44 = vadd.f32 %v14061_v25, %v14060_v9  ;;  %v14063_v17 = vpop.f32.mrb[86].mxu0 }
 0x59c   : > { %v14064_v34 = vpop.f32.mrb[87].mxu0 }
 0x59d   : > { %v14311_v24 = vadd.f32 %v14310_v0, %v14062_v44  ;;  %v14065_v54 = vadd.f32 %v14064_v34, %v14063_v17 }
 0x59f   : > { %v14319_v14 = vadd.f32 %v14318_v50, %v14065_v54  ;;  %v14312_v46 = vadd.f32 %v14311_v24, %v14240_v26 }
 0x5a1   : > { %v14066_v62 = vpop.f32.mrb[88].mxu0  ;;  %v14320_v23 = vadd.f32 %v14319_v14, %v14241_v8 }
 0x5a2   : > { %v14067_v16 = vpop.f32.mrb[89].mxu0 }
 0x5a3   : > { %v14068_v43 = vadd.f32 %v14067_v16, %v14066_v62  ;;  %v14069_v52 = vpop.f32.mrb[90].mxu0 }
 0x5a4   : > { %v14070_v38 = vpop.f32.mrb[91].mxu0 }
 0x5a5   : > { %v14071_v19 = vadd.f32 %v14070_v38, %v14069_v52  ;;  %v14330_v55 = vadd.f32 %v14329_v15, %v14068_v43 }
 0x5a7   : > { %v14336_v27 = vadd.f32 %v14335_v49, %v14071_v19 }
 0x5a9   : > { %v14072_v10 = vpop.f32.mrb[92].mxu0 }
 0x5aa   : > { %v14073_v36 = vpop.f32.mrb[93].mxu0 }
 0x5ab   : > { %v14074_v28 = vadd.f32 %v14073_v36, %v14072_v10  ;;  %v14075_v59 = vpop.f32.mrb[94].mxu0 }
 0x5ac   : > { %v14076_v21 = vpop.f32.mrb[95].mxu0 }
 0x5ad   : > { %v14077_v48 = vadd.f32 %v14076_v21, %v14075_v59  ;;  %v14327_v63 = vadd.f32 %v14326_v2, %v14074_v28 }
 0x5af   : > { %v14333_v7 = vadd.f32 %v14332_v60, %v14077_v48 }
 0x5b1   : > { %v14264_v11 = vpop.f32.mrb[96].mxu0 }
 0x5b2   : > { %v14313_v12 = vadd.f32 %v14312_v46, %v14264_v11  ;;  %v12957_v37 = vpop.f32.mrb[97].mxu0 }
 0x5b3   : > { %v14317_v53 = vadd.f32 %v14316_v61, %v12957_v37  ;;  %v14265_v40 = vpop.f32.mrb[98].mxu0 }
 0x5b4   : > { %12998 = vst [vmem:[%s417_s10 + $0x10] sm:$0xff] %v14313_v12  ;;  %v14321_v0 = vadd.f32 %v14320_v23, %v14265_v40  ;;  %v12960_v6 = vpop.f32.mrb[99].mxu0 }
 0x5b5   : > { %12996 = vst [vmem:[%s417_s10] sm:$0xff] %v14317_v53  ;;  %v14325_v50 = vadd.f32 %v14324_v29, %v12960_v6 }
 0x5b6   : > { %12999 = vst [vmem:[%s417_s10 + $0x18] sm:$0xff] %v14321_v0 }
 0x5b7   : > { %12997 = vst [vmem:[%s417_s10 + $0x8] sm:$0xff] %v14325_v50 }
 0x5c5   : > { %v14268_v57 = vpop.f32.mrb[12].mxu1 }
 0x5c6   : > { %v14328_v56 = vadd.f32 %v14327_v63, %v14268_v57  ;;  %v12973_v39 = vpop.f32.mrb[13].mxu1 }
 0x5c7   : > { %v14331_v4 = vadd.f32 %v14330_v55, %v12973_v39  ;;  %v14269_v1 = vpop.f32.mrb[14].mxu1 }
 0x5c8   : > { %13002 = vst [vmem:[%s417_s10 + $0x30] sm:$0xff] %v14328_v56  ;;  %v14334_v15 = vadd.f32 %v14333_v7, %v14269_v1  ;;  %v12976_v41 = vpop.f32.mrb[15].mxu1 }
 0x5c9   : > { %13000 = vst [vmem:[%s417_s10 + $0x20] sm:$0xff] %v14331_v4  ;;  %v14337_v49 = vadd.f32 %v14336_v27, %v12976_v41 }
 0x5ca   : > { %13003 = vst [vmem:[%s417_s10 + $0x38] sm:$0xff] %v14334_v15 }
 0x5cb   : > { %13001 = vst [vmem:[%s417_s10 + $0x28] sm:$0xff] %v14337_v49 }
 0x5cc   : > { %14916 = shalt.err (!%p14913_p11)
}
 0x5cd   : > { %s14917_s17 = scalar_lea.hbm %s19425_s16, 1024  ;;  %s14921_s20 = scalar_lea.hbm %s19477_s8, 2048 }
 0x5ce   : > { %p14918_p12 = scmp.ne.s32.totalorder %s19425_s16, %s14917_s17  ;;  %p14922_p9 = scmp.lt.u32.totalorder %s19425_s16, %s19477_s8 }
 0x5cf   : > { %p14923_p7 = scmp.lt.u32.totalorder %s14921_s20, %s14917_s17  ;;  %p14925_p4 = scmp.lt.u32.totalorder %s14917_s17, %s19425_s16 }
 0x5d0   : > { %p14919_p0 = pnand %p14918_p12, %p19741_p13 }
 0x5d1   : > { %p14924_p10 = por %p14923_p7, %p14922_p9 }
 0x5d2   : > { %p14920_p5 = pneg %p14919_p0 }
 0x5d3   : > { %p14926_p1 = por %p14925_p4, %p14924_p10 }
 0x5d5   : > { %p14927_p3 = pnand %p14926_p1, %p14920_p5 }
 0x5d7   : > { %14930 = shalt.err (!%p14927_p3)
}
 0x5d8   : > { %s15002_s25 = smov 128   ;;  %s15003_s19 = smov 8  }
 0x5d9   : > { %14404 = dma.vmem_to_hbm [thread:$0]  (%p19741_p13), %s19420_s21, 1024, %s19425_s16, %s13005_s11, %s15002_s25, %s15002_s25, %s15003_s19  }
 0x5da PF: > { %s13033_s24 = sand.u32 1, %s14973_s27   ;;  %p19742_p2 = scmp.ne.s32.totalorder %s19573_s18, 0 }
 0x5db   : > { %p19743_p8 = scmp.ge.s32.totalorder %s14985_s30, 2  ;;  %s13034_s13 = scalar_lea.sflag [#allocation6], %s13033_s24 }
 0x5dd   : > { %p14433_p6 = pnand %p19743_p8, %p19742_p2 }
 0x5df   : > { %14968 = dma.done.wait (!%p14433_p6), %s13034_s13, 1024  }
 0x5e0   : > { %14970 = vsyncadd (!%p14433_p6), %s13034_s13, 4294966272  ;;  %p25_p11 = scmp.ge.s32.totalorder %s15254_s23, 4   ;;  %s19744_s27 = smov %s14977_s28 }
 0x5e1   : > { %s19745_s28 = smov %s14981_s29  ;;  %s19746_s29 = smov %s15266_s14 }
 0x5e2   : > { %s19747_s30 = smov %s15254_s23  ;;  %27 = sbr.rel (!%p25_p11) target bundleno = 9 (0x9), region = 136 }
 0x5e9   :  { %13039 = vsyncpa [#allocation5], 1 }
 0x5ea   :  { %13041 = vsyncpa [#allocation5 + $0x1], 1 }
 0x5eb   :  { %13042 = vsyncpa [#allocation8], 1 }
 0x5ec   :  { %13043 = vsyncpa [#allocation11], 1 }
 0x5ed   :  { %13044 = vsyncpa [#allocation14], 1 }
 0x5ee   :  { %13045 = vsyncpa [#allocation17], 1 }
 0x5ef   :  { %13046 = vsyncpa [#allocation6], 1 }
 0x5f0   :  { %13048 = vsyncpa [#allocation6 + $0x1], 1 }

</bundles_post_ra>
